<compile_context>
chip_gen: v6e
topology: v6e:2x2x1
jax: 0.10.0
libtpu: 0.0.40
codegen_flags: <defaults>
</compile_context>

<pallas_src>
import functools

import jax
import jax.numpy as jnp
from jax import lax
from jax.experimental import pallas as pl
from jax.experimental.pallas import tpu as pltpu

IN_FEATURES = 4096
HIDDEN = 1024


def svm_kernel(x_ref, w1_ref, b1_ref, w2_ref, part_ref):
    """One grid step = one HIDDEN slice.

    partial_logits[s] = ReLU(x @ W1[:, slice_s] + b1[slice_s]) @ W2[:, slice_s].T

    x/W1 are bf16 with f32 MXU accumulation; the epilogue (bias, ReLU, small head
    matmul) is f32.  Final bias + softmax over summed partials happen in the JAX
    wrapper so the HIDDEN slices are independent ("parallel" grid axis).
    """
    h = jnp.dot(x_ref[...], w1_ref[...], preferred_element_type=jnp.float32)
    h = jnp.maximum(h + b1_ref[...], 0.0)
    # W2 is stored PyTorch-native [C, H]; contract on its hidden axis (axis 1).
    part = lax.dot_general(
        h, w2_ref[...],
        dimension_numbers=(((1,), (1,)), ((), ())),
        preferred_element_type=jnp.float32)
    part_ref[0] = part


@functools.partial(jax.jit, static_argnames=("hidden_splits",))
def _svm_forward_impl(x, w1, b1, w2, b2, *, hidden_splits):
    B, K = x.shape
    H = w1.shape[1]
    C = w2.shape[0]
    S = hidden_splits
    Hs = H // S

    cost = pl.CostEstimate(
        flops=2 * B * K * H + 2 * B * H * C,
        transcendentals=B * C,
        bytes_accessed=(x.size * 2 + w1.size * 2 + b1.size * 4
                        + w2.size * 4 + S * B * C * 4),
    )

    partial_logits = pl.pallas_call(
        svm_kernel,
        out_shape=jax.ShapeDtypeStruct((S, B, C), jnp.float32),
        grid_spec=pltpu.PrefetchScalarGridSpec(
            num_scalar_prefetch=0,
            grid=(S,),
            in_specs=[
                pl.BlockSpec((B, K), lambda s: (0, 0)),    # x   (bf16, full)
                pl.BlockSpec((K, Hs), lambda s: (0, s)),   # W1  (bf16, hidden slice)
                pl.BlockSpec((1, Hs), lambda s: (0, s)),   # b1  (f32, hidden slice)
                pl.BlockSpec((C, Hs), lambda s: (0, s)),   # W2  (f32, [C,H] slice)
            ],
            out_specs=pl.BlockSpec((1, B, C), lambda s: (s, 0, 0)),
        ),
        compiler_params=pltpu.CompilerParams(
            dimension_semantics=("parallel",),
            vmem_limit_bytes=32 * 1024 * 1024,
        ),
        cost_estimate=cost,
    )(x, w1, b1, w2)

    # Tiny (B, C) epilogue: combine partial logits, add bias, stable softmax.
    logits = jnp.sum(partial_logits, axis=0) + b2[None, :]
    m = jnp.max(logits, axis=-1, keepdims=True)
    e = jnp.exp(logits - m)
    return e / jnp.sum(e, axis=-1, keepdims=True)


def svm_net_forward(x, w1, b1, w2, b2, *, hidden_splits=None):
    """Forward pass of SVMNet.

    x:  [B, 4096]               bfloat16 (stored bf16 in HBM; asserted, not cast)
    w1: [4096, 1024]            bfloat16 ([in, out] layout; == PyTorch x @ W.T)
    b1: [1024] (or [1, 1024])   float32
    w2: [num_classes, 1024]     float32  (PyTorch-native [out, in] layout)
    b2: [num_classes]           float32
    """
    if x.dtype != jnp.bfloat16 or w1.dtype != jnp.bfloat16:
        raise TypeError(
            "x and w1 must already be stored as bfloat16 (convert once offline); "
            f"got x={x.dtype}, w1={w1.dtype}. An in-jit astype would add ~3x HBM "
            "traffic to this W1-stream-bound kernel.")
    b1 = jnp.asarray(b1, jnp.float32).reshape(1, -1)
    w2 = jnp.asarray(w2, jnp.float32)
    b2 = jnp.asarray(b2, jnp.float32).reshape(-1)

    if hidden_splits is None:
        # v7x has 2 TensorCores per chip: split HIDDEN across them via the
        # "parallel" grid axis.  Single-TC generations (v5e/v6e) use one step.
        kind = jax.devices()[0].device_kind.lower()
        hidden_splits = 2 if "v7" in kind else 1
    assert w1.shape[1] % hidden_splits == 0

    return _svm_forward_impl(x, w1, b1, w2, b2, hidden_splits=hidden_splits)


def init_params(key, num_classes):
    """Deterministic nn.Linear-style init (uniform +-1/sqrt(fan_in))."""
    k1, k2, k3, k4 = jax.random.split(key, 4)
    bound1 = 1.0 / jnp.sqrt(IN_FEATURES)
    bound2 = 1.0 / jnp.sqrt(HIDDEN)
    w1 = jax.random.uniform(k1, (IN_FEATURES, HIDDEN), jnp.float32, -bound1, bound1)
    b1 = jax.random.uniform(k2, (HIDDEN,), jnp.float32, -bound1, bound1)
    # Small head kept PyTorch-native [out, in] = [num_classes, 1024] (lane-dense).
    w2 = jax.random.uniform(k3, (num_classes, HIDDEN), jnp.float32, -bound2, bound2)
    b2 = jax.random.uniform(k4, (num_classes,), jnp.float32, -bound2, bound2)
    return w1, b1, w2, b2


if __name__ == "__main__":
    num_classes = 16
    batch = 8

    key = jax.random.PRNGKey(0)
    kx, kp = jax.random.split(key)
    x = jax.random.normal(kx, (batch, IN_FEATURES), jnp.float32)
    w1, b1, w2, b2 = init_params(kp, num_classes)

    # One-time offline conversion of the streamed operands to bf16 (how they would
    # be stored for inference).  The wrapper asserts this instead of casting in-jit.
    x_bf = x.astype(jnp.bfloat16)
    w1_bf = w1.astype(jnp.bfloat16)

    out = svm_net_forward(x_bf, w1_bf, b1, w2, b2)
    out = jax.block_until_ready(out)

    # Pure-JAX reference with the same bf16 quantization of x / W1 (f32 math
    # elsewhere), isolating kernel correctness from quantization error.
    xq = x_bf.astype(jnp.float32)
    w1q = w1_bf.astype(jnp.float32)
    h = jnp.maximum(xq @ w1q + b1.reshape(1, -1), 0.0)
    logits = h @ w2.T + b2.reshape(1, -1)
    ref = jax.nn.softmax(logits, axis=-1)

    assert out.shape == (batch, num_classes)
    err = float(jnp.max(jnp.abs(out - ref)))
    assert jnp.allclose(out, ref, atol=1e-4, rtol=1e-4), err
    assert jnp.allclose(jnp.sum(out, axis=-1), 1.0, atol=1e-5)

    print("KERNEL_OK")
</pallas_src>

<mosaic_0001>
module attributes {stable_mosaic.version = 11 : i64} {
  func.func @svm_kernel(%arg0: i32, %arg1: memref<8x4096xbf16, #tpu.memory_space<vmem>>, %arg2: memref<4096x1024xbf16, #tpu.memory_space<vmem>>, %arg3: memref<1x1024xf32, #tpu.memory_space<vmem>>, %arg4: memref<16x1024xf32, #tpu.memory_space<vmem>>, %arg5: memref<1x8x16xf32, #tpu.memory_space<vmem>>) attributes {dimension_semantics = [#tpu.dimension_semantics<parallel>], iteration_bounds = array<i64: 1>, scalar_prefetch = 0 : i64, scratch_operands = 0 : i64, tpu.core_type = #tpu.core_type<tc>, window_params = [{pipeline_mode = #tpu.pipeline_mode<synchronous>, transform_indices = @transform_0, window_bounds = array<i64: 8, 4096>}, {transform_indices = @transform_1, window_bounds = array<i64: 4096, 1024>}, {transform_indices = @transform_2, window_bounds = array<i64: 1, 1024>}, {transform_indices = @transform_3, window_bounds = array<i64: 16, 1024>}, {transform_indices = @transform_4, window_bounds = array<i64: 1, 8, 16>}]} {
    %c0 = arith.constant 0 : index
    %c0_0 = arith.constant 0 : index
    %0 = vector.load %arg1[%c0, %c0_0] : memref<8x4096xbf16, #tpu.memory_space<vmem>>, vector<8x4096xbf16>
    %c0_1 = arith.constant 0 : index
    %c0_2 = arith.constant 0 : index
    %1 = vector.load %arg2[%c0_1, %c0_2] : memref<4096x1024xbf16, #tpu.memory_space<vmem>>, vector<4096x1024xbf16>
    %cst = arith.constant dense<0.000000e+00> : vector<8x1024xf32>
    %2 = tpu.matmul %0, %1, %cst {dimension_numbers = #tpu.dot_dimension_numbers<[1], [0], [0], [1], [0, 0, 1, 1], [], []>} : vector<8x4096xbf16>, vector<4096x1024xbf16>, vector<8x1024xf32> -> vector<8x1024xf32>
    %c0_3 = arith.constant 0 : index
    %c0_4 = arith.constant 0 : index
    %3 = vector.load %arg3[%c0_3, %c0_4] : memref<1x1024xf32, #tpu.memory_space<vmem>>, vector<1x1024xf32>
    %4 = vector.broadcast %3 : vector<1x1024xf32> to vector<8x1024xf32>
    %5 = arith.addf %2, %4 : vector<8x1024xf32>
    %cst_5 = arith.constant 0.000000e+00 : f32
    %6 = vector.broadcast %cst_5 : f32 to vector<8x1024xf32>
    %7 = arith.maximumf %5, %6 : vector<8x1024xf32>
    %c0_6 = arith.constant 0 : index
    %c0_7 = arith.constant 0 : index
    %8 = vector.load %arg4[%c0_6, %c0_7] : memref<16x1024xf32, #tpu.memory_space<vmem>>, vector<16x1024xf32>
    %cst_8 = arith.constant dense<0.000000e+00> : vector<8x16xf32>
    %9 = tpu.matmul %7, %8, %cst_8 {dimension_numbers = #tpu.dot_dimension_numbers<[1], [1], [0], [0], [0, 0, 1, 0], [], []>} : vector<8x1024xf32>, vector<16x1024xf32>, vector<8x16xf32> -> vector<8x16xf32>
    %c0_9 = arith.constant 0 : index
    %c0_10 = arith.constant 0 : index
    %c0_11 = arith.constant 0 : index
    %10 = vector.load %arg5[%c0_9, %c0_10, %c0_11] : memref<1x8x16xf32, #tpu.memory_space<vmem>>, vector<1x8x16xf32>
    %11 = vector.shape_cast %10 : vector<1x8x16xf32> to vector<8x16xf32>
    %12 = vector.shape_cast %9 : vector<8x16xf32> to vector<1x8x16xf32>
    tpu.vector_store %arg5[%c0_9, %c0_10, %c0_11], %12 {strides = array<i32>} : memref<1x8x16xf32, #tpu.memory_space<vmem>>, vector<1x8x16xf32>,
    return
  }
  func.func @transform_0(%arg0: i32) -> (i32, i32) {
    %c0_i32 = arith.constant 0 : i32
    %c0_i32_0 = arith.constant 0 : i32
    %c0_i32_1 = arith.constant 0 : i32
    return %c0_i32, %c0_i32_0 : i32, i32
  }
  func.func @transform_1(%arg0: i32) -> (i32, i32) {
    %c0_i32 = arith.constant 0 : i32
    %c0_i32_0 = arith.constant 0 : i32
    return %c0_i32, %arg0 : i32, i32
  }
  func.func @transform_2(%arg0: i32) -> (i32, i32) {
    %c0_i32 = arith.constant 0 : i32
    %c0_i32_0 = arith.constant 0 : i32
    return %c0_i32, %arg0 : i32, i32
  }
  func.func @transform_3(%arg0: i32) -> (i32, i32) {
    %c0_i32 = arith.constant 0 : i32
    %c0_i32_0 = arith.constant 0 : i32
    return %c0_i32, %arg0 : i32, i32
  }
  func.func @transform_4(%arg0: i32) -> (i32, i32, i32) {
    %c0_i32 = arith.constant 0 : i32
    %c0_i32_0 = arith.constant 0 : i32
    %c0_i32_1 = arith.constant 0 : i32
    return %arg0, %c0_i32, %c0_i32_0 : i32, i32, i32
  }
}

</mosaic_0001>

<bundles_post_ra>
// kernel: _svm_forward_impl.1
= control target key start
LH: loop header
LB: loop body
LE: loop exit
PB: predicated region body
PF: predicated region fallthrough
CT: control target
= control target key end

     0   :  { %9 = vsyncpa [#allocation3], 0  ;;  %s18189_s0 = inlined_call_operand.hbm [shape: bf16[8,4096], index: 0, kind: input, shape index: {}]   ;;  %s18190_s1 = inlined_call_operand.hbm [shape: bf16[4096,1024], index: 1, kind: input, shape index: {}]   ;;  %s18191_s2 = inlined_call_operand.hbm [shape: f32[1,1024], index: 2, kind: input, shape index: {}]   ;;  %s18192_s3 = inlined_call_operand.hbm [shape: f32[16,1024], index: 3, kind: input, shape index: {}]   ;;  %s18193_s4 = inlined_call_operand.vmem [shape: f32[1,8,16], index: 4, kind: output, shape index: {}]  }
   0x1   :  { %10 = vsyncpa [#allocation5], 0 }
   0x2   :  { %11 = vsyncpa [#allocation8], 0  ;;  %s17672_s15 = smov [#allocation4]  }
   0x3   :  { %s27_s16 = sshll.u32 %s17672_s15, 4  ;;  %s28_s16 = int_to_ptr.vmem [resolvable:$true] %s27_s16 }
   0x4   :  { %s17594_s17 = scalar_lea.vmem %s28_s16, 262144  ;;  %p17599_p1 = scmp.lt.s32.totalorder %s28_s16, %s28_s16 }
   0x5   :  { %p17595_p0 = scmp.ne.s32.totalorder %s28_s16, %s17594_s17  ;;  %p17600_p2 = scmp.lt.s32.totalorder %s17594_s17, %s17594_s17 }
   0x7   :  { %p17601_p3 = por %p17600_p2, %p17599_p1 }
   0x9   :  { %p17602_p4 = pnand %p17601_p3, %p17595_p0 }
   0xb   :  { %17605 = shalt.err (!%p17602_p4)
}
   0xc   :  { %s17673_s18 = smov 512   ;;  %s17674_s19 = smov 32  }
   0xd   :  { %33 = dma.hbm_to_vmem [thread:$0]  %s18190_s1, 262144, %s28_s16, [#allocation5], %s17673_s18, %s17673_s18, %s17674_s19  }
   0xe   :  { %s17675_s22 = smov [#allocation2]   ;;  %s17676_s24 = smov [#allocation6]  }
   0xf   :  { %s18_s23 = sshll.u32 %s17675_s22, 4  ;;  %s40_s25 = sshll.u32 %s17676_s24, 4  ;;  %s19_s23 = int_to_ptr.vmem [resolvable:$true] %s18_s23  ;;  %s41_s25 = int_to_ptr.vmem [resolvable:$true] %s40_s25 }
  0x10   :  { %s17614_s26 = scalar_lea.vmem %s19_s23, 2048  ;;  %p17619_p6 = scmp.lt.s32.totalorder %s19_s23, %s19_s23 }
  0x11   :  { %p17615_p5 = scmp.ne.s32.totalorder %s19_s23, %s17614_s26  ;;  %p17620_p7 = scmp.lt.s32.totalorder %s17614_s26, %s17614_s26 }
  0x13   :  { %p17621_p8 = por %p17620_p7, %p17619_p6 }
  0x15   :  { %p17622_p9 = pnand %p17621_p8, %p17615_p5 }
  0x17   :  { %17625 = shalt.err (!%p17622_p9)
}
  0x18   :  { %21 = dma.hbm_to_vmem [thread:$0]  %s18189_s0, 2048, %s19_s23, [#allocation3]  }
  0x19   :  { %s17634_s29 = scalar_lea.vmem %s41_s25, 128  ;;  %p17639_p11 = scmp.lt.s32.totalorder %s41_s25, %s41_s25 }
  0x1a   :  { %p17635_p10 = scmp.ne.s32.totalorder %s41_s25, %s17634_s29  ;;  %p17640_p12 = scmp.lt.s32.totalorder %s17634_s29, %s17634_s29 }
  0x1c   :  { %p17641_p13 = por %p17640_p12, %p17639_p11 }
  0x1e   :  { %p17642_p0 = pnand %p17641_p13, %p17635_p10 }
  0x20   :  { %17645 = shalt.err (!%p17642_p0)
}
  0x21   :  { %43 = dma.hbm_to_vmem [thread:$0]  %s18191_s2, 128, %s41_s25, [#allocation5]  }
  0x22   :  { %s17677_s5 = smov [#allocation7]  }
  0x23   :  { %s49_s6 = sshll.u32 %s17677_s5, 4  ;;  %s50_s6 = int_to_ptr.vmem [resolvable:$true] %s49_s6 }
  0x24   :  { %s17654_s7 = scalar_lea.vmem %s50_s6, 2048  ;;  %p17659_p2 = scmp.lt.s32.totalorder %s50_s6, %s50_s6 }
  0x25   :  { %p17655_p1 = scmp.ne.s32.totalorder %s50_s6, %s17654_s7  ;;  %p17660_p3 = scmp.lt.s32.totalorder %s17654_s7, %s17654_s7 }
  0x27   :  { %p17661_p4 = por %p17660_p3, %p17659_p2 }
  0x29   :  { %p17662_p5 = pnand %p17661_p4, %p17655_p1 }
  0x2b   :  { %17665 = shalt.err (!%p17662_p5)
}
  0x2c   :  { %s17678_s0 = smov 1024   ;;  %s17679_s8 = smov 64  }
  0x2d   :  { %55 = dma.hbm_to_vmem [thread:$0]  %s18192_s3, 2048, %s50_s6, [#allocation8], %s17678_s0, %s17678_s0, %s17679_s8  }
  0x2e   :  { %17666 = dma.done.wait [#allocation3], 2048  }
  0x2f   :  { %17667 = vsyncadd [#allocation3], 4294965248 }
  0x30   :  { %17668 = dma.done.wait [#allocation5], 262272  }
  0x31   :  { %17669 = vsyncadd [#allocation5], 4294705024 }
  0x32   :  { %17670 = dma.done.wait [#allocation8], 2048  }
  0x33   :  { %17671 = vsyncadd [#allocation8], 4294965248  ;;  %v140_v0 = vld [vmem:[#allocation4 + $0x1c0] sm:$0xff]  ;;  %v17719_v54 = vld [vmem:[#allocation2 + $0x8] sm:$0xff]  ;;  %vm15454_vm0 = vcmask 130048  }
  0x34   :  { %v144_v1 = vld [vmem:[#allocation4 + $0x1e0] sm:$0xff]  ;;  %v17727_v59 = vcombine.high %v17719_v54, %v17719_v54 }
  0x35   :  { %v268_v2 = vld [vmem:[#allocation4 + $0x5c0] sm:$0xff]  ;;  %v15552_v3 = vcombine.high %v140_v0, %v144_v1  ;;  %v15551_v5 = vcombine.low %v140_v0, %v144_v1 }
  0x36   :  { %v272_v4 = vld [vmem:[#allocation4 + $0x5e0] sm:$0xff]  ;;  %12599 = vmatprep.mubr.bf16.mxu1 %v17727_v59 }
  0x37   :  { %v132_v6 = vld [vmem:[#allocation4 + $0x180] sm:$0xff]  ;;  %v15680_v8 = vcombine.high %v268_v2, %v272_v4  ;;  %v15679_v9 = vcombine.low %v268_v2, %v272_v4  ;;  %12526 = vmatprep.subr.bf16.mxu0 %v15552_v3 }
  0x38   :  { %v136_v7 = vld [vmem:[#allocation4 + $0x1a0] sm:$0xff]  ;;  %12527 = vmatpush1.bf16.msra.mxu0 %v15551_v5 }
  0x39   :  { %v15544_v10 = vcombine.high %v132_v6, %v136_v7  ;;  %v260_v11 = vld [vmem:[#allocation4 + $0x580] sm:$0xff]  ;;  %12567 = vmatprep.subr.bf16.mxu1 %v15680_v8  ;;  %v15543_v18 = vcombine.low %v132_v6, %v136_v7 }
  0x3a   :  { %v264_v12 = vld [vmem:[#allocation4 + $0x5a0] sm:$0xff]  ;;  %12568 = vmatpush1.bf16.msra.mxu1 %v15679_v9 }
  0x3b   :  { %v124_v13 = vld [vmem:[#allocation4 + $0x140] sm:$0xff]  ;;  %v15672_v14 = vcombine.high %v260_v11, %v264_v12  ;;  %12528 = vmatprep.subr.bf16.mxu0 %v15544_v10  ;;  %v15671_v19 = vcombine.low %v260_v11, %v264_v12 }
  0x3c   :  { %v128_v15 = vld [vmem:[#allocation4 + $0x160] sm:$0xff]  ;;  %12529 = vmatpush1.bf16.msra.mxu0 %v15543_v18 }
  0x3d   :  { %v252_v16 = vld [vmem:[#allocation4 + $0x540] sm:$0xff]  ;;  %v15536_v20 = vcombine.high %v124_v13, %v128_v15  ;;  %12569 = vmatprep.subr.bf16.mxu1 %v15672_v14  ;;  %v15535_v26 = vcombine.low %v124_v13, %v128_v15 }
  0x3e   :  { %v256_v17 = vld [vmem:[#allocation4 + $0x560] sm:$0xff]  ;;  %12570 = vmatpush1.bf16.msra.mxu1 %v15671_v19 }
  0x3f   :  { %v15664_v21 = vcombine.high %v252_v16, %v256_v17  ;;  %v116_v22 = vld [vmem:[#allocation4 + $0x100] sm:$0xff]  ;;  %12530 = vmatprep.subr.bf16.mxu0 %v15536_v20  ;;  %v15663_v27 = vcombine.low %v252_v16, %v256_v17 }
  0x40   :  { %v120_v23 = vld [vmem:[#allocation4 + $0x120] sm:$0xff]  ;;  %12531 = vmatpush1.bf16.msra.mxu0 %v15535_v26 }
  0x41   :  { %v244_v24 = vld [vmem:[#allocation4 + $0x500] sm:$0xff]  ;;  %v15528_v28 = vcombine.high %v116_v22, %v120_v23  ;;  %12571 = vmatprep.subr.bf16.mxu1 %v15664_v21  ;;  %v15527_v34 = vcombine.low %v116_v22, %v120_v23 }
  0x42   :  { %v248_v25 = vld [vmem:[#allocation4 + $0x520] sm:$0xff]  ;;  %12572 = vmatpush1.bf16.msra.mxu1 %v15663_v27 }
  0x43   :  { %v15656_v29 = vcombine.high %v244_v24, %v248_v25  ;;  %v108_v30 = vld [vmem:[#allocation4 + $0xc0] sm:$0xff]  ;;  %12532 = vmatprep.subr.bf16.mxu0 %v15528_v28  ;;  %v15655_v35 = vcombine.low %v244_v24, %v248_v25 }
  0x44   :  { %v112_v31 = vld [vmem:[#allocation4 + $0xe0] sm:$0xff]  ;;  %12533 = vmatpush1.bf16.msra.mxu0 %v15527_v34 }
  0x45   :  { %v236_v32 = vld [vmem:[#allocation4 + $0x4c0] sm:$0xff]  ;;  %v15520_v36 = vcombine.high %v108_v30, %v112_v31  ;;  %12573 = vmatprep.subr.bf16.mxu1 %v15656_v29  ;;  %v15519_v42 = vcombine.low %v108_v30, %v112_v31 }
  0x46   :  { %v240_v33 = vld [vmem:[#allocation4 + $0x4e0] sm:$0xff]  ;;  %12574 = vmatpush1.bf16.msra.mxu1 %v15655_v35 }
  0x47   :  { %v15648_v37 = vcombine.high %v236_v32, %v240_v33  ;;  %v100_v38 = vld [vmem:[#allocation4 + $0x80] sm:$0xff]  ;;  %12534 = vmatprep.subr.bf16.mxu0 %v15520_v36  ;;  %v15647_v43 = vcombine.low %v236_v32, %v240_v33 }
  0x48   :  { %v104_v39 = vld [vmem:[#allocation4 + $0xa0] sm:$0xff]  ;;  %12535 = vmatpush1.bf16.msra.mxu0 %v15519_v42 }
  0x49   :  { %v228_v40 = vld [vmem:[#allocation4 + $0x480] sm:$0xff]  ;;  %v15512_v44 = vcombine.high %v100_v38, %v104_v39  ;;  %12575 = vmatprep.subr.bf16.mxu1 %v15648_v37  ;;  %v15511_v50 = vcombine.low %v100_v38, %v104_v39 }
  0x4a   :  { %v232_v41 = vld [vmem:[#allocation4 + $0x4a0] sm:$0xff]  ;;  %12576 = vmatpush1.bf16.msra.mxu1 %v15647_v43 }
  0x4b   :  { %v15640_v45 = vcombine.high %v228_v40, %v232_v41  ;;  %v92_v46 = vld [vmem:[#allocation4 + $0x40] sm:$0xff]  ;;  %12536 = vmatprep.subr.bf16.mxu0 %v15512_v44  ;;  %v15639_v51 = vcombine.low %v228_v40, %v232_v41 }
  0x4c   :  { %v96_v47 = vld [vmem:[#allocation4 + $0x60] sm:$0xff]  ;;  %12537 = vmatpush1.bf16.msra.mxu0 %v15511_v50 }
  0x4d   :  { %v220_v48 = vld [vmem:[#allocation4 + $0x440] sm:$0xff]  ;;  %v15504_v52 = vcombine.high %v92_v46, %v96_v47  ;;  %12577 = vmatprep.subr.bf16.mxu1 %v15640_v45  ;;  %v15503_v62 = vcombine.low %v92_v46, %v96_v47 }
  0x4e   :  { %v224_v49 = vld [vmem:[#allocation4 + $0x460] sm:$0xff]  ;;  %12578 = vmatpush1.bf16.msra.mxu1 %v15639_v51 }
  0x4f   :  { %v17717_v53 = vld [vmem:[#allocation2] sm:$0xff]  ;;  %v15632_v55 = vcombine.high %v220_v48, %v224_v49  ;;  %12538 = vmatprep.subr.bf16.mxu0 %v15504_v52  ;;  %v15631_v63 = vcombine.low %v220_v48, %v224_v49 }
  0x50   :  { %v84_v56 = vld [vmem:[#allocation4] sm:$0xff]  ;;  %v17723_v58 = vcombine.high %v17717_v53, %v17717_v53  ;;  %12539 = vmatpush1.bf16.msra.mxu0 %v15503_v62 }
  0x51   :  { %v88_v57 = vld [vmem:[#allocation4 + $0x20] sm:$0xff]  ;;  %12579 = vmatprep.subr.bf16.mxu1 %v15632_v55 }
  0x52   :  { %v212_v60 = vld [vmem:[#allocation4 + $0x400] sm:$0xff]  ;;  %12558 = vmatprep.mubr.bf16.mxu0 %v17723_v58  ;;  %v15496_v0 = vcombine.high %v84_v56, %v88_v57  ;;  %v15495_v6 = vcombine.low %v84_v56, %v88_v57  ;;  %12580 = vmatpush1.bf16.msra.mxu1 %v15631_v63 }
  0x53   :  { %v216_v61 = vld [vmem:[#allocation4 + $0x420] sm:$0xff] }
  0x54   :  { %v15624_v1 = vcombine.high %v212_v60, %v216_v61  ;;  %v204_v2 = vld [vmem:[#allocation4 + $0x3c0] sm:$0xff]  ;;  %12540 = vmatprep.subr.bf16.mxu0 %v15496_v0  ;;  %v15623_v7 = vcombine.low %v212_v60, %v216_v61 }
  0x55   :  { %v208_v3 = vld [vmem:[#allocation4 + $0x3e0] sm:$0xff]  ;;  %12541 = vmatpush1.bf16.msra.mxu0 %v15495_v6 }
  0x56   :  { %v332_v4 = vld [vmem:[#allocation4 + $0x7c0] sm:$0xff]  ;;  %v15616_v8 = vcombine.high %v204_v2, %v208_v3  ;;  %12581 = vmatprep.subr.bf16.mxu1 %v15624_v1  ;;  %v15615_v14 = vcombine.low %v204_v2, %v208_v3 }
  0x57   :  { %v336_v5 = vld [vmem:[#allocation4 + $0x7e0] sm:$0xff]  ;;  %12582 = vmatpush1.bf16.msra.mxu1 %v15623_v7 }
  0x58   :  { %v15744_v9 = vcombine.high %v332_v4, %v336_v5  ;;  %v196_v10 = vld [vmem:[#allocation4 + $0x380] sm:$0xff]  ;;  %12542 = vmatprep.subr.bf16.mxu0 %v15616_v8  ;;  %v15743_v15 = vcombine.low %v332_v4, %v336_v5 }
  0x59   :  { %v200_v11 = vld [vmem:[#allocation4 + $0x3a0] sm:$0xff]  ;;  %12543 = vmatpush2.bf16.msra.mxu0 %v15615_v14 }
  0x5a   :  { %v324_v12 = vld [vmem:[#allocation4 + $0x780] sm:$0xff]  ;;  %v15608_v16 = vcombine.high %v196_v10, %v200_v11  ;;  %12583 = vmatprep.subr.bf16.mxu1 %v15744_v9  ;;  %v15607_v22 = vcombine.low %v196_v10, %v200_v11 }
  0x5b   :  { %v328_v13 = vld [vmem:[#allocation4 + $0x7a0] sm:$0xff]  ;;  %12584 = vmatpush2.bf16.msra.mxu1 %v15743_v15 }
  0x5c   :  { %v15736_v17 = vcombine.high %v324_v12, %v328_v13  ;;  %v188_v18 = vld [vmem:[#allocation4 + $0x340] sm:$0xff]  ;;  %12544 = vmatprep.subr.bf16.mxu0 %v15608_v16  ;;  %v15735_v23 = vcombine.low %v324_v12, %v328_v13  ;;  %v17733_v16 = vcombine.low %v17717_v53, %v17717_v53 }
  0x5d   :  { %v192_v19 = vld [vmem:[#allocation4 + $0x360] sm:$0xff]  ;;  %12545 = vmatpush2.bf16.msra.mxu0 %v15607_v22  ;;  %v17741_v22 = vld [vmem:[#allocation2 + $0x18] sm:$0xff] }
  0x5e   :  { %v316_v20 = vld [vmem:[#allocation4 + $0x740] sm:$0xff]  ;;  %v15600_v24 = vcombine.high %v188_v18, %v192_v19  ;;  %12585 = vmatprep.subr.bf16.mxu1 %v15736_v17  ;;  %v15599_v30 = vcombine.low %v188_v18, %v192_v19  ;;  %v17735_v19 = vld [vmem:[#allocation2 + $0x10] sm:$0xff] }
  0x5f   :  { %v320_v21 = vld [vmem:[#allocation4 + $0x760] sm:$0xff]  ;;  %12586 = vmatpush2.bf16.msra.mxu1 %v15735_v23 }
  0x60   :  { %v15728_v25 = vcombine.high %v316_v20, %v320_v21  ;;  %v180_v26 = vld [vmem:[#allocation4 + $0x300] sm:$0xff]  ;;  %12546 = vmatprep.subr.bf16.mxu0 %v15600_v24  ;;  %v15727_v31 = vcombine.low %v316_v20, %v320_v21  ;;  %v17739_v20 = vcombine.low %v17719_v54, %v17719_v54 }
  0x61   :  { %v184_v27 = vld [vmem:[#allocation4 + $0x320] sm:$0xff]  ;;  %12547 = vmatpush2.bf16.msra.mxu0 %v15599_v30 }
  0x62   :  { %v308_v28 = vld [vmem:[#allocation4 + $0x700] sm:$0xff]  ;;  %v15592_v32 = vcombine.high %v180_v26, %v184_v27  ;;  %12587 = vmatprep.subr.bf16.mxu1 %v15728_v25  ;;  %v15591_v38 = vcombine.low %v180_v26, %v184_v27  ;;  %v17745_v27 = vcombine.high %v17735_v19, %v17735_v19 }
  0x63   :  { %v312_v29 = vld [vmem:[#allocation4 + $0x720] sm:$0xff]  ;;  %12588 = vmatpush2.bf16.msra.mxu1 %v15727_v31 }
  0x64   :  { %v15720_v33 = vcombine.high %v308_v28, %v312_v29  ;;  %v172_v34 = vld [vmem:[#allocation4 + $0x2c0] sm:$0xff]  ;;  %12548 = vmatprep.subr.bf16.mxu0 %v15592_v32  ;;  %v15719_v39 = vcombine.low %v308_v28, %v312_v29  ;;  %v17750_v29 = vcombine.high %v17741_v22, %v17741_v22 }
  0x65   :  { %v176_v35 = vld [vmem:[#allocation4 + $0x2e0] sm:$0xff]  ;;  %12549 = vmatpush2.bf16.msra.mxu0 %v15591_v38 }
  0x66   :  { %v300_v36 = vld [vmem:[#allocation4 + $0x6c0] sm:$0xff]  ;;  %v15584_v40 = vcombine.high %v172_v34, %v176_v35  ;;  %12589 = vmatprep.subr.bf16.mxu1 %v15720_v33  ;;  %v15583_v46 = vcombine.low %v172_v34, %v176_v35 }
  0x67   :  { %v304_v37 = vld [vmem:[#allocation4 + $0x6e0] sm:$0xff]  ;;  %12590 = vmatpush2.bf16.msra.mxu1 %v15719_v39 }
  0x68   :  { %v15712_v41 = vcombine.high %v300_v36, %v304_v37  ;;  %v164_v42 = vld [vmem:[#allocation4 + $0x280] sm:$0xff]  ;;  %12550 = vmatprep.subr.bf16.mxu0 %v15584_v40  ;;  %v15711_v47 = vcombine.low %v300_v36, %v304_v37 }
  0x69   :  { %v168_v43 = vld [vmem:[#allocation4 + $0x2a0] sm:$0xff]  ;;  %12551 = vmatpush2.bf16.msra.mxu0 %v15583_v46 }
  0x6a   :  { %v292_v44 = vld [vmem:[#allocation4 + $0x680] sm:$0xff]  ;;  %v15576_v48 = vcombine.high %v164_v42, %v168_v43  ;;  %12591 = vmatprep.subr.bf16.mxu1 %v15712_v41  ;;  %v15575_v56 = vcombine.low %v164_v42, %v168_v43 }
  0x6b   :  { %v296_v45 = vld [vmem:[#allocation4 + $0x6a0] sm:$0xff]  ;;  %12592 = vmatpush2.bf16.msra.mxu1 %v15711_v47 }
  0x6c   :  { %v15704_v49 = vcombine.high %v292_v44, %v296_v45  ;;  %v156_v50 = vld [vmem:[#allocation4 + $0x240] sm:$0xff]  ;;  %12552 = vmatprep.subr.bf16.mxu0 %v15576_v48  ;;  %v15703_v57 = vcombine.low %v292_v44, %v296_v45 }
  0x6d   :  { %v160_v51 = vld [vmem:[#allocation4 + $0x260] sm:$0xff]  ;;  %12553 = vmatpush2.bf16.msra.mxu0 %v15575_v56 }
  0x6e   :  { %v284_v52 = vld [vmem:[#allocation4 + $0x640] sm:$0xff]  ;;  %v15568_v60 = vcombine.high %v156_v50, %v160_v51  ;;  %12593 = vmatprep.subr.bf16.mxu1 %v15704_v49  ;;  %v15567_v2 = vcombine.low %v156_v50, %v160_v51 }
  0x6f   :  { %v288_v55 = vld [vmem:[#allocation4 + $0x660] sm:$0xff]  ;;  %12594 = vmatpush2.bf16.msra.mxu1 %v15703_v57 }
  0x70   :  { %v15696_v61 = vcombine.high %v284_v52, %v288_v55  ;;  %v148_v62 = vld [vmem:[#allocation4 + $0x200] sm:$0xff]  ;;  %12554 = vmatprep.subr.bf16.mxu0 %v15568_v60  ;;  %v15695_v3 = vcombine.low %v284_v52, %v288_v55 }
  0x71   :  { %v152_v63 = vld [vmem:[#allocation4 + $0x220] sm:$0xff]  ;;  %12555 = vmatpush2.bf16.msra.mxu0 %v15567_v2 }
  0x72   :  { %v276_v0 = vld [vmem:[#allocation4 + $0x600] sm:$0xff]  ;;  %v15560_v4 = vcombine.high %v148_v62, %v152_v63  ;;  %12595 = vmatprep.subr.bf16.mxu1 %v15696_v61  ;;  %v15559_v10 = vcombine.low %v148_v62, %v152_v63 }
  0x73   :  { %v280_v1 = vld [vmem:[#allocation4 + $0x620] sm:$0xff]  ;;  %12596 = vmatpush2.bf16.msra.mxu1 %v15695_v3 }
  0x74   :  { %v15688_v5 = vcombine.high %v276_v0, %v280_v1  ;;  %v396_v6 = vld [vmem:[#allocation4 + $0x9c0] sm:$0xff]  ;;  %12556 = vmatprep.subr.bf16.mxu0 %v15560_v4  ;;  %v15687_v11 = vcombine.low %v276_v0, %v280_v1 }
  0x75   :  { %v400_v7 = vld [vmem:[#allocation4 + $0x9e0] sm:$0xff]  ;;  %12557 = vmatpush2.bf16.msra.mxu0 %v15559_v10 }
  0x76   :  { %v524_v8 = vld [vmem:[#allocation4 + $0xdc0] sm:$0xff]  ;;  %v15808_v12 = vcombine.high %v396_v6, %v400_v7  ;;  %12597 = vmatprep.subr.bf16.mxu1 %v15688_v5  ;;  %v15807_v21 = vcombine.low %v396_v6, %v400_v7 }
  0x77   :  { %v528_v9 = vld [vmem:[#allocation4 + $0xde0] sm:$0xff]  ;;  %12598 = vmatpush2.bf16.msra.mxu1 %v15687_v11 }
  0x78   :  { %v15936_v13 = vcombine.high %v524_v8, %v528_v9  ;;  %v388_v14 = vld [vmem:[#allocation4 + $0x980] sm:$0xff]  ;;  %12608 = vmatprep.subr.bf16.mxu0 %v15808_v12  ;;  %v15935_v23 = vcombine.low %v524_v8, %v528_v9  ;;  %12559 = vmatmul.mubr.bf16.vlgmr.msra.gmra.mxu0 %v17733_v16 }
  0x79   :  { %v392_v15 = vld [vmem:[#allocation4 + $0x9a0] sm:$0xff]  ;;  %12609 = vmatpush1.bf16.msra.mxu0 %v15807_v21  ;;  %12640 = vmatprep.mubr.bf16.mxu0 %v17745_v27 }
  0x7a   :  { %v516_v17 = vld [vmem:[#allocation4 + $0xd80] sm:$0xff]  ;;  %v15800_v24 = vcombine.high %v388_v14, %v392_v15  ;;  %12649 = vmatprep.subr.bf16.mxu1 %v15936_v13  ;;  %12600 = vmatmul.mubr.bf16.vlgmr.msra.gmra.mxu1 %v17739_v20  ;;  %v15799_v30 = vcombine.low %v388_v14, %v392_v15 }
  0x7b   :  { %v520_v18 = vld [vmem:[#allocation4 + $0xda0] sm:$0xff]  ;;  %12650 = vmatpush1.bf16.msra.mxu1 %v15935_v23  ;;  %12681 = vmatprep.mubr.bf16.mxu1 %v17750_v29 }
  0x7c   :  { %v15928_v25 = vcombine.high %v516_v17, %v520_v18  ;;  %v380_v53 = vld [vmem:[#allocation4 + $0x940] sm:$0xff]  ;;  %12610 = vmatprep.subr.bf16.mxu0 %v15800_v24  ;;  %v15927_v31 = vcombine.low %v516_v17, %v520_v18 }
  0x7d   :  { %v384_v26 = vld [vmem:[#allocation4 + $0x960] sm:$0xff]  ;;  %12611 = vmatpush1.bf16.msra.mxu0 %v15799_v30 }
  0x7e   :  { %v508_v28 = vld [vmem:[#allocation4 + $0xd40] sm:$0xff]  ;;  %v15792_v32 = vcombine.high %v380_v53, %v384_v26  ;;  %12651 = vmatprep.subr.bf16.mxu1 %v15928_v25  ;;  %v15791_v38 = vcombine.low %v380_v53, %v384_v26 }
  0x7f   :  { %v512_v54 = vld [vmem:[#allocation4 + $0xd60] sm:$0xff]  ;;  %12652 = vmatpush1.bf16.msra.mxu1 %v15927_v31 }
  0x80   :  { %v15920_v33 = vcombine.high %v508_v28, %v512_v54  ;;  %v372_v34 = vld [vmem:[#allocation4 + $0x900] sm:$0xff]  ;;  %12612 = vmatprep.subr.bf16.mxu0 %v15792_v32  ;;  %v15919_v39 = vcombine.low %v508_v28, %v512_v54 }
  0x81   :  { %v376_v35 = vld [vmem:[#allocation4 + $0x920] sm:$0xff]  ;;  %12613 = vmatpush1.bf16.msra.mxu0 %v15791_v38 }
  0x82   :  { %v500_v36 = vld [vmem:[#allocation4 + $0xd00] sm:$0xff]  ;;  %v15784_v40 = vcombine.high %v372_v34, %v376_v35  ;;  %12653 = vmatprep.subr.bf16.mxu1 %v15920_v33  ;;  %v15783_v46 = vcombine.low %v372_v34, %v376_v35 }
  0x83   :  { %v504_v37 = vld [vmem:[#allocation4 + $0xd20] sm:$0xff]  ;;  %12654 = vmatpush1.bf16.msra.mxu1 %v15919_v39 }
  0x84   :  { %v15912_v41 = vcombine.high %v500_v36, %v504_v37  ;;  %v364_v42 = vld [vmem:[#allocation4 + $0x8c0] sm:$0xff]  ;;  %12614 = vmatprep.subr.bf16.mxu0 %v15784_v40  ;;  %v15911_v47 = vcombine.low %v500_v36, %v504_v37 }
  0x85   :  { %v368_v43 = vld [vmem:[#allocation4 + $0x8e0] sm:$0xff]  ;;  %12615 = vmatpush1.bf16.msra.mxu0 %v15783_v46 }
  0x86   :  { %v492_v44 = vld [vmem:[#allocation4 + $0xcc0] sm:$0xff]  ;;  %v15776_v48 = vcombine.high %v364_v42, %v368_v43  ;;  %12655 = vmatprep.subr.bf16.mxu1 %v15912_v41  ;;  %v15775_v56 = vcombine.low %v364_v42, %v368_v43 }
  0x87   :  { %v496_v45 = vld [vmem:[#allocation4 + $0xce0] sm:$0xff]  ;;  %12656 = vmatpush1.bf16.msra.mxu1 %v15911_v47 }
  0x88   :  { %v15904_v49 = vcombine.high %v492_v44, %v496_v45  ;;  %v356_v50 = vld [vmem:[#allocation4 + $0x880] sm:$0xff]  ;;  %12616 = vmatprep.subr.bf16.mxu0 %v15776_v48  ;;  %v15903_v57 = vcombine.low %v492_v44, %v496_v45 }
  0x89   :  { %v360_v51 = vld [vmem:[#allocation4 + $0x8a0] sm:$0xff]  ;;  %12617 = vmatpush1.bf16.msra.mxu0 %v15775_v56 }
  0x8a   :  { %v484_v52 = vld [vmem:[#allocation4 + $0xc80] sm:$0xff]  ;;  %v15768_v60 = vcombine.high %v356_v50, %v360_v51  ;;  %12657 = vmatprep.subr.bf16.mxu1 %v15904_v49  ;;  %v15767_v2 = vcombine.low %v356_v50, %v360_v51 }
  0x8b   :  { %v488_v55 = vld [vmem:[#allocation4 + $0xca0] sm:$0xff]  ;;  %12658 = vmatpush1.bf16.msra.mxu1 %v15903_v57 }
  0x8c   :  { %v15896_v61 = vcombine.high %v484_v52, %v488_v55  ;;  %v348_v62 = vld [vmem:[#allocation4 + $0x840] sm:$0xff]  ;;  %12618 = vmatprep.subr.bf16.mxu0 %v15768_v60  ;;  %v15895_v3 = vcombine.low %v484_v52, %v488_v55 }
  0x8d   :  { %v352_v63 = vld [vmem:[#allocation4 + $0x860] sm:$0xff]  ;;  %12619 = vmatpush1.bf16.msra.mxu0 %v15767_v2 }
  0x8e   :  { %v476_v0 = vld [vmem:[#allocation4 + $0xc40] sm:$0xff]  ;;  %v15760_v4 = vcombine.high %v348_v62, %v352_v63  ;;  %12659 = vmatprep.subr.bf16.mxu1 %v15896_v61  ;;  %v15759_v10 = vcombine.low %v348_v62, %v352_v63 }
  0x8f   :  { %v480_v1 = vld [vmem:[#allocation4 + $0xc60] sm:$0xff]  ;;  %12660 = vmatpush1.bf16.msra.mxu1 %v15895_v3 }
  0x90   :  { %v15888_v5 = vcombine.high %v476_v0, %v480_v1  ;;  %v340_v6 = vld [vmem:[#allocation4 + $0x800] sm:$0xff]  ;;  %12620 = vmatprep.subr.bf16.mxu0 %v15760_v4  ;;  %v15887_v11 = vcombine.low %v476_v0, %v480_v1 }
  0x91   :  { %v344_v7 = vld [vmem:[#allocation4 + $0x820] sm:$0xff]  ;;  %12621 = vmatpush1.bf16.msra.mxu0 %v15759_v10 }
  0x92   :  { %v468_v8 = vld [vmem:[#allocation4 + $0xc00] sm:$0xff]  ;;  %v15752_v12 = vcombine.high %v340_v6, %v344_v7  ;;  %12661 = vmatprep.subr.bf16.mxu1 %v15888_v5  ;;  %v15751_v21 = vcombine.low %v340_v6, %v344_v7 }
  0x93   :  { %v472_v9 = vld [vmem:[#allocation4 + $0xc20] sm:$0xff]  ;;  %12662 = vmatpush1.bf16.msra.mxu1 %v15887_v11 }
  0x94   :  { %v15880_v13 = vcombine.high %v468_v8, %v472_v9  ;;  %v460_v14 = vld [vmem:[#allocation4 + $0xbc0] sm:$0xff]  ;;  %12622 = vmatprep.subr.bf16.mxu0 %v15752_v12  ;;  %v15879_v23 = vcombine.low %v468_v8, %v472_v9 }
  0x95   :  { %v464_v15 = vld [vmem:[#allocation4 + $0xbe0] sm:$0xff]  ;;  %12623 = vmatpush1.bf16.msra.mxu0 %v15751_v21 }
  0x96   :  { %v588_v17 = vld [vmem:[#allocation4 + $0xfc0] sm:$0xff]  ;;  %v15872_v24 = vcombine.high %v460_v14, %v464_v15  ;;  %12663 = vmatprep.subr.bf16.mxu1 %v15880_v13  ;;  %v15871_v30 = vcombine.low %v460_v14, %v464_v15 }
  0x97   :  { %v592_v18 = vld [vmem:[#allocation4 + $0xfe0] sm:$0xff]  ;;  %12664 = vmatpush1.bf16.msra.mxu1 %v15879_v23 }
  0x98   :  { %v16000_v25 = vcombine.high %v588_v17, %v592_v18  ;;  %v452_v53 = vld [vmem:[#allocation4 + $0xb80] sm:$0xff]  ;;  %12624 = vmatprep.subr.bf16.mxu0 %v15872_v24  ;;  %v15999_v31 = vcombine.low %v588_v17, %v592_v18 }
  0x99   :  { %v456_v26 = vld [vmem:[#allocation4 + $0xba0] sm:$0xff]  ;;  %12625 = vmatpush2.bf16.msra.mxu0 %v15871_v30 }
  0x9a   :  { %v580_v28 = vld [vmem:[#allocation4 + $0xf80] sm:$0xff]  ;;  %v15864_v32 = vcombine.high %v452_v53, %v456_v26  ;;  %12665 = vmatprep.subr.bf16.mxu1 %v16000_v25  ;;  %v15863_v38 = vcombine.low %v452_v53, %v456_v26 }
  0x9b   :  { %v584_v54 = vld [vmem:[#allocation4 + $0xfa0] sm:$0xff]  ;;  %12666 = vmatpush2.bf16.msra.mxu1 %v15999_v31 }
  0x9c   :  { %v15992_v33 = vcombine.high %v580_v28, %v584_v54  ;;  %v444_v34 = vld [vmem:[#allocation4 + $0xb40] sm:$0xff]  ;;  %12626 = vmatprep.subr.bf16.mxu0 %v15864_v32  ;;  %v15991_v39 = vcombine.low %v580_v28, %v584_v54 }
  0x9d   :  { %v448_v35 = vld [vmem:[#allocation4 + $0xb60] sm:$0xff]  ;;  %12627 = vmatpush2.bf16.msra.mxu0 %v15863_v38 }
  0x9e   :  { %v572_v36 = vld [vmem:[#allocation4 + $0xf40] sm:$0xff]  ;;  %v15856_v40 = vcombine.high %v444_v34, %v448_v35  ;;  %12667 = vmatprep.subr.bf16.mxu1 %v15992_v33  ;;  %v15855_v46 = vcombine.low %v444_v34, %v448_v35 }
  0x9f   :  { %v576_v37 = vld [vmem:[#allocation4 + $0xf60] sm:$0xff]  ;;  %12668 = vmatpush2.bf16.msra.mxu1 %v15991_v39 }
  0xa0   :  { %v15984_v41 = vcombine.high %v572_v36, %v576_v37  ;;  %v436_v42 = vld [vmem:[#allocation4 + $0xb00] sm:$0xff]  ;;  %12628 = vmatprep.subr.bf16.mxu0 %v15856_v40  ;;  %v15983_v47 = vcombine.low %v572_v36, %v576_v37  ;;  %v17757_v36 = vcombine.low %v17735_v19, %v17735_v19  ;;  %v17763_v40 = vcombine.low %v17741_v22, %v17741_v22 }
  0xa1   :  { %v440_v43 = vld [vmem:[#allocation4 + $0xb20] sm:$0xff]  ;;  %12629 = vmatpush2.bf16.msra.mxu0 %v15855_v46 }
  0xa2   :  { %v564_v44 = vld [vmem:[#allocation4 + $0xf00] sm:$0xff]  ;;  %v15848_v48 = vcombine.high %v436_v42, %v440_v43  ;;  %12669 = vmatprep.subr.bf16.mxu1 %v15984_v41  ;;  %v15847_v56 = vcombine.low %v436_v42, %v440_v43  ;;  %v17765_v42 = vld [vmem:[#allocation2 + $0x28] sm:$0xff] }
  0xa3   :  { %v568_v45 = vld [vmem:[#allocation4 + $0xf20] sm:$0xff]  ;;  %12670 = vmatpush2.bf16.msra.mxu1 %v15983_v47 }
  0xa4   :  { %v15976_v49 = vcombine.high %v564_v44, %v568_v45  ;;  %v428_v50 = vld [vmem:[#allocation4 + $0xac0] sm:$0xff]  ;;  %12630 = vmatprep.subr.bf16.mxu0 %v15848_v48  ;;  %v15975_v57 = vcombine.low %v564_v44, %v568_v45 }
  0xa5   :  { %v432_v51 = vld [vmem:[#allocation4 + $0xae0] sm:$0xff]  ;;  %12631 = vmatpush2.bf16.msra.mxu0 %v15847_v56 }
  0xa6   :  { %v556_v52 = vld [vmem:[#allocation4 + $0xec0] sm:$0xff]  ;;  %v15840_v60 = vcombine.high %v428_v50, %v432_v51  ;;  %12671 = vmatprep.subr.bf16.mxu1 %v15976_v49  ;;  %v15839_v2 = vcombine.low %v428_v50, %v432_v51  ;;  %v17774_v49 = vcombine.high %v17765_v42, %v17765_v42 }
  0xa7   :  { %v560_v55 = vld [vmem:[#allocation4 + $0xee0] sm:$0xff]  ;;  %12672 = vmatpush2.bf16.msra.mxu1 %v15975_v57 }
  0xa8   :  { %v15968_v61 = vcombine.high %v556_v52, %v560_v55  ;;  %v420_v62 = vld [vmem:[#allocation4 + $0xa80] sm:$0xff]  ;;  %12632 = vmatprep.subr.bf16.mxu0 %v15840_v60  ;;  %v15967_v3 = vcombine.low %v556_v52, %v560_v55 }
  0xa9   :  { %v424_v63 = vld [vmem:[#allocation4 + $0xaa0] sm:$0xff]  ;;  %12633 = vmatpush2.bf16.msra.mxu0 %v15839_v2 }
  0xaa   :  { %v548_v0 = vld [vmem:[#allocation4 + $0xe80] sm:$0xff]  ;;  %v15832_v4 = vcombine.high %v420_v62, %v424_v63  ;;  %12673 = vmatprep.subr.bf16.mxu1 %v15968_v61  ;;  %v15831_v10 = vcombine.low %v420_v62, %v424_v63 }
  0xab   :  { %v552_v1 = vld [vmem:[#allocation4 + $0xea0] sm:$0xff]  ;;  %12674 = vmatpush2.bf16.msra.mxu1 %v15967_v3 }
  0xac   :  { %v15960_v5 = vcombine.high %v548_v0, %v552_v1  ;;  %v412_v6 = vld [vmem:[#allocation4 + $0xa40] sm:$0xff]  ;;  %12634 = vmatprep.subr.bf16.mxu0 %v15832_v4  ;;  %v15959_v11 = vcombine.low %v548_v0, %v552_v1 }
  0xad   :  { %v416_v7 = vld [vmem:[#allocation4 + $0xa60] sm:$0xff]  ;;  %12635 = vmatpush2.bf16.msra.mxu0 %v15831_v10 }
  0xae   :  { %v540_v8 = vld [vmem:[#allocation4 + $0xe40] sm:$0xff]  ;;  %v15824_v12 = vcombine.high %v412_v6, %v416_v7  ;;  %12675 = vmatprep.subr.bf16.mxu1 %v15960_v5  ;;  %v15823_v21 = vcombine.low %v412_v6, %v416_v7 }
  0xaf   :  { %v544_v9 = vld [vmem:[#allocation4 + $0xe60] sm:$0xff]  ;;  %12676 = vmatpush2.bf16.msra.mxu1 %v15959_v11 }
  0xb0   :  { %v15952_v13 = vcombine.high %v540_v8, %v544_v9  ;;  %v404_v14 = vld [vmem:[#allocation4 + $0xa00] sm:$0xff]  ;;  %12636 = vmatprep.subr.bf16.mxu0 %v15824_v12  ;;  %v15951_v23 = vcombine.low %v540_v8, %v544_v9 }
  0xb1   :  { %v408_v15 = vld [vmem:[#allocation4 + $0xa20] sm:$0xff]  ;;  %12637 = vmatpush2.bf16.msra.mxu0 %v15823_v21 }
  0xb2   :  { %v532_v17 = vld [vmem:[#allocation4 + $0xe00] sm:$0xff]  ;;  %v15816_v24 = vcombine.high %v404_v14, %v408_v15  ;;  %12677 = vmatprep.subr.bf16.mxu1 %v15952_v13  ;;  %v15815_v30 = vcombine.low %v404_v14, %v408_v15 }
  0xb3   :  { %v536_v18 = vld [vmem:[#allocation4 + $0xe20] sm:$0xff]  ;;  %12678 = vmatpush2.bf16.msra.mxu1 %v15951_v23 }
  0xb4   :  { %v15944_v25 = vcombine.high %v532_v17, %v536_v18  ;;  %v652_v53 = vld [vmem:[#allocation4 + $0x11c0] sm:$0xff]  ;;  %12638 = vmatprep.subr.bf16.mxu0 %v15816_v24  ;;  %v15943_v31 = vcombine.low %v532_v17, %v536_v18 }
  0xb5   :  { %v656_v26 = vld [vmem:[#allocation4 + $0x11e0] sm:$0xff]  ;;  %12639 = vmatpush2.bf16.msra.mxu0 %v15815_v30 }
  0xb6   :  { %v780_v28 = vld [vmem:[#allocation4 + $0x15c0] sm:$0xff]  ;;  %v16064_v32 = vcombine.high %v652_v53, %v656_v26  ;;  %12679 = vmatprep.subr.bf16.mxu1 %v15944_v25  ;;  %v16063_v41 = vcombine.low %v652_v53, %v656_v26 }
  0xb7   :  { %v784_v54 = vld [vmem:[#allocation4 + $0x15e0] sm:$0xff]  ;;  %12680 = vmatpush2.bf16.msra.mxu1 %v15943_v31 }
  0xb8   :  { %v16192_v33 = vcombine.high %v780_v28, %v784_v54  ;;  %v644_v34 = vld [vmem:[#allocation4 + $0x1180] sm:$0xff]  ;;  %12690 = vmatprep.subr.bf16.mxu0 %v16064_v32  ;;  %v16191_v43 = vcombine.low %v780_v28, %v784_v54  ;;  %12641 = vmatmul.mubr.bf16.vlgmr.msra.gmra.mxu0 %v17757_v36 }
  0xb9   :  { %v648_v35 = vld [vmem:[#allocation4 + $0x11a0] sm:$0xff]  ;;  %12691 = vmatpush1.bf16.msra.mxu0 %v16063_v41 }
  0xba   :  { %v772_v37 = vld [vmem:[#allocation4 + $0x1580] sm:$0xff]  ;;  %v16056_v44 = vcombine.high %v644_v34, %v648_v35  ;;  %12731 = vmatprep.subr.bf16.mxu1 %v16192_v33  ;;  %12682 = vmatmul.mubr.bf16.vlgmr.msra.gmra.mxu1 %v17763_v40  ;;  %v16055_v50 = vcombine.low %v644_v34, %v648_v35 }
  0xbb   :  { %v776_v38 = vld [vmem:[#allocation4 + $0x15a0] sm:$0xff]  ;;  %12732 = vmatpush1.bf16.msra.mxu1 %v16191_v43  ;;  %12763 = vmatprep.mubr.bf16.mxu1 %v17774_v49 }
  0xbc   :  { %v17759_v39 = vld [vmem:[#allocation2 + $0x20] sm:$0xff]  ;;  %v16184_v45 = vcombine.high %v772_v37, %v776_v38  ;;  %12692 = vmatprep.subr.bf16.mxu0 %v16056_v44  ;;  %v16183_v51 = vcombine.low %v772_v37, %v776_v38 }
  0xbd   :  { %v636_v19 = vld [vmem:[#allocation4 + $0x1140] sm:$0xff]  ;;  %v17769_v47 = vcombine.high %v17759_v39, %v17759_v39  ;;  %12693 = vmatpush1.bf16.msra.mxu0 %v16055_v50 }
  0xbe   :  { %v640_v46 = vld [vmem:[#allocation4 + $0x1160] sm:$0xff]  ;;  %12733 = vmatprep.subr.bf16.mxu1 %v16184_v45 }
  0xbf   :  { %v764_v48 = vld [vmem:[#allocation4 + $0x1540] sm:$0xff]  ;;  %v16048_v52 = vcombine.high %v636_v19, %v640_v46  ;;  %12722 = vmatprep.mubr.bf16.mxu0 %v17769_v47  ;;  %v16047_v62 = vcombine.low %v636_v19, %v640_v46  ;;  %12734 = vmatpush1.bf16.msra.mxu1 %v16183_v51 }
  0xc0   :  { %v768_v22 = vld [vmem:[#allocation4 + $0x1560] sm:$0xff] }
  0xc1   :  { %v16176_v55 = vcombine.high %v764_v48, %v768_v22  ;;  %v628_v56 = vld [vmem:[#allocation4 + $0x1100] sm:$0xff]  ;;  %12694 = vmatprep.subr.bf16.mxu0 %v16048_v52  ;;  %v16175_v63 = vcombine.low %v764_v48, %v768_v22 }
  0xc2   :  { %v632_v57 = vld [vmem:[#allocation4 + $0x1120] sm:$0xff]  ;;  %12695 = vmatpush1.bf16.msra.mxu0 %v16047_v62 }
  0xc3   :  { %v756_v60 = vld [vmem:[#allocation4 + $0x1500] sm:$0xff]  ;;  %v16040_v0 = vcombine.high %v628_v56, %v632_v57  ;;  %12735 = vmatprep.subr.bf16.mxu1 %v16176_v55  ;;  %v16039_v6 = vcombine.low %v628_v56, %v632_v57 }
  0xc4   :  { %v760_v61 = vld [vmem:[#allocation4 + $0x1520] sm:$0xff]  ;;  %12736 = vmatpush1.bf16.msra.mxu1 %v16175_v63 }
  0xc5   :  { %v16168_v1 = vcombine.high %v756_v60, %v760_v61  ;;  %v620_v2 = vld [vmem:[#allocation4 + $0x10c0] sm:$0xff]  ;;  %12696 = vmatprep.subr.bf16.mxu0 %v16040_v0  ;;  %v16167_v7 = vcombine.low %v756_v60, %v760_v61 }
  0xc6   :  { %v624_v3 = vld [vmem:[#allocation4 + $0x10e0] sm:$0xff]  ;;  %12697 = vmatpush1.bf16.msra.mxu0 %v16039_v6 }
  0xc7   :  { %v748_v4 = vld [vmem:[#allocation4 + $0x14c0] sm:$0xff]  ;;  %v16032_v8 = vcombine.high %v620_v2, %v624_v3  ;;  %12737 = vmatprep.subr.bf16.mxu1 %v16168_v1  ;;  %v16031_v14 = vcombine.low %v620_v2, %v624_v3 }
  0xc8   :  { %v752_v5 = vld [vmem:[#allocation4 + $0x14e0] sm:$0xff]  ;;  %12738 = vmatpush1.bf16.msra.mxu1 %v16167_v7 }
  0xc9   :  { %v16160_v9 = vcombine.high %v748_v4, %v752_v5  ;;  %v612_v10 = vld [vmem:[#allocation4 + $0x1080] sm:$0xff]  ;;  %12698 = vmatprep.subr.bf16.mxu0 %v16032_v8  ;;  %v16159_v15 = vcombine.low %v748_v4, %v752_v5 }
  0xca   :  { %v616_v11 = vld [vmem:[#allocation4 + $0x10a0] sm:$0xff]  ;;  %12699 = vmatpush1.bf16.msra.mxu0 %v16031_v14 }
  0xcb   :  { %v740_v12 = vld [vmem:[#allocation4 + $0x1480] sm:$0xff]  ;;  %v16024_v17 = vcombine.high %v612_v10, %v616_v11  ;;  %12739 = vmatprep.subr.bf16.mxu1 %v16160_v9  ;;  %v16023_v53 = vcombine.low %v612_v10, %v616_v11 }
  0xcc   :  { %v744_v13 = vld [vmem:[#allocation4 + $0x14a0] sm:$0xff]  ;;  %12740 = vmatpush1.bf16.msra.mxu1 %v16159_v15 }
  0xcd   :  { %v16152_v18 = vcombine.high %v740_v12, %v744_v13  ;;  %v604_v21 = vld [vmem:[#allocation4 + $0x1040] sm:$0xff]  ;;  %12700 = vmatprep.subr.bf16.mxu0 %v16024_v17  ;;  %v16151_v26 = vcombine.low %v740_v12, %v744_v13 }
  0xce   :  { %v608_v23 = vld [vmem:[#allocation4 + $0x1060] sm:$0xff]  ;;  %12701 = vmatpush1.bf16.msra.mxu0 %v16023_v53 }
  0xcf   :  { %v732_v24 = vld [vmem:[#allocation4 + $0x1440] sm:$0xff]  ;;  %v16016_v28 = vcombine.high %v604_v21, %v608_v23  ;;  %12741 = vmatprep.subr.bf16.mxu1 %v16152_v18  ;;  %v16015_v34 = vcombine.low %v604_v21, %v608_v23 }
  0xd0   :  { %v736_v25 = vld [vmem:[#allocation4 + $0x1460] sm:$0xff]  ;;  %12742 = vmatpush1.bf16.msra.mxu1 %v16151_v26 }
  0xd1   :  { %v16144_v54 = vcombine.high %v732_v24, %v736_v25  ;;  %v596_v30 = vld [vmem:[#allocation4 + $0x1000] sm:$0xff]  ;;  %12702 = vmatprep.subr.bf16.mxu0 %v16016_v28  ;;  %v16143_v35 = vcombine.low %v732_v24, %v736_v25 }
  0xd2   :  { %v600_v31 = vld [vmem:[#allocation4 + $0x1020] sm:$0xff]  ;;  %12703 = vmatpush1.bf16.msra.mxu0 %v16015_v34 }
  0xd3   :  { %v724_v32 = vld [vmem:[#allocation4 + $0x1400] sm:$0xff]  ;;  %v16008_v37 = vcombine.high %v596_v30, %v600_v31  ;;  %12743 = vmatprep.subr.bf16.mxu1 %v16144_v54  ;;  %v16007_v19 = vcombine.low %v596_v30, %v600_v31 }
  0xd4   :  { %v728_v33 = vld [vmem:[#allocation4 + $0x1420] sm:$0xff]  ;;  %12744 = vmatpush1.bf16.msra.mxu1 %v16143_v35 }
  0xd5   :  { %v16136_v38 = vcombine.high %v724_v32, %v728_v33  ;;  %v716_v41 = vld [vmem:[#allocation4 + $0x13c0] sm:$0xff]  ;;  %12704 = vmatprep.subr.bf16.mxu0 %v16008_v37  ;;  %v16135_v46 = vcombine.low %v724_v32, %v728_v33 }
  0xd6   :  { %v720_v43 = vld [vmem:[#allocation4 + $0x13e0] sm:$0xff]  ;;  %12705 = vmatpush1.bf16.msra.mxu0 %v16007_v19 }
  0xd7   :  { %v844_v44 = vld [vmem:[#allocation4 + $0x17c0] sm:$0xff]  ;;  %v16128_v48 = vcombine.high %v716_v41, %v720_v43  ;;  %12745 = vmatprep.subr.bf16.mxu1 %v16136_v38  ;;  %v16127_v56 = vcombine.low %v716_v41, %v720_v43 }
  0xd8   :  { %v848_v45 = vld [vmem:[#allocation4 + $0x17e0] sm:$0xff]  ;;  %12746 = vmatpush1.bf16.msra.mxu1 %v16135_v46 }
  0xd9   :  { %v16256_v22 = vcombine.high %v844_v44, %v848_v45  ;;  %v708_v50 = vld [vmem:[#allocation4 + $0x1380] sm:$0xff]  ;;  %12706 = vmatprep.subr.bf16.mxu0 %v16128_v48  ;;  %v16255_v57 = vcombine.low %v844_v44, %v848_v45 }
  0xda   :  { %v712_v51 = vld [vmem:[#allocation4 + $0x13a0] sm:$0xff]  ;;  %12707 = vmatpush2.bf16.msra.mxu0 %v16127_v56 }
  0xdb   :  { %v836_v52 = vld [vmem:[#allocation4 + $0x1780] sm:$0xff]  ;;  %v16120_v60 = vcombine.high %v708_v50, %v712_v51  ;;  %12747 = vmatprep.subr.bf16.mxu1 %v16256_v22  ;;  %v16119_v2 = vcombine.low %v708_v50, %v712_v51 }
  0xdc   :  { %v840_v55 = vld [vmem:[#allocation4 + $0x17a0] sm:$0xff]  ;;  %12748 = vmatpush2.bf16.msra.mxu1 %v16255_v57 }
  0xdd   :  { %v16248_v61 = vcombine.high %v836_v52, %v840_v55  ;;  %v700_v62 = vld [vmem:[#allocation4 + $0x1340] sm:$0xff]  ;;  %12708 = vmatprep.subr.bf16.mxu0 %v16120_v60  ;;  %v16247_v3 = vcombine.low %v836_v52, %v840_v55 }
  0xde   :  { %v704_v63 = vld [vmem:[#allocation4 + $0x1360] sm:$0xff]  ;;  %12709 = vmatpush2.bf16.msra.mxu0 %v16119_v2 }
  0xdf   :  { %v828_v0 = vld [vmem:[#allocation4 + $0x1740] sm:$0xff]  ;;  %v16112_v4 = vcombine.high %v700_v62, %v704_v63  ;;  %12749 = vmatprep.subr.bf16.mxu1 %v16248_v61  ;;  %v16111_v10 = vcombine.low %v700_v62, %v704_v63 }
  0xe0   :  { %v832_v1 = vld [vmem:[#allocation4 + $0x1760] sm:$0xff]  ;;  %12750 = vmatpush2.bf16.msra.mxu1 %v16247_v3 }
  0xe1   :  { %v16240_v5 = vcombine.high %v828_v0, %v832_v1  ;;  %v692_v6 = vld [vmem:[#allocation4 + $0x1300] sm:$0xff]  ;;  %12710 = vmatprep.subr.bf16.mxu0 %v16112_v4  ;;  %v16239_v11 = vcombine.low %v828_v0, %v832_v1  ;;  %v17781_v4 = vcombine.low %v17759_v39, %v17759_v39 }
  0xe2   :  { %v696_v7 = vld [vmem:[#allocation4 + $0x1320] sm:$0xff]  ;;  %12711 = vmatpush2.bf16.msra.mxu0 %v16111_v10  ;;  %v17789_v10 = vld [vmem:[#allocation2 + $0x38] sm:$0xff] }
  0xe3   :  { %v820_v8 = vld [vmem:[#allocation4 + $0x1700] sm:$0xff]  ;;  %v16104_v12 = vcombine.high %v692_v6, %v696_v7  ;;  %12751 = vmatprep.subr.bf16.mxu1 %v16240_v5  ;;  %v16103_v21 = vcombine.low %v692_v6, %v696_v7  ;;  %v17783_v7 = vld [vmem:[#allocation2 + $0x30] sm:$0xff] }
  0xe4   :  { %v824_v9 = vld [vmem:[#allocation4 + $0x1720] sm:$0xff]  ;;  %12752 = vmatpush2.bf16.msra.mxu1 %v16239_v11 }
  0xe5   :  { %v16232_v13 = vcombine.high %v820_v8, %v824_v9  ;;  %v684_v14 = vld [vmem:[#allocation4 + $0x12c0] sm:$0xff]  ;;  %12712 = vmatprep.subr.bf16.mxu0 %v16104_v12  ;;  %v16231_v23 = vcombine.low %v820_v8, %v824_v9  ;;  %v17787_v8 = vcombine.low %v17765_v42, %v17765_v42 }
  0xe6   :  { %v688_v15 = vld [vmem:[#allocation4 + $0x12e0] sm:$0xff]  ;;  %12713 = vmatpush2.bf16.msra.mxu0 %v16103_v21 }
  0xe7   :  { %v812_v17 = vld [vmem:[#allocation4 + $0x16c0] sm:$0xff]  ;;  %v16096_v24 = vcombine.high %v684_v14, %v688_v15  ;;  %12753 = vmatprep.subr.bf16.mxu1 %v16232_v13  ;;  %v16095_v30 = vcombine.low %v684_v14, %v688_v15  ;;  %v17793_v15 = vcombine.high %v17783_v7, %v17783_v7 }
  0xe8   :  { %v816_v18 = vld [vmem:[#allocation4 + $0x16e0] sm:$0xff]  ;;  %12754 = vmatpush2.bf16.msra.mxu1 %v16231_v23 }
  0xe9   :  { %v16224_v25 = vcombine.high %v812_v17, %v816_v18  ;;  %v676_v53 = vld [vmem:[#allocation4 + $0x1280] sm:$0xff]  ;;  %12714 = vmatprep.subr.bf16.mxu0 %v16096_v24  ;;  %v16223_v31 = vcombine.low %v812_v17, %v816_v18  ;;  %v17798_v18 = vcombine.high %v17789_v10, %v17789_v10 }
  0xea   :  { %v680_v26 = vld [vmem:[#allocation4 + $0x12a0] sm:$0xff]  ;;  %12715 = vmatpush2.bf16.msra.mxu0 %v16095_v30 }
  0xeb   :  { %v804_v28 = vld [vmem:[#allocation4 + $0x1680] sm:$0xff]  ;;  %v16088_v32 = vcombine.high %v676_v53, %v680_v26  ;;  %12755 = vmatprep.subr.bf16.mxu1 %v16224_v25  ;;  %v16087_v41 = vcombine.low %v676_v53, %v680_v26 }
  0xec   :  { %v808_v54 = vld [vmem:[#allocation4 + $0x16a0] sm:$0xff]  ;;  %12756 = vmatpush2.bf16.msra.mxu1 %v16223_v31 }
  0xed   :  { %v16216_v33 = vcombine.high %v804_v28, %v808_v54  ;;  %v668_v34 = vld [vmem:[#allocation4 + $0x1240] sm:$0xff]  ;;  %12716 = vmatprep.subr.bf16.mxu0 %v16088_v32  ;;  %v16215_v43 = vcombine.low %v804_v28, %v808_v54 }
  0xee   :  { %v672_v35 = vld [vmem:[#allocation4 + $0x1260] sm:$0xff]  ;;  %12717 = vmatpush2.bf16.msra.mxu0 %v16087_v41 }
  0xef   :  { %v796_v37 = vld [vmem:[#allocation4 + $0x1640] sm:$0xff]  ;;  %v16080_v44 = vcombine.high %v668_v34, %v672_v35  ;;  %12757 = vmatprep.subr.bf16.mxu1 %v16216_v33  ;;  %v16079_v50 = vcombine.low %v668_v34, %v672_v35 }
  0xf0   :  { %v800_v38 = vld [vmem:[#allocation4 + $0x1660] sm:$0xff]  ;;  %12758 = vmatpush2.bf16.msra.mxu1 %v16215_v43 }
  0xf1   :  { %v16208_v45 = vcombine.high %v796_v37, %v800_v38  ;;  %v660_v19 = vld [vmem:[#allocation4 + $0x1200] sm:$0xff]  ;;  %12718 = vmatprep.subr.bf16.mxu0 %v16080_v44  ;;  %v16207_v51 = vcombine.low %v796_v37, %v800_v38 }
  0xf2   :  { %v664_v46 = vld [vmem:[#allocation4 + $0x1220] sm:$0xff]  ;;  %12719 = vmatpush2.bf16.msra.mxu0 %v16079_v50 }
  0xf3   :  { %v788_v48 = vld [vmem:[#allocation4 + $0x1600] sm:$0xff]  ;;  %v16072_v52 = vcombine.high %v660_v19, %v664_v46  ;;  %12759 = vmatprep.subr.bf16.mxu1 %v16208_v45  ;;  %v16071_v62 = vcombine.low %v660_v19, %v664_v46 }
  0xf4   :  { %v792_v22 = vld [vmem:[#allocation4 + $0x1620] sm:$0xff]  ;;  %12760 = vmatpush2.bf16.msra.mxu1 %v16207_v51 }
  0xf5   :  { %v16200_v55 = vcombine.high %v788_v48, %v792_v22  ;;  %v908_v56 = vld [vmem:[#allocation4 + $0x19c0] sm:$0xff]  ;;  %12720 = vmatprep.subr.bf16.mxu0 %v16072_v52  ;;  %v16199_v63 = vcombine.low %v788_v48, %v792_v22 }
  0xf6   :  { %v912_v57 = vld [vmem:[#allocation4 + $0x19e0] sm:$0xff]  ;;  %12721 = vmatpush2.bf16.msra.mxu0 %v16071_v62 }
  0xf7   :  { %v1036_v60 = vld [vmem:[#allocation4 + $0x1dc0] sm:$0xff]  ;;  %v16320_v0 = vcombine.high %v908_v56, %v912_v57  ;;  %12761 = vmatprep.subr.bf16.mxu1 %v16200_v55  ;;  %v16319_v9 = vcombine.low %v908_v56, %v912_v57 }
  0xf8   :  { %v1040_v61 = vld [vmem:[#allocation4 + $0x1de0] sm:$0xff]  ;;  %12762 = vmatpush2.bf16.msra.mxu1 %v16199_v63 }
  0xf9   :  { %v16448_v1 = vcombine.high %v1036_v60, %v1040_v61  ;;  %v900_v2 = vld [vmem:[#allocation4 + $0x1980] sm:$0xff]  ;;  %12772 = vmatprep.subr.bf16.mxu0 %v16320_v0  ;;  %v16447_v11 = vcombine.low %v1036_v60, %v1040_v61  ;;  %12723 = vmatmul.mubr.bf16.vlgmr.msra.gmra.mxu0 %v17781_v4 }
  0xfa   :  { %v904_v3 = vld [vmem:[#allocation4 + $0x19a0] sm:$0xff]  ;;  %12773 = vmatpush1.bf16.msra.mxu0 %v16319_v9  ;;  %12804 = vmatprep.mubr.bf16.mxu0 %v17793_v15 }
  0xfb   :  { %v1028_v5 = vld [vmem:[#allocation4 + $0x1d80] sm:$0xff]  ;;  %v16312_v12 = vcombine.high %v900_v2, %v904_v3  ;;  %12813 = vmatprep.subr.bf16.mxu1 %v16448_v1  ;;  %12764 = vmatmul.mubr.bf16.vlgmr.msra.gmra.mxu1 %v17787_v8  ;;  %v16311_v21 = vcombine.low %v900_v2, %v904_v3 }
  0xfc   :  { %v1032_v6 = vld [vmem:[#allocation4 + $0x1da0] sm:$0xff]  ;;  %12814 = vmatpush1.bf16.msra.mxu1 %v16447_v11  ;;  %12845 = vmatprep.mubr.bf16.mxu1 %v17798_v18 }
  0xfd   :  { %v16440_v13 = vcombine.high %v1028_v5, %v1032_v6  ;;  %v892_v39 = vld [vmem:[#allocation4 + $0x1940] sm:$0xff]  ;;  %12774 = vmatprep.subr.bf16.mxu0 %v16312_v12  ;;  %v16439_v23 = vcombine.low %v1028_v5, %v1032_v6 }
  0xfe   :  { %v896_v14 = vld [vmem:[#allocation4 + $0x1960] sm:$0xff]  ;;  %12775 = vmatpush1.bf16.msra.mxu0 %v16311_v21 }
  0xff   :  { %v1020_v17 = vld [vmem:[#allocation4 + $0x1d40] sm:$0xff]  ;;  %v16304_v24 = vcombine.high %v892_v39, %v896_v14  ;;  %12815 = vmatprep.subr.bf16.mxu1 %v16440_v13  ;;  %v16303_v30 = vcombine.low %v892_v39, %v896_v14 }
 0x100   :  { %v1024_v42 = vld [vmem:[#allocation4 + $0x1d60] sm:$0xff]  ;;  %12816 = vmatpush1.bf16.msra.mxu1 %v16439_v23 }
 0x101   :  { %v16432_v25 = vcombine.high %v1020_v17, %v1024_v42  ;;  %v884_v53 = vld [vmem:[#allocation4 + $0x1900] sm:$0xff]  ;;  %12776 = vmatprep.subr.bf16.mxu0 %v16304_v24  ;;  %v16431_v31 = vcombine.low %v1020_v17, %v1024_v42 }
 0x102   :  { %v888_v26 = vld [vmem:[#allocation4 + $0x1920] sm:$0xff]  ;;  %12777 = vmatpush1.bf16.msra.mxu0 %v16303_v30 }
 0x103   :  { %v1012_v28 = vld [vmem:[#allocation4 + $0x1d00] sm:$0xff]  ;;  %v16296_v32 = vcombine.high %v884_v53, %v888_v26  ;;  %12817 = vmatprep.subr.bf16.mxu1 %v16432_v25  ;;  %v16295_v41 = vcombine.low %v884_v53, %v888_v26 }
 0x104   :  { %v1016_v54 = vld [vmem:[#allocation4 + $0x1d20] sm:$0xff]  ;;  %12818 = vmatpush1.bf16.msra.mxu1 %v16431_v31 }
 0x105   :  { %v16424_v33 = vcombine.high %v1012_v28, %v1016_v54  ;;  %v876_v34 = vld [vmem:[#allocation4 + $0x18c0] sm:$0xff]  ;;  %12778 = vmatprep.subr.bf16.mxu0 %v16296_v32  ;;  %v16423_v43 = vcombine.low %v1012_v28, %v1016_v54 }
 0x106   :  { %v880_v35 = vld [vmem:[#allocation4 + $0x18e0] sm:$0xff]  ;;  %12779 = vmatpush1.bf16.msra.mxu0 %v16295_v41 }
 0x107   :  { %v1004_v37 = vld [vmem:[#allocation4 + $0x1cc0] sm:$0xff]  ;;  %v16288_v44 = vcombine.high %v876_v34, %v880_v35  ;;  %12819 = vmatprep.subr.bf16.mxu1 %v16424_v33  ;;  %v16287_v50 = vcombine.low %v876_v34, %v880_v35 }
 0x108   :  { %v1008_v38 = vld [vmem:[#allocation4 + $0x1ce0] sm:$0xff]  ;;  %12820 = vmatpush1.bf16.msra.mxu1 %v16423_v43 }
 0x109   :  { %v16416_v45 = vcombine.high %v1004_v37, %v1008_v38  ;;  %v868_v19 = vld [vmem:[#allocation4 + $0x1880] sm:$0xff]  ;;  %12780 = vmatprep.subr.bf16.mxu0 %v16288_v44  ;;  %v16415_v51 = vcombine.low %v1004_v37, %v1008_v38 }
 0x10a   :  { %v872_v46 = vld [vmem:[#allocation4 + $0x18a0] sm:$0xff]  ;;  %12781 = vmatpush1.bf16.msra.mxu0 %v16287_v50 }
 0x10b   :  { %v996_v48 = vld [vmem:[#allocation4 + $0x1c80] sm:$0xff]  ;;  %v16280_v52 = vcombine.high %v868_v19, %v872_v46  ;;  %12821 = vmatprep.subr.bf16.mxu1 %v16416_v45  ;;  %v16279_v62 = vcombine.low %v868_v19, %v872_v46 }
 0x10c   :  { %v1000_v22 = vld [vmem:[#allocation4 + $0x1ca0] sm:$0xff]  ;;  %12822 = vmatpush1.bf16.msra.mxu1 %v16415_v51 }
 0x10d   :  { %v16408_v55 = vcombine.high %v996_v48, %v1000_v22  ;;  %v860_v56 = vld [vmem:[#allocation4 + $0x1840] sm:$0xff]  ;;  %12782 = vmatprep.subr.bf16.mxu0 %v16280_v52  ;;  %v16407_v63 = vcombine.low %v996_v48, %v1000_v22 }
 0x10e   :  { %v864_v57 = vld [vmem:[#allocation4 + $0x1860] sm:$0xff]  ;;  %12783 = vmatpush1.bf16.msra.mxu0 %v16279_v62 }
 0x10f   :  { %v988_v60 = vld [vmem:[#allocation4 + $0x1c40] sm:$0xff]  ;;  %v16272_v0 = vcombine.high %v860_v56, %v864_v57  ;;  %12823 = vmatprep.subr.bf16.mxu1 %v16408_v55  ;;  %v16271_v9 = vcombine.low %v860_v56, %v864_v57 }
 0x110   :  { %v992_v61 = vld [vmem:[#allocation4 + $0x1c60] sm:$0xff]  ;;  %12824 = vmatpush1.bf16.msra.mxu1 %v16407_v63 }
 0x111   :  { %v16400_v1 = vcombine.high %v988_v60, %v992_v61  ;;  %v852_v2 = vld [vmem:[#allocation4 + $0x1800] sm:$0xff]  ;;  %12784 = vmatprep.subr.bf16.mxu0 %v16272_v0  ;;  %v16399_v11 = vcombine.low %v988_v60, %v992_v61 }
 0x112   :  { %v856_v3 = vld [vmem:[#allocation4 + $0x1820] sm:$0xff]  ;;  %12785 = vmatpush1.bf16.msra.mxu0 %v16271_v9 }
 0x113   :  { %v980_v5 = vld [vmem:[#allocation4 + $0x1c00] sm:$0xff]  ;;  %v16264_v12 = vcombine.high %v852_v2, %v856_v3  ;;  %12825 = vmatprep.subr.bf16.mxu1 %v16400_v1  ;;  %v16263_v21 = vcombine.low %v852_v2, %v856_v3 }
 0x114   :  { %v984_v6 = vld [vmem:[#allocation4 + $0x1c20] sm:$0xff]  ;;  %12826 = vmatpush1.bf16.msra.mxu1 %v16399_v11 }
 0x115   :  { %v16392_v13 = vcombine.high %v980_v5, %v984_v6  ;;  %v972_v39 = vld [vmem:[#allocation4 + $0x1bc0] sm:$0xff]  ;;  %12786 = vmatprep.subr.bf16.mxu0 %v16264_v12  ;;  %v16391_v23 = vcombine.low %v980_v5, %v984_v6 }
 0x116   :  { %v976_v14 = vld [vmem:[#allocation4 + $0x1be0] sm:$0xff]  ;;  %12787 = vmatpush1.bf16.msra.mxu0 %v16263_v21 }
 0x117   :  { %v1100_v17 = vld [vmem:[#allocation4 + $0x1fc0] sm:$0xff]  ;;  %v16384_v24 = vcombine.high %v972_v39, %v976_v14  ;;  %12827 = vmatprep.subr.bf16.mxu1 %v16392_v13  ;;  %v16383_v30 = vcombine.low %v972_v39, %v976_v14 }
 0x118   :  { %v1104_v42 = vld [vmem:[#allocation4 + $0x1fe0] sm:$0xff]  ;;  %12828 = vmatpush1.bf16.msra.mxu1 %v16391_v23  ;;  %v2134_v23 = vlaneseq }
 0x119   :  { %v16512_v25 = vcombine.high %v1100_v17, %v1104_v42  ;;  %v964_v53 = vld [vmem:[#allocation4 + $0x1b80] sm:$0xff]  ;;  %12788 = vmatprep.subr.bf16.mxu0 %v16384_v24  ;;  %v16511_v31 = vcombine.low %v1100_v17, %v1104_v42 }
 0x11a   :  { %v968_v26 = vld [vmem:[#allocation4 + $0x1ba0] sm:$0xff]  ;;  %12789 = vmatpush2.bf16.msra.mxu0 %v16383_v30 }
 0x11b   :  { %v1092_v28 = vld [vmem:[#allocation4 + $0x1f80] sm:$0xff]  ;;  %v16376_v32 = vcombine.high %v964_v53, %v968_v26  ;;  %12829 = vmatprep.subr.bf16.mxu1 %v16512_v25  ;;  %v16375_v41 = vcombine.low %v964_v53, %v968_v26 }
 0x11c   :  { %v1096_v54 = vld [vmem:[#allocation4 + $0x1fa0] sm:$0xff]  ;;  %12830 = vmatpush2.bf16.msra.mxu1 %v16511_v31 }
 0x11d   :  { %v16504_v33 = vcombine.high %v1092_v28, %v1096_v54  ;;  %v956_v34 = vld [vmem:[#allocation4 + $0x1b40] sm:$0xff]  ;;  %12790 = vmatprep.subr.bf16.mxu0 %v16376_v32  ;;  %v16503_v43 = vcombine.low %v1092_v28, %v1096_v54  ;;  %v17803_v32 = vshrl.u32 %v2134_v23, 7 }
 0x11e   :  { %v960_v35 = vld [vmem:[#allocation4 + $0x1b60] sm:$0xff]  ;;  %12791 = vmatpush2.bf16.msra.mxu0 %v16375_v41 }
 0x11f   :  { %v1084_v37 = vld [vmem:[#allocation4 + $0x1f40] sm:$0xff]  ;;  %v16368_v44 = vcombine.high %v956_v34, %v960_v35  ;;  %12831 = vmatprep.subr.bf16.mxu1 %v16504_v33  ;;  %v16367_v50 = vcombine.low %v956_v34, %v960_v35 }
 0x120   :  { %v1088_v38 = vld [vmem:[#allocation4 + $0x1f60] sm:$0xff]  ;;  %12832 = vmatpush2.bf16.msra.mxu1 %v16503_v43 }
 0x121   :  { %v16496_v45 = vcombine.high %v1084_v37, %v1088_v38  ;;  %v948_v19 = vld [vmem:[#allocation4 + $0x1b00] sm:$0xff]  ;;  %12792 = vmatprep.subr.bf16.mxu0 %v16368_v44  ;;  %v16495_v51 = vcombine.low %v1084_v37, %v1088_v38 }
 0x122   :  { %v952_v46 = vld [vmem:[#allocation4 + $0x1b20] sm:$0xff]  ;;  %12793 = vmatpush2.bf16.msra.mxu0 %v16367_v50  ;;  %v2140_v50 = vsub.s32 1, %v17803_v32 }
 0x123   :  { %v1076_v48 = vld [vmem:[#allocation4 + $0x1f00] sm:$0xff]  ;;  %v16360_v52 = vcombine.high %v948_v19, %v952_v46  ;;  %12833 = vmatprep.subr.bf16.mxu1 %v16496_v45  ;;  %v16359_v62 = vcombine.low %v948_v19, %v952_v46  ;;  %v2136_v45 = vsub.s32 0, %v17803_v32 }
 0x124   :  { %v1080_v22 = vld [vmem:[#allocation4 + $0x1f20] sm:$0xff]  ;;  %12834 = vmatpush2.bf16.msra.mxu1 %v16495_v51 }
 0x125   :  { %v16488_v55 = vcombine.high %v1076_v48, %v1080_v22  ;;  %v940_v56 = vld [vmem:[#allocation4 + $0x1ac0] sm:$0xff]  ;;  %12794 = vmatprep.subr.bf16.mxu0 %v16360_v52  ;;  %v16487_v63 = vcombine.low %v1076_v48, %v1080_v22 }
 0x126   :  { %v944_v57 = vld [vmem:[#allocation4 + $0x1ae0] sm:$0xff]  ;;  %12795 = vmatpush2.bf16.msra.mxu0 %v16359_v62  ;;  %v17815_v62 = vcombine.low %v17789_v10, %v17789_v10 }
 0x127   :  { %v1068_v60 = vld [vmem:[#allocation4 + $0x1ec0] sm:$0xff]  ;;  %v16352_v0 = vcombine.high %v940_v56, %v944_v57  ;;  %12835 = vmatprep.subr.bf16.mxu1 %v16488_v55  ;;  %v16351_v9 = vcombine.low %v940_v56, %v944_v57  ;;  %v17809_v55 = vcombine.low %v17783_v7, %v17783_v7 }
 0x128   :  { %v1072_v61 = vld [vmem:[#allocation4 + $0x1ee0] sm:$0xff]  ;;  %12836 = vmatpush2.bf16.msra.mxu1 %v16487_v63 }
 0x129   :  { %v16480_v1 = vcombine.high %v1068_v60, %v1072_v61  ;;  %v932_v2 = vld [vmem:[#allocation4 + $0x1a80] sm:$0xff]  ;;  %12796 = vmatprep.subr.bf16.mxu0 %v16352_v0  ;;  %v16479_v11 = vcombine.low %v1068_v60, %v1072_v61  ;;  %v17817_v0 = vld [vmem:[#allocation2 + $0x48] sm:$0xff] }
 0x12a   :  { %v936_v3 = vld [vmem:[#allocation4 + $0x1aa0] sm:$0xff]  ;;  %12797 = vmatpush2.bf16.msra.mxu0 %v16351_v9 }
 0x12b   :  { %v1060_v5 = vld [vmem:[#allocation4 + $0x1e80] sm:$0xff]  ;;  %v16344_v12 = vcombine.high %v932_v2, %v936_v3  ;;  %12837 = vmatprep.subr.bf16.mxu1 %v16480_v1  ;;  %v16343_v21 = vcombine.low %v932_v2, %v936_v3 }
 0x12c   :  { %v1064_v6 = vld [vmem:[#allocation4 + $0x1ea0] sm:$0xff]  ;;  %12838 = vmatpush2.bf16.msra.mxu1 %v16479_v11 }
 0x12d   :  { %v16472_v13 = vcombine.high %v1060_v5, %v1064_v6  ;;  %v924_v39 = vld [vmem:[#allocation4 + $0x1a40] sm:$0xff]  ;;  %12798 = vmatprep.subr.bf16.mxu0 %v16344_v12  ;;  %v16471_v24 = vcombine.low %v1060_v5, %v1064_v6 }
 0x12e   :  { %v928_v14 = vld [vmem:[#allocation4 + $0x1a60] sm:$0xff]  ;;  %12799 = vmatpush2.bf16.msra.mxu0 %v16343_v21 }
 0x12f   :  { %v1052_v17 = vld [vmem:[#allocation4 + $0x1e40] sm:$0xff]  ;;  %v16336_v25 = vcombine.high %v924_v39, %v928_v14  ;;  %12839 = vmatprep.subr.bf16.mxu1 %v16472_v13  ;;  %v16335_v31 = vcombine.low %v924_v39, %v928_v14  ;;  %v17826_v13 = vcombine.high %v17817_v0, %v17817_v0 }
 0x130   :  { %v1056_v42 = vld [vmem:[#allocation4 + $0x1e60] sm:$0xff]  ;;  %12840 = vmatpush2.bf16.msra.mxu1 %v16471_v24 }
 0x131   :  { %v16464_v53 = vcombine.high %v1052_v17, %v1056_v42  ;;  %v916_v26 = vld [vmem:[#allocation4 + $0x1a00] sm:$0xff]  ;;  %12800 = vmatprep.subr.bf16.mxu0 %v16336_v25  ;;  %v16463_v33 = vcombine.low %v1052_v17, %v1056_v42 }
 0x132   :  { %v920_v28 = vld [vmem:[#allocation4 + $0x1a20] sm:$0xff]  ;;  %12801 = vmatpush2.bf16.msra.mxu0 %v16335_v31 }
 0x133   :  { %v1044_v54 = vld [vmem:[#allocation4 + $0x1e00] sm:$0xff]  ;;  %v16328_v34 = vcombine.high %v916_v26, %v920_v28  ;;  %12841 = vmatprep.subr.bf16.mxu1 %v16464_v53  ;;  %v16327_v44 = vcombine.low %v916_v26, %v920_v28 }
 0x134   :  { %v1048_v30 = vld [vmem:[#allocation4 + $0x1e20] sm:$0xff]  ;;  %12842 = vmatpush2.bf16.msra.mxu1 %v16463_v33 }
 0x135   :  { %v16456_v35 = vcombine.high %v1044_v54, %v1048_v30  ;;  %v1164_v37 = vld [vmem:[#allocation4 + $0x21c0] sm:$0xff]  ;;  %12802 = vmatprep.subr.bf16.mxu0 %v16328_v34  ;;  %v16455_v19 = vcombine.low %v1044_v54, %v1048_v30 }
 0x136   :  { %v1168_v38 = vld [vmem:[#allocation4 + $0x21e0] sm:$0xff]  ;;  %12803 = vmatpush2.bf16.msra.mxu0 %v16327_v44 }
 0x137   :  { %v1292_v41 = vld [vmem:[#allocation4 + $0x25c0] sm:$0xff]  ;;  %v16576_v48 = vcombine.high %v1164_v37, %v1168_v38  ;;  %12843 = vmatprep.subr.bf16.mxu1 %v16456_v35  ;;  %v16575_v63 = vcombine.low %v1164_v37, %v1168_v38 }
 0x138   :  { %v1296_v43 = vld [vmem:[#allocation4 + $0x25e0] sm:$0xff]  ;;  %12844 = vmatpush2.bf16.msra.mxu1 %v16455_v19  ;;  %v12560_v11 = vpop.f32.mrf.mxu0 }
 0x139   :  { %v2132_v46 = vld [vmem:[#allocation6] sm:$0xff]  ;;  %v16704_v22 = vcombine.high %v1292_v41, %v1296_v43  ;;  %12854 = vmatprep.subr.bf16.mxu0 %v16576_v48  ;;  %v16703_v1 = vcombine.low %v1292_v41, %v1296_v43  ;;  %12805 = vmatmul.mubr.bf16.vlgmr.msra.gmra.mxu0 %v17809_v55 }
 0x13a   :  { %v1156_v51 = vld [vmem:[#allocation4 + $0x2180] sm:$0xff]  ;;  %v2137_v61 = vrot.slane %v2132_v46, %v2136_v45  ;;  %v2141_v7 = vrot.slane %v2132_v46, %v2140_v50  ;;  %v12601_v14 = vpop.f32.mrf.mxu1  ;;  %12855 = vmatpush1.bf16.msra.mxu0 %v16575_v63  ;;  %v12562_v42 = vpop.f32.mrf.mxu0 }
 0x13b   :  { %v1160_v52 = vld [vmem:[#allocation4 + $0x21a0] sm:$0xff]  ;;  %12895 = vmatprep.subr.bf16.mxu1 %v16704_v22  ;;  %12846 = vmatmul.mubr.bf16.vlgmr.msra.gmra.mxu1 %v17815_v62 }
 0x13c   :  { %v1284_v56 = vld [vmem:[#allocation4 + $0x2580] sm:$0xff]  ;;  %v16568_v2 = vcombine.high %v1156_v51, %v1160_v52  ;;  %v12561_v39 = vadd.f32 %v12560_v11, %v2137_v61  ;;  %v16567_v17 = vcombine.low %v1156_v51, %v1160_v52  ;;  %12896 = vmatpush1.bf16.msra.mxu1 %v16703_v1  ;;  %v12563_v25 = vadd.f32 %v12562_v42, %v2141_v7  ;;  %v12603_v53 = vpop.f32.mrf.mxu1  ;;  %v12564_v30 = vpop.f32.mrf.mxu0 }
 0x13d   :  { %v1288_v57 = vld [vmem:[#allocation4 + $0x25a0] sm:$0xff]  ;;  %12927 = vmatprep.mubr.bf16.mxu1 %v17826_v13 }
 0x13e   :  { %v17811_v60 = vld [vmem:[#allocation2 + $0x40] sm:$0xff]  ;;  %v16696_v3 = vcombine.high %v1284_v56, %v1288_v57  ;;  %12856 = vmatprep.subr.bf16.mxu0 %v16568_v2  ;;  %v16695_v21 = vcombine.low %v1284_v56, %v1288_v57  ;;  %v17829_v24 = vadd.f32 %v12601_v14, %v12561_v39  ;;  %v17833_v34 = vadd.f32 %v12603_v53, %v12563_v25  ;;  %v12605_v35 = vpop.f32.mrf.mxu1  ;;  %v12565_v38 = vpop.f32.mrf.mxu0 }
 0x13f   :  { %v1148_v5 = vld [vmem:[#allocation4 + $0x2140] sm:$0xff]  ;;  %v17821_v9 = vcombine.high %v17811_v60, %v17811_v60  ;;  %12857 = vmatpush1.bf16.msra.mxu0 %v16567_v17 }
 0x140   :  { %v1152_v6 = vld [vmem:[#allocation4 + $0x2160] sm:$0xff]  ;;  %12897 = vmatprep.subr.bf16.mxu1 %v16696_v3  ;;  %v12606_v44 = vpop.f32.mrf.mxu1 }
 0x141   :  { %v1276_v10 = vld [vmem:[#allocation4 + $0x2540] sm:$0xff]  ;;  %v16560_v23 = vcombine.high %v1148_v5, %v1152_v6  ;;  %12886 = vmatprep.mubr.bf16.mxu0 %v17821_v9  ;;  %v16559_v37 = vcombine.low %v1148_v5, %v1152_v6  ;;  %12898 = vmatpush1.bf16.msra.mxu1 %v16695_v21 }
 0x142   :  { %v1280_v12 = vld [vmem:[#allocation4 + $0x2560] sm:$0xff] }
 0x143   :  { %v16688_v26 = vcombine.high %v1276_v10, %v1280_v12  ;;  %v1140_v28 = vld [vmem:[#allocation4 + $0x2100] sm:$0xff]  ;;  %12858 = vmatprep.subr.bf16.mxu0 %v16560_v23  ;;  %v16687_v41 = vcombine.low %v1276_v10, %v1280_v12 }
 0x144   :  { %v1144_v54 = vld [vmem:[#allocation4 + $0x2120] sm:$0xff]  ;;  %12859 = vmatpush1.bf16.msra.mxu0 %v16559_v37 }
 0x145   :  { %v1268_v31 = vld [vmem:[#allocation4 + $0x2500] sm:$0xff]  ;;  %v16552_v43 = vcombine.high %v1140_v28, %v1144_v54  ;;  %12899 = vmatprep.subr.bf16.mxu1 %v16688_v26  ;;  %v16551_v50 = vcombine.low %v1140_v28, %v1144_v54 }
 0x146   :  { %v1272_v33 = vld [vmem:[#allocation4 + $0x2520] sm:$0xff]  ;;  %12900 = vmatpush1.bf16.msra.mxu1 %v16687_v41 }
 0x147   :  { %v16680_v45 = vcombine.high %v1268_v31, %v1272_v33  ;;  %v1132_v19 = vld [vmem:[#allocation4 + $0x20c0] sm:$0xff]  ;;  %12860 = vmatprep.subr.bf16.mxu0 %v16552_v43  ;;  %v16679_v51 = vcombine.low %v1268_v31, %v1272_v33 }
 0x148   :  { %v1136_v46 = vld [vmem:[#allocation4 + $0x20e0] sm:$0xff]  ;;  %12861 = vmatpush1.bf16.msra.mxu0 %v16551_v50 }
 0x149   :  { %v1260_v48 = vld [vmem:[#allocation4 + $0x24c0] sm:$0xff]  ;;  %v16544_v52 = vcombine.high %v1132_v19, %v1136_v46  ;;  %12901 = vmatprep.subr.bf16.mxu1 %v16680_v45  ;;  %v16543_v2 = vcombine.low %v1132_v19, %v1136_v46 }
 0x14a   :  { %v1264_v22 = vld [vmem:[#allocation4 + $0x24e0] sm:$0xff]  ;;  %12902 = vmatpush1.bf16.msra.mxu1 %v16679_v51 }
 0x14b   :  { %v16672_v56 = vcombine.high %v1260_v48, %v1264_v22  ;;  %v1124_v57 = vld [vmem:[#allocation4 + $0x2080] sm:$0xff]  ;;  %12862 = vmatprep.subr.bf16.mxu0 %v16544_v52  ;;  %v16671_v7 = vcombine.low %v1260_v48, %v1264_v22 }
 0x14c   :  { %v1128_v61 = vld [vmem:[#allocation4 + $0x20a0] sm:$0xff]  ;;  %12863 = vmatpush1.bf16.msra.mxu0 %v16543_v2 }
 0x14d   :  { %v1252_v63 = vld [vmem:[#allocation4 + $0x2480] sm:$0xff]  ;;  %v16536_v3 = vcombine.high %v1124_v57, %v1128_v61  ;;  %12903 = vmatprep.subr.bf16.mxu1 %v16672_v56  ;;  %v16535_v39 = vcombine.low %v1124_v57, %v1128_v61 }
 0x14e   :  { %v1256_v1 = vld [vmem:[#allocation4 + $0x24a0] sm:$0xff]  ;;  %12904 = vmatpush1.bf16.msra.mxu1 %v16671_v7 }
 0x14f   :  { %v16664_v5 = vcombine.high %v1252_v63, %v1256_v1  ;;  %v1116_v6 = vld [vmem:[#allocation4 + $0x2040] sm:$0xff]  ;;  %12864 = vmatprep.subr.bf16.mxu0 %v16536_v3  ;;  %v16663_v14 = vcombine.low %v1252_v63, %v1256_v1 }
 0x150   :  { %v1120_v11 = vld [vmem:[#allocation4 + $0x2060] sm:$0xff]  ;;  %12865 = vmatpush1.bf16.msra.mxu0 %v16535_v39 }
 0x151   :  { %v1244_v10 = vld [vmem:[#allocation4 + $0x2440] sm:$0xff]  ;;  %v16528_v17 = vcombine.high %v1116_v6, %v1120_v11  ;;  %12905 = vmatprep.subr.bf16.mxu1 %v16664_v5  ;;  %v16527_v26 = vcombine.low %v1116_v6, %v1120_v11 }
 0x152   :  { %v1248_v12 = vld [vmem:[#allocation4 + $0x2460] sm:$0xff]  ;;  %12906 = vmatpush1.bf16.msra.mxu1 %v16663_v14 }
 0x153   :  { %v16656_v42 = vcombine.high %v1244_v10, %v1248_v12  ;;  %v1108_v21 = vld [vmem:[#allocation4 + $0x2000] sm:$0xff]  ;;  %12866 = vmatprep.subr.bf16.mxu0 %v16528_v17  ;;  %v16655_v28 = vcombine.low %v1244_v10, %v1248_v12 }
 0x154   :  { %v1112_v23 = vld [vmem:[#allocation4 + $0x2020] sm:$0xff]  ;;  %12867 = vmatpush1.bf16.msra.mxu0 %v16527_v26 }
 0x155   :  { %v1236_v25 = vld [vmem:[#allocation4 + $0x2400] sm:$0xff]  ;;  %v16520_v54 = vcombine.high %v1108_v21, %v1112_v23  ;;  %12907 = vmatprep.subr.bf16.mxu1 %v16656_v42  ;;  %v16519_v38 = vcombine.low %v1108_v21, %v1112_v23 }
 0x156   :  { %v1240_v53 = vld [vmem:[#allocation4 + $0x2420] sm:$0xff]  ;;  %12908 = vmatpush1.bf16.msra.mxu1 %v16655_v28 }
 0x157   :  { %v16648_v30 = vcombine.high %v1236_v25, %v1240_v53  ;;  %v1228_v31 = vld [vmem:[#allocation4 + $0x23c0] sm:$0xff]  ;;  %12868 = vmatprep.subr.bf16.mxu0 %v16520_v54  ;;  %v16647_v41 = vcombine.low %v1236_v25, %v1240_v53 }
 0x158   :  { %v1232_v33 = vld [vmem:[#allocation4 + $0x23e0] sm:$0xff]  ;;  %12869 = vmatpush1.bf16.msra.mxu0 %v16519_v38 }
 0x159   :  { %v1356_v35 = vld [vmem:[#allocation4 + $0x27c0] sm:$0xff]  ;;  %v16640_v43 = vcombine.high %v1228_v31, %v1232_v33  ;;  %12909 = vmatprep.subr.bf16.mxu1 %v16648_v30  ;;  %v16639_v22 = vcombine.low %v1228_v31, %v1232_v33 }
 0x15a   :  { %v1360_v37 = vld [vmem:[#allocation4 + $0x27e0] sm:$0xff]  ;;  %12910 = vmatpush1.bf16.msra.mxu1 %v16647_v41 }
 0x15b   :  { %v16768_v44 = vcombine.high %v1356_v35, %v1360_v37  ;;  %v1220_v45 = vld [vmem:[#allocation4 + $0x2380] sm:$0xff]  ;;  %12870 = vmatprep.subr.bf16.mxu0 %v16640_v43  ;;  %v16767_v50 = vcombine.low %v1356_v35, %v1360_v37 }
 0x15c   :  { %v1224_v19 = vld [vmem:[#allocation4 + $0x23a0] sm:$0xff]  ;;  %12871 = vmatpush2.bf16.msra.mxu0 %v16639_v22 }
 0x15d   :  { %v1348_v46 = vld [vmem:[#allocation4 + $0x2780] sm:$0xff]  ;;  %v16632_v51 = vcombine.high %v1220_v45, %v1224_v19  ;;  %12911 = vmatprep.subr.bf16.mxu1 %v16768_v44  ;;  %v16631_v1 = vcombine.low %v1220_v45, %v1224_v19 }
 0x15e   :  { %v1352_v48 = vld [vmem:[#allocation4 + $0x27a0] sm:$0xff]  ;;  %12912 = vmatpush2.bf16.msra.mxu1 %v16767_v50 }
 0x15f   :  { %v16760_v52 = vcombine.high %v1348_v46, %v1352_v48  ;;  %v1212_v56 = vld [vmem:[#allocation4 + $0x2340] sm:$0xff]  ;;  %12872 = vmatprep.subr.bf16.mxu0 %v16632_v51  ;;  %v16759_v2 = vcombine.low %v1348_v46, %v1352_v48 }
 0x160   :  { %v1216_v57 = vld [vmem:[#allocation4 + $0x2360] sm:$0xff]  ;;  %12873 = vmatpush2.bf16.msra.mxu0 %v16631_v1 }
 0x161   :  { %v1340_v61 = vld [vmem:[#allocation4 + $0x2740] sm:$0xff]  ;;  %v16624_v7 = vcombine.high %v1212_v56, %v1216_v57  ;;  %12913 = vmatprep.subr.bf16.mxu1 %v16760_v52  ;;  %v16623_v12 = vcombine.low %v1212_v56, %v1216_v57 }
 0x162   :  { %v1344_v63 = vld [vmem:[#allocation4 + $0x2760] sm:$0xff]  ;;  %12914 = vmatpush2.bf16.msra.mxu1 %v16759_v2 }
 0x163   :  { %v16752_v3 = vcombine.high %v1340_v61, %v1344_v63  ;;  %v1204_v5 = vld [vmem:[#allocation4 + $0x2300] sm:$0xff]  ;;  %12874 = vmatprep.subr.bf16.mxu0 %v16624_v7  ;;  %v16751_v39 = vcombine.low %v1340_v61, %v1344_v63 }
 0x164   :  { %v1208_v6 = vld [vmem:[#allocation4 + $0x2320] sm:$0xff]  ;;  %12875 = vmatpush2.bf16.msra.mxu0 %v16623_v12 }
 0x165   :  { %v1332_v11 = vld [vmem:[#allocation4 + $0x2700] sm:$0xff]  ;;  %v16616_v14 = vcombine.high %v1204_v5, %v1208_v6  ;;  %12915 = vmatprep.subr.bf16.mxu1 %v16752_v3  ;;  %v16615_v53 = vcombine.low %v1204_v5, %v1208_v6 }
 0x166   :  { %v1336_v10 = vld [vmem:[#allocation4 + $0x2720] sm:$0xff]  ;;  %12916 = vmatpush2.bf16.msra.mxu1 %v16751_v39 }
 0x167   :  { %v16744_v17 = vcombine.high %v1332_v11, %v1336_v10  ;;  %v1196_v42 = vld [vmem:[#allocation4 + $0x22c0] sm:$0xff]  ;;  %12876 = vmatprep.subr.bf16.mxu0 %v16616_v14  ;;  %v16743_v26 = vcombine.low %v1332_v11, %v1336_v10 }
 0x168   :  { %v1200_v21 = vld [vmem:[#allocation4 + $0x22e0] sm:$0xff]  ;;  %12877 = vmatpush2.bf16.msra.mxu0 %v16615_v53  ;;  %v17839_v53 = vld [vmem:[#allocation2 + $0x50] sm:$0xff] }
 0x169   :  { %v1324_v23 = vld [vmem:[#allocation4 + $0x26c0] sm:$0xff]  ;;  %v16608_v28 = vcombine.high %v1196_v42, %v1200_v21  ;;  %12917 = vmatprep.subr.bf16.mxu1 %v16744_v17  ;;  %v16607_v37 = vcombine.low %v1196_v42, %v1200_v21  ;;  %v17837_v21 = vcombine.low %v17811_v60, %v17811_v60 }
 0x16a   :  { %v1328_v25 = vld [vmem:[#allocation4 + $0x26e0] sm:$0xff]  ;;  %12918 = vmatpush2.bf16.msra.mxu1 %v16743_v26  ;;  %v17843_v26 = vcombine.low %v17817_v0, %v17817_v0 }
 0x16b   :  { %v16736_v54 = vcombine.high %v1324_v23, %v1328_v25  ;;  %v1188_v30 = vld [vmem:[#allocation4 + $0x2280] sm:$0xff]  ;;  %12878 = vmatprep.subr.bf16.mxu0 %v16608_v28  ;;  %v16735_v38 = vcombine.low %v1324_v23, %v1328_v25 }
 0x16c   :  { %v1192_v31 = vld [vmem:[#allocation4 + $0x22a0] sm:$0xff]  ;;  %12879 = vmatpush2.bf16.msra.mxu0 %v16607_v37  ;;  %v17849_v37 = vcombine.high %v17839_v53, %v17839_v53 }
 0x16d   :  { %v1316_v33 = vld [vmem:[#allocation4 + $0x2680] sm:$0xff]  ;;  %v16600_v41 = vcombine.high %v1188_v30, %v1192_v31  ;;  %12919 = vmatprep.subr.bf16.mxu1 %v16736_v54  ;;  %v16599_v48 = vcombine.low %v1188_v30, %v1192_v31  ;;  %v17845_v54 = vld [vmem:[#allocation2 + $0x58] sm:$0xff] }
 0x16e   :  { %v1320_v35 = vld [vmem:[#allocation4 + $0x26a0] sm:$0xff]  ;;  %12920 = vmatpush2.bf16.msra.mxu1 %v16735_v38 }
 0x16f   :  { %v16728_v43 = vcombine.high %v1316_v33, %v1320_v35  ;;  %v1180_v44 = vld [vmem:[#allocation4 + $0x2240] sm:$0xff]  ;;  %12880 = vmatprep.subr.bf16.mxu0 %v16600_v41  ;;  %v16727_v22 = vcombine.low %v1316_v33, %v1320_v35 }
 0x170   :  { %v1184_v45 = vld [vmem:[#allocation4 + $0x2260] sm:$0xff]  ;;  %12881 = vmatpush2.bf16.msra.mxu0 %v16599_v48 }
 0x171   :  { %v1308_v19 = vld [vmem:[#allocation4 + $0x2640] sm:$0xff]  ;;  %v16592_v50 = vcombine.high %v1180_v44, %v1184_v45  ;;  %12921 = vmatprep.subr.bf16.mxu1 %v16728_v43  ;;  %v16591_v63 = vcombine.low %v1180_v44, %v1184_v45  ;;  %v17854_v43 = vcombine.high %v17845_v54, %v17845_v54 }
 0x172   :  { %v1312_v46 = vld [vmem:[#allocation4 + $0x2660] sm:$0xff]  ;;  %12922 = vmatpush2.bf16.msra.mxu1 %v16727_v22 }
 0x173   :  { %v16720_v51 = vcombine.high %v1308_v19, %v1312_v46  ;;  %v1172_v52 = vld [vmem:[#allocation4 + $0x2200] sm:$0xff]  ;;  %12882 = vmatprep.subr.bf16.mxu0 %v16592_v50  ;;  %v16719_v1 = vcombine.low %v1308_v19, %v1312_v46 }
 0x174   :  { %v1176_v56 = vld [vmem:[#allocation4 + $0x2220] sm:$0xff]  ;;  %12883 = vmatpush2.bf16.msra.mxu0 %v16591_v63 }
 0x175   :  { %v1300_v57 = vld [vmem:[#allocation4 + $0x2600] sm:$0xff]  ;;  %v16584_v2 = vcombine.high %v1172_v52, %v1176_v56  ;;  %12923 = vmatprep.subr.bf16.mxu1 %v16720_v51  ;;  %v16583_v10 = vcombine.low %v1172_v52, %v1176_v56 }
 0x176   :  { %v1304_v61 = vld [vmem:[#allocation4 + $0x2620] sm:$0xff]  ;;  %12924 = vmatpush2.bf16.msra.mxu1 %v16719_v1 }
 0x177   :  { %v16712_v7 = vcombine.high %v1300_v57, %v1304_v61  ;;  %v1420_v3 = vld [vmem:[#allocation4 + $0x29c0] sm:$0xff]  ;;  %12884 = vmatprep.subr.bf16.mxu0 %v16584_v2  ;;  %v16711_v12 = vcombine.low %v1300_v57, %v1304_v61 }
 0x178   :  { %v1424_v5 = vld [vmem:[#allocation4 + $0x29e0] sm:$0xff]  ;;  %12885 = vmatpush2.bf16.msra.mxu0 %v16583_v10  ;;  %v12642_v38 = vpop.f32.mrf.mxu0 }
 0x179   :  { %v1548_v6 = vld [vmem:[#allocation4 + $0x2dc0] sm:$0xff]  ;;  %v16832_v39 = vcombine.high %v1420_v3, %v1424_v5  ;;  %12925 = vmatprep.subr.bf16.mxu1 %v16712_v7  ;;  %v16831_v28 = vcombine.low %v1420_v3, %v1424_v5  ;;  %v12643_v44 = vadd.f32 %v12642_v38, %v17829_v24 }
 0x17a   :  { %v1552_v11 = vld [vmem:[#allocation4 + $0x2de0] sm:$0xff]  ;;  %12926 = vmatpush2.bf16.msra.mxu1 %v16711_v12  ;;  %v12683_v45 = vpop.f32.mrf.mxu1  ;;  %v12644_v46 = vpop.f32.mrf.mxu0 }
 0x17b   :  { %v16960_v14 = vcombine.high %v1548_v6, %v1552_v11  ;;  %v1412_v17 = vld [vmem:[#allocation4 + $0x2980] sm:$0xff]  ;;  %12936 = vmatprep.subr.bf16.mxu0 %v16832_v39  ;;  %v16959_v30 = vcombine.low %v1548_v6, %v1552_v11  ;;  %12887 = vmatmul.mubr.bf16.vlgmr.msra.gmra.mxu0 %v17837_v21  ;;  %v17858_v50 = vadd.f32 %v12683_v45, %v12643_v44 }
 0x17c   :  { %v1416_v42 = vld [vmem:[#allocation4 + $0x29a0] sm:$0xff]  ;;  %12937 = vmatpush1.bf16.msra.mxu0 %v16831_v28  ;;  %v12645_v51 = vadd.f32 %v12644_v46, %v17833_v34  ;;  %v12685_v52 = vpop.f32.mrf.mxu1  ;;  %12968 = vmatprep.mubr.bf16.mxu0 %v17849_v37  ;;  %v12646_v24 = vpop.f32.mrf.mxu0 }
 0x17d   :  { %v1540_v23 = vld [vmem:[#allocation4 + $0x2d80] sm:$0xff]  ;;  %v16824_v31 = vcombine.high %v1412_v17, %v1416_v42  ;;  %12977 = vmatprep.subr.bf16.mxu1 %v16960_v14  ;;  %12928 = vmatmul.mubr.bf16.vlgmr.msra.gmra.mxu1 %v17843_v26  ;;  %v16823_v19 = vcombine.low %v1412_v17, %v1416_v42 }
 0x17e   :  { %v1544_v25 = vld [vmem:[#allocation4 + $0x2da0] sm:$0xff]  ;;  %12978 = vmatpush1.bf16.msra.mxu1 %v16959_v30  ;;  %13009 = vmatprep.mubr.bf16.mxu1 %v17854_v43  ;;  %v17863_v2 = vadd.f32 %v12685_v52, %v12645_v51  ;;  %v12687_v7 = vpop.f32.mrf.mxu1  ;;  %v12647_v5 = vpop.f32.mrf.mxu0 }
 0x17f   :  { %v16952_v33 = vcombine.high %v1540_v23, %v1544_v25  ;;  %v1404_v60 = vld [vmem:[#allocation4 + $0x2940] sm:$0xff]  ;;  %12938 = vmatprep.subr.bf16.mxu0 %v16824_v31  ;;  %v16951_v48 = vcombine.low %v1540_v23, %v1544_v25 }
 0x180   :  { %v1408_v35 = vld [vmem:[#allocation4 + $0x2960] sm:$0xff]  ;;  %12939 = vmatpush1.bf16.msra.mxu0 %v16823_v19  ;;  %v12688_v11 = vpop.f32.mrf.mxu1 }
 0x181   :  { %v1532_v0 = vld [vmem:[#allocation4 + $0x2d40] sm:$0xff]  ;;  %v16816_v22 = vcombine.high %v1404_v60, %v1408_v35  ;;  %12979 = vmatprep.subr.bf16.mxu1 %v16952_v33  ;;  %v16815_v3 = vcombine.low %v1404_v60, %v1408_v35 }
 0x182   :  { %v1536_v41 = vld [vmem:[#allocation4 + $0x2d60] sm:$0xff]  ;;  %12980 = vmatpush1.bf16.msra.mxu1 %v16951_v48 }
 0x183   :  { %v16944_v56 = vcombine.high %v1532_v0, %v1536_v41  ;;  %v1396_v57 = vld [vmem:[#allocation4 + $0x2900] sm:$0xff]  ;;  %12940 = vmatprep.subr.bf16.mxu0 %v16816_v22  ;;  %v16943_v34 = vcombine.low %v1532_v0, %v1536_v41 }
 0x184   :  { %v1400_v61 = vld [vmem:[#allocation4 + $0x2920] sm:$0xff]  ;;  %12941 = vmatpush1.bf16.msra.mxu0 %v16815_v3 }
 0x185   :  { %v1524_v63 = vld [vmem:[#allocation4 + $0x2d00] sm:$0xff]  ;;  %v16808_v6 = vcombine.high %v1396_v57, %v1400_v61  ;;  %12981 = vmatprep.subr.bf16.mxu1 %v16944_v56  ;;  %v16807_v42 = vcombine.low %v1396_v57, %v1400_v61 }
 0x186   :  { %v1528_v1 = vld [vmem:[#allocation4 + $0x2d20] sm:$0xff]  ;;  %12982 = vmatpush1.bf16.msra.mxu1 %v16943_v34 }
 0x187   :  { %v16936_v10 = vcombine.high %v1524_v63, %v1528_v1  ;;  %v1388_v12 = vld [vmem:[#allocation4 + $0x28c0] sm:$0xff]  ;;  %12942 = vmatprep.subr.bf16.mxu0 %v16808_v6  ;;  %v16935_v23 = vcombine.low %v1524_v63, %v1528_v1 }
 0x188   :  { %v1392_v39 = vld [vmem:[#allocation4 + $0x28e0] sm:$0xff]  ;;  %12943 = vmatpush1.bf16.msra.mxu0 %v16807_v42 }
 0x189   :  { %v1516_v14 = vld [vmem:[#allocation4 + $0x2cc0] sm:$0xff]  ;;  %v16800_v25 = vcombine.high %v1388_v12, %v1392_v39  ;;  %12983 = vmatprep.subr.bf16.mxu1 %v16936_v10  ;;  %v16799_v35 = vcombine.low %v1388_v12, %v1392_v39 }
 0x18a   :  { %v1520_v17 = vld [vmem:[#allocation4 + $0x2ce0] sm:$0xff]  ;;  %12984 = vmatpush1.bf16.msra.mxu1 %v16935_v23 }
 0x18b   :  { %v16928_v28 = vcombine.high %v1516_v14, %v1520_v17  ;;  %v1380_v30 = vld [vmem:[#allocation4 + $0x2880] sm:$0xff]  ;;  %12944 = vmatprep.subr.bf16.mxu0 %v16800_v25  ;;  %v16927_v38 = vcombine.low %v1516_v14, %v1520_v17 }
 0x18c   :  { %v1384_v31 = vld [vmem:[#allocation4 + $0x28a0] sm:$0xff]  ;;  %12945 = vmatpush1.bf16.msra.mxu0 %v16799_v35 }
 0x18d   :  { %v1508_v33 = vld [vmem:[#allocation4 + $0x2c80] sm:$0xff]  ;;  %v16792_v0 = vcombine.high %v1380_v30, %v1384_v31  ;;  %12985 = vmatprep.subr.bf16.mxu1 %v16928_v28  ;;  %v16791_v48 = vcombine.low %v1380_v30, %v1384_v31 }
 0x18e   :  { %v1512_v60 = vld [vmem:[#allocation4 + $0x2ca0] sm:$0xff]  ;;  %12986 = vmatpush1.bf16.msra.mxu1 %v16927_v38 }
 0x18f   :  { %v16920_v41 = vcombine.high %v1508_v33, %v1512_v60  ;;  %v1372_v44 = vld [vmem:[#allocation4 + $0x2840] sm:$0xff]  ;;  %12946 = vmatprep.subr.bf16.mxu0 %v16792_v0  ;;  %v16919_v22 = vcombine.low %v1508_v33, %v1512_v60 }
 0x190   :  { %v1376_v45 = vld [vmem:[#allocation4 + $0x2860] sm:$0xff]  ;;  %12947 = vmatpush1.bf16.msra.mxu0 %v16791_v48 }
 0x191   :  { %v1500_v19 = vld [vmem:[#allocation4 + $0x2c40] sm:$0xff]  ;;  %v16784_v51 = vcombine.high %v1372_v44, %v1376_v45  ;;  %12987 = vmatprep.subr.bf16.mxu1 %v16920_v41  ;;  %v16783_v63 = vcombine.low %v1372_v44, %v1376_v45 }
 0x192   :  { %v1504_v46 = vld [vmem:[#allocation4 + $0x2c60] sm:$0xff]  ;;  %12988 = vmatpush1.bf16.msra.mxu1 %v16919_v22 }
 0x193   :  { %v16912_v52 = vcombine.high %v1500_v19, %v1504_v46  ;;  %v1364_v56 = vld [vmem:[#allocation4 + $0x2800] sm:$0xff]  ;;  %12948 = vmatprep.subr.bf16.mxu0 %v16784_v51  ;;  %v16911_v1 = vcombine.low %v1500_v19, %v1504_v46 }
 0x194   :  { %v1368_v57 = vld [vmem:[#allocation4 + $0x2820] sm:$0xff]  ;;  %12949 = vmatpush1.bf16.msra.mxu0 %v16783_v63 }
 0x195   :  { %v1492_v61 = vld [vmem:[#allocation4 + $0x2c00] sm:$0xff]  ;;  %v16776_v7 = vcombine.high %v1364_v56, %v1368_v57  ;;  %12989 = vmatprep.subr.bf16.mxu1 %v16912_v52  ;;  %v16775_v10 = vcombine.low %v1364_v56, %v1368_v57 }
 0x196   :  { %v1496_v24 = vld [vmem:[#allocation4 + $0x2c20] sm:$0xff]  ;;  %12990 = vmatpush1.bf16.msra.mxu1 %v16911_v1 }
 0x197   :  { %v16904_v3 = vcombine.high %v1492_v61, %v1496_v24  ;;  %v1484_v5 = vld [vmem:[#allocation4 + $0x2bc0] sm:$0xff]  ;;  %12950 = vmatprep.subr.bf16.mxu0 %v16776_v7  ;;  %v16903_v12 = vcombine.low %v1492_v61, %v1496_v24 }
 0x198   :  { %v1488_v34 = vld [vmem:[#allocation4 + $0x2be0] sm:$0xff]  ;;  %12951 = vmatpush1.bf16.msra.mxu0 %v16775_v10 }
 0x199   :  { %v1612_v6 = vld [vmem:[#allocation4 + $0x2fc0] sm:$0xff]  ;;  %v16896_v39 = vcombine.high %v1484_v5, %v1488_v34  ;;  %12991 = vmatprep.subr.bf16.mxu1 %v16904_v3  ;;  %v16895_v28 = vcombine.low %v1484_v5, %v1488_v34 }
 0x19a   :  { %v1616_v11 = vld [vmem:[#allocation4 + $0x2fe0] sm:$0xff]  ;;  %12992 = vmatpush1.bf16.msra.mxu1 %v16903_v12 }
 0x19b   :  { %v17024_v14 = vcombine.high %v1612_v6, %v1616_v11  ;;  %v1476_v17 = vld [vmem:[#allocation4 + $0x2b80] sm:$0xff]  ;;  %12952 = vmatprep.subr.bf16.mxu0 %v16896_v39  ;;  %v17023_v30 = vcombine.low %v1612_v6, %v1616_v11 }
 0x19c   :  { %v1480_v42 = vld [vmem:[#allocation4 + $0x2ba0] sm:$0xff]  ;;  %12953 = vmatpush2.bf16.msra.mxu0 %v16895_v28 }
 0x19d   :  { %v1604_v23 = vld [vmem:[#allocation4 + $0x2f80] sm:$0xff]  ;;  %v16888_v31 = vcombine.high %v1476_v17, %v1480_v42  ;;  %12993 = vmatprep.subr.bf16.mxu1 %v17024_v14  ;;  %v16887_v41 = vcombine.low %v1476_v17, %v1480_v42 }
 0x19e   :  { %v1608_v25 = vld [vmem:[#allocation4 + $0x2fa0] sm:$0xff]  ;;  %12994 = vmatpush2.bf16.msra.mxu1 %v17023_v30 }
 0x19f   :  { %v17016_v33 = vcombine.high %v1604_v23, %v1608_v25  ;;  %v1468_v60 = vld [vmem:[#allocation4 + $0x2b40] sm:$0xff]  ;;  %12954 = vmatprep.subr.bf16.mxu0 %v16888_v31  ;;  %v17015_v44 = vcombine.low %v1604_v23, %v1608_v25 }
 0x1a0   :  { %v1472_v35 = vld [vmem:[#allocation4 + $0x2b60] sm:$0xff]  ;;  %12955 = vmatpush2.bf16.msra.mxu0 %v16887_v41 }
 0x1a1   :  { %v1596_v38 = vld [vmem:[#allocation4 + $0x2f40] sm:$0xff]  ;;  %v16880_v45 = vcombine.high %v1468_v60, %v1472_v35  ;;  %12995 = vmatprep.subr.bf16.mxu1 %v17016_v33  ;;  %v16879_v52 = vcombine.low %v1468_v60, %v1472_v35 }
 0x1a2   :  { %v1600_v0 = vld [vmem:[#allocation4 + $0x2f60] sm:$0xff]  ;;  %12996 = vmatpush2.bf16.msra.mxu1 %v17015_v44 }
 0x1a3   :  { %v17008_v19 = vcombine.high %v1596_v38, %v1600_v0  ;;  %v1460_v46 = vld [vmem:[#allocation4 + $0x2b00] sm:$0xff]  ;;  %12956 = vmatprep.subr.bf16.mxu0 %v16880_v45  ;;  %v17007_v56 = vcombine.low %v1596_v38, %v1600_v0 }
 0x1a4   :  { %v1464_v48 = vld [vmem:[#allocation4 + $0x2b20] sm:$0xff]  ;;  %12957 = vmatpush2.bf16.msra.mxu0 %v16879_v52 }
 0x1a5   :  { %v1588_v22 = vld [vmem:[#allocation4 + $0x2f00] sm:$0xff]  ;;  %v16872_v57 = vcombine.high %v1460_v46, %v1464_v48  ;;  %12997 = vmatprep.subr.bf16.mxu1 %v17008_v19  ;;  %v16871_v3 = vcombine.low %v1460_v46, %v1464_v48 }
 0x1a6   :  { %v1592_v51 = vld [vmem:[#allocation4 + $0x2f20] sm:$0xff]  ;;  %12998 = vmatpush2.bf16.msra.mxu1 %v17007_v56 }
 0x1a7   :  { %v17000_v61 = vcombine.high %v1588_v22, %v1592_v51  ;;  %v1452_v24 = vld [vmem:[#allocation4 + $0x2ac0] sm:$0xff]  ;;  %12958 = vmatprep.subr.bf16.mxu0 %v16872_v57  ;;  %v16999_v5 = vcombine.low %v1588_v22, %v1592_v51 }
 0x1a8   :  { %v1456_v63 = vld [vmem:[#allocation4 + $0x2ae0] sm:$0xff]  ;;  %12959 = vmatpush2.bf16.msra.mxu0 %v16871_v3 }
 0x1a9   :  { %v1580_v1 = vld [vmem:[#allocation4 + $0x2ec0] sm:$0xff]  ;;  %v16864_v34 = vcombine.high %v1452_v24, %v1456_v63  ;;  %12999 = vmatprep.subr.bf16.mxu1 %v17000_v61  ;;  %v16863_v14 = vcombine.low %v1452_v24, %v1456_v63 }
 0x1aa   :  { %v1584_v7 = vld [vmem:[#allocation4 + $0x2ee0] sm:$0xff]  ;;  %13000 = vmatpush2.bf16.msra.mxu1 %v16999_v5  ;;  %v17867_v5 = vcombine.low %v17839_v53, %v17839_v53 }
 0x1ab   :  { %v16992_v6 = vcombine.high %v1580_v1, %v1584_v7  ;;  %v1444_v11 = vld [vmem:[#allocation4 + $0x2a80] sm:$0xff]  ;;  %12960 = vmatprep.subr.bf16.mxu0 %v16864_v34  ;;  %v16991_v17 = vcombine.low %v1580_v1, %v1584_v7 }
 0x1ac   :  { %v1448_v10 = vld [vmem:[#allocation4 + $0x2aa0] sm:$0xff]  ;;  %12961 = vmatpush2.bf16.msra.mxu0 %v16863_v14 }
 0x1ad   :  { %v1572_v12 = vld [vmem:[#allocation4 + $0x2e80] sm:$0xff]  ;;  %v16856_v42 = vcombine.high %v1444_v11, %v1448_v10  ;;  %13001 = vmatprep.subr.bf16.mxu1 %v16992_v6  ;;  %v16855_v33 = vcombine.low %v1444_v11, %v1448_v10  ;;  %v17873_v10 = vcombine.low %v17845_v54, %v17845_v54 }
 0x1ae   :  { %v1576_v39 = vld [vmem:[#allocation4 + $0x2ea0] sm:$0xff]  ;;  %13002 = vmatpush2.bf16.msra.mxu1 %v16991_v17 }
 0x1af   :  { %v16984_v23 = vcombine.high %v1572_v12, %v1576_v39  ;;  %v1436_v25 = vld [vmem:[#allocation4 + $0x2a40] sm:$0xff]  ;;  %12962 = vmatprep.subr.bf16.mxu0 %v16856_v42  ;;  %v16983_v60 = vcombine.low %v1572_v12, %v1576_v39  ;;  %v17875_v39 = vld [vmem:[#allocation2 + $0x68] sm:$0xff] }
 0x1b0   :  { %v1440_v28 = vld [vmem:[#allocation4 + $0x2a60] sm:$0xff]  ;;  %12963 = vmatpush2.bf16.msra.mxu0 %v16855_v33 }
 0x1b1   :  { %v1564_v30 = vld [vmem:[#allocation4 + $0x2e40] sm:$0xff]  ;;  %v16848_v35 = vcombine.high %v1436_v25, %v1440_v28  ;;  %13003 = vmatprep.subr.bf16.mxu1 %v16984_v23  ;;  %v16847_v19 = vcombine.low %v1436_v25, %v1440_v28 }
 0x1b2   :  { %v1568_v31 = vld [vmem:[#allocation4 + $0x2e60] sm:$0xff]  ;;  %13004 = vmatpush2.bf16.msra.mxu1 %v16983_v60 }
 0x1b3   :  { %v16976_v38 = vcombine.high %v1564_v30, %v1568_v31  ;;  %v1428_v0 = vld [vmem:[#allocation4 + $0x2a00] sm:$0xff]  ;;  %12964 = vmatprep.subr.bf16.mxu0 %v16848_v35  ;;  %v16975_v46 = vcombine.low %v1564_v30, %v1568_v31  ;;  %v17884_v31 = vcombine.high %v17875_v39, %v17875_v39 }
 0x1b4   :  { %v1432_v41 = vld [vmem:[#allocation4 + $0x2a20] sm:$0xff]  ;;  %12965 = vmatpush2.bf16.msra.mxu0 %v16847_v19 }
 0x1b5   :  { %v1556_v44 = vld [vmem:[#allocation4 + $0x2e00] sm:$0xff]  ;;  %v16840_v48 = vcombine.high %v1428_v0, %v1432_v41  ;;  %13005 = vmatprep.subr.bf16.mxu1 %v16976_v38  ;;  %v16839_v61 = vcombine.low %v1428_v0, %v1432_v41 }
 0x1b6   :  { %v1560_v45 = vld [vmem:[#allocation4 + $0x2e20] sm:$0xff]  ;;  %13006 = vmatpush2.bf16.msra.mxu1 %v16975_v46 }
 0x1b7   :  { %v16968_v22 = vcombine.high %v1556_v44, %v1560_v45  ;;  %v1676_v51 = vld [vmem:[#allocation4 + $0x31c0] sm:$0xff]  ;;  %12966 = vmatprep.subr.bf16.mxu0 %v16840_v48  ;;  %v16967_v24 = vcombine.low %v1556_v44, %v1560_v45 }
 0x1b8   :  { %v1680_v52 = vld [vmem:[#allocation4 + $0x31e0] sm:$0xff]  ;;  %12967 = vmatpush2.bf16.msra.mxu0 %v16839_v61 }
 0x1b9   :  { %v1804_v56 = vld [vmem:[#allocation4 + $0x35c0] sm:$0xff]  ;;  %v17088_v63 = vcombine.high %v1676_v51, %v1680_v52  ;;  %13007 = vmatprep.subr.bf16.mxu1 %v16968_v22  ;;  %v17087_v12 = vcombine.low %v1676_v51, %v1680_v52  ;;  %v12724_v28 = vpop.f32.mrf.mxu0 }
 0x1ba   :  { %v1808_v57 = vld [vmem:[#allocation4 + $0x35e0] sm:$0xff]  ;;  %13008 = vmatpush2.bf16.msra.mxu1 %v16967_v24  ;;  %v12725_v33 = vadd.f32 %v12724_v28, %v17858_v50 }
 0x1bb   :  { %v17216_v1 = vcombine.high %v1804_v56, %v1808_v57  ;;  %v1668_v7 = vld [vmem:[#allocation4 + $0x3180] sm:$0xff]  ;;  %13018 = vmatprep.subr.bf16.mxu0 %v17088_v63  ;;  %v17215_v14 = vcombine.low %v1804_v56, %v1808_v57  ;;  %12969 = vmatmul.mubr.bf16.vlgmr.msra.gmra.mxu0 %v17867_v5  ;;  %v12765_v60 = vpop.f32.mrf.mxu1  ;;  %v12726_v38 = vpop.f32.mrf.mxu0 }
 0x1bc   :  { %v1672_v3 = vld [vmem:[#allocation4 + $0x31a0] sm:$0xff]  ;;  %13019 = vmatpush1.bf16.msra.mxu0 %v17087_v12  ;;  %v17888_v44 = vadd.f32 %v12765_v60, %v12725_v33  ;;  %v12727_v45 = vadd.f32 %v12726_v38, %v17863_v2 }
 0x1bd   :  { %v1796_v34 = vld [vmem:[#allocation4 + $0x3580] sm:$0xff]  ;;  %v17080_v17 = vcombine.high %v1668_v7, %v1672_v3  ;;  %13059 = vmatprep.subr.bf16.mxu1 %v17216_v1  ;;  %13010 = vmatmul.mubr.bf16.vlgmr.msra.gmra.mxu1 %v17873_v10  ;;  %v17079_v35 = vcombine.low %v1668_v7, %v1672_v3  ;;  %v12767_v19 = vpop.f32.mrf.mxu1  ;;  %v12728_v50 = vpop.f32.mrf.mxu0 }
 0x1be   :  { %v1800_v6 = vld [vmem:[#allocation4 + $0x35a0] sm:$0xff]  ;;  %13060 = vmatpush1.bf16.msra.mxu1 %v17215_v14  ;;  %13091 = vmatprep.mubr.bf16.mxu1 %v17884_v31  ;;  %v17893_v56 = vadd.f32 %v12767_v19, %v12727_v45 }
 0x1bf   :  { %v17869_v11 = vld [vmem:[#allocation2 + $0x60] sm:$0xff]  ;;  %v17208_v42 = vcombine.high %v1796_v34, %v1800_v6  ;;  %13020 = vmatprep.subr.bf16.mxu0 %v17080_v17  ;;  %v17207_v0 = vcombine.low %v1796_v34, %v1800_v6  ;;  %v12769_v57 = vpop.f32.mrf.mxu1  ;;  %v12729_v24 = vpop.f32.mrf.mxu0 }
 0x1c0   :  { %v1660_v53 = vld [vmem:[#allocation4 + $0x3140] sm:$0xff]  ;;  %v17879_v25 = vcombine.high %v17869_v11, %v17869_v11  ;;  %13021 = vmatpush1.bf16.msra.mxu0 %v17079_v35 }
 0x1c1   :  { %v1664_v23 = vld [vmem:[#allocation4 + $0x3160] sm:$0xff]  ;;  %13061 = vmatprep.subr.bf16.mxu1 %v17208_v42  ;;  %v12770_v1 = vpop.f32.mrf.mxu1 }
 0x1c2   :  { %v1788_v54 = vld [vmem:[#allocation4 + $0x3540] sm:$0xff]  ;;  %v17072_v41 = vcombine.high %v1660_v53, %v1664_v23  ;;  %13050 = vmatprep.mubr.bf16.mxu0 %v17879_v25  ;;  %v17071_v61 = vcombine.low %v1660_v53, %v1664_v23  ;;  %13062 = vmatpush1.bf16.msra.mxu1 %v17207_v0 }
 0x1c3   :  { %v1792_v30 = vld [vmem:[#allocation4 + $0x3560] sm:$0xff] }
 0x1c4   :  { %v17200_v46 = vcombine.high %v1788_v54, %v1792_v30  ;;  %v1652_v48 = vld [vmem:[#allocation4 + $0x3100] sm:$0xff]  ;;  %13022 = vmatprep.subr.bf16.mxu0 %v17072_v41  ;;  %v17199_v2 = vcombine.low %v1788_v54, %v1792_v30 }
 0x1c5   :  { %v1656_v22 = vld [vmem:[#allocation4 + $0x3120] sm:$0xff]  ;;  %13023 = vmatpush1.bf16.msra.mxu0 %v17071_v61 }
 0x1c6   :  { %v1780_v51 = vld [vmem:[#allocation4 + $0x3500] sm:$0xff]  ;;  %v17064_v63 = vcombine.high %v1652_v48, %v1656_v22  ;;  %13063 = vmatprep.subr.bf16.mxu1 %v17200_v46  ;;  %v17063_v14 = vcombine.low %v1652_v48, %v1656_v22 }
 0x1c7   :  { %v1784_v52 = vld [vmem:[#allocation4 + $0x3520] sm:$0xff]  ;;  %13064 = vmatpush1.bf16.msra.mxu1 %v17199_v2 }
 0x1c8   :  { %v17192_v7 = vcombine.high %v1780_v51, %v1784_v52  ;;  %v1644_v3 = vld [vmem:[#allocation4 + $0x30c0] sm:$0xff]  ;;  %13024 = vmatprep.subr.bf16.mxu0 %v17064_v63  ;;  %v17191_v17 = vcombine.low %v1780_v51, %v1784_v52 }
 0x1c9   :  { %v1648_v34 = vld [vmem:[#allocation4 + $0x30e0] sm:$0xff]  ;;  %13025 = vmatpush1.bf16.msra.mxu0 %v17063_v14 }
 0x1ca   :  { %v1772_v6 = vld [vmem:[#allocation4 + $0x34c0] sm:$0xff]  ;;  %v17056_v42 = vcombine.high %v1644_v3, %v1648_v34  ;;  %13065 = vmatprep.subr.bf16.mxu1 %v17192_v7  ;;  %v17055_v30 = vcombine.low %v1644_v3, %v1648_v34 }
 0x1cb   :  { %v1776_v12 = vld [vmem:[#allocation4 + $0x34e0] sm:$0xff]  ;;  %13066 = vmatpush1.bf16.msra.mxu1 %v17191_v17 }
 0x1cc   :  { %v17184_v53 = vcombine.high %v1772_v6, %v1776_v12  ;;  %v1636_v23 = vld [vmem:[#allocation4 + $0x3080] sm:$0xff]  ;;  %13026 = vmatprep.subr.bf16.mxu0 %v17056_v42  ;;  %v17183_v60 = vcombine.low %v1772_v6, %v1776_v12 }
 0x1cd   :  { %v1640_v28 = vld [vmem:[#allocation4 + $0x30a0] sm:$0xff]  ;;  %13027 = vmatpush1.bf16.msra.mxu0 %v17055_v30 }
 0x1ce   :  { %v1764_v33 = vld [vmem:[#allocation4 + $0x3480] sm:$0xff]  ;;  %v17048_v35 = vcombine.high %v1636_v23, %v1640_v28  ;;  %13067 = vmatprep.subr.bf16.mxu1 %v17184_v53  ;;  %v17047_v46 = vcombine.low %v1636_v23, %v1640_v28 }
 0x1cf   :  { %v1768_v54 = vld [vmem:[#allocation4 + $0x34a0] sm:$0xff]  ;;  %13068 = vmatpush1.bf16.msra.mxu1 %v17183_v60 }
 0x1d0   :  { %v17176_v38 = vcombine.high %v1764_v33, %v1768_v54  ;;  %v1628_v0 = vld [vmem:[#allocation4 + $0x3040] sm:$0xff]  ;;  %13028 = vmatprep.subr.bf16.mxu0 %v17048_v35  ;;  %v17175_v48 = vcombine.low %v1764_v33, %v1768_v54 }
 0x1d1   :  { %v1632_v41 = vld [vmem:[#allocation4 + $0x3060] sm:$0xff]  ;;  %13029 = vmatpush1.bf16.msra.mxu0 %v17047_v46 }
 0x1d2   :  { %v1756_v45 = vld [vmem:[#allocation4 + $0x3440] sm:$0xff]  ;;  %v17040_v22 = vcombine.high %v1628_v0, %v1632_v41  ;;  %13069 = vmatprep.subr.bf16.mxu1 %v17176_v38  ;;  %v17039_v24 = vcombine.low %v1628_v0, %v1632_v41 }
 0x1d3   :  { %v1760_v19 = vld [vmem:[#allocation4 + $0x3460] sm:$0xff]  ;;  %13070 = vmatpush1.bf16.msra.mxu1 %v17175_v48 }
 0x1d4   :  { %v17168_v50 = vcombine.high %v1756_v45, %v1760_v19  ;;  %v1620_v51 = vld [vmem:[#allocation4 + $0x3000] sm:$0xff]  ;;  %13030 = vmatprep.subr.bf16.mxu0 %v17040_v22  ;;  %v17167_v2 = vcombine.low %v1756_v45, %v1760_v19 }
 0x1d5   :  { %v1624_v52 = vld [vmem:[#allocation4 + $0x3020] sm:$0xff]  ;;  %13031 = vmatpush1.bf16.msra.mxu0 %v17039_v24 }
 0x1d6   :  { %v1748_v57 = vld [vmem:[#allocation4 + $0x3400] sm:$0xff]  ;;  %v17032_v63 = vcombine.high %v1620_v51, %v1624_v52  ;;  %13071 = vmatprep.subr.bf16.mxu1 %v17168_v50  ;;  %v17031_v12 = vcombine.low %v1620_v51, %v1624_v52 }
 0x1d7   :  { %v1752_v61 = vld [vmem:[#allocation4 + $0x3420] sm:$0xff]  ;;  %13072 = vmatpush1.bf16.msra.mxu1 %v17167_v2 }
 0x1d8   :  { %v17160_v1 = vcombine.high %v1748_v57, %v1752_v61  ;;  %v1740_v7 = vld [vmem:[#allocation4 + $0x33c0] sm:$0xff]  ;;  %13032 = vmatprep.subr.bf16.mxu0 %v17032_v63  ;;  %v17159_v14 = vcombine.low %v1748_v57, %v1752_v61 }
 0x1d9   :  { %v1744_v3 = vld [vmem:[#allocation4 + $0x33e0] sm:$0xff]  ;;  %13033 = vmatpush1.bf16.msra.mxu0 %v17031_v12 }
 0x1da   :  { %v1868_v34 = vld [vmem:[#allocation4 + $0x37c0] sm:$0xff]  ;;  %v17152_v17 = vcombine.high %v1740_v7, %v1744_v3  ;;  %13073 = vmatprep.subr.bf16.mxu1 %v17160_v1  ;;  %v17151_v54 = vcombine.low %v1740_v7, %v1744_v3 }
 0x1db   :  { %v1872_v6 = vld [vmem:[#allocation4 + $0x37e0] sm:$0xff]  ;;  %13074 = vmatpush1.bf16.msra.mxu1 %v17159_v14 }
 0x1dc   :  { %v17280_v42 = vcombine.high %v1868_v34, %v1872_v6  ;;  %v1732_v53 = vld [vmem:[#allocation4 + $0x3380] sm:$0xff]  ;;  %13034 = vmatprep.subr.bf16.mxu0 %v17152_v17  ;;  %v17279_v30 = vcombine.low %v1868_v34, %v1872_v6 }
 0x1dd   :  { %v1736_v23 = vld [vmem:[#allocation4 + $0x33a0] sm:$0xff]  ;;  %13035 = vmatpush2.bf16.msra.mxu0 %v17151_v54 }
 0x1de   :  { %v1860_v28 = vld [vmem:[#allocation4 + $0x3780] sm:$0xff]  ;;  %v17144_v60 = vcombine.high %v1732_v53, %v1736_v23  ;;  %13075 = vmatprep.subr.bf16.mxu1 %v17280_v42  ;;  %v17143_v19 = vcombine.low %v1732_v53, %v1736_v23 }
 0x1df   :  { %v1864_v33 = vld [vmem:[#allocation4 + $0x37a0] sm:$0xff]  ;;  %13076 = vmatpush2.bf16.msra.mxu1 %v17279_v30 }
 0x1e0   :  { %v17272_v35 = vcombine.high %v1860_v28, %v1864_v33  ;;  %v1724_v38 = vld [vmem:[#allocation4 + $0x3340] sm:$0xff]  ;;  %13036 = vmatprep.subr.bf16.mxu0 %v17144_v60  ;;  %v17271_v46 = vcombine.low %v1860_v28, %v1864_v33 }
 0x1e1   :  { %v1728_v0 = vld [vmem:[#allocation4 + $0x3360] sm:$0xff]  ;;  %13037 = vmatpush2.bf16.msra.mxu0 %v17143_v19 }
 0x1e2   :  { %v1852_v41 = vld [vmem:[#allocation4 + $0x3740] sm:$0xff]  ;;  %v17136_v48 = vcombine.high %v1724_v38, %v1728_v0  ;;  %13077 = vmatprep.subr.bf16.mxu1 %v17272_v35  ;;  %v17135_v61 = vcombine.low %v1724_v38, %v1728_v0 }
 0x1e3   :  { %v1856_v45 = vld [vmem:[#allocation4 + $0x3760] sm:$0xff]  ;;  %13078 = vmatpush2.bf16.msra.mxu1 %v17271_v46 }
 0x1e4   :  { %v17264_v22 = vcombine.high %v1852_v41, %v1856_v45  ;;  %v1716_v50 = vld [vmem:[#allocation4 + $0x3300] sm:$0xff]  ;;  %13038 = vmatprep.subr.bf16.mxu0 %v17136_v48  ;;  %v17263_v24 = vcombine.low %v1852_v41, %v1856_v45 }
 0x1e5   :  { %v1720_v51 = vld [vmem:[#allocation4 + $0x3320] sm:$0xff]  ;;  %13039 = vmatpush2.bf16.msra.mxu0 %v17135_v61 }
 0x1e6   :  { %v1844_v52 = vld [vmem:[#allocation4 + $0x3700] sm:$0xff]  ;;  %v17128_v2 = vcombine.high %v1716_v50, %v1720_v51  ;;  %13079 = vmatprep.subr.bf16.mxu1 %v17264_v22  ;;  %v17127_v6 = vcombine.low %v1716_v50, %v1720_v51 }
 0x1e7   :  { %v1848_v57 = vld [vmem:[#allocation4 + $0x3720] sm:$0xff]  ;;  %13080 = vmatpush2.bf16.msra.mxu1 %v17263_v24 }
 0x1e8   :  { %v17256_v63 = vcombine.high %v1844_v52, %v1848_v57  ;;  %v1708_v1 = vld [vmem:[#allocation4 + $0x32c0] sm:$0xff]  ;;  %13040 = vmatprep.subr.bf16.mxu0 %v17128_v2  ;;  %v17255_v12 = vcombine.low %v1844_v52, %v1848_v57 }
 0x1e9   :  { %v1712_v7 = vld [vmem:[#allocation4 + $0x32e0] sm:$0xff]  ;;  %13041 = vmatpush2.bf16.msra.mxu0 %v17127_v6 }
 0x1ea   :  { %v1836_v3 = vld [vmem:[#allocation4 + $0x36c0] sm:$0xff]  ;;  %v17120_v14 = vcombine.high %v1708_v1, %v1712_v7  ;;  %13081 = vmatprep.subr.bf16.mxu1 %v17256_v63  ;;  %v17119_v33 = vcombine.low %v1708_v1, %v1712_v7 }
 0x1eb   :  { %v1840_v34 = vld [vmem:[#allocation4 + $0x36e0] sm:$0xff]  ;;  %13082 = vmatpush2.bf16.msra.mxu1 %v17255_v12 }
 0x1ec   :  { %v17248_v17 = vcombine.high %v1836_v3, %v1840_v34  ;;  %v1700_v42 = vld [vmem:[#allocation4 + $0x3280] sm:$0xff]  ;;  %13042 = vmatprep.subr.bf16.mxu0 %v17120_v14  ;;  %v17247_v54 = vcombine.low %v1836_v3, %v1840_v34 }
 0x1ed   :  { %v1704_v53 = vld [vmem:[#allocation4 + $0x32a0] sm:$0xff]  ;;  %13043 = vmatpush2.bf16.msra.mxu0 %v17119_v33  ;;  %v17899_v33 = vld [vmem:[#allocation2 + $0x70] sm:$0xff] }
 0x1ee   :  { %v1828_v23 = vld [vmem:[#allocation4 + $0x3680] sm:$0xff]  ;;  %v17112_v30 = vcombine.high %v1700_v42, %v1704_v53  ;;  %13083 = vmatprep.subr.bf16.mxu1 %v17248_v17  ;;  %v17111_v45 = vcombine.low %v1700_v42, %v1704_v53  ;;  %v17897_v53 = vcombine.low %v17869_v11, %v17869_v11 }
 0x1ef   :  { %v1832_v28 = vld [vmem:[#allocation4 + $0x36a0] sm:$0xff]  ;;  %13084 = vmatpush2.bf16.msra.mxu1 %v17247_v54  ;;  %v17903_v54 = vcombine.low %v17875_v39, %v17875_v39 }
 0x1f0   :  { %v17240_v60 = vcombine.high %v1828_v23, %v1832_v28  ;;  %v1692_v35 = vld [vmem:[#allocation4 + $0x3240] sm:$0xff]  ;;  %13044 = vmatprep.subr.bf16.mxu0 %v17112_v30  ;;  %v17239_v19 = vcombine.low %v1828_v23, %v1832_v28 }
 0x1f1   :  { %v1696_v38 = vld [vmem:[#allocation4 + $0x3260] sm:$0xff]  ;;  %13045 = vmatpush2.bf16.msra.mxu0 %v17111_v45  ;;  %v17909_v45 = vcombine.high %v17899_v33, %v17899_v33 }
 0x1f2   :  { %v1820_v0 = vld [vmem:[#allocation4 + $0x3640] sm:$0xff]  ;;  %v17104_v46 = vcombine.high %v1692_v35, %v1696_v38  ;;  %13085 = vmatprep.subr.bf16.mxu1 %v17240_v60  ;;  %v17103_v57 = vcombine.low %v1692_v35, %v1696_v38  ;;  %v17905_v60 = vld [vmem:[#allocation2 + $0x78] sm:$0xff] }
 0x1f3   :  { %v1824_v41 = vld [vmem:[#allocation4 + $0x3660] sm:$0xff]  ;;  %13086 = vmatpush2.bf16.msra.mxu1 %v17239_v19 }
 0x1f4   :  { %v17232_v48 = vcombine.high %v1820_v0, %v1824_v41  ;;  %v1684_v22 = vld [vmem:[#allocation4 + $0x3200] sm:$0xff]  ;;  %13046 = vmatprep.subr.bf16.mxu0 %v17104_v46  ;;  %v17231_v61 = vcombine.low %v1820_v0, %v1824_v41 }
 0x1f5   :  { %v1688_v50 = vld [vmem:[#allocation4 + $0x3220] sm:$0xff]  ;;  %13047 = vmatpush2.bf16.msra.mxu0 %v17103_v57 }
 0x1f6   :  { %v1812_v51 = vld [vmem:[#allocation4 + $0x3600] sm:$0xff]  ;;  %v17096_v24 = vcombine.high %v1684_v22, %v1688_v50  ;;  %13087 = vmatprep.subr.bf16.mxu1 %v17232_v48  ;;  %v17095_v34 = vcombine.low %v1684_v22, %v1688_v50  ;;  %v17914_v48 = vcombine.high %v17905_v60, %v17905_v60 }
 0x1f7   :  { %v1816_v52 = vld [vmem:[#allocation4 + $0x3620] sm:$0xff]  ;;  %13088 = vmatpush2.bf16.msra.mxu1 %v17231_v61 }
 0x1f8   :  { %v17224_v2 = vcombine.high %v1812_v51, %v1816_v52  ;;  %v1932_v63 = vld [vmem:[#allocation4 + $0x39c0] sm:$0xff]  ;;  %13048 = vmatprep.subr.bf16.mxu0 %v17096_v24  ;;  %v17223_v6 = vcombine.low %v1812_v51, %v1816_v52 }
 0x1f9   :  { %v1936_v1 = vld [vmem:[#allocation4 + $0x39e0] sm:$0xff]  ;;  %13049 = vmatpush2.bf16.msra.mxu0 %v17095_v34  ;;  %v12806_v19 = vpop.f32.mrf.mxu0 }
 0x1fa   :  { %v2060_v7 = vld [vmem:[#allocation4 + $0x3dc0] sm:$0xff]  ;;  %v17344_v12 = vcombine.high %v1932_v63, %v1936_v1  ;;  %13089 = vmatprep.subr.bf16.mxu1 %v17224_v2  ;;  %v17343_v30 = vcombine.low %v1932_v63, %v1936_v1  ;;  %v12807_v22 = vadd.f32 %v12806_v19, %v17888_v44 }
 0x1fb   :  { %v2064_v3 = vld [vmem:[#allocation4 + $0x3de0] sm:$0xff]  ;;  %13090 = vmatpush2.bf16.msra.mxu1 %v17223_v6  ;;  %v12847_v50 = vpop.f32.mrf.mxu1  ;;  %v12808_v52 = vpop.f32.mrf.mxu0 }
 0x1fc   :  { %v17472_v14 = vcombine.high %v2060_v7, %v2064_v3  ;;  %v1924_v17 = vld [vmem:[#allocation4 + $0x3980] sm:$0xff]  ;;  %13100 = vmatprep.subr.bf16.mxu0 %v17344_v12  ;;  %v17471_v35 = vcombine.low %v2060_v7, %v2064_v3  ;;  %13051 = vmatmul.mubr.bf16.vlgmr.msra.gmra.mxu0 %v17897_v53  ;;  %v17918_v24 = vadd.f32 %v12847_v50, %v12807_v22 }
 0x1fd   :  { %v1928_v42 = vld [vmem:[#allocation4 + $0x39a0] sm:$0xff]  ;;  %13101 = vmatpush1.bf16.msra.mxu0 %v17343_v30  ;;  %v12809_v2 = vadd.f32 %v12808_v52, %v17893_v56  ;;  %v12849_v63 = vpop.f32.mrf.mxu1  ;;  %13132 = vmatprep.mubr.bf16.mxu0 %v17909_v45  ;;  %v12810_v44 = vpop.f32.mrf.mxu0 }
 0x1fe   :  { %v2052_v23 = vld [vmem:[#allocation4 + $0x3d80] sm:$0xff]  ;;  %v17336_v38 = vcombine.high %v1924_v17, %v1928_v42  ;;  %13141 = vmatprep.subr.bf16.mxu1 %v17472_v14  ;;  %13092 = vmatmul.mubr.bf16.vlgmr.msra.gmra.mxu1 %v17903_v54  ;;  %v17335_v51 = vcombine.low %v1924_v17, %v1928_v42 }
 0x1ff   :  { %v2056_v28 = vld [vmem:[#allocation4 + $0x3da0] sm:$0xff]  ;;  %13142 = vmatpush1.bf16.msra.mxu1 %v17471_v35  ;;  %13173 = vmatprep.mubr.bf16.mxu1 %v17914_v48  ;;  %v17923_v12 = vadd.f32 %v12849_v63, %v12809_v2  ;;  %v12851_v14 = vpop.f32.mrf.mxu1  ;;  %v12811_v42 = vpop.f32.mrf.mxu0 }
 0x200   :  { %v17464_v0 = vcombine.high %v2052_v23, %v2056_v28  ;;  %v1916_v11 = vld [vmem:[#allocation4 + $0x3940] sm:$0xff]  ;;  %13102 = vmatprep.subr.bf16.mxu0 %v17336_v38  ;;  %v17463_v57 = vcombine.low %v2052_v23, %v2056_v28 }
 0x201   :  { %v1920_v41 = vld [vmem:[#allocation4 + $0x3960] sm:$0xff]  ;;  %13103 = vmatpush1.bf16.msra.mxu0 %v17335_v51  ;;  %v12852_v28 = vpop.f32.mrf.mxu1 }
 0x202   :  { %v2044_v39 = vld [vmem:[#allocation4 + $0x3d40] sm:$0xff]  ;;  %v17328_v61 = vcombine.high %v1916_v11, %v1920_v41  ;;  %13143 = vmatprep.subr.bf16.mxu1 %v17464_v0  ;;  %v17327_v17 = vcombine.low %v1916_v11, %v1920_v41 }
 0x203   :  { %v2048_v46 = vld [vmem:[#allocation4 + $0x3d60] sm:$0xff]  ;;  %13144 = vmatpush1.bf16.msra.mxu1 %v17463_v57 }
 0x204   :  { %v17456_v1 = vcombine.high %v2044_v39, %v2048_v46  ;;  %v1908_v7 = vld [vmem:[#allocation4 + $0x3900] sm:$0xff]  ;;  %13104 = vmatprep.subr.bf16.mxu0 %v17328_v61  ;;  %v17455_v56 = vcombine.low %v2044_v39, %v2048_v46 }
 0x205   :  { %v1912_v3 = vld [vmem:[#allocation4 + $0x3920] sm:$0xff]  ;;  %13105 = vmatpush1.bf16.msra.mxu0 %v17327_v17 }
 0x206   :  { %v2036_v34 = vld [vmem:[#allocation4 + $0x3d00] sm:$0xff]  ;;  %v17320_v23 = vcombine.high %v1908_v7, %v1912_v3  ;;  %13145 = vmatprep.subr.bf16.mxu1 %v17456_v1  ;;  %v17319_v22 = vcombine.low %v1908_v7, %v1912_v3 }
 0x207   :  { %v2040_v6 = vld [vmem:[#allocation4 + $0x3d20] sm:$0xff]  ;;  %13146 = vmatpush1.bf16.msra.mxu1 %v17455_v56 }
 0x208   :  { %v17448_v30 = vcombine.high %v2036_v34, %v2040_v6  ;;  %v1900_v35 = vld [vmem:[#allocation4 + $0x38c0] sm:$0xff]  ;;  %13106 = vmatprep.subr.bf16.mxu0 %v17320_v23  ;;  %v17447_v50 = vcombine.low %v2036_v34, %v2040_v6 }
 0x209   :  { %v1904_v38 = vld [vmem:[#allocation4 + $0x38e0] sm:$0xff]  ;;  %13107 = vmatpush1.bf16.msra.mxu0 %v17319_v22 }
 0x20a   :  { %v2028_v0 = vld [vmem:[#allocation4 + $0x3cc0] sm:$0xff]  ;;  %v17312_v52 = vcombine.high %v1900_v35, %v1904_v38  ;;  %13147 = vmatprep.subr.bf16.mxu1 %v17448_v30  ;;  %v17311_v46 = vcombine.low %v1900_v35, %v1904_v38 }
 0x20b   :  { %v2032_v19 = vld [vmem:[#allocation4 + $0x3ce0] sm:$0xff]  ;;  %13148 = vmatpush1.bf16.msra.mxu1 %v17447_v50 }
 0x20c   :  { %v17440_v11 = vcombine.high %v2028_v0, %v2032_v19  ;;  %v1892_v41 = vld [vmem:[#allocation4 + $0x3880] sm:$0xff]  ;;  %13108 = vmatprep.subr.bf16.mxu0 %v17312_v52  ;;  %v17439_v61 = vcombine.low %v2028_v0, %v2032_v19 }
 0x20d   :  { %v1896_v51 = vld [vmem:[#allocation4 + $0x38a0] sm:$0xff]  ;;  %13109 = vmatpush1.bf16.msra.mxu0 %v17311_v46 }
 0x20e   :  { %v2020_v57 = vld [vmem:[#allocation4 + $0x3c80] sm:$0xff]  ;;  %v17304_v2 = vcombine.high %v1892_v41, %v1896_v51  ;;  %13149 = vmatprep.subr.bf16.mxu1 %v17440_v11  ;;  %v17303_v34 = vcombine.low %v1892_v41, %v1896_v51 }
 0x20f   :  { %v2024_v39 = vld [vmem:[#allocation4 + $0x3ca0] sm:$0xff]  ;;  %13150 = vmatpush1.bf16.msra.mxu1 %v17439_v61 }
 0x210   :  { %v17432_v63 = vcombine.high %v2020_v57, %v2024_v39  ;;  %v1884_v1 = vld [vmem:[#allocation4 + $0x3840] sm:$0xff]  ;;  %13110 = vmatprep.subr.bf16.mxu0 %v17304_v2  ;;  %v17431_v6 = vcombine.low %v2020_v57, %v2024_v39 }
 0x211   :  { %v1888_v7 = vld [vmem:[#allocation4 + $0x3860] sm:$0xff]  ;;  %13111 = vmatpush1.bf16.msra.mxu0 %v17303_v34 }
 0x212   :  { %v2012_v3 = vld [vmem:[#allocation4 + $0x3c40] sm:$0xff]  ;;  %v17296_v14 = vcombine.high %v1884_v1, %v1888_v7  ;;  %13151 = vmatprep.subr.bf16.mxu1 %v17432_v63  ;;  %v17295_v30 = vcombine.low %v1884_v1, %v1888_v7 }
 0x213   :  { %v2016_v44 = vld [vmem:[#allocation4 + $0x3c60] sm:$0xff]  ;;  %13152 = vmatpush1.bf16.msra.mxu1 %v17431_v6 }
 0x214   :  { %v17424_v17 = vcombine.high %v2012_v3, %v2016_v44  ;;  %v1876_v42 = vld [vmem:[#allocation4 + $0x3800] sm:$0xff]  ;;  %13112 = vmatprep.subr.bf16.mxu0 %v17296_v14  ;;  %v17423_v35 = vcombine.low %v2012_v3, %v2016_v44 }
 0x215   :  { %v1880_v56 = vld [vmem:[#allocation4 + $0x3820] sm:$0xff]  ;;  %13113 = vmatpush1.bf16.msra.mxu0 %v17295_v30 }
 0x216   :  { %v2004_v23 = vld [vmem:[#allocation4 + $0x3c00] sm:$0xff]  ;;  %v17288_v38 = vcombine.high %v1876_v42, %v1880_v56  ;;  %13153 = vmatprep.subr.bf16.mxu1 %v17424_v17  ;;  %v17287_v11 = vcombine.low %v1876_v42, %v1880_v56 }
 0x217   :  { %v2008_v28 = vld [vmem:[#allocation4 + $0x3c20] sm:$0xff]  ;;  %13154 = vmatpush1.bf16.msra.mxu1 %v17423_v35 }
 0x218   :  { %v17416_v0 = vcombine.high %v2004_v23, %v2008_v28  ;;  %v1996_v19 = vld [vmem:[#allocation4 + $0x3bc0] sm:$0xff]  ;;  %13114 = vmatprep.subr.bf16.mxu0 %v17288_v38  ;;  %v17415_v41 = vcombine.low %v2004_v23, %v2008_v28 }
 0x219   :  { %v2000_v22 = vld [vmem:[#allocation4 + $0x3be0] sm:$0xff]  ;;  %13115 = vmatpush1.bf16.msra.mxu0 %v17287_v11 }
 0x21a   :  { %v2124_v50 = vld [vmem:[#allocation4 + $0x3fc0] sm:$0xff]  ;;  %v17408_v51 = vcombine.high %v1996_v19, %v2000_v22  ;;  %13155 = vmatprep.subr.bf16.mxu1 %v17416_v0  ;;  %v17407_v63 = vcombine.low %v1996_v19, %v2000_v22 }
 0x21b   :  { %v2128_v52 = vld [vmem:[#allocation4 + $0x3fe0] sm:$0xff]  ;;  %13156 = vmatpush1.bf16.msra.mxu1 %v17415_v41 }
 0x21c   :  { %v17536_v57 = vcombine.high %v2124_v50, %v2128_v52  ;;  %v1988_v39 = vld [vmem:[#allocation4 + $0x3b80] sm:$0xff]  ;;  %13116 = vmatprep.subr.bf16.mxu0 %v17408_v51  ;;  %v17535_v1 = vcombine.low %v2124_v50, %v2128_v52 }
 0x21d   :  { %v1992_v46 = vld [vmem:[#allocation4 + $0x3ba0] sm:$0xff]  ;;  %13117 = vmatpush2.bf16.msra.mxu0 %v17407_v63 }
 0x21e   :  { %v2116_v61 = vld [vmem:[#allocation4 + $0x3f80] sm:$0xff]  ;;  %v17400_v7 = vcombine.high %v1988_v39, %v1992_v46  ;;  %13157 = vmatprep.subr.bf16.mxu1 %v17536_v57  ;;  %v17399_v17 = vcombine.low %v1988_v39, %v1992_v46 }
 0x21f   :  { %v2120_v2 = vld [vmem:[#allocation4 + $0x3fa0] sm:$0xff]  ;;  %13158 = vmatpush2.bf16.msra.mxu1 %v17535_v1 }
 0x220   :  { %v17528_v3 = vcombine.high %v2116_v61, %v2120_v2  ;;  %v1980_v44 = vld [vmem:[#allocation4 + $0x3b40] sm:$0xff]  ;;  %13118 = vmatprep.subr.bf16.mxu0 %v17400_v7  ;;  %v17527_v42 = vcombine.low %v2116_v61, %v2120_v2 }
 0x221   :  { %v1984_v34 = vld [vmem:[#allocation4 + $0x3b60] sm:$0xff]  ;;  %13119 = vmatpush2.bf16.msra.mxu0 %v17399_v17 }
 0x222   :  { %v2108_v6 = vld [vmem:[#allocation4 + $0x3f40] sm:$0xff]  ;;  %v17392_v56 = vcombine.high %v1980_v44, %v1984_v34  ;;  %13159 = vmatprep.subr.bf16.mxu1 %v17528_v3  ;;  %v17391_v0 = vcombine.low %v1980_v44, %v1984_v34 }
 0x223   :  { %v2112_v14 = vld [vmem:[#allocation4 + $0x3f60] sm:$0xff]  ;;  %13160 = vmatpush2.bf16.msra.mxu1 %v17527_v42 }
 0x224   :  { %v17520_v23 = vcombine.high %v2108_v6, %v2112_v14  ;;  %v1972_v28 = vld [vmem:[#allocation4 + $0x3b00] sm:$0xff]  ;;  %13120 = vmatprep.subr.bf16.mxu0 %v17392_v56  ;;  %v17519_v19 = vcombine.low %v2108_v6, %v2112_v14 }
 0x225   :  { %v1976_v30 = vld [vmem:[#allocation4 + $0x3b20] sm:$0xff]  ;;  %13121 = vmatpush2.bf16.msra.mxu0 %v17391_v0 }
 0x226   :  { %v2100_v35 = vld [vmem:[#allocation4 + $0x3f00] sm:$0xff]  ;;  %v17384_v22 = vcombine.high %v1972_v28, %v1976_v30  ;;  %13161 = vmatprep.subr.bf16.mxu1 %v17520_v23  ;;  %v17383_v57 = vcombine.low %v1972_v28, %v1976_v30 }
 0x227   :  { %v2104_v38 = vld [vmem:[#allocation4 + $0x3f20] sm:$0xff]  ;;  %13162 = vmatpush2.bf16.msra.mxu1 %v17519_v19 }
 0x228   :  { %v17512_v50 = vcombine.high %v2100_v35, %v2104_v38  ;;  %v1964_v52 = vld [vmem:[#allocation4 + $0x3ac0] sm:$0xff]  ;;  %13122 = vmatprep.subr.bf16.mxu0 %v17384_v22  ;;  %v17511_v39 = vcombine.low %v2100_v35, %v2104_v38 }
 0x229   :  { %v1968_v11 = vld [vmem:[#allocation4 + $0x3ae0] sm:$0xff]  ;;  %13123 = vmatpush2.bf16.msra.mxu0 %v17383_v57  ;;  %v145_v57 = vld [vmem:[#allocation4 + $0x1e8] sm:$0xff] }
 0x22a   :  { %v2092_v41 = vld [vmem:[#allocation4 + $0x3ec0] sm:$0xff]  ;;  %v17376_v46 = vcombine.high %v1964_v52, %v1968_v11  ;;  %13163 = vmatprep.subr.bf16.mxu1 %v17512_v50  ;;  %v17375_v3 = vcombine.low %v1964_v52, %v1968_v11 }
 0x22b   :  { %v2096_v51 = vld [vmem:[#allocation4 + $0x3ee0] sm:$0xff]  ;;  %13164 = vmatpush2.bf16.msra.mxu1 %v17511_v39  ;;  %v269_v39 = vld [vmem:[#allocation4 + $0x5c8] sm:$0xff] }
 0x22c   :  { %v17504_v61 = vcombine.high %v2092_v41, %v2096_v51  ;;  %v1956_v2 = vld [vmem:[#allocation4 + $0x3a80] sm:$0xff]  ;;  %13124 = vmatprep.subr.bf16.mxu0 %v17376_v46  ;;  %v17503_v44 = vcombine.low %v2092_v41, %v2096_v51  ;;  %v141_v51 = vld [vmem:[#allocation4 + $0x1c8] sm:$0xff] }
 0x22d   :  { %v1960_v63 = vld [vmem:[#allocation4 + $0x3aa0] sm:$0xff]  ;;  %13125 = vmatpush2.bf16.msra.mxu0 %v17375_v3  ;;  %v273_v46 = vld [vmem:[#allocation4 + $0x5e8] sm:$0xff] }
 0x22e   :  { %v2084_v1 = vld [vmem:[#allocation4 + $0x3e80] sm:$0xff]  ;;  %v17368_v34 = vcombine.high %v1956_v2, %v1960_v63  ;;  %13165 = vmatprep.subr.bf16.mxu1 %v17504_v61  ;;  %v17367_v23 = vcombine.low %v1956_v2, %v1960_v63  ;;  %v15554_v63 = vcombine.high %v141_v51, %v145_v57  ;;  %v137_v3 = vld [vmem:[#allocation4 + $0x1a8] sm:$0xff] }
 0x22f   :  { %v2088_v7 = vld [vmem:[#allocation4 + $0x3ea0] sm:$0xff]  ;;  %13166 = vmatpush2.bf16.msra.mxu1 %v17503_v44  ;;  %v17927_v44 = vcombine.low %v17899_v33, %v17899_v33  ;;  %v253_v33 = vld [vmem:[#allocation4 + $0x548] sm:$0xff] }
 0x230   :  { %v17496_v6 = vcombine.high %v2084_v1, %v2088_v7  ;;  %v1948_v14 = vld [vmem:[#allocation4 + $0x3a40] sm:$0xff]  ;;  %13126 = vmatprep.subr.bf16.mxu0 %v17368_v34  ;;  %v17495_v28 = vcombine.low %v2084_v1, %v2088_v7  ;;  %v15682_v1 = vcombine.high %v269_v39, %v273_v46  ;;  %v133_v7 = vld [vmem:[#allocation4 + $0x188] sm:$0xff] }
 0x231   :  { %v1952_v17 = vld [vmem:[#allocation4 + $0x3a60] sm:$0xff]  ;;  %13127 = vmatpush2.bf16.msra.mxu0 %v17367_v23  ;;  %v261_v34 = vld [vmem:[#allocation4 + $0x588] sm:$0xff] }
 0x232   :  { %v2076_v42 = vld [vmem:[#allocation4 + $0x3e40] sm:$0xff]  ;;  %v17360_v30 = vcombine.high %v1948_v14, %v1952_v17  ;;  %13167 = vmatprep.subr.bf16.mxu1 %v17496_v6  ;;  %v17359_v50 = vcombine.low %v1948_v14, %v1952_v17  ;;  %v265_v6 = vld [vmem:[#allocation4 + $0x5a8] sm:$0xff]  ;;  %v17931_v14 = vcombine.low %v17905_v60, %v17905_v60  ;;  %v15553_v17 = vcombine.low %v141_v51, %v145_v57 }
 0x233   :  { %v2080_v56 = vld [vmem:[#allocation4 + $0x3e60] sm:$0xff]  ;;  %13168 = vmatpush2.bf16.msra.mxu1 %v17495_v28  ;;  %v15674_v23 = vcombine.high %v261_v34, %v265_v6  ;;  %v125_v28 = vld [vmem:[#allocation4 + $0x148] sm:$0xff]  ;;  %v15545_v60 = vcombine.low %v133_v7, %v137_v3 }
 0x234   :  { %v17488_v35 = vcombine.high %v2076_v42, %v2080_v56  ;;  %v1940_v38 = vld [vmem:[#allocation4 + $0x3a00] sm:$0xff]  ;;  %13128 = vmatprep.subr.bf16.mxu0 %v17360_v30  ;;  %v17487_v52 = vcombine.low %v2076_v42, %v2080_v56  ;;  %v15681_v42 = vcombine.low %v269_v39, %v273_v46  ;;  %v15546_v56 = vcombine.high %v133_v7, %v137_v3  ;;  %v129_v30 = vld [vmem:[#allocation4 + $0x168] sm:$0xff] }
 0x235   :  { %v1944_v0 = vld [vmem:[#allocation4 + $0x3a20] sm:$0xff]  ;;  %13129 = vmatpush2.bf16.msra.mxu0 %v17359_v50  ;;  %v15673_v50 = vcombine.low %v261_v34, %v265_v6  ;;  %v117_v57 = vld [vmem:[#allocation4 + $0x108] sm:$0xff] }
 0x236   :  { %v2068_v19 = vld [vmem:[#allocation4 + $0x3e00] sm:$0xff]  ;;  %v17352_v11 = vcombine.high %v1940_v38, %v1944_v0  ;;  %13169 = vmatprep.subr.bf16.mxu1 %v17488_v35  ;;  %v17351_v61 = vcombine.low %v1940_v38, %v1944_v0  ;;  %v257_v38 = vld [vmem:[#allocation4 + $0x568] sm:$0xff] }
 0x237   :  { %v2072_v22 = vld [vmem:[#allocation4 + $0x3e20] sm:$0xff]  ;;  %13170 = vmatpush2.bf16.msra.mxu1 %v17487_v52  ;;  %v15538_v52 = vcombine.high %v125_v28, %v129_v30  ;;  %v15666_v51 = vcombine.high %v253_v33, %v257_v38  ;;  %v121_v39 = vld [vmem:[#allocation4 + $0x128] sm:$0xff]  ;;  %v15665_v7 = vcombine.low %v253_v33, %v257_v38 }
 0x238   :  { %v17480_v41 = vcombine.high %v2068_v19, %v2072_v22  ;;  %13130 = vmatprep.subr.bf16.mxu0 %v17352_v11  ;;  %v17479_v2 = vcombine.low %v2068_v19, %v2072_v22  ;;  %v245_v46 = vld [vmem:[#allocation4 + $0x508] sm:$0xff]  ;;  %v15530_v3 = vcombine.high %v117_v57, %v121_v39 }
 0x239   :  { %13131 = vmatpush2.bf16.msra.mxu0 %v17351_v61  ;;  %v249_v61 = vld [vmem:[#allocation4 + $0x528] sm:$0xff] }
 0x23a   :  { %13171 = vmatprep.subr.bf16.mxu1 %v17480_v41  ;;  %13182 = vmatprep.subr.bf16.mxu0 %v15554_v63  ;;  %v15537_v63 = vcombine.low %v125_v28, %v129_v30  ;;  %v15658_v6 = vcombine.high %v245_v46, %v249_v61  ;;  %v101_v30 = vld [vmem:[#allocation4 + $0x88] sm:$0xff] }
 0x23b   :  { %13172 = vmatpush2.bf16.msra.mxu1 %v17479_v2  ;;  %v12888_v35 = vpop.f32.mrf.mxu0  ;;  %v233_v33 = vld [vmem:[#allocation4 + $0x4a8] sm:$0xff] }
 0x23c   :  { %13223 = vmatprep.subr.bf16.mxu1 %v15682_v1  ;;  %13133 = vmatmul.mubr.bf16.vlgmr.msra.gmra.mxu0 %v17927_v44  ;;  %v12889_v0 = vadd.f32 %v12888_v35, %v17918_v24  ;;  %v15529_v35 = vcombine.low %v117_v57, %v121_v39  ;;  %v97_v57 = vld [vmem:[#allocation4 + $0x68] sm:$0xff] }
 0x23d   :  { %v12929_v19 = vpop.f32.mrf.mxu1  ;;  %13183 = vmatpush1.bf16.msra.mxu0 %v15553_v17  ;;  %v17936_v22 = vpop.f32.mrf.mxu0  ;;  %13214 = vmatprep.mubr.bf16.mxu0 %v17723_v58  ;;  %v109_v17 = vld [vmem:[#allocation4 + $0xc8] sm:$0xff] }
 0x23e   :  { %13174 = vmatmul.mubr.bf16.vlgmr.msra.gmra.mxu1 %v17931_v14  ;;  %13184 = vmatprep.subr.bf16.mxu0 %v15546_v56  ;;  %v17938_v11 = vadd.f32 %v12929_v19, %v12889_v0  ;;  %v237_v56 = vld [vmem:[#allocation4 + $0x4c8] sm:$0xff]  ;;  %v15657_v0 = vcombine.low %v245_v46, %v249_v61 }
 0x23f   :  { %13224 = vmatpush1.bf16.msra.mxu1 %v15681_v42  ;;  %v17940_v41 = vpop.f32.mrf.mxu1  ;;  %v12892_v24 = vpop.f32.mrf.mxu0  ;;  %13255 = vmatprep.mubr.bf16.mxu1 %v17727_v59  ;;  %v113_v42 = vld [vmem:[#allocation4 + $0xe8] sm:$0xff] }
 0x240   :  { %13225 = vmatprep.subr.bf16.mxu1 %v15674_v23  ;;  %v241_v23 = vld [vmem:[#allocation4 + $0x4e8] sm:$0xff]  ;;  %v15522_v19 = vcombine.high %v109_v17, %v113_v42  ;;  %v15521_v38 = vcombine.low %v109_v17, %v113_v42 }
 0x241   :  { %v12933_v2 = vpop.f32.mrf.mxu1  ;;  %13185 = vmatpush1.bf16.msra.mxu0 %v15545_v60  ;;  %v12893_v1 = vpop.f32.mrf.mxu0  ;;  %v15650_v28 = vcombine.high %v237_v56, %v241_v23  ;;  %v105_v60 = vld [vmem:[#allocation4 + $0xa8] sm:$0xff] }
 0x242   :  { %13186 = vmatprep.subr.bf16.mxu0 %v15538_v52  ;;  %v15649_v52 = vcombine.low %v237_v56, %v241_v23  ;;  %v93_v2 = vld [vmem:[#allocation4 + $0x48] sm:$0xff]  ;;  %v15513_v46 = vcombine.low %v101_v30, %v105_v60 }
 0x243   :  { %13226 = vmatpush1.bf16.msra.mxu1 %v15673_v50  ;;  %v12934_v34 = vpop.f32.mrf.mxu1  ;;  %v229_v50 = vld [vmem:[#allocation4 + $0x488] sm:$0xff]  ;;  %v15506_v1 = vcombine.high %v93_v2, %v97_v57  ;;  %v15505_v42 = vcombine.low %v93_v2, %v97_v57 }
 0x244   :  { %13227 = vmatprep.subr.bf16.mxu1 %v15666_v51  ;;  %v15514_v51 = vcombine.high %v101_v30, %v105_v60  ;;  %v15642_v24 = vcombine.high %v229_v50, %v233_v33  ;;  %v221_v39 = vld [vmem:[#allocation4 + $0x448] sm:$0xff]  ;;  %v15641_v61 = vcombine.low %v229_v50, %v233_v33 }
 0x245   :  { %13187 = vmatpush1.bf16.msra.mxu0 %v15537_v63  ;;  %v225_v63 = vld [vmem:[#allocation4 + $0x468] sm:$0xff] }
 0x246   :  { %13188 = vmatprep.subr.bf16.mxu0 %v15530_v3  ;;  %v85_v3 = vld [vmem:[#allocation4 + $0x8] sm:$0xff]  ;;  %v15633_v56 = vcombine.low %v221_v39, %v225_v63 }
 0x247   :  { %13228 = vmatpush1.bf16.msra.mxu1 %v15665_v7  ;;  %v15634_v7 = vcombine.high %v221_v39, %v225_v63  ;;  %v89_v34 = vld [vmem:[#allocation4 + $0x28] sm:$0xff] }
 0x248   :  { %13229 = vmatprep.subr.bf16.mxu1 %v15658_v6  ;;  %v213_v6 = vld [vmem:[#allocation4 + $0x408] sm:$0xff]  ;;  %v15498_v23 = vcombine.high %v85_v3, %v89_v34  ;;  %v15497_v60 = vcombine.low %v85_v3, %v89_v34 }
 0x249   :  { %13189 = vmatpush1.bf16.msra.mxu0 %v15529_v35  ;;  %v217_v17 = vld [vmem:[#allocation4 + $0x428] sm:$0xff] }
 0x24a   :  { %13190 = vmatprep.subr.bf16.mxu0 %v15522_v19  ;;  %v15626_v35 = vcombine.high %v213_v6, %v217_v17  ;;  %v209_v19 = vld [vmem:[#allocation4 + $0x3e8] sm:$0xff]  ;;  %v15625_v50 = vcombine.low %v213_v6, %v217_v17 }
 0x24b   :  { %13230 = vmatpush1.bf16.msra.mxu1 %v15657_v0  ;;  %v205_v0 = vld [vmem:[#allocation4 + $0x3c8] sm:$0xff] }
 0x24c   :  { %13231 = vmatprep.subr.bf16.mxu1 %v15650_v28  ;;  %v333_v28 = vld [vmem:[#allocation4 + $0x7c8] sm:$0xff]  ;;  %v15618_v33 = vcombine.high %v205_v0, %v209_v19  ;;  %v15617_v57 = vcombine.low %v205_v0, %v209_v19 }
 0x24d   :  { %13191 = vmatpush1.bf16.msra.mxu0 %v15521_v38  ;;  %v337_v30 = vld [vmem:[#allocation4 + $0x7e8] sm:$0xff] }
 0x24e   :  { %13192 = vmatprep.subr.bf16.mxu0 %v15514_v51  ;;  %v15746_v38 = vcombine.high %v333_v28, %v337_v30  ;;  %v201_v51 = vld [vmem:[#allocation4 + $0x3a8] sm:$0xff]  ;;  %v15745_v39 = vcombine.low %v333_v28, %v337_v30 }
 0x24f   :  { %13232 = vmatpush1.bf16.msra.mxu1 %v15649_v52  ;;  %v197_v52 = vld [vmem:[#allocation4 + $0x388] sm:$0xff] }
 0x250   :  { %13233 = vmatprep.subr.bf16.mxu1 %v15642_v24  ;;  %v325_v24 = vld [vmem:[#allocation4 + $0x788] sm:$0xff]  ;;  %v15610_v63 = vcombine.high %v197_v52, %v201_v51  ;;  %v15609_v34 = vcombine.low %v197_v52, %v201_v51 }
 0x251   :  { %13193 = vmatpush1.bf16.msra.mxu0 %v15513_v46  ;;  %v329_v2 = vld [vmem:[#allocation4 + $0x7a8] sm:$0xff] }
 0x252   :  { %13194 = vmatprep.subr.bf16.mxu0 %v15506_v1  ;;  %v15738_v46 = vcombine.high %v325_v24, %v329_v2  ;;  %v193_v1 = vld [vmem:[#allocation4 + $0x368] sm:$0xff]  ;;  %v15737_v6 = vcombine.low %v325_v24, %v329_v2 }
 0x253   :  { %13234 = vmatpush1.bf16.msra.mxu1 %v15641_v61  ;;  %v189_v61 = vld [vmem:[#allocation4 + $0x348] sm:$0xff] }
 0x254   :  { %13235 = vmatprep.subr.bf16.mxu1 %v15634_v7  ;;  %v317_v7 = vld [vmem:[#allocation4 + $0x748] sm:$0xff]  ;;  %v15602_v17 = vcombine.high %v189_v61, %v193_v1  ;;  %v15601_v19 = vcombine.low %v189_v61, %v193_v1 }
 0x255   :  { %13195 = vmatpush1.bf16.msra.mxu0 %v15505_v42  ;;  %v321_v3 = vld [vmem:[#allocation4 + $0x768] sm:$0xff] }
 0x256   :  { %13196 = vmatprep.subr.bf16.mxu0 %v15498_v23  ;;  %v15730_v42 = vcombine.high %v317_v7, %v321_v3  ;;  %v185_v23 = vld [vmem:[#allocation4 + $0x328] sm:$0xff]  ;;  %v15729_v28 = vcombine.low %v317_v7, %v321_v3 }
 0x257   :  { %13236 = vmatpush1.bf16.msra.mxu1 %v15633_v56  ;;  %v181_v56 = vld [vmem:[#allocation4 + $0x308] sm:$0xff] }
 0x258   :  { %13237 = vmatprep.subr.bf16.mxu1 %v15626_v35  ;;  %v309_v35 = vld [vmem:[#allocation4 + $0x708] sm:$0xff]  ;;  %v15594_v30 = vcombine.high %v181_v56, %v185_v23  ;;  %v15593_v51 = vcombine.low %v181_v56, %v185_v23 }
 0x259   :  { %13197 = vmatpush1.bf16.msra.mxu0 %v15497_v60  ;;  %v313_v0 = vld [vmem:[#allocation4 + $0x728] sm:$0xff] }
 0x25a   :  { %13198 = vmatprep.subr.bf16.mxu0 %v15618_v33  ;;  %v15722_v60 = vcombine.high %v309_v35, %v313_v0  ;;  %v177_v33 = vld [vmem:[#allocation4 + $0x2e8] sm:$0xff]  ;;  %v15721_v24 = vcombine.low %v309_v35, %v313_v0 }
 0x25b   :  { %13238 = vmatpush1.bf16.msra.mxu1 %v15625_v50  ;;  %v173_v50 = vld [vmem:[#allocation4 + $0x2c8] sm:$0xff] }
 0x25c   :  { %13239 = vmatprep.subr.bf16.mxu1 %v15746_v38  ;;  %v301_v38 = vld [vmem:[#allocation4 + $0x6c8] sm:$0xff]  ;;  %v15586_v2 = vcombine.high %v173_v50, %v177_v33  ;;  %v15585_v1 = vcombine.low %v173_v50, %v177_v33 }
 0x25d   :  { %13199 = vmatpush2.bf16.msra.mxu0 %v15617_v57  ;;  %v305_v52 = vld [vmem:[#allocation4 + $0x6e8] sm:$0xff] }
 0x25e   :  { %13200 = vmatprep.subr.bf16.mxu0 %v15610_v63  ;;  %v15714_v57 = vcombine.high %v301_v38, %v305_v52  ;;  %v169_v63 = vld [vmem:[#allocation4 + $0x2a8] sm:$0xff]  ;;  %v15713_v7 = vcombine.low %v301_v38, %v305_v52 }
 0x25f   :  { %13240 = vmatpush2.bf16.msra.mxu1 %v15745_v39  ;;  %v165_v39 = vld [vmem:[#allocation4 + $0x288] sm:$0xff] }
 0x260   :  { %13241 = vmatprep.subr.bf16.mxu1 %v15738_v46  ;;  %v293_v46 = vld [vmem:[#allocation4 + $0x688] sm:$0xff]  ;;  %v15578_v3 = vcombine.high %v165_v39, %v169_v63  ;;  %v15577_v23 = vcombine.low %v165_v39, %v169_v63 }
 0x261   :  { %13201 = vmatpush2.bf16.msra.mxu0 %v15609_v34  ;;  %v297_v61 = vld [vmem:[#allocation4 + $0x6a8] sm:$0xff] }
 0x262   :  { %13202 = vmatprep.subr.bf16.mxu0 %v15602_v17  ;;  %v15706_v34 = vcombine.high %v293_v46, %v297_v61  ;;  %v161_v17 = vld [vmem:[#allocation4 + $0x268] sm:$0xff]  ;;  %v15705_v35 = vcombine.low %v293_v46, %v297_v61 }
 0x263   :  { %13242 = vmatpush2.bf16.msra.mxu1 %v15737_v6  ;;  %v157_v6 = vld [vmem:[#allocation4 + $0x248] sm:$0xff] }
 0x264   :  { %13243 = vmatprep.subr.bf16.mxu1 %v15730_v42  ;;  %v285_v42 = vld [vmem:[#allocation4 + $0x648] sm:$0xff]  ;;  %v15570_v0 = vcombine.high %v157_v6, %v161_v17  ;;  %v15569_v33 = vcombine.low %v157_v6, %v161_v17  ;;  %v12891_v17 = vadd.f32 %v17936_v22, %v17923_v12 }
 0x265   :  { %13203 = vmatpush2.bf16.msra.mxu0 %v15601_v19  ;;  %v289_v56 = vld [vmem:[#allocation4 + $0x668] sm:$0xff] }
 0x266   :  { %13204 = vmatprep.subr.bf16.mxu0 %v15594_v30  ;;  %v15698_v19 = vcombine.high %v285_v42, %v289_v56  ;;  %v153_v30 = vld [vmem:[#allocation4 + $0x228] sm:$0xff]  ;;  %v15697_v38 = vcombine.low %v285_v42, %v289_v56 }
 0x267   :  { %13244 = vmatpush2.bf16.msra.mxu1 %v15729_v28  ;;  %v149_v28 = vld [vmem:[#allocation4 + $0x208] sm:$0xff] }
 0x268   :  { %13245 = vmatprep.subr.bf16.mxu1 %v15722_v60  ;;  %v277_v60 = vld [vmem:[#allocation4 + $0x608] sm:$0xff]  ;;  %v15562_v52 = vcombine.high %v149_v28, %v153_v30  ;;  %v15561_v63 = vcombine.low %v149_v28, %v153_v30 }
 0x269   :  { %13205 = vmatpush2.bf16.msra.mxu0 %v15593_v51  ;;  %v281_v50 = vld [vmem:[#allocation4 + $0x628] sm:$0xff] }
 0x26a   :  { %13206 = vmatprep.subr.bf16.mxu0 %v15586_v2  ;;  %v15690_v51 = vcombine.high %v277_v60, %v281_v50  ;;  %v401_v2 = vld [vmem:[#allocation4 + $0x9e8] sm:$0xff]  ;;  %v15689_v46 = vcombine.low %v277_v60, %v281_v50  ;;  %v12932_v50 = vadd.f32 %v17940_v41, %v12891_v17 }
 0x26b   :  { %13246 = vmatpush2.bf16.msra.mxu1 %v15721_v24  ;;  %v397_v24 = vld [vmem:[#allocation4 + $0x9c8] sm:$0xff] }
 0x26c   :  { %13247 = vmatprep.subr.bf16.mxu1 %v15714_v57  ;;  %v525_v57 = vld [vmem:[#allocation4 + $0xdc8] sm:$0xff]  ;;  %v15810_v61 = vcombine.high %v397_v24, %v401_v2  ;;  %v15809_v42 = vcombine.low %v397_v24, %v401_v2 }
 0x26d   :  { %13207 = vmatpush2.bf16.msra.mxu0 %v15585_v1  ;;  %v529_v39 = vld [vmem:[#allocation4 + $0xde8] sm:$0xff] }
 0x26e   :  { %13208 = vmatprep.subr.bf16.mxu0 %v15578_v3  ;;  %v15938_v1 = vcombine.high %v525_v57, %v529_v39  ;;  %v393_v3 = vld [vmem:[#allocation4 + $0x9a8] sm:$0xff]  ;;  %v15937_v56 = vcombine.low %v525_v57, %v529_v39 }
 0x26f   :  { %13248 = vmatpush2.bf16.msra.mxu1 %v15713_v7  ;;  %v389_v7 = vld [vmem:[#allocation4 + $0x988] sm:$0xff] }
 0x270   :  { %13249 = vmatprep.subr.bf16.mxu1 %v15706_v34  ;;  %v517_v34 = vld [vmem:[#allocation4 + $0xd88] sm:$0xff]  ;;  %v15801_v22 = vcombine.low %v389_v7, %v393_v3 }
 0x271   :  { %13209 = vmatpush2.bf16.msra.mxu0 %v15577_v23  ;;  %v521_v6 = vld [vmem:[#allocation4 + $0xda8] sm:$0xff]  ;;  %v15802_v23 = vcombine.high %v389_v7, %v393_v3 }
 0x272   :  { %13210 = vmatprep.subr.bf16.mxu0 %v15570_v0  ;;  %v381_v0 = vld [vmem:[#allocation4 + $0x948] sm:$0xff] }
 0x273   :  { %13250 = vmatpush2.bf16.msra.mxu1 %v15705_v35  ;;  %v15930_v35 = vcombine.high %v517_v34, %v521_v6  ;;  %v509_v30 = vld [vmem:[#allocation4 + $0xd48] sm:$0xff] }
 0x274   :  { %13251 = vmatprep.subr.bf16.mxu1 %v15698_v19  ;;  %v385_v19 = vld [vmem:[#allocation4 + $0x968] sm:$0xff] }
 0x275   :  { %13211 = vmatpush2.bf16.msra.mxu0 %v15569_v33  ;;  %v513_v60 = vld [vmem:[#allocation4 + $0xd68] sm:$0xff]  ;;  %v15793_v3 = vcombine.low %v381_v0, %v385_v19 }
 0x276   :  { %13212 = vmatprep.subr.bf16.mxu0 %v15562_v52  ;;  %v15929_v52 = vcombine.low %v517_v34, %v521_v6  ;;  %v15922_v39 = vcombine.high %v509_v30, %v513_v60  ;;  %v377_v41 = vld [vmem:[#allocation4 + $0x928] sm:$0xff]  ;;  %v15921_v6 = vcombine.low %v509_v30, %v513_v60 }
 0x277   :  { %13252 = vmatpush2.bf16.msra.mxu1 %v15697_v38  ;;  %v489_v30 = vld [vmem:[#allocation4 + $0xca8] sm:$0xff] }
 0x278   :  { %13253 = vmatprep.subr.bf16.mxu1 %v15690_v51  ;;  %v15794_v51 = vcombine.high %v381_v0, %v385_v19  ;;  %v357_v19 = vld [vmem:[#allocation4 + $0x888] sm:$0xff] }
 0x279   :  { %13213 = vmatpush2.bf16.msra.mxu0 %v15561_v63  ;;  %v373_v63 = vld [vmem:[#allocation4 + $0x908] sm:$0xff] }
 0x27a   :  { %13264 = vmatprep.subr.bf16.mxu0 %v15810_v61  ;;  %v505_v61 = vld [vmem:[#allocation4 + $0xd28] sm:$0xff]  ;;  %v15786_v17 = vcombine.high %v373_v63, %v377_v41 }
 0x27b   :  { %13254 = vmatpush2.bf16.msra.mxu1 %v15689_v46  ;;  %v12970_v28 = vpop.f32.mrf.mxu0  ;;  %v501_v46 = vld [vmem:[#allocation4 + $0xd08] sm:$0xff] }
 0x27c   :  { %13305 = vmatprep.subr.bf16.mxu1 %v15938_v1  ;;  %13215 = vmatmul.mubr.bf16.vlgmr.msra.gmra.mxu0 %v17733_v16  ;;  %v12971_v33 = vadd.f32 %v12970_v28, %v17938_v11  ;;  %v493_v28 = vld [vmem:[#allocation4 + $0xcc8] sm:$0xff] }
 0x27d   :  { %v13011_v12 = vpop.f32.mrf.mxu1  ;;  %13265 = vmatpush1.bf16.msra.mxu0 %v15809_v42  ;;  %v12972_v38 = vpop.f32.mrf.mxu0  ;;  %13296 = vmatprep.mubr.bf16.mxu0 %v17745_v27 }
 0x27e   :  { %13256 = vmatmul.mubr.bf16.vlgmr.msra.gmra.mxu1 %v17739_v20  ;;  %13266 = vmatprep.subr.bf16.mxu0 %v15802_v23  ;;  %v17950_v24 = vadd.f32 %v13011_v12, %v12971_v33  ;;  %v12973_v2 = vadd.f32 %v12972_v38, %v12932_v50  ;;  %v365_v23 = vld [vmem:[#allocation4 + $0x8c8] sm:$0xff]  ;;  %v15785_v33 = vcombine.low %v373_v63, %v377_v41 }
 0x27f   :  { %13306 = vmatpush1.bf16.msra.mxu1 %v15937_v56  ;;  %v13013_v57 = vpop.f32.mrf.mxu1  ;;  %v12974_v11 = vpop.f32.mrf.mxu0  ;;  %13337 = vmatprep.mubr.bf16.mxu1 %v17750_v29  ;;  %v15914_v56 = vcombine.high %v501_v46, %v505_v61  ;;  %v497_v50 = vld [vmem:[#allocation4 + $0xce8] sm:$0xff]  ;;  %v15913_v12 = vcombine.low %v501_v46, %v505_v61 }
 0x280   :  { %13307 = vmatprep.subr.bf16.mxu1 %v15930_v35  ;;  %v17954_v1 = vadd.f32 %v13013_v57, %v12973_v2  ;;  %v369_v35 = vld [vmem:[#allocation4 + $0x8e8] sm:$0xff]  ;;  %v15906_v0 = vcombine.high %v493_v28, %v497_v50 }
 0x281   :  { %v13015_v7 = vpop.f32.mrf.mxu1  ;;  %13267 = vmatpush1.bf16.msra.mxu0 %v15801_v22  ;;  %v12975_v34 = vpop.f32.mrf.mxu0  ;;  %v15778_v38 = vcombine.high %v365_v23, %v369_v35  ;;  %v361_v22 = vld [vmem:[#allocation4 + $0x8a8] sm:$0xff]  ;;  %v15777_v60 = vcombine.low %v365_v23, %v369_v35 }
 0x282   :  { %13268 = vmatprep.subr.bf16.mxu0 %v15794_v51  ;;  %v15905_v51 = vcombine.low %v493_v28, %v497_v50  ;;  %v15770_v2 = vcombine.high %v357_v19, %v361_v22  ;;  %v353_v63 = vld [vmem:[#allocation4 + $0x868] sm:$0xff]  ;;  %v15769_v46 = vcombine.low %v357_v19, %v361_v22 }
 0x283   :  { %13308 = vmatpush1.bf16.msra.mxu1 %v15929_v52  ;;  %v13016_v42 = vpop.f32.mrf.mxu1  ;;  %v485_v52 = vld [vmem:[#allocation4 + $0xc88] sm:$0xff] }
 0x284   :  { %13309 = vmatprep.subr.bf16.mxu1 %v15922_v39  ;;  %v15898_v57 = vcombine.high %v485_v52, %v489_v30  ;;  %v349_v39 = vld [vmem:[#allocation4 + $0x848] sm:$0xff]  ;;  %v15897_v61 = vcombine.low %v485_v52, %v489_v30 }
 0x285   :  { %13269 = vmatpush1.bf16.msra.mxu0 %v15793_v3  ;;  %v477_v41 = vld [vmem:[#allocation4 + $0xc48] sm:$0xff]  ;;  %v15762_v7 = vcombine.high %v349_v39, %v353_v63 }
 0x286   :  { %13270 = vmatprep.subr.bf16.mxu0 %v15786_v17  ;;  %v481_v11 = vld [vmem:[#allocation4 + $0xc68] sm:$0xff] }
 0x287   :  { %13310 = vmatpush1.bf16.msra.mxu1 %v15921_v6  ;;  %v15890_v3 = vcombine.high %v477_v41, %v481_v11  ;;  %v341_v34 = vld [vmem:[#allocation4 + $0x808] sm:$0xff]  ;;  %v15889_v23 = vcombine.low %v477_v41, %v481_v11 }
 0x288   :  { %13311 = vmatprep.subr.bf16.mxu1 %v15914_v56  ;;  %v345_v6 = vld [vmem:[#allocation4 + $0x828] sm:$0xff]  ;;  %v15761_v56 = vcombine.low %v349_v39, %v353_v63 }
 0x289   :  { %13271 = vmatpush1.bf16.msra.mxu0 %v15785_v33  ;;  %v469_v17 = vld [vmem:[#allocation4 + $0xc08] sm:$0xff]  ;;  %v15754_v35 = vcombine.high %v341_v34, %v345_v6 }
 0x28a   :  { %13272 = vmatprep.subr.bf16.mxu0 %v15778_v38  ;;  %v473_v42 = vld [vmem:[#allocation4 + $0xc28] sm:$0xff] }
 0x28b   :  { %13312 = vmatpush1.bf16.msra.mxu1 %v15913_v12  ;;  %v15882_v28 = vcombine.high %v469_v17, %v473_v42  ;;  %v461_v50 = vld [vmem:[#allocation4 + $0xbc8] sm:$0xff]  ;;  %v15881_v19 = vcombine.low %v469_v17, %v473_v42 }
 0x28c   :  { %13313 = vmatprep.subr.bf16.mxu1 %v15906_v0  ;;  %v465_v33 = vld [vmem:[#allocation4 + $0xbe8] sm:$0xff]  ;;  %v15753_v0 = vcombine.low %v341_v34, %v345_v6 }
 0x28d   :  { %13273 = vmatpush1.bf16.msra.mxu0 %v15777_v60  ;;  %v589_v12 = vld [vmem:[#allocation4 + $0xfc8] sm:$0xff]  ;;  %v15874_v22 = vcombine.high %v461_v50, %v465_v33 }
 0x28e   :  { %13274 = vmatprep.subr.bf16.mxu0 %v15770_v2  ;;  %v593_v38 = vld [vmem:[#allocation4 + $0xfe8] sm:$0xff] }
 0x28f   :  { %13314 = vmatpush1.bf16.msra.mxu1 %v15905_v51  ;;  %v16002_v52 = vcombine.high %v589_v12, %v593_v38  ;;  %v453_v30 = vld [vmem:[#allocation4 + $0xb88] sm:$0xff]  ;;  %v16001_v39 = vcombine.low %v589_v12, %v593_v38 }
 0x290   :  { %13315 = vmatprep.subr.bf16.mxu1 %v15898_v57  ;;  %v457_v60 = vld [vmem:[#allocation4 + $0xba8] sm:$0xff]  ;;  %v15873_v57 = vcombine.low %v461_v50, %v465_v33 }
 0x291   :  { %13275 = vmatpush1.bf16.msra.mxu0 %v15769_v46  ;;  %v581_v51 = vld [vmem:[#allocation4 + $0xf88] sm:$0xff]  ;;  %v15866_v63 = vcombine.high %v453_v30, %v457_v60 }
 0x292   :  { %13276 = vmatprep.subr.bf16.mxu0 %v15762_v7  ;;  %v585_v2 = vld [vmem:[#allocation4 + $0xfa8] sm:$0xff] }
 0x293   :  { %13316 = vmatpush1.bf16.msra.mxu1 %v15897_v61  ;;  %v15994_v41 = vcombine.high %v581_v51, %v585_v2  ;;  %v445_v11 = vld [vmem:[#allocation4 + $0xb48] sm:$0xff]  ;;  %v15993_v34 = vcombine.low %v581_v51, %v585_v2 }
 0x294   :  { %13317 = vmatprep.subr.bf16.mxu1 %v15890_v3  ;;  %v449_v46 = vld [vmem:[#allocation4 + $0xb68] sm:$0xff]  ;;  %v15865_v3 = vcombine.low %v453_v30, %v457_v60 }
 0x295   :  { %13277 = vmatpush1.bf16.msra.mxu0 %v15761_v56  ;;  %v573_v61 = vld [vmem:[#allocation4 + $0xf48] sm:$0xff]  ;;  %v15858_v6 = vcombine.high %v445_v11, %v449_v46 }
 0x296   :  { %13278 = vmatprep.subr.bf16.mxu0 %v15754_v35  ;;  %v577_v7 = vld [vmem:[#allocation4 + $0xf68] sm:$0xff] }
 0x297   :  { %13318 = vmatpush1.bf16.msra.mxu1 %v15889_v23  ;;  %v15986_v17 = vcombine.high %v573_v61, %v577_v7  ;;  %v437_v42 = vld [vmem:[#allocation4 + $0xb08] sm:$0xff]  ;;  %v15985_v50 = vcombine.low %v573_v61, %v577_v7 }
 0x298   :  { %13319 = vmatprep.subr.bf16.mxu1 %v15882_v28  ;;  %v441_v56 = vld [vmem:[#allocation4 + $0xb28] sm:$0xff]  ;;  %v15857_v28 = vcombine.low %v445_v11, %v449_v46 }
 0x299   :  { %13279 = vmatpush1.bf16.msra.mxu0 %v15753_v0  ;;  %v565_v23 = vld [vmem:[#allocation4 + $0xf08] sm:$0xff]  ;;  %v15850_v33 = vcombine.high %v437_v42, %v441_v56 }
 0x29a   :  { %13280 = vmatprep.subr.bf16.mxu0 %v15874_v22  ;;  %v569_v35 = vld [vmem:[#allocation4 + $0xf28] sm:$0xff] }
 0x29b   :  { %13320 = vmatpush1.bf16.msra.mxu1 %v15881_v19  ;;  %v15978_v12 = vcombine.high %v565_v23, %v569_v35  ;;  %v429_v38 = vld [vmem:[#allocation4 + $0xac8] sm:$0xff]  ;;  %v15977_v30 = vcombine.low %v565_v23, %v569_v35 }
 0x29c   :  { %13321 = vmatprep.subr.bf16.mxu1 %v16002_v52  ;;  %v433_v0 = vld [vmem:[#allocation4 + $0xae8] sm:$0xff]  ;;  %v15849_v52 = vcombine.low %v437_v42, %v441_v56 }
 0x29d   :  { %13281 = vmatpush2.bf16.msra.mxu0 %v15873_v57  ;;  %v557_v19 = vld [vmem:[#allocation4 + $0xec8] sm:$0xff]  ;;  %v15842_v60 = vcombine.high %v429_v38, %v433_v0 }
 0x29e   :  { %13282 = vmatprep.subr.bf16.mxu0 %v15866_v63  ;;  %v561_v22 = vld [vmem:[#allocation4 + $0xee8] sm:$0xff] }
 0x29f   :  { %13322 = vmatpush2.bf16.msra.mxu1 %v16001_v39  ;;  %v15970_v51 = vcombine.high %v557_v19, %v561_v22  ;;  %v421_v2 = vld [vmem:[#allocation4 + $0xa88] sm:$0xff]  ;;  %v15969_v11 = vcombine.low %v557_v19, %v561_v22 }
 0x2a0   :  { %13323 = vmatprep.subr.bf16.mxu1 %v15994_v41  ;;  %v425_v57 = vld [vmem:[#allocation4 + $0xaa8] sm:$0xff]  ;;  %v15841_v41 = vcombine.low %v429_v38, %v433_v0 }
 0x2a1   :  { %13283 = vmatpush2.bf16.msra.mxu0 %v15865_v3  ;;  %v549_v39 = vld [vmem:[#allocation4 + $0xe88] sm:$0xff]  ;;  %v15834_v46 = vcombine.high %v421_v2, %v425_v57 }
 0x2a2   :  { %13284 = vmatprep.subr.bf16.mxu0 %v15858_v6  ;;  %v553_v63 = vld [vmem:[#allocation4 + $0xea8] sm:$0xff] }
 0x2a3   :  { %13324 = vmatpush2.bf16.msra.mxu1 %v15993_v34  ;;  %v15962_v61 = vcombine.high %v549_v39, %v553_v63  ;;  %v413_v7 = vld [vmem:[#allocation4 + $0xa48] sm:$0xff]  ;;  %v15961_v42 = vcombine.low %v549_v39, %v553_v63 }
 0x2a4   :  { %13325 = vmatprep.subr.bf16.mxu1 %v15986_v17  ;;  %v417_v3 = vld [vmem:[#allocation4 + $0xa68] sm:$0xff]  ;;  %v15833_v17 = vcombine.low %v421_v2, %v425_v57 }
 0x2a5   :  { %13285 = vmatpush2.bf16.msra.mxu0 %v15857_v28  ;;  %v541_v34 = vld [vmem:[#allocation4 + $0xe48] sm:$0xff]  ;;  %v15826_v56 = vcombine.high %v413_v7, %v417_v3 }
 0x2a6   :  { %13286 = vmatprep.subr.bf16.mxu0 %v15850_v33  ;;  %v545_v6 = vld [vmem:[#allocation4 + $0xe68] sm:$0xff] }
 0x2a7   :  { %13326 = vmatpush2.bf16.msra.mxu1 %v15985_v50  ;;  %v15954_v23 = vcombine.high %v541_v34, %v545_v6  ;;  %v405_v35 = vld [vmem:[#allocation4 + $0xa08] sm:$0xff]  ;;  %v15953_v38 = vcombine.low %v541_v34, %v545_v6 }
 0x2a8   :  { %13327 = vmatprep.subr.bf16.mxu1 %v15978_v12  ;;  %v409_v28 = vld [vmem:[#allocation4 + $0xa28] sm:$0xff]  ;;  %v15825_v12 = vcombine.low %v413_v7, %v417_v3 }
 0x2a9   :  { %13287 = vmatpush2.bf16.msra.mxu0 %v15849_v52  ;;  %v533_v50 = vld [vmem:[#allocation4 + $0xe08] sm:$0xff]  ;;  %v15818_v0 = vcombine.high %v405_v35, %v409_v28 }
 0x2aa   :  { %13288 = vmatprep.subr.bf16.mxu0 %v15842_v60  ;;  %v537_v33 = vld [vmem:[#allocation4 + $0xe28] sm:$0xff] }
 0x2ab   :  { %13328 = vmatpush2.bf16.msra.mxu1 %v15977_v30  ;;  %v15946_v19 = vcombine.high %v533_v50, %v537_v33  ;;  %v653_v22 = vld [vmem:[#allocation4 + $0x11c8] sm:$0xff]  ;;  %v15945_v2 = vcombine.low %v533_v50, %v537_v33 }
 0x2ac   :  { %13329 = vmatprep.subr.bf16.mxu1 %v15970_v51  ;;  %v657_v52 = vld [vmem:[#allocation4 + $0x11e8] sm:$0xff]  ;;  %v15817_v51 = vcombine.low %v405_v35, %v409_v28 }
 0x2ad   :  { %13289 = vmatpush2.bf16.msra.mxu0 %v15841_v41  ;;  %v781_v30 = vld [vmem:[#allocation4 + $0x15c8] sm:$0xff]  ;;  %v16066_v57 = vcombine.high %v653_v22, %v657_v52 }
 0x2ae   :  { %13290 = vmatprep.subr.bf16.mxu0 %v15834_v46  ;;  %v785_v60 = vld [vmem:[#allocation4 + $0x15e8] sm:$0xff] }
 0x2af   :  { %13330 = vmatpush2.bf16.msra.mxu1 %v15969_v11  ;;  %v16194_v39 = vcombine.high %v781_v30, %v785_v60  ;;  %v645_v63 = vld [vmem:[#allocation4 + $0x1188] sm:$0xff]  ;;  %v16193_v7 = vcombine.low %v781_v30, %v785_v60 }
 0x2b0   :  { %13331 = vmatprep.subr.bf16.mxu1 %v15962_v61  ;;  %v649_v41 = vld [vmem:[#allocation4 + $0x11a8] sm:$0xff]  ;;  %v16065_v61 = vcombine.low %v653_v22, %v657_v52 }
 0x2b1   :  { %13291 = vmatpush2.bf16.msra.mxu0 %v15833_v17  ;;  %v773_v11 = vld [vmem:[#allocation4 + $0x1588] sm:$0xff]  ;;  %v16058_v3 = vcombine.high %v645_v63, %v649_v41  ;;  %v16057_v50 = vcombine.low %v645_v63, %v649_v41 }
 0x2b2   :  { %13292 = vmatprep.subr.bf16.mxu0 %v15826_v56  ;;  %v777_v46 = vld [vmem:[#allocation4 + $0x15a8] sm:$0xff] }
 0x2b3   :  { %13332 = vmatpush2.bf16.msra.mxu1 %v15961_v42  ;;  %v16186_v34 = vcombine.high %v773_v11, %v777_v46  ;;  %v637_v6 = vld [vmem:[#allocation4 + $0x1148] sm:$0xff] }
 0x2b4   :  { %13333 = vmatprep.subr.bf16.mxu1 %v15954_v23  ;;  %v641_v17 = vld [vmem:[#allocation4 + $0x1168] sm:$0xff] }
 0x2b5   :  { %13293 = vmatpush2.bf16.msra.mxu0 %v15825_v12  ;;  %v765_v56 = vld [vmem:[#allocation4 + $0x1548] sm:$0xff]  ;;  %v16185_v12 = vcombine.low %v773_v11, %v777_v46  ;;  %v16049_v63 = vcombine.low %v637_v6, %v641_v17 }
 0x2b6   :  { %13294 = vmatprep.subr.bf16.mxu0 %v15818_v0  ;;  %v769_v23 = vld [vmem:[#allocation4 + $0x1568] sm:$0xff] }
 0x2b7   :  { %13334 = vmatpush2.bf16.msra.mxu1 %v15953_v38  ;;  %v16050_v38 = vcombine.high %v637_v6, %v641_v17  ;;  %v16178_v52 = vcombine.high %v765_v56, %v769_v23  ;;  %v629_v30 = vld [vmem:[#allocation4 + $0x1108] sm:$0xff] }
 0x2b8   :  { %13335 = vmatprep.subr.bf16.mxu1 %v15946_v19  ;;  %v633_v60 = vld [vmem:[#allocation4 + $0x1128] sm:$0xff] }
 0x2b9   :  { %13295 = vmatpush2.bf16.msra.mxu0 %v15817_v51  ;;  %v757_v51 = vld [vmem:[#allocation4 + $0x1508] sm:$0xff]  ;;  %v16042_v11 = vcombine.high %v629_v30, %v633_v60 }
 0x2ba   :  { %13346 = vmatprep.subr.bf16.mxu0 %v16066_v57  ;;  %v613_v17 = vld [vmem:[#allocation4 + $0x1088] sm:$0xff] }
 0x2bb   :  { %13336 = vmatpush2.bf16.msra.mxu1 %v15945_v2  ;;  %v761_v2 = vld [vmem:[#allocation4 + $0x1528] sm:$0xff] }
 0x2bc   :  { %13387 = vmatprep.subr.bf16.mxu1 %v16194_v39  ;;  %v13052_v42 = vpop.f32.mrf.mxu0  ;;  %13297 = vmatmul.mubr.bf16.vlgmr.msra.gmra.mxu0 %v17757_v36 }
 0x2bd   :  { %v13053_v35 = vadd.f32 %v13052_v42, %v17950_v24  ;;  %13347 = vmatpush1.bf16.msra.mxu0 %v16065_v61  ;;  %13378 = vmatprep.mubr.bf16.mxu0 %v17769_v47  ;;  %v16170_v61 = vcombine.high %v757_v51, %v761_v2  ;;  %v753_v42 = vld [vmem:[#allocation4 + $0x14e8] sm:$0xff] }
 0x2be   :  { %v13093_v28 = vpop.f32.mrf.mxu1  ;;  %13338 = vmatmul.mubr.bf16.vlgmr.msra.gmra.mxu1 %v17763_v40  ;;  %v13054_v33 = vpop.f32.mrf.mxu0  ;;  %13348 = vmatprep.subr.bf16.mxu0 %v16058_v3  ;;  %v625_v3 = vld [vmem:[#allocation4 + $0x10e8] sm:$0xff] }
 0x2bf   :  { %13388 = vmatpush1.bf16.msra.mxu1 %v16193_v7  ;;  %v17959_v0 = vadd.f32 %v13093_v28, %v13053_v35  ;;  %v13055_v19 = vadd.f32 %v13054_v33, %v17954_v1  ;;  %13419 = vmatprep.mubr.bf16.mxu1 %v17774_v49  ;;  %v16177_v1 = vcombine.low %v765_v56, %v769_v23  ;;  %v621_v7 = vld [vmem:[#allocation4 + $0x10c8] sm:$0xff] }
 0x2c0   :  { %v13095_v22 = vpop.f32.mrf.mxu1  ;;  %13389 = vmatprep.subr.bf16.mxu1 %v16186_v34  ;;  %v13056_v24 = vpop.f32.mrf.mxu0  ;;  %v749_v34 = vld [vmem:[#allocation4 + $0x14c8] sm:$0xff]  ;;  %v16041_v35 = vcombine.low %v629_v30, %v633_v60  ;;  %v16169_v28 = vcombine.low %v757_v51, %v761_v2  ;;  %v16034_v33 = vcombine.high %v621_v7, %v625_v3  ;;  %v16033_v23 = vcombine.low %v621_v7, %v625_v3 }
 0x2c1   :  { %v17964_v57 = vadd.f32 %v13095_v22, %v13055_v19  ;;  %13349 = vmatpush1.bf16.msra.mxu0 %v16057_v50  ;;  %v16162_v6 = vcombine.high %v749_v34, %v753_v42  ;;  %v617_v50 = vld [vmem:[#allocation4 + $0x10a8] sm:$0xff] }
 0x2c2   :  { %v13097_v39 = vpop.f32.mrf.mxu1  ;;  %v13057_v41 = vpop.f32.mrf.mxu0  ;;  %13350 = vmatprep.subr.bf16.mxu0 %v16050_v38  ;;  %v745_v56 = vld [vmem:[#allocation4 + $0x14a8] sm:$0xff]  ;;  %v16161_v38 = vcombine.low %v749_v34, %v753_v42  ;;  %v16026_v19 = vcombine.high %v613_v17, %v617_v50  ;;  %v16025_v51 = vcombine.low %v613_v17, %v617_v50 }
 0x2c3   :  { %13390 = vmatpush1.bf16.msra.mxu1 %v16185_v12  ;;  %v741_v12 = vld [vmem:[#allocation4 + $0x1488] sm:$0xff] }
 0x2c4   :  { %v13098_v46 = vpop.f32.mrf.mxu1  ;;  %13391 = vmatprep.subr.bf16.mxu1 %v16178_v52  ;;  %v16154_v22 = vcombine.high %v741_v12, %v745_v56  ;;  %v605_v52 = vld [vmem:[#allocation4 + $0x1048] sm:$0xff]  ;;  %v16153_v2 = vcombine.low %v741_v12, %v745_v56 }
 0x2c5   :  { %13351 = vmatpush1.bf16.msra.mxu0 %v16049_v63  ;;  %v609_v30 = vld [vmem:[#allocation4 + $0x1068] sm:$0xff] }
 0x2c6   :  { %13352 = vmatprep.subr.bf16.mxu0 %v16042_v11  ;;  %v733_v60 = vld [vmem:[#allocation4 + $0x1448] sm:$0xff]  ;;  %v16018_v39 = vcombine.high %v605_v52, %v609_v30 }
 0x2c7   :  { %13392 = vmatpush1.bf16.msra.mxu1 %v16177_v1  ;;  %v737_v24 = vld [vmem:[#allocation4 + $0x1468] sm:$0xff] }
 0x2c8   :  { %13393 = vmatprep.subr.bf16.mxu1 %v16170_v61  ;;  %v16146_v63 = vcombine.high %v733_v60, %v737_v24  ;;  %v597_v41 = vld [vmem:[#allocation4 + $0x1008] sm:$0xff]  ;;  %v16017_v61 = vcombine.low %v605_v52, %v609_v30  ;;  %v16145_v7 = vcombine.low %v733_v60, %v737_v24 }
 0x2c9   :  { %13353 = vmatpush1.bf16.msra.mxu0 %v16041_v35  ;;  %v601_v1 = vld [vmem:[#allocation4 + $0x1028] sm:$0xff] }
 0x2ca   :  { %13354 = vmatprep.subr.bf16.mxu0 %v16034_v33  ;;  %v725_v11 = vld [vmem:[#allocation4 + $0x1408] sm:$0xff]  ;;  %v16010_v3 = vcombine.high %v597_v41, %v601_v1 }
 0x2cb   :  { %13394 = vmatpush1.bf16.msra.mxu1 %v16169_v28  ;;  %v729_v46 = vld [vmem:[#allocation4 + $0x1428] sm:$0xff] }
 0x2cc   :  { %13395 = vmatprep.subr.bf16.mxu1 %v16162_v6  ;;  %v16138_v34 = vcombine.high %v725_v11, %v729_v46  ;;  %v717_v42 = vld [vmem:[#allocation4 + $0x13c8] sm:$0xff]  ;;  %v16009_v6 = vcombine.low %v597_v41, %v601_v1  ;;  %v16137_v17 = vcombine.low %v725_v11, %v729_v46 }
 0x2cd   :  { %13355 = vmatpush1.bf16.msra.mxu0 %v16033_v23  ;;  %v721_v35 = vld [vmem:[#allocation4 + $0x13e8] sm:$0xff] }
 0x2ce   :  { %13356 = vmatprep.subr.bf16.mxu0 %v16026_v19  ;;  %v845_v28 = vld [vmem:[#allocation4 + $0x17c8] sm:$0xff]  ;;  %v16130_v50 = vcombine.high %v717_v42, %v721_v35 }
 0x2cf   :  { %13396 = vmatpush1.bf16.msra.mxu1 %v16161_v38  ;;  %v849_v33 = vld [vmem:[#allocation4 + $0x17e8] sm:$0xff] }
 0x2d0   :  { %13397 = vmatprep.subr.bf16.mxu1 %v16154_v22  ;;  %v16258_v12 = vcombine.high %v845_v28, %v849_v33  ;;  %v709_v56 = vld [vmem:[#allocation4 + $0x1388] sm:$0xff]  ;;  %v16129_v22 = vcombine.low %v717_v42, %v721_v35  ;;  %v16257_v52 = vcombine.low %v845_v28, %v849_v33 }
 0x2d1   :  { %13357 = vmatpush1.bf16.msra.mxu0 %v16025_v51  ;;  %v713_v23 = vld [vmem:[#allocation4 + $0x13a8] sm:$0xff] }
 0x2d2   :  { %13358 = vmatprep.subr.bf16.mxu0 %v16018_v39  ;;  %v837_v38 = vld [vmem:[#allocation4 + $0x1788] sm:$0xff]  ;;  %v16122_v30 = vcombine.high %v709_v56, %v713_v23 }
 0x2d3   :  { %13398 = vmatpush1.bf16.msra.mxu1 %v16153_v2  ;;  %v841_v19 = vld [vmem:[#allocation4 + $0x17a8] sm:$0xff] }
 0x2d4   :  { %13399 = vmatprep.subr.bf16.mxu1 %v16146_v63  ;;  %v16250_v60 = vcombine.high %v837_v38, %v841_v19  ;;  %v701_v24 = vld [vmem:[#allocation4 + $0x1348] sm:$0xff]  ;;  %v16121_v63 = vcombine.low %v709_v56, %v713_v23  ;;  %v16249_v41 = vcombine.low %v837_v38, %v841_v19 }
 0x2d5   :  { %13359 = vmatpush1.bf16.msra.mxu0 %v16017_v61  ;;  %v705_v51 = vld [vmem:[#allocation4 + $0x1368] sm:$0xff] }
 0x2d6   :  { %13360 = vmatprep.subr.bf16.mxu0 %v16010_v3  ;;  %v829_v2 = vld [vmem:[#allocation4 + $0x1748] sm:$0xff]  ;;  %v16114_v1 = vcombine.high %v701_v24, %v705_v51 }
 0x2d7   :  { %13400 = vmatpush1.bf16.msra.mxu1 %v16145_v7  ;;  %v833_v39 = vld [vmem:[#allocation4 + $0x1768] sm:$0xff] }
 0x2d8   :  { %13401 = vmatprep.subr.bf16.mxu1 %v16138_v34  ;;  %v16242_v11 = vcombine.high %v829_v2, %v833_v39  ;;  %v693_v46 = vld [vmem:[#allocation4 + $0x1308] sm:$0xff]  ;;  %v16113_v34 = vcombine.low %v701_v24, %v705_v51  ;;  %v16241_v42 = vcombine.low %v829_v2, %v833_v39 }
 0x2d9   :  { %13361 = vmatpush1.bf16.msra.mxu0 %v16009_v6  ;;  %v697_v61 = vld [vmem:[#allocation4 + $0x1328] sm:$0xff] }
 0x2da   :  { %13362 = vmatprep.subr.bf16.mxu0 %v16130_v50  ;;  %v821_v7 = vld [vmem:[#allocation4 + $0x1708] sm:$0xff]  ;;  %v16106_v35 = vcombine.high %v693_v46, %v697_v61 }
 0x2db   :  { %13402 = vmatpush1.bf16.msra.mxu1 %v16137_v17  ;;  %v825_v3 = vld [vmem:[#allocation4 + $0x1728] sm:$0xff] }
 0x2dc   :  { %13403 = vmatprep.subr.bf16.mxu1 %v16258_v12  ;;  %v16234_v28 = vcombine.high %v821_v7, %v825_v3  ;;  %v685_v33 = vld [vmem:[#allocation4 + $0x12c8] sm:$0xff]  ;;  %v16105_v12 = vcombine.low %v693_v46, %v697_v61  ;;  %v16233_v56 = vcombine.low %v821_v7, %v825_v3 }
 0x2dd   :  { %13363 = vmatpush2.bf16.msra.mxu0 %v16129_v22  ;;  %v689_v6 = vld [vmem:[#allocation4 + $0x12e8] sm:$0xff] }
 0x2de   :  { %13364 = vmatprep.subr.bf16.mxu0 %v16122_v30  ;;  %v813_v17 = vld [vmem:[#allocation4 + $0x16c8] sm:$0xff]  ;;  %v16098_v23 = vcombine.high %v685_v33, %v689_v6 }
 0x2df   :  { %13404 = vmatpush2.bf16.msra.mxu1 %v16257_v52  ;;  %v817_v50 = vld [vmem:[#allocation4 + $0x16e8] sm:$0xff] }
 0x2e0   :  { %13405 = vmatprep.subr.bf16.mxu1 %v16250_v60  ;;  %v16226_v38 = vcombine.high %v813_v17, %v817_v50  ;;  %v677_v19 = vld [vmem:[#allocation4 + $0x1288] sm:$0xff]  ;;  %v16097_v60 = vcombine.low %v685_v33, %v689_v6  ;;  %v16225_v24 = vcombine.low %v813_v17, %v817_v50 }
 0x2e1   :  { %13365 = vmatpush2.bf16.msra.mxu0 %v16121_v63  ;;  %v681_v22 = vld [vmem:[#allocation4 + $0x12a8] sm:$0xff] }
 0x2e2   :  { %13366 = vmatprep.subr.bf16.mxu0 %v16114_v1  ;;  %v805_v52 = vld [vmem:[#allocation4 + $0x1688] sm:$0xff]  ;;  %v16090_v51 = vcombine.high %v677_v19, %v681_v22 }
 0x2e3   :  { %13406 = vmatpush2.bf16.msra.mxu1 %v16249_v41  ;;  %v809_v30 = vld [vmem:[#allocation4 + $0x16a8] sm:$0xff] }
 0x2e4   :  { %13407 = vmatprep.subr.bf16.mxu1 %v16242_v11  ;;  %v16218_v2 = vcombine.high %v805_v52, %v809_v30  ;;  %v669_v39 = vld [vmem:[#allocation4 + $0x1248] sm:$0xff]  ;;  %v16089_v11 = vcombine.low %v677_v19, %v681_v22  ;;  %v16217_v46 = vcombine.low %v805_v52, %v809_v30 }
 0x2e5   :  { %13367 = vmatpush2.bf16.msra.mxu0 %v16113_v34  ;;  %v673_v63 = vld [vmem:[#allocation4 + $0x1268] sm:$0xff] }
 0x2e6   :  { %13368 = vmatprep.subr.bf16.mxu0 %v16106_v35  ;;  %v797_v41 = vld [vmem:[#allocation4 + $0x1648] sm:$0xff]  ;;  %v16082_v61 = vcombine.high %v669_v39, %v673_v63 }
 0x2e7   :  { %13408 = vmatpush2.bf16.msra.mxu1 %v16241_v42  ;;  %v801_v1 = vld [vmem:[#allocation4 + $0x1668] sm:$0xff] }
 0x2e8   :  { %13409 = vmatprep.subr.bf16.mxu1 %v16234_v28  ;;  %v16210_v7 = vcombine.high %v797_v41, %v801_v1  ;;  %v661_v3 = vld [vmem:[#allocation4 + $0x1208] sm:$0xff]  ;;  %v16081_v28 = vcombine.low %v669_v39, %v673_v63  ;;  %v16209_v33 = vcombine.low %v797_v41, %v801_v1 }
 0x2e9   :  { %13369 = vmatpush2.bf16.msra.mxu0 %v16105_v12  ;;  %v665_v34 = vld [vmem:[#allocation4 + $0x1228] sm:$0xff] }
 0x2ea   :  { %13370 = vmatprep.subr.bf16.mxu0 %v16098_v23  ;;  %v789_v42 = vld [vmem:[#allocation4 + $0x1608] sm:$0xff]  ;;  %v16074_v6 = vcombine.high %v661_v3, %v665_v34 }
 0x2eb   :  { %13410 = vmatpush2.bf16.msra.mxu1 %v16233_v56  ;;  %v793_v35 = vld [vmem:[#allocation4 + $0x1628] sm:$0xff] }
 0x2ec   :  { %13411 = vmatprep.subr.bf16.mxu1 %v16226_v38  ;;  %v16202_v17 = vcombine.high %v789_v42, %v793_v35  ;;  %v909_v50 = vld [vmem:[#allocation4 + $0x19c8] sm:$0xff]  ;;  %v16073_v38 = vcombine.low %v661_v3, %v665_v34  ;;  %v16201_v19 = vcombine.low %v789_v42, %v793_v35 }
 0x2ed   :  { %13371 = vmatpush2.bf16.msra.mxu0 %v16097_v60  ;;  %v913_v12 = vld [vmem:[#allocation4 + $0x19e8] sm:$0xff] }
 0x2ee   :  { %13372 = vmatprep.subr.bf16.mxu0 %v16090_v51  ;;  %v1037_v56 = vld [vmem:[#allocation4 + $0x1dc8] sm:$0xff]  ;;  %v16322_v22 = vcombine.high %v909_v50, %v913_v12 }
 0x2ef   :  { %13412 = vmatpush2.bf16.msra.mxu1 %v16225_v24  ;;  %v1041_v23 = vld [vmem:[#allocation4 + $0x1de8] sm:$0xff] }
 0x2f0   :  { %13413 = vmatprep.subr.bf16.mxu1 %v16218_v2  ;;  %v16450_v52 = vcombine.high %v1037_v56, %v1041_v23  ;;  %v901_v30 = vld [vmem:[#allocation4 + $0x1988] sm:$0xff]  ;;  %v16321_v2 = vcombine.low %v909_v50, %v913_v12  ;;  %v16449_v39 = vcombine.low %v1037_v56, %v1041_v23 }
 0x2f1   :  { %13373 = vmatpush2.bf16.msra.mxu0 %v16089_v11  ;;  %v905_v60 = vld [vmem:[#allocation4 + $0x19a8] sm:$0xff] }
 0x2f2   :  { %13374 = vmatprep.subr.bf16.mxu0 %v16082_v61  ;;  %v1029_v24 = vld [vmem:[#allocation4 + $0x1d88] sm:$0xff]  ;;  %v16314_v63 = vcombine.high %v901_v30, %v905_v60  ;;  %v16313_v42 = vcombine.low %v901_v30, %v905_v60 }
 0x2f3   :  { %13414 = vmatpush2.bf16.msra.mxu1 %v16217_v46  ;;  %v1033_v51 = vld [vmem:[#allocation4 + $0x1da8] sm:$0xff] }
 0x2f4   :  { %13415 = vmatprep.subr.bf16.mxu1 %v16210_v7  ;;  %v16442_v41 = vcombine.high %v1029_v24, %v1033_v51  ;;  %v893_v1 = vld [vmem:[#allocation4 + $0x1948] sm:$0xff] }
 0x2f5   :  { %13375 = vmatpush2.bf16.msra.mxu0 %v16081_v28  ;;  %v897_v11 = vld [vmem:[#allocation4 + $0x1968] sm:$0xff]  ;;  %v16441_v28 = vcombine.low %v1029_v24, %v1033_v51 }
 0x2f6   :  { %13376 = vmatprep.subr.bf16.mxu0 %v16074_v6  ;;  %v1021_v61 = vld [vmem:[#allocation4 + $0x1d48] sm:$0xff]  ;;  %v16305_v30 = vcombine.low %v893_v1, %v897_v11 }
 0x2f7   :  { %13416 = vmatpush2.bf16.msra.mxu1 %v16209_v33  ;;  %v1025_v7 = vld [vmem:[#allocation4 + $0x1d68] sm:$0xff]  ;;  %v16306_v33 = vcombine.high %v893_v1, %v897_v11 }
 0x2f8   :  { %13417 = vmatprep.subr.bf16.mxu1 %v16202_v17  ;;  %v16434_v12 = vcombine.high %v1021_v61, %v1025_v7  ;;  %v885_v56 = vld [vmem:[#allocation4 + $0x1908] sm:$0xff] }
 0x2f9   :  { %13377 = vmatpush2.bf16.msra.mxu0 %v16073_v38  ;;  %v889_v23 = vld [vmem:[#allocation4 + $0x1928] sm:$0xff] }
 0x2fa   :  { %13428 = vmatprep.subr.bf16.mxu0 %v16322_v22  ;;  %v1013_v38 = vld [vmem:[#allocation4 + $0x1d08] sm:$0xff]  ;;  %v16298_v24 = vcombine.high %v885_v56, %v889_v23 }
 0x2fb   :  { %13418 = vmatpush2.bf16.msra.mxu1 %v16201_v19  ;;  %v1017_v19 = vld [vmem:[#allocation4 + $0x1d28] sm:$0xff] }
 0x2fc   :  { %13469 = vmatprep.subr.bf16.mxu1 %v16450_v52  ;;  %v13134_v46 = vpop.f32.mrf.mxu0  ;;  %13379 = vmatmul.mubr.bf16.vlgmr.msra.gmra.mxu0 %v17781_v4  ;;  %v869_v11 = vld [vmem:[#allocation4 + $0x1888] sm:$0xff] }
 0x2fd   :  { %v13135_v3 = vadd.f32 %v13134_v46, %v17959_v0  ;;  %13429 = vmatpush1.bf16.msra.mxu0 %v16321_v2  ;;  %13460 = vmatprep.mubr.bf16.mxu0 %v17793_v15  ;;  %v16426_v2 = vcombine.high %v1013_v38, %v1017_v19  ;;  %v1009_v46 = vld [vmem:[#allocation4 + $0x1ce8] sm:$0xff] }
 0x2fe   :  { %v13175_v34 = vpop.f32.mrf.mxu1  ;;  %13420 = vmatmul.mubr.bf16.vlgmr.msra.gmra.mxu1 %v17787_v8  ;;  %v13136_v35 = vpop.f32.mrf.mxu0  ;;  %13430 = vmatprep.subr.bf16.mxu0 %v16314_v63  ;;  %v881_v63 = vld [vmem:[#allocation4 + $0x18e8] sm:$0xff] }
 0x2ff   :  { %13470 = vmatpush1.bf16.msra.mxu1 %v16449_v39  ;;  %v17969_v6 = vadd.f32 %v13175_v34, %v13135_v3  ;;  %v13137_v17 = vadd.f32 %v13136_v35, %v17964_v57  ;;  %13501 = vmatprep.mubr.bf16.mxu1 %v17798_v18  ;;  %v16433_v57 = vcombine.low %v1021_v61, %v1025_v7  ;;  %v877_v39 = vld [vmem:[#allocation4 + $0x18c8] sm:$0xff] }
 0x300   :  { %v13177_v50 = vpop.f32.mrf.mxu1  ;;  %13471 = vmatprep.subr.bf16.mxu1 %v16442_v41  ;;  %v13138_v0 = vpop.f32.mrf.mxu0  ;;  %v1005_v41 = vld [vmem:[#allocation4 + $0x1cc8] sm:$0xff]  ;;  %v16297_v3 = vcombine.low %v885_v56, %v889_v23  ;;  %v16425_v34 = vcombine.low %v1013_v38, %v1017_v19  ;;  %v16290_v35 = vcombine.high %v877_v39, %v881_v63  ;;  %v16289_v7 = vcombine.low %v877_v39, %v881_v63 }
 0x301   :  { %v17974_v22 = vadd.f32 %v13177_v50, %v13137_v17  ;;  %13431 = vmatpush1.bf16.msra.mxu0 %v16313_v42  ;;  %v16418_v1 = vcombine.high %v1005_v41, %v1009_v46  ;;  %v873_v42 = vld [vmem:[#allocation4 + $0x18a8] sm:$0xff] }
 0x302   :  { %v13179_v52 = vpop.f32.mrf.mxu1  ;;  %v13139_v60 = vpop.f32.mrf.mxu0  ;;  %13432 = vmatprep.subr.bf16.mxu0 %v16306_v33  ;;  %v1001_v61 = vld [vmem:[#allocation4 + $0x1ca8] sm:$0xff]  ;;  %v16417_v33 = vcombine.low %v1005_v41, %v1009_v46  ;;  %v16282_v17 = vcombine.high %v869_v11, %v873_v42  ;;  %v16281_v38 = vcombine.low %v869_v11, %v873_v42 }
 0x303   :  { %13472 = vmatpush1.bf16.msra.mxu1 %v16441_v28  ;;  %v997_v28 = vld [vmem:[#allocation4 + $0x1c88] sm:$0xff] }
 0x304   :  { %v13180_v51 = vpop.f32.mrf.mxu1  ;;  %13473 = vmatprep.subr.bf16.mxu1 %v16434_v12  ;;  %v16410_v50 = vcombine.high %v997_v28, %v1001_v61  ;;  %v861_v12 = vld [vmem:[#allocation4 + $0x1848] sm:$0xff]  ;;  %v16409_v19 = vcombine.low %v997_v28, %v1001_v61 }
 0x305   :  { %13433 = vmatpush1.bf16.msra.mxu0 %v16305_v30  ;;  %v865_v56 = vld [vmem:[#allocation4 + $0x1868] sm:$0xff] }
 0x306   :  { %13434 = vmatprep.subr.bf16.mxu0 %v16298_v24  ;;  %v989_v23 = vld [vmem:[#allocation4 + $0x1c48] sm:$0xff]  ;;  %v16274_v52 = vcombine.high %v861_v12, %v865_v56 }
 0x307   :  { %13474 = vmatpush1.bf16.msra.mxu1 %v16433_v57  ;;  %v993_v0 = vld [vmem:[#allocation4 + $0x1c68] sm:$0xff] }
 0x308   :  { %13475 = vmatprep.subr.bf16.mxu1 %v16426_v2  ;;  %v16402_v30 = vcombine.high %v989_v23, %v993_v0  ;;  %v853_v60 = vld [vmem:[#allocation4 + $0x1808] sm:$0xff]  ;;  %v16273_v2 = vcombine.low %v861_v12, %v865_v56  ;;  %v16401_v39 = vcombine.low %v989_v23, %v993_v0 }
 0x309   :  { %13435 = vmatpush1.bf16.msra.mxu0 %v16297_v3  ;;  %v857_v57 = vld [vmem:[#allocation4 + $0x1828] sm:$0xff] }
 0x30a   :  { %13436 = vmatprep.subr.bf16.mxu0 %v16290_v35  ;;  %v981_v24 = vld [vmem:[#allocation4 + $0x1c08] sm:$0xff]  ;;  %v16266_v63 = vcombine.high %v853_v60, %v857_v57 }
 0x30b   :  { %13476 = vmatpush1.bf16.msra.mxu1 %v16425_v34  ;;  %v985_v51 = vld [vmem:[#allocation4 + $0x1c28] sm:$0xff] }
 0x30c   :  { %13477 = vmatprep.subr.bf16.mxu1 %v16418_v1  ;;  %v16394_v41 = vcombine.high %v981_v24, %v985_v51  ;;  %v973_v46 = vld [vmem:[#allocation4 + $0x1bc8] sm:$0xff]  ;;  %v16265_v1 = vcombine.low %v853_v60, %v857_v57  ;;  %v16393_v11 = vcombine.low %v981_v24, %v985_v51 }
 0x30d   :  { %13437 = vmatpush1.bf16.msra.mxu0 %v16289_v7  ;;  %v977_v3 = vld [vmem:[#allocation4 + $0x1be8] sm:$0xff] }
 0x30e   :  { %13438 = vmatprep.subr.bf16.mxu0 %v16282_v17  ;;  %v1101_v34 = vld [vmem:[#allocation4 + $0x1fc8] sm:$0xff]  ;;  %v16386_v42 = vcombine.high %v973_v46, %v977_v3 }
 0x30f   :  { %13478 = vmatpush1.bf16.msra.mxu1 %v16417_v33  ;;  %v1105_v35 = vld [vmem:[#allocation4 + $0x1fe8] sm:$0xff] }
 0x310   :  { %13479 = vmatprep.subr.bf16.mxu1 %v16410_v50  ;;  %v16514_v28 = vcombine.high %v1101_v34, %v1105_v35  ;;  %v965_v61 = vld [vmem:[#allocation4 + $0x1b88] sm:$0xff]  ;;  %v16385_v50 = vcombine.low %v973_v46, %v977_v3  ;;  %v16513_v12 = vcombine.low %v1101_v34, %v1105_v35 }
 0x311   :  { %13439 = vmatpush1.bf16.msra.mxu0 %v16281_v38  ;;  %v969_v7 = vld [vmem:[#allocation4 + $0x1ba8] sm:$0xff] }
 0x312   :  { %13440 = vmatprep.subr.bf16.mxu0 %v16274_v52  ;;  %v1093_v33 = vld [vmem:[#allocation4 + $0x1f88] sm:$0xff]  ;;  %v16378_v56 = vcombine.high %v965_v61, %v969_v7 }
 0x313   :  { %13480 = vmatpush1.bf16.msra.mxu1 %v16409_v19  ;;  %v1097_v17 = vld [vmem:[#allocation4 + $0x1fa8] sm:$0xff] }
 0x314   :  { %13481 = vmatprep.subr.bf16.mxu1 %v16402_v30  ;;  %v16506_v23 = vcombine.high %v1093_v33, %v1097_v17  ;;  %v957_v0 = vld [vmem:[#allocation4 + $0x1b48] sm:$0xff]  ;;  %v16377_v30 = vcombine.low %v965_v61, %v969_v7  ;;  %v16505_v60 = vcombine.low %v1093_v33, %v1097_v17 }
 0x315   :  { %13441 = vmatpush1.bf16.msra.mxu0 %v16273_v2  ;;  %v961_v38 = vld [vmem:[#allocation4 + $0x1b68] sm:$0xff] }
 0x316   :  { %13442 = vmatprep.subr.bf16.mxu0 %v16266_v63  ;;  %v1085_v19 = vld [vmem:[#allocation4 + $0x1f48] sm:$0xff]  ;;  %v16370_v57 = vcombine.high %v957_v0, %v961_v38 }
 0x317   :  { %13482 = vmatpush1.bf16.msra.mxu1 %v16401_v39  ;;  %v1089_v52 = vld [vmem:[#allocation4 + $0x1f68] sm:$0xff] }
 0x318   :  { %13483 = vmatprep.subr.bf16.mxu1 %v16394_v41  ;;  %v16498_v24 = vcombine.high %v1085_v19, %v1089_v52  ;;  %v949_v51 = vld [vmem:[#allocation4 + $0x1b08] sm:$0xff]  ;;  %v16369_v41 = vcombine.low %v957_v0, %v961_v38  ;;  %v16497_v46 = vcombine.low %v1085_v19, %v1089_v52 }
 0x319   :  { %13443 = vmatpush1.bf16.msra.mxu0 %v16265_v1  ;;  %v953_v2 = vld [vmem:[#allocation4 + $0x1b28] sm:$0xff] }
 0x31a   :  { %13444 = vmatprep.subr.bf16.mxu0 %v16386_v42  ;;  %v1077_v39 = vld [vmem:[#allocation4 + $0x1f08] sm:$0xff]  ;;  %v16362_v3 = vcombine.high %v949_v51, %v953_v2 }
 0x31b   :  { %13484 = vmatpush1.bf16.msra.mxu1 %v16393_v11  ;;  %v1081_v63 = vld [vmem:[#allocation4 + $0x1f28] sm:$0xff] }
 0x31c   :  { %13485 = vmatprep.subr.bf16.mxu1 %v16514_v28  ;;  %v16490_v34 = vcombine.high %v1077_v39, %v1081_v63  ;;  %v941_v35 = vld [vmem:[#allocation4 + $0x1ac8] sm:$0xff]  ;;  %v16361_v28 = vcombine.low %v949_v51, %v953_v2  ;;  %v16489_v61 = vcombine.low %v1077_v39, %v1081_v63 }
 0x31d   :  { %13445 = vmatpush2.bf16.msra.mxu0 %v16385_v50  ;;  %v945_v1 = vld [vmem:[#allocation4 + $0x1ae8] sm:$0xff] }
 0x31e   :  { %13446 = vmatprep.subr.bf16.mxu0 %v16378_v56  ;;  %v1069_v11 = vld [vmem:[#allocation4 + $0x1ec8] sm:$0xff]  ;;  %v16354_v7 = vcombine.high %v941_v35, %v945_v1 }
 0x31f   :  { %13486 = vmatpush2.bf16.msra.mxu1 %v16513_v12  ;;  %v1073_v42 = vld [vmem:[#allocation4 + $0x1ee8] sm:$0xff] }
 0x320   :  { %13487 = vmatprep.subr.bf16.mxu1 %v16506_v23  ;;  %v16482_v33 = vcombine.high %v1069_v11, %v1073_v42  ;;  %v933_v17 = vld [vmem:[#allocation4 + $0x1a88] sm:$0xff]  ;;  %v16353_v23 = vcombine.low %v941_v35, %v945_v1  ;;  %v16481_v0 = vcombine.low %v1069_v11, %v1073_v42 }
 0x321   :  { %13447 = vmatpush2.bf16.msra.mxu0 %v16377_v30  ;;  %v937_v50 = vld [vmem:[#allocation4 + $0x1aa8] sm:$0xff] }
 0x322   :  { %13448 = vmatprep.subr.bf16.mxu0 %v16370_v57  ;;  %v1061_v12 = vld [vmem:[#allocation4 + $0x1e88] sm:$0xff]  ;;  %v16346_v38 = vcombine.high %v933_v17, %v937_v50 }
 0x323   :  { %13488 = vmatpush2.bf16.msra.mxu1 %v16505_v60  ;;  %v1065_v56 = vld [vmem:[#allocation4 + $0x1ea8] sm:$0xff] }
 0x324   :  { %13489 = vmatprep.subr.bf16.mxu1 %v16498_v24  ;;  %v16474_v19 = vcombine.high %v1061_v12, %v1065_v56  ;;  %v925_v52 = vld [vmem:[#allocation4 + $0x1a48] sm:$0xff]  ;;  %v16345_v24 = vcombine.low %v933_v17, %v937_v50  ;;  %v16473_v51 = vcombine.low %v1061_v12, %v1065_v56  ;;  %v2144_v17 = vsub.s32 2, %v17803_v32 }
 0x325   :  { %13449 = vmatpush2.bf16.msra.mxu0 %v16369_v41  ;;  %v929_v30 = vld [vmem:[#allocation4 + $0x1a68] sm:$0xff] }
 0x326   :  { %13450 = vmatprep.subr.bf16.mxu0 %v16362_v3  ;;  %v1053_v60 = vld [vmem:[#allocation4 + $0x1e48] sm:$0xff]  ;;  %v16338_v2 = vcombine.high %v925_v52, %v929_v30 }
 0x327   :  { %13490 = vmatpush2.bf16.msra.mxu1 %v16497_v46  ;;  %v1057_v57 = vld [vmem:[#allocation4 + $0x1e68] sm:$0xff] }
 0x328   :  { %13491 = vmatprep.subr.bf16.mxu1 %v16490_v34  ;;  %v16466_v39 = vcombine.high %v1053_v60, %v1057_v57  ;;  %v917_v63 = vld [vmem:[#allocation4 + $0x1a08] sm:$0xff]  ;;  %v16337_v34 = vcombine.low %v925_v52, %v929_v30  ;;  %v16465_v35 = vcombine.low %v1053_v60, %v1057_v57  ;;  %v17583_v30 = vld [vmem:[#allocation6] sm:$0xff] }
 0x329   :  { %13451 = vmatpush2.bf16.msra.mxu0 %v16361_v28  ;;  %v921_v41 = vld [vmem:[#allocation4 + $0x1a28] sm:$0xff]  ;;  %v2145_v60 = vrot.slane %v17583_v30, %v2144_v17 }
 0x32a   :  { %13452 = vmatprep.subr.bf16.mxu0 %v16354_v7  ;;  %v1045_v46 = vld [vmem:[#allocation4 + $0x1e08] sm:$0xff]  ;;  %v16330_v1 = vcombine.high %v917_v63, %v921_v41 }
 0x32b   :  { %13492 = vmatpush2.bf16.msra.mxu1 %v16489_v61  ;;  %v1049_v3 = vld [vmem:[#allocation4 + $0x1e28] sm:$0xff] }
 0x32c   :  { %13493 = vmatprep.subr.bf16.mxu1 %v16482_v33  ;;  %v16458_v11 = vcombine.high %v1045_v46, %v1049_v3  ;;  %v1165_v42 = vld [vmem:[#allocation4 + $0x21c8] sm:$0xff]  ;;  %v16329_v33 = vcombine.low %v917_v63, %v921_v41  ;;  %v16457_v50 = vcombine.low %v1045_v46, %v1049_v3 }
 0x32d   :  { %13453 = vmatpush2.bf16.msra.mxu0 %v16353_v23  ;;  %v1169_v28 = vld [vmem:[#allocation4 + $0x21e8] sm:$0xff]  ;;  %v2148_v23 = vsub.s32 3, %v17803_v32 }
 0x32e   :  { %13454 = vmatprep.subr.bf16.mxu0 %v16346_v38  ;;  %v1293_v61 = vld [vmem:[#allocation4 + $0x25c8] sm:$0xff]  ;;  %v16578_v12 = vcombine.high %v1165_v42, %v1169_v28  ;;  %v16577_v57 = vcombine.low %v1165_v42, %v1169_v28 }
 0x32f   :  { %13494 = vmatpush2.bf16.msra.mxu1 %v16481_v0  ;;  %v1297_v7 = vld [vmem:[#allocation4 + $0x25e8] sm:$0xff] }
 0x330   :  { %13495 = vmatprep.subr.bf16.mxu1 %v16474_v19  ;;  %v16706_v56 = vcombine.high %v1293_v61, %v1297_v7  ;;  %v1157_v0 = vld [vmem:[#allocation4 + $0x2188] sm:$0xff] }
 0x331   :  { %13455 = vmatpush2.bf16.msra.mxu0 %v16345_v24  ;;  %v1161_v38 = vld [vmem:[#allocation4 + $0x21a8] sm:$0xff]  ;;  %v16705_v24 = vcombine.low %v1293_v61, %v1297_v7 }
 0x332   :  { %13456 = vmatprep.subr.bf16.mxu0 %v16338_v2  ;;  %v1285_v19 = vld [vmem:[#allocation4 + $0x2588] sm:$0xff]  ;;  %v2149_v2 = vrot.slane %v17583_v30, %v2148_v23 }
 0x333   :  { %13496 = vmatpush2.bf16.msra.mxu1 %v16473_v51  ;;  %v1289_v52 = vld [vmem:[#allocation4 + $0x25a8] sm:$0xff]  ;;  %v16570_v51 = vcombine.high %v1157_v0, %v1161_v38 }
 0x334   :  { %13497 = vmatprep.subr.bf16.mxu1 %v16466_v39  ;;  %v16698_v39 = vcombine.high %v1285_v19, %v1289_v52  ;;  %v1149_v63 = vld [vmem:[#allocation4 + $0x2148] sm:$0xff]  ;;  %v16697_v28 = vcombine.low %v1285_v19, %v1289_v52 }
 0x335   :  { %13457 = vmatpush2.bf16.msra.mxu0 %v16337_v34  ;;  %v1153_v41 = vld [vmem:[#allocation4 + $0x2168] sm:$0xff] }
 0x336   :  { %13458 = vmatprep.subr.bf16.mxu0 %v16330_v1  ;;  %v1277_v3 = vld [vmem:[#allocation4 + $0x2548] sm:$0xff]  ;;  %v16562_v61 = vcombine.high %v1149_v63, %v1153_v41  ;;  %v16561_v19 = vcombine.low %v1149_v63, %v1153_v41 }
 0x337   :  { %13498 = vmatpush2.bf16.msra.mxu1 %v16465_v35  ;;  %v1281_v34 = vld [vmem:[#allocation4 + $0x2568] sm:$0xff] }
 0x338   :  { %13499 = vmatprep.subr.bf16.mxu1 %v16458_v11  ;;  %v16569_v11 = vcombine.low %v1157_v0, %v1161_v38  ;;  %v1269_v30 = vld [vmem:[#allocation4 + $0x2508] sm:$0xff] }
 0x339   :  { %13459 = vmatpush2.bf16.msra.mxu0 %v16329_v33  ;;  %v1125_v41 = vld [vmem:[#allocation4 + $0x2088] sm:$0xff] }
 0x33a   :  { %13510 = vmatprep.subr.bf16.mxu0 %v16578_v12  ;;  %v1141_v12 = vld [vmem:[#allocation4 + $0x2108] sm:$0xff] }
 0x33b   :  { %13500 = vmatpush2.bf16.msra.mxu1 %v16457_v50  ;;  %v16690_v50 = vcombine.high %v1277_v3, %v1281_v34 }
 0x33c   :  { %13551 = vmatprep.subr.bf16.mxu1 %v16706_v56  ;;  %v13216_v46 = vpop.f32.mrf.mxu0  ;;  %13461 = vmatmul.mubr.bf16.vlgmr.msra.gmra.mxu0 %v17809_v55  ;;  %v1145_v56 = vld [vmem:[#allocation4 + $0x2128] sm:$0xff] }
 0x33d   :  { %v13217_v35 = vadd.f32 %v13216_v46, %v2145_v60  ;;  %13511 = vmatpush1.bf16.msra.mxu0 %v16577_v57  ;;  %13542 = vmatprep.mubr.bf16.mxu0 %v17821_v9  ;;  %v1273_v60 = vld [vmem:[#allocation4 + $0x2528] sm:$0xff]  ;;  %v16689_v57 = vcombine.low %v1277_v3, %v1281_v34 }
 0x33e   :  { %v13257_v1 = vpop.f32.mrf.mxu1  ;;  %13502 = vmatmul.mubr.bf16.vlgmr.msra.gmra.mxu1 %v17815_v62  ;;  %v13218_v42 = vpop.f32.mrf.mxu0  ;;  %13512 = vmatprep.subr.bf16.mxu0 %v16570_v51  ;;  %v1137_v46 = vld [vmem:[#allocation4 + $0x20e8] sm:$0xff] }
 0x33f   :  { %13552 = vmatpush1.bf16.msra.mxu1 %v16705_v24  ;;  %v17980_v7 = vadd.f32 %v13257_v1, %v13217_v35  ;;  %v13219_v33 = vadd.f32 %v13218_v42, %v2149_v2  ;;  %13583 = vmatprep.mubr.bf16.mxu1 %v17826_v13  ;;  %v16554_v24 = vcombine.high %v1141_v12, %v1145_v56  ;;  %v1261_v35 = vld [vmem:[#allocation4 + $0x24c8] sm:$0xff] }
 0x340   :  { %v13259_v17 = vpop.f32.mrf.mxu1  ;;  %13553 = vmatprep.subr.bf16.mxu1 %v16698_v39  ;;  %v13220_v23 = vpop.f32.mrf.mxu0  ;;  %v16682_v2 = vcombine.high %v1269_v30, %v1273_v60  ;;  %v1133_v39 = vld [vmem:[#allocation4 + $0x20c8] sm:$0xff]  ;;  %v16553_v42 = vcombine.low %v1141_v12, %v1145_v56 }
 0x341   :  { %v17984_v0 = vadd.f32 %v13259_v17, %v13219_v33  ;;  %13513 = vmatpush1.bf16.msra.mxu0 %v16569_v11  ;;  %v1265_v1 = vld [vmem:[#allocation4 + $0x24e8] sm:$0xff]  ;;  %v16681_v33 = vcombine.low %v1269_v30, %v1273_v60  ;;  %v16546_v17 = vcombine.high %v1133_v39, %v1137_v46  ;;  %v16545_v34 = vcombine.low %v1133_v39, %v1137_v46 }
 0x342   :  { %v13261_v38 = vpop.f32.mrf.mxu1  ;;  %v13221_v52 = vpop.f32.mrf.mxu0  ;;  %13514 = vmatprep.subr.bf16.mxu0 %v16562_v61  ;;  %v16674_v63 = vcombine.high %v1261_v35, %v1265_v1  ;;  %v1129_v11 = vld [vmem:[#allocation4 + $0x20a8] sm:$0xff]  ;;  %v16673_v61 = vcombine.low %v1261_v35, %v1265_v1 }
 0x343   :  { %13554 = vmatpush1.bf16.msra.mxu1 %v16697_v28  ;;  %v1253_v28 = vld [vmem:[#allocation4 + $0x2488] sm:$0xff]  ;;  %v16537_v30 = vcombine.low %v1125_v41, %v1129_v11 }
 0x344   :  { %v13262_v51 = vpop.f32.mrf.mxu1  ;;  %13555 = vmatprep.subr.bf16.mxu1 %v16690_v50  ;;  %v1257_v3 = vld [vmem:[#allocation4 + $0x24a8] sm:$0xff]  ;;  %v16538_v50 = vcombine.high %v1125_v41, %v1129_v11 }
 0x345   :  { %13515 = vmatpush1.bf16.msra.mxu0 %v16561_v19  ;;  %v16666_v23 = vcombine.high %v1253_v28, %v1257_v3  ;;  %v1117_v38 = vld [vmem:[#allocation4 + $0x2048] sm:$0xff]  ;;  %v16665_v60 = vcombine.low %v1253_v28, %v1257_v3 }
 0x346   :  { %13516 = vmatprep.subr.bf16.mxu0 %v16554_v24  ;;  %v1121_v12 = vld [vmem:[#allocation4 + $0x2068] sm:$0xff] }
 0x347   :  { %13556 = vmatpush1.bf16.msra.mxu1 %v16689_v57  ;;  %v1245_v56 = vld [vmem:[#allocation4 + $0x2448] sm:$0xff]  ;;  %v16530_v52 = vcombine.high %v1117_v38, %v1121_v12  ;;  %v16529_v46 = vcombine.low %v1117_v38, %v1121_v12 }
 0x348   :  { %13557 = vmatprep.subr.bf16.mxu1 %v16682_v2  ;;  %v1249_v19 = vld [vmem:[#allocation4 + $0x2468] sm:$0xff] }
 0x349   :  { %13517 = vmatpush1.bf16.msra.mxu0 %v16553_v42  ;;  %v16658_v57 = vcombine.high %v1245_v56, %v1249_v19  ;;  %v1109_v24 = vld [vmem:[#allocation4 + $0x2008] sm:$0xff]  ;;  %v16657_v35 = vcombine.low %v1245_v56, %v1249_v19 }
 0x34a   :  { %13518 = vmatprep.subr.bf16.mxu0 %v16546_v17  ;;  %v1113_v51 = vld [vmem:[#allocation4 + $0x2028] sm:$0xff] }
 0x34b   :  { %13558 = vmatpush1.bf16.msra.mxu1 %v16681_v33  ;;  %v1237_v2 = vld [vmem:[#allocation4 + $0x2408] sm:$0xff]  ;;  %v16522_v1 = vcombine.high %v1109_v24, %v1113_v51  ;;  %v16521_v11 = vcombine.low %v1109_v24, %v1113_v51 }
 0x34c   :  { %13559 = vmatprep.subr.bf16.mxu1 %v16674_v63  ;;  %v1241_v39 = vld [vmem:[#allocation4 + $0x2428] sm:$0xff] }
 0x34d   :  { %13519 = vmatpush1.bf16.msra.mxu0 %v16545_v34  ;;  %v16650_v42 = vcombine.high %v1237_v2, %v1241_v39  ;;  %v1229_v33 = vld [vmem:[#allocation4 + $0x23c8] sm:$0xff]  ;;  %v16649_v28 = vcombine.low %v1237_v2, %v1241_v39 }
 0x34e   :  { %13520 = vmatprep.subr.bf16.mxu0 %v16538_v50  ;;  %v1233_v17 = vld [vmem:[#allocation4 + $0x23e8] sm:$0xff] }
 0x34f   :  { %13560 = vmatpush1.bf16.msra.mxu1 %v16673_v61  ;;  %v1357_v63 = vld [vmem:[#allocation4 + $0x27c8] sm:$0xff]  ;;  %v16642_v3 = vcombine.high %v1229_v33, %v1233_v17  ;;  %v16641_v12 = vcombine.low %v1229_v33, %v1233_v17 }
 0x350   :  { %13561 = vmatprep.subr.bf16.mxu1 %v16666_v23  ;;  %v1361_v41 = vld [vmem:[#allocation4 + $0x27e8] sm:$0xff] }
 0x351   :  { %13521 = vmatpush1.bf16.msra.mxu0 %v16537_v30  ;;  %v16770_v34 = vcombine.high %v1357_v63, %v1361_v41  ;;  %v1221_v61 = vld [vmem:[#allocation4 + $0x2388] sm:$0xff]  ;;  %v16769_v56 = vcombine.low %v1357_v63, %v1361_v41 }
 0x352   :  { %13522 = vmatprep.subr.bf16.mxu0 %v16530_v52  ;;  %v1225_v50 = vld [vmem:[#allocation4 + $0x23a8] sm:$0xff] }
 0x353   :  { %13562 = vmatpush1.bf16.msra.mxu1 %v16665_v60  ;;  %v1349_v23 = vld [vmem:[#allocation4 + $0x2788] sm:$0xff]  ;;  %v16634_v19 = vcombine.high %v1221_v61, %v1225_v50  ;;  %v16633_v51 = vcombine.low %v1221_v61, %v1225_v50 }
 0x354   :  { %13563 = vmatprep.subr.bf16.mxu1 %v16658_v57  ;;  %v1353_v38 = vld [vmem:[#allocation4 + $0x27a8] sm:$0xff] }
 0x355   :  { %13523 = vmatpush1.bf16.msra.mxu0 %v16529_v46  ;;  %v16762_v30 = vcombine.high %v1349_v23, %v1353_v38  ;;  %v1213_v60 = vld [vmem:[#allocation4 + $0x2348] sm:$0xff]  ;;  %v16761_v2 = vcombine.low %v1349_v23, %v1353_v38 }
 0x356   :  { %13524 = vmatprep.subr.bf16.mxu0 %v16522_v1  ;;  %v1217_v52 = vld [vmem:[#allocation4 + $0x2368] sm:$0xff] }
 0x357   :  { %13564 = vmatpush1.bf16.msra.mxu1 %v16657_v35  ;;  %v1341_v57 = vld [vmem:[#allocation4 + $0x2748] sm:$0xff]  ;;  %v16626_v39 = vcombine.high %v1213_v60, %v1217_v52  ;;  %v16625_v17 = vcombine.low %v1213_v60, %v1217_v52 }
 0x358   :  { %13565 = vmatprep.subr.bf16.mxu1 %v16650_v42  ;;  %v1345_v24 = vld [vmem:[#allocation4 + $0x2768] sm:$0xff] }
 0x359   :  { %13525 = vmatpush1.bf16.msra.mxu0 %v16521_v11  ;;  %v16754_v46 = vcombine.high %v1341_v57, %v1345_v24  ;;  %v1205_v35 = vld [vmem:[#allocation4 + $0x2308] sm:$0xff]  ;;  %v16753_v63 = vcombine.low %v1341_v57, %v1345_v24 }
 0x35a   :  { %13526 = vmatprep.subr.bf16.mxu0 %v16642_v3  ;;  %v1209_v1 = vld [vmem:[#allocation4 + $0x2328] sm:$0xff] }
 0x35b   :  { %13566 = vmatpush1.bf16.msra.mxu1 %v16649_v28  ;;  %v1333_v42 = vld [vmem:[#allocation4 + $0x2708] sm:$0xff]  ;;  %v16618_v41 = vcombine.high %v1205_v35, %v1209_v1  ;;  %v16617_v50 = vcombine.low %v1205_v35, %v1209_v1 }
 0x35c   :  { %13567 = vmatprep.subr.bf16.mxu1 %v16770_v34  ;;  %v1337_v33 = vld [vmem:[#allocation4 + $0x2728] sm:$0xff] }
 0x35d   :  { %13527 = vmatpush2.bf16.msra.mxu0 %v16641_v12  ;;  %v16746_v11 = vcombine.high %v1333_v42, %v1337_v33  ;;  %v1197_v28 = vld [vmem:[#allocation4 + $0x22c8] sm:$0xff]  ;;  %v16745_v23 = vcombine.low %v1333_v42, %v1337_v33 }
 0x35e   :  { %13528 = vmatprep.subr.bf16.mxu0 %v16634_v19  ;;  %v1201_v3 = vld [vmem:[#allocation4 + $0x22e8] sm:$0xff] }
 0x35f   :  { %13568 = vmatpush2.bf16.msra.mxu1 %v16769_v56  ;;  %v1325_v34 = vld [vmem:[#allocation4 + $0x26c8] sm:$0xff]  ;;  %v16610_v38 = vcombine.high %v1197_v28, %v1201_v3  ;;  %v16609_v52 = vcombine.low %v1197_v28, %v1201_v3 }
 0x360   :  { %13569 = vmatprep.subr.bf16.mxu1 %v16762_v30  ;;  %v1329_v61 = vld [vmem:[#allocation4 + $0x26e8] sm:$0xff] }
 0x361   :  { %13529 = vmatpush2.bf16.msra.mxu0 %v16633_v51  ;;  %v16738_v12 = vcombine.high %v1325_v34, %v1329_v61  ;;  %v1189_v56 = vld [vmem:[#allocation4 + $0x2288] sm:$0xff]  ;;  %v16737_v57 = vcombine.low %v1325_v34, %v1329_v61 }
 0x362   :  { %13530 = vmatprep.subr.bf16.mxu0 %v16626_v39  ;;  %v1193_v19 = vld [vmem:[#allocation4 + $0x22a8] sm:$0xff] }
 0x363   :  { %13570 = vmatpush2.bf16.msra.mxu1 %v16761_v2  ;;  %v1317_v30 = vld [vmem:[#allocation4 + $0x2688] sm:$0xff]  ;;  %v16602_v24 = vcombine.high %v1189_v56, %v1193_v19  ;;  %v16601_v1 = vcombine.low %v1189_v56, %v1193_v19 }
 0x364   :  { %13571 = vmatprep.subr.bf16.mxu1 %v16754_v46  ;;  %v1321_v60 = vld [vmem:[#allocation4 + $0x26a8] sm:$0xff] }
 0x365   :  { %13531 = vmatpush2.bf16.msra.mxu0 %v16625_v17  ;;  %v16730_v51 = vcombine.high %v1317_v30, %v1321_v60  ;;  %v1181_v2 = vld [vmem:[#allocation4 + $0x2248] sm:$0xff]  ;;  %v16729_v42 = vcombine.low %v1317_v30, %v1321_v60 }
 0x366   :  { %13532 = vmatprep.subr.bf16.mxu0 %v16618_v41  ;;  %v1185_v39 = vld [vmem:[#allocation4 + $0x2268] sm:$0xff] }
 0x367   :  { %13572 = vmatpush2.bf16.msra.mxu1 %v16753_v63  ;;  %v1309_v46 = vld [vmem:[#allocation4 + $0x2648] sm:$0xff]  ;;  %v16594_v33 = vcombine.high %v1181_v2, %v1185_v39  ;;  %v16593_v3 = vcombine.low %v1181_v2, %v1185_v39 }
 0x368   :  { %13573 = vmatprep.subr.bf16.mxu1 %v16746_v11  ;;  %v1313_v35 = vld [vmem:[#allocation4 + $0x2668] sm:$0xff] }
 0x369   :  { %13533 = vmatpush2.bf16.msra.mxu0 %v16617_v50  ;;  %v16722_v17 = vcombine.high %v1309_v46, %v1313_v35  ;;  %v1173_v63 = vld [vmem:[#allocation4 + $0x2208] sm:$0xff]  ;;  %v16721_v34 = vcombine.low %v1309_v46, %v1313_v35 }
 0x36a   :  { %13534 = vmatprep.subr.bf16.mxu0 %v16610_v38  ;;  %v1177_v41 = vld [vmem:[#allocation4 + $0x2228] sm:$0xff] }
 0x36b   :  { %13574 = vmatpush2.bf16.msra.mxu1 %v16745_v23  ;;  %v1301_v11 = vld [vmem:[#allocation4 + $0x2608] sm:$0xff]  ;;  %v16586_v61 = vcombine.high %v1173_v63, %v1177_v41  ;;  %v16585_v19 = vcombine.low %v1173_v63, %v1177_v41 }
 0x36c   :  { %13575 = vmatprep.subr.bf16.mxu1 %v16738_v12  ;;  %v1305_v28 = vld [vmem:[#allocation4 + $0x2628] sm:$0xff] }
 0x36d   :  { %13535 = vmatpush2.bf16.msra.mxu0 %v16609_v52  ;;  %v16714_v50 = vcombine.high %v1301_v11, %v1305_v28  ;;  %v1421_v23 = vld [vmem:[#allocation4 + $0x29c8] sm:$0xff]  ;;  %v16713_v30 = vcombine.low %v1301_v11, %v1305_v28 }
 0x36e   :  { %13536 = vmatprep.subr.bf16.mxu0 %v16602_v24  ;;  %v1425_v38 = vld [vmem:[#allocation4 + $0x29e8] sm:$0xff] }
 0x36f   :  { %13576 = vmatpush2.bf16.msra.mxu1 %v16737_v57  ;;  %v1549_v12 = vld [vmem:[#allocation4 + $0x2dc8] sm:$0xff]  ;;  %v16834_v60 = vcombine.high %v1421_v23, %v1425_v38  ;;  %v16833_v39 = vcombine.low %v1421_v23, %v1425_v38 }
 0x370   :  { %13577 = vmatprep.subr.bf16.mxu1 %v16730_v51  ;;  %v1553_v56 = vld [vmem:[#allocation4 + $0x2de8] sm:$0xff] }
 0x371   :  { %13537 = vmatpush2.bf16.msra.mxu0 %v16601_v1  ;;  %v16962_v52 = vcombine.high %v1549_v12, %v1553_v56  ;;  %v1413_v57 = vld [vmem:[#allocation4 + $0x2988] sm:$0xff]  ;;  %v16961_v46 = vcombine.low %v1549_v12, %v1553_v56 }
 0x372   :  { %13538 = vmatprep.subr.bf16.mxu0 %v16594_v33  ;;  %v1417_v24 = vld [vmem:[#allocation4 + $0x29a8] sm:$0xff] }
 0x373   :  { %13578 = vmatpush2.bf16.msra.mxu1 %v16729_v42  ;;  %v1541_v51 = vld [vmem:[#allocation4 + $0x2d88] sm:$0xff]  ;;  %v16826_v35 = vcombine.high %v1413_v57, %v1417_v24 }
 0x374   :  { %13579 = vmatprep.subr.bf16.mxu1 %v16722_v17  ;;  %v1545_v2 = vld [vmem:[#allocation4 + $0x2da8] sm:$0xff] }
 0x375   :  { %13539 = vmatpush2.bf16.msra.mxu0 %v16593_v3  ;;  %v16954_v1 = vcombine.high %v1541_v51, %v1545_v2  ;;  %v1405_v42 = vld [vmem:[#allocation4 + $0x2948] sm:$0xff]  ;;  %v16825_v3 = vcombine.low %v1413_v57, %v1417_v24 }
 0x376   :  { %13540 = vmatprep.subr.bf16.mxu0 %v16586_v61  ;;  %v1409_v33 = vld [vmem:[#allocation4 + $0x2968] sm:$0xff]  ;;  %v16953_v61 = vcombine.low %v1541_v51, %v1545_v2 }
 0x377   :  { %13580 = vmatpush2.bf16.msra.mxu1 %v16721_v34  ;;  %v1533_v63 = vld [vmem:[#allocation4 + $0x2d48] sm:$0xff]  ;;  %v16817_v51 = vcombine.low %v1405_v42, %v1409_v33 }
 0x378   :  { %13581 = vmatprep.subr.bf16.mxu1 %v16714_v50  ;;  %v1537_v41 = vld [vmem:[#allocation4 + $0x2d68] sm:$0xff]  ;;  %v16818_v50 = vcombine.high %v1405_v42, %v1409_v33 }
 0x379   :  { %13541 = vmatpush2.bf16.msra.mxu0 %v16585_v19  ;;  %v16946_v56 = vcombine.high %v1533_v63, %v1537_v41  ;;  %v1397_v19 = vld [vmem:[#allocation4 + $0x2908] sm:$0xff] }
 0x37a   :  { %13592 = vmatprep.subr.bf16.mxu0 %v16834_v60  ;;  %v1525_v60 = vld [vmem:[#allocation4 + $0x2d08] sm:$0xff] }
 0x37b   :  { %13582 = vmatpush2.bf16.msra.mxu1 %v16713_v30  ;;  %v1401_v30 = vld [vmem:[#allocation4 + $0x2928] sm:$0xff] }
 0x37c   :  { %13633 = vmatprep.subr.bf16.mxu1 %v16962_v52  ;;  %v13298_v17 = vpop.f32.mrf.mxu0  ;;  %13543 = vmatmul.mubr.bf16.vlgmr.msra.gmra.mxu0 %v17837_v21  ;;  %v1529_v52 = vld [vmem:[#allocation4 + $0x2d28] sm:$0xff] }
 0x37d   :  { %v13299_v11 = vadd.f32 %v13298_v17, %v17980_v7  ;;  %13593 = vmatpush1.bf16.msra.mxu0 %v16833_v39  ;;  %13624 = vmatprep.mubr.bf16.mxu0 %v17849_v37  ;;  %v16810_v39 = vcombine.high %v1397_v19, %v1401_v30  ;;  %v1393_v17 = vld [vmem:[#allocation4 + $0x28e8] sm:$0xff] }
 0x37e   :  { %v13339_v28 = vpop.f32.mrf.mxu1  ;;  %13584 = vmatmul.mubr.bf16.vlgmr.msra.gmra.mxu1 %v17843_v26  ;;  %v13300_v34 = vpop.f32.mrf.mxu0  ;;  %13594 = vmatprep.subr.bf16.mxu0 %v16826_v35  ;;  %v16938_v35 = vcombine.high %v1525_v60, %v1529_v52  ;;  %v1381_v33 = vld [vmem:[#allocation4 + $0x2888] sm:$0xff] }
 0x37f   :  { %13634 = vmatpush1.bf16.msra.mxu1 %v16961_v46  ;;  %v17989_v23 = vadd.f32 %v13339_v28, %v13299_v11  ;;  %v13301_v38 = vadd.f32 %v13300_v34, %v17984_v0  ;;  %13665 = vmatprep.mubr.bf16.mxu1 %v17854_v43  ;;  %v16945_v0 = vcombine.low %v1533_v63, %v1537_v41  ;;  %v1517_v11 = vld [vmem:[#allocation4 + $0x2cc8] sm:$0xff] }
 0x380   :  { %v13341_v12 = vpop.f32.mrf.mxu1  ;;  %13635 = vmatprep.subr.bf16.mxu1 %v16954_v1  ;;  %v13302_v7 = vpop.f32.mrf.mxu0  ;;  %v1389_v1 = vld [vmem:[#allocation4 + $0x28c8] sm:$0xff]  ;;  %v16809_v34 = vcombine.low %v1397_v19, %v1401_v30 }
 0x381   :  { %v17994_v57 = vadd.f32 %v13341_v12, %v13301_v38  ;;  %13595 = vmatpush1.bf16.msra.mxu0 %v16825_v3  ;;  %v1521_v28 = vld [vmem:[#allocation4 + $0x2ce8] sm:$0xff]  ;;  %v16937_v38 = vcombine.low %v1525_v60, %v1529_v52  ;;  %v16802_v12 = vcombine.high %v1389_v1, %v1393_v17  ;;  %v16801_v41 = vcombine.low %v1389_v1, %v1393_v17 }
 0x382   :  { %v13343_v24 = vpop.f32.mrf.mxu1  ;;  %v13303_v2 = vpop.f32.mrf.mxu0  ;;  %13596 = vmatprep.subr.bf16.mxu0 %v16818_v50  ;;  %v16930_v42 = vcombine.high %v1517_v11, %v1521_v28  ;;  %v1385_v3 = vld [vmem:[#allocation4 + $0x28a8] sm:$0xff]  ;;  %v16929_v50 = vcombine.low %v1517_v11, %v1521_v28 }
 0x383   :  { %13636 = vmatpush1.bf16.msra.mxu1 %v16953_v61  ;;  %v1509_v61 = vld [vmem:[#allocation4 + $0x2c88] sm:$0xff]  ;;  %v16793_v60 = vcombine.low %v1381_v33, %v1385_v3 }
 0x384   :  { %v13344_v46 = vpop.f32.mrf.mxu1  ;;  %13637 = vmatprep.subr.bf16.mxu1 %v16946_v56  ;;  %v1513_v63 = vld [vmem:[#allocation4 + $0x2ca8] sm:$0xff]  ;;  %v16794_v56 = vcombine.high %v1381_v33, %v1385_v3 }
 0x385   :  { %13597 = vmatpush1.bf16.msra.mxu0 %v16817_v51  ;;  %v16922_v7 = vcombine.high %v1509_v61, %v1513_v63  ;;  %v1373_v24 = vld [vmem:[#allocation4 + $0x2848] sm:$0xff]  ;;  %v16921_v52 = vcombine.low %v1509_v61, %v1513_v63 }
 0x386   :  { %13598 = vmatprep.subr.bf16.mxu0 %v16810_v39  ;;  %v1377_v19 = vld [vmem:[#allocation4 + $0x2868] sm:$0xff] }
 0x387   :  { %13638 = vmatpush1.bf16.msra.mxu1 %v16945_v0  ;;  %v1501_v30 = vld [vmem:[#allocation4 + $0x2c48] sm:$0xff]  ;;  %v16786_v2 = vcombine.high %v1373_v24, %v1377_v19  ;;  %v16785_v17 = vcombine.low %v1373_v24, %v1377_v19 }
 0x388   :  { %13639 = vmatprep.subr.bf16.mxu1 %v16938_v35  ;;  %v1505_v51 = vld [vmem:[#allocation4 + $0x2c68] sm:$0xff] }
 0x389   :  { %13599 = vmatpush1.bf16.msra.mxu0 %v16809_v34  ;;  %v16914_v0 = vcombine.high %v1501_v30, %v1505_v51  ;;  %v1365_v39 = vld [vmem:[#allocation4 + $0x2808] sm:$0xff]  ;;  %v16913_v11 = vcombine.low %v1501_v30, %v1505_v51 }
 0x38a   :  { %13600 = vmatprep.subr.bf16.mxu0 %v16802_v12  ;;  %v1369_v46 = vld [vmem:[#allocation4 + $0x2828] sm:$0xff] }
 0x38b   :  { %13640 = vmatpush1.bf16.msra.mxu1 %v16937_v38  ;;  %v1493_v35 = vld [vmem:[#allocation4 + $0x2c08] sm:$0xff]  ;;  %v16778_v28 = vcombine.high %v1365_v39, %v1369_v46  ;;  %v16777_v3 = vcombine.low %v1365_v39, %v1369_v46 }
 0x38c   :  { %13641 = vmatprep.subr.bf16.mxu1 %v16930_v42  ;;  %v1497_v1 = vld [vmem:[#allocation4 + $0x2c28] sm:$0xff] }
 0x38d   :  { %13601 = vmatpush1.bf16.msra.mxu0 %v16801_v41  ;;  %v16906_v34 = vcombine.high %v1493_v35, %v1497_v1  ;;  %v1485_v38 = vld [vmem:[#allocation4 + $0x2bc8] sm:$0xff]  ;;  %v16905_v61 = vcombine.low %v1493_v35, %v1497_v1 }
 0x38e   :  { %13602 = vmatprep.subr.bf16.mxu0 %v16794_v56  ;;  %v1489_v12 = vld [vmem:[#allocation4 + $0x2be8] sm:$0xff] }
 0x38f   :  { %13642 = vmatpush1.bf16.msra.mxu1 %v16929_v50  ;;  %v1613_v42 = vld [vmem:[#allocation4 + $0x2fc8] sm:$0xff]  ;;  %v16898_v63 = vcombine.high %v1485_v38, %v1489_v12  ;;  %v16897_v19 = vcombine.low %v1485_v38, %v1489_v12 }
 0x390   :  { %13643 = vmatprep.subr.bf16.mxu1 %v16922_v7  ;;  %v1617_v33 = vld [vmem:[#allocation4 + $0x2fe8] sm:$0xff] }
 0x391   :  { %13603 = vmatpush1.bf16.msra.mxu0 %v16793_v60  ;;  %v17026_v41 = vcombine.high %v1613_v42, %v1617_v33  ;;  %v1477_v50 = vld [vmem:[#allocation4 + $0x2b88] sm:$0xff]  ;;  %v17025_v30 = vcombine.low %v1613_v42, %v1617_v33 }
 0x392   :  { %13604 = vmatprep.subr.bf16.mxu0 %v16786_v2  ;;  %v1481_v56 = vld [vmem:[#allocation4 + $0x2ba8] sm:$0xff] }
 0x393   :  { %13644 = vmatpush1.bf16.msra.mxu1 %v16921_v52  ;;  %v1605_v7 = vld [vmem:[#allocation4 + $0x2f88] sm:$0xff]  ;;  %v16890_v51 = vcombine.high %v1477_v50, %v1481_v56  ;;  %v16889_v46 = vcombine.low %v1477_v50, %v1481_v56 }
 0x394   :  { %13645 = vmatprep.subr.bf16.mxu1 %v16914_v0  ;;  %v1609_v24 = vld [vmem:[#allocation4 + $0x2fa8] sm:$0xff] }
 0x395   :  { %13605 = vmatpush1.bf16.msra.mxu0 %v16785_v17  ;;  %v17018_v60 = vcombine.high %v1605_v7, %v1609_v24  ;;  %v1469_v52 = vld [vmem:[#allocation4 + $0x2b48] sm:$0xff]  ;;  %v17017_v35 = vcombine.low %v1605_v7, %v1609_v24 }
 0x396   :  { %13606 = vmatprep.subr.bf16.mxu0 %v16778_v28  ;;  %v1473_v2 = vld [vmem:[#allocation4 + $0x2b68] sm:$0xff] }
 0x397   :  { %13646 = vmatpush1.bf16.msra.mxu1 %v16913_v11  ;;  %v1597_v0 = vld [vmem:[#allocation4 + $0x2f48] sm:$0xff]  ;;  %v16882_v1 = vcombine.high %v1469_v52, %v1473_v2  ;;  %v16881_v12 = vcombine.low %v1469_v52, %v1473_v2 }
 0x398   :  { %13647 = vmatprep.subr.bf16.mxu1 %v16906_v34  ;;  %v1601_v39 = vld [vmem:[#allocation4 + $0x2f68] sm:$0xff] }
 0x399   :  { %13607 = vmatpush1.bf16.msra.mxu0 %v16777_v3  ;;  %v17010_v17 = vcombine.high %v1597_v0, %v1601_v39  ;;  %v1461_v11 = vld [vmem:[#allocation4 + $0x2b08] sm:$0xff]  ;;  %v17009_v42 = vcombine.low %v1597_v0, %v1601_v39 }
 0x39a   :  { %13608 = vmatprep.subr.bf16.mxu0 %v16898_v63  ;;  %v1465_v28 = vld [vmem:[#allocation4 + $0x2b28] sm:$0xff] }
 0x39b   :  { %13648 = vmatpush1.bf16.msra.mxu1 %v16905_v61  ;;  %v1589_v34 = vld [vmem:[#allocation4 + $0x2f08] sm:$0xff]  ;;  %v16874_v33 = vcombine.high %v1461_v11, %v1465_v28  ;;  %v16873_v56 = vcombine.low %v1461_v11, %v1465_v28 }
 0x39c   :  { %13649 = vmatprep.subr.bf16.mxu1 %v17026_v41  ;;  %v1593_v38 = vld [vmem:[#allocation4 + $0x2f28] sm:$0xff] }
 0x39d   :  { %13609 = vmatpush2.bf16.msra.mxu0 %v16897_v19  ;;  %v17002_v3 = vcombine.high %v1589_v34, %v1593_v38  ;;  %v1453_v61 = vld [vmem:[#allocation4 + $0x2ac8] sm:$0xff]  ;;  %v17001_v7 = vcombine.low %v1589_v34, %v1593_v38 }
 0x39e   :  { %13610 = vmatprep.subr.bf16.mxu0 %v16890_v51  ;;  %v1457_v63 = vld [vmem:[#allocation4 + $0x2ae8] sm:$0xff] }
 0x39f   :  { %13650 = vmatpush2.bf16.msra.mxu1 %v17025_v30  ;;  %v1581_v41 = vld [vmem:[#allocation4 + $0x2ec8] sm:$0xff]  ;;  %v16866_v24 = vcombine.high %v1453_v61, %v1457_v63  ;;  %v16865_v2 = vcombine.low %v1453_v61, %v1457_v63 }
 0x3a0   :  { %13651 = vmatprep.subr.bf16.mxu1 %v17018_v60  ;;  %v1585_v50 = vld [vmem:[#allocation4 + $0x2ee8] sm:$0xff] }
 0x3a1   :  { %13611 = vmatpush2.bf16.msra.mxu0 %v16889_v46  ;;  %v16994_v19 = vcombine.high %v1581_v41, %v1585_v50  ;;  %v1445_v30 = vld [vmem:[#allocation4 + $0x2a88] sm:$0xff]  ;;  %v16993_v0 = vcombine.low %v1581_v41, %v1585_v50 }
 0x3a2   :  { %13612 = vmatprep.subr.bf16.mxu0 %v16882_v1  ;;  %v1449_v51 = vld [vmem:[#allocation4 + $0x2aa8] sm:$0xff] }
 0x3a3   :  { %13652 = vmatpush2.bf16.msra.mxu1 %v17017_v35  ;;  %v1573_v60 = vld [vmem:[#allocation4 + $0x2e88] sm:$0xff]  ;;  %v16858_v39 = vcombine.high %v1445_v30, %v1449_v51  ;;  %v16857_v28 = vcombine.low %v1445_v30, %v1449_v51 }
 0x3a4   :  { %13653 = vmatprep.subr.bf16.mxu1 %v17010_v17  ;;  %v1577_v52 = vld [vmem:[#allocation4 + $0x2ea8] sm:$0xff] }
 0x3a5   :  { %13613 = vmatpush2.bf16.msra.mxu0 %v16881_v12  ;;  %v16986_v46 = vcombine.high %v1573_v60, %v1577_v52  ;;  %v1437_v35 = vld [vmem:[#allocation4 + $0x2a48] sm:$0xff]  ;;  %v16985_v34 = vcombine.low %v1573_v60, %v1577_v52 }
 0x3a6   :  { %13614 = vmatprep.subr.bf16.mxu0 %v16874_v33  ;;  %v1441_v1 = vld [vmem:[#allocation4 + $0x2a68] sm:$0xff] }
 0x3a7   :  { %13654 = vmatpush2.bf16.msra.mxu1 %v17009_v42  ;;  %v1565_v17 = vld [vmem:[#allocation4 + $0x2e48] sm:$0xff]  ;;  %v16850_v38 = vcombine.high %v1437_v35, %v1441_v1  ;;  %v16849_v63 = vcombine.low %v1437_v35, %v1441_v1 }
 0x3a8   :  { %13655 = vmatprep.subr.bf16.mxu1 %v17002_v3  ;;  %v1569_v11 = vld [vmem:[#allocation4 + $0x2e68] sm:$0xff] }
 0x3a9   :  { %13615 = vmatpush2.bf16.msra.mxu0 %v16873_v56  ;;  %v16978_v12 = vcombine.high %v1565_v17, %v1569_v11  ;;  %v1429_v42 = vld [vmem:[#allocation4 + $0x2a08] sm:$0xff]  ;;  %v16977_v41 = vcombine.low %v1565_v17, %v1569_v11 }
 0x3aa   :  { %13616 = vmatprep.subr.bf16.mxu0 %v16866_v24  ;;  %v1433_v33 = vld [vmem:[#allocation4 + $0x2a28] sm:$0xff] }
 0x3ab   :  { %13656 = vmatpush2.bf16.msra.mxu1 %v17001_v7  ;;  %v1557_v3 = vld [vmem:[#allocation4 + $0x2e08] sm:$0xff]  ;;  %v16842_v50 = vcombine.high %v1429_v42, %v1433_v33  ;;  %v16841_v51 = vcombine.low %v1429_v42, %v1433_v33 }
 0x3ac   :  { %13657 = vmatprep.subr.bf16.mxu1 %v16994_v19  ;;  %v1561_v61 = vld [vmem:[#allocation4 + $0x2e28] sm:$0xff] }
 0x3ad   :  { %13617 = vmatpush2.bf16.msra.mxu0 %v16865_v2  ;;  %v16970_v56 = vcombine.high %v1557_v3, %v1561_v61  ;;  %v1677_v7 = vld [vmem:[#allocation4 + $0x31c8] sm:$0xff]  ;;  %v16969_v60 = vcombine.low %v1557_v3, %v1561_v61 }
 0x3ae   :  { %13618 = vmatprep.subr.bf16.mxu0 %v16858_v39  ;;  %v1681_v24 = vld [vmem:[#allocation4 + $0x31e8] sm:$0xff] }
 0x3af   :  { %13658 = vmatpush2.bf16.msra.mxu1 %v16993_v0  ;;  %v1805_v19 = vld [vmem:[#allocation4 + $0x35c8] sm:$0xff]  ;;  %v17090_v52 = vcombine.high %v1677_v7, %v1681_v24  ;;  %v17089_v1 = vcombine.low %v1677_v7, %v1681_v24 }
 0x3b0   :  { %13659 = vmatprep.subr.bf16.mxu1 %v16986_v46  ;;  %v1809_v30 = vld [vmem:[#allocation4 + $0x35e8] sm:$0xff] }
 0x3b1   :  { %13619 = vmatpush2.bf16.msra.mxu0 %v16857_v28  ;;  %v17218_v2 = vcombine.high %v1805_v19, %v1809_v30  ;;  %v1669_v0 = vld [vmem:[#allocation4 + $0x3188] sm:$0xff]  ;;  %v17217_v17 = vcombine.low %v1805_v19, %v1809_v30 }
 0x3b2   :  { %13620 = vmatprep.subr.bf16.mxu0 %v16850_v38  ;;  %v1673_v39 = vld [vmem:[#allocation4 + $0x31a8] sm:$0xff] }
 0x3b3   :  { %13660 = vmatpush2.bf16.msra.mxu1 %v16985_v34  ;;  %v1797_v46 = vld [vmem:[#allocation4 + $0x3588] sm:$0xff]  ;;  %v17082_v11 = vcombine.high %v1669_v0, %v1673_v39 }
 0x3b4   :  { %13661 = vmatprep.subr.bf16.mxu1 %v16978_v12  ;;  %v1801_v35 = vld [vmem:[#allocation4 + $0x35a8] sm:$0xff] }
 0x3b5   :  { %13621 = vmatpush2.bf16.msra.mxu0 %v16849_v63  ;;  %v17210_v28 = vcombine.high %v1797_v46, %v1801_v35  ;;  %v1661_v34 = vld [vmem:[#allocation4 + $0x3148] sm:$0xff]  ;;  %v17081_v63 = vcombine.low %v1669_v0, %v1673_v39 }
 0x3b6   :  { %13622 = vmatprep.subr.bf16.mxu0 %v16842_v50  ;;  %v1665_v38 = vld [vmem:[#allocation4 + $0x3168] sm:$0xff]  ;;  %v17209_v50 = vcombine.low %v1797_v46, %v1801_v35 }
 0x3b7   :  { %13662 = vmatpush2.bf16.msra.mxu1 %v16977_v41  ;;  %v1789_v42 = vld [vmem:[#allocation4 + $0x3548] sm:$0xff]  ;;  %v17073_v46 = vcombine.low %v1661_v34, %v1665_v38 }
 0x3b8   :  { %13663 = vmatprep.subr.bf16.mxu1 %v16970_v56  ;;  %v1793_v33 = vld [vmem:[#allocation4 + $0x3568] sm:$0xff]  ;;  %v17074_v56 = vcombine.high %v1661_v34, %v1665_v38 }
 0x3b9   :  { %13623 = vmatpush2.bf16.msra.mxu0 %v16841_v51  ;;  %v17202_v30 = vcombine.high %v1789_v42, %v1793_v33  ;;  %v1653_v51 = vld [vmem:[#allocation4 + $0x3108] sm:$0xff] }
 0x3ba   :  { %13674 = vmatprep.subr.bf16.mxu0 %v17090_v52  ;;  %v1781_v52 = vld [vmem:[#allocation4 + $0x3508] sm:$0xff] }
 0x3bb   :  { %13664 = vmatpush2.bf16.msra.mxu1 %v16969_v60  ;;  %v1657_v60 = vld [vmem:[#allocation4 + $0x3128] sm:$0xff] }
 0x3bc   :  { %13715 = vmatprep.subr.bf16.mxu1 %v17218_v2  ;;  %v13380_v12 = vpop.f32.mrf.mxu0  ;;  %13625 = vmatmul.mubr.bf16.vlgmr.msra.gmra.mxu0 %v17867_v5  ;;  %v1785_v2 = vld [vmem:[#allocation4 + $0x3528] sm:$0xff] }
 0x3bd   :  { %v13381_v3 = vadd.f32 %v13380_v12, %v17989_v23  ;;  %13675 = vmatpush1.bf16.msra.mxu0 %v17089_v1  ;;  %13706 = vmatprep.mubr.bf16.mxu0 %v17879_v25  ;;  %v17066_v1 = vcombine.high %v1653_v51, %v1657_v60  ;;  %v1649_v12 = vld [vmem:[#allocation4 + $0x30e8] sm:$0xff] }
 0x3be   :  { %v13421_v61 = vpop.f32.mrf.mxu1  ;;  %13666 = vmatmul.mubr.bf16.vlgmr.msra.gmra.mxu1 %v17873_v10  ;;  %v13382_v41 = vpop.f32.mrf.mxu0  ;;  %13676 = vmatprep.subr.bf16.mxu0 %v17082_v11  ;;  %v17194_v11 = vcombine.high %v1781_v52, %v1785_v2  ;;  %v1637_v38 = vld [vmem:[#allocation4 + $0x3088] sm:$0xff] }
 0x3bf   :  { %13716 = vmatpush1.bf16.msra.mxu1 %v17217_v17  ;;  %v17999_v7 = vadd.f32 %v13421_v61, %v13381_v3  ;;  %v13383_v24 = vadd.f32 %v13382_v41, %v17994_v57  ;;  %13747 = vmatprep.mubr.bf16.mxu1 %v17884_v31  ;;  %v17201_v57 = vcombine.low %v1789_v42, %v1793_v33  ;;  %v1773_v3 = vld [vmem:[#allocation4 + $0x34c8] sm:$0xff] }
 0x3c0   :  { %v13423_v19 = vpop.f32.mrf.mxu1  ;;  %13717 = vmatprep.subr.bf16.mxu1 %v17210_v28  ;;  %v13384_v23 = vpop.f32.mrf.mxu0  ;;  %v1645_v28 = vld [vmem:[#allocation4 + $0x30c8] sm:$0xff]  ;;  %v17065_v41 = vcombine.low %v1653_v51, %v1657_v60 }
 0x3c1   :  { %v18004_v0 = vadd.f32 %v13423_v19, %v13383_v24  ;;  %13677 = vmatpush1.bf16.msra.mxu0 %v17081_v63  ;;  %v1777_v61 = vld [vmem:[#allocation4 + $0x34e8] sm:$0xff]  ;;  %v17193_v24 = vcombine.low %v1781_v52, %v1785_v2  ;;  %v17058_v19 = vcombine.high %v1645_v28, %v1649_v12  ;;  %v17057_v33 = vcombine.low %v1645_v28, %v1649_v12 }
 0x3c2   :  { %v13425_v39 = vpop.f32.mrf.mxu1  ;;  %v13385_v35 = vpop.f32.mrf.mxu0  ;;  %13678 = vmatprep.subr.bf16.mxu0 %v17074_v56  ;;  %v17186_v34 = vcombine.high %v1773_v3, %v1777_v61  ;;  %v1641_v63 = vld [vmem:[#allocation4 + $0x30a8] sm:$0xff]  ;;  %v17185_v56 = vcombine.low %v1773_v3, %v1777_v61 }
 0x3c3   :  { %13718 = vmatpush1.bf16.msra.mxu1 %v17209_v50  ;;  %v1765_v50 = vld [vmem:[#allocation4 + $0x3488] sm:$0xff]  ;;  %v17049_v52 = vcombine.low %v1637_v38, %v1641_v63 }
 0x3c4   :  { %v13426_v17 = vpop.f32.mrf.mxu1  ;;  %13719 = vmatprep.subr.bf16.mxu1 %v17202_v30  ;;  %v1769_v42 = vld [vmem:[#allocation4 + $0x34a8] sm:$0xff]  ;;  %v17050_v30 = vcombine.high %v1637_v38, %v1641_v63 }
 0x3c5   :  { %13679 = vmatpush1.bf16.msra.mxu0 %v17073_v46  ;;  %v17178_v23 = vcombine.high %v1765_v50, %v1769_v42  ;;  %v1629_v39 = vld [vmem:[#allocation4 + $0x3048] sm:$0xff]  ;;  %v17177_v2 = vcombine.low %v1765_v50, %v1769_v42 }
 0x3c6   :  { %13680 = vmatprep.subr.bf16.mxu0 %v17066_v1  ;;  %v1633_v51 = vld [vmem:[#allocation4 + $0x3068] sm:$0xff] }
 0x3c7   :  { %13720 = vmatpush1.bf16.msra.mxu1 %v17201_v57  ;;  %v1757_v60 = vld [vmem:[#allocation4 + $0x3448] sm:$0xff]  ;;  %v17042_v35 = vcombine.high %v1629_v39, %v1633_v51  ;;  %v17041_v12 = vcombine.low %v1629_v39, %v1633_v51 }
 0x3c8   :  { %13721 = vmatprep.subr.bf16.mxu1 %v17194_v11  ;;  %v1761_v46 = vld [vmem:[#allocation4 + $0x3468] sm:$0xff] }
 0x3c9   :  { %13681 = vmatpush1.bf16.msra.mxu0 %v17065_v41  ;;  %v17170_v57 = vcombine.high %v1757_v60, %v1761_v46  ;;  %v1621_v1 = vld [vmem:[#allocation4 + $0x3008] sm:$0xff]  ;;  %v17169_v3 = vcombine.low %v1757_v60, %v1761_v46 }
 0x3ca   :  { %13682 = vmatprep.subr.bf16.mxu0 %v17058_v19  ;;  %v1625_v17 = vld [vmem:[#allocation4 + $0x3028] sm:$0xff] }
 0x3cb   :  { %13722 = vmatpush1.bf16.msra.mxu1 %v17193_v24  ;;  %v1749_v11 = vld [vmem:[#allocation4 + $0x3408] sm:$0xff]  ;;  %v17034_v61 = vcombine.high %v1621_v1, %v1625_v17  ;;  %v17033_v63 = vcombine.low %v1621_v1, %v1625_v17 }
 0x3cc   :  { %13723 = vmatprep.subr.bf16.mxu1 %v17186_v34  ;;  %v1753_v28 = vld [vmem:[#allocation4 + $0x3428] sm:$0xff] }
 0x3cd   :  { %13683 = vmatpush1.bf16.msra.mxu0 %v17057_v33  ;;  %v17162_v41 = vcombine.high %v1749_v11, %v1753_v28  ;;  %v1741_v24 = vld [vmem:[#allocation4 + $0x33c8] sm:$0xff]  ;;  %v17161_v50 = vcombine.low %v1749_v11, %v1753_v28 }
 0x3ce   :  { %13684 = vmatprep.subr.bf16.mxu0 %v17050_v30  ;;  %v1745_v19 = vld [vmem:[#allocation4 + $0x33e8] sm:$0xff] }
 0x3cf   :  { %13724 = vmatpush1.bf16.msra.mxu1 %v17185_v56  ;;  %v1869_v34 = vld [vmem:[#allocation4 + $0x37c8] sm:$0xff]  ;;  %v17154_v42 = vcombine.high %v1741_v24, %v1745_v19  ;;  %v17153_v51 = vcombine.low %v1741_v24, %v1745_v19 }
 0x3d0   :  { %13725 = vmatprep.subr.bf16.mxu1 %v17178_v23  ;;  %v1873_v38 = vld [vmem:[#allocation4 + $0x37e8] sm:$0xff] }
 0x3d1   :  { %13685 = vmatpush1.bf16.msra.mxu0 %v17049_v52  ;;  %v17282_v33 = vcombine.high %v1869_v34, %v1873_v38  ;;  %v1733_v56 = vld [vmem:[#allocation4 + $0x3388] sm:$0xff]  ;;  %v17281_v60 = vcombine.low %v1869_v34, %v1873_v38 }
 0x3d2   :  { %13686 = vmatprep.subr.bf16.mxu0 %v17042_v35  ;;  %v1737_v30 = vld [vmem:[#allocation4 + $0x33a8] sm:$0xff] }
 0x3d3   :  { %13726 = vmatpush1.bf16.msra.mxu1 %v17177_v2  ;;  %v1861_v23 = vld [vmem:[#allocation4 + $0x3788] sm:$0xff]  ;;  %v17146_v46 = vcombine.high %v1733_v56, %v1737_v30  ;;  %v17145_v17 = vcombine.low %v1733_v56, %v1737_v30 }
 0x3d4   :  { %13727 = vmatprep.subr.bf16.mxu1 %v17170_v57  ;;  %v1865_v39 = vld [vmem:[#allocation4 + $0x37a8] sm:$0xff] }
 0x3d5   :  { %13687 = vmatpush1.bf16.msra.mxu0 %v17041_v12  ;;  %v17274_v52 = vcombine.high %v1861_v23, %v1865_v39  ;;  %v1725_v2 = vld [vmem:[#allocation4 + $0x3348] sm:$0xff]  ;;  %v17273_v11 = vcombine.low %v1861_v23, %v1865_v39 }
 0x3d6   :  { %13688 = vmatprep.subr.bf16.mxu0 %v17034_v61  ;;  %v1729_v35 = vld [vmem:[#allocation4 + $0x3368] sm:$0xff] }
 0x3d7   :  { %13728 = vmatpush1.bf16.msra.mxu1 %v17169_v3  ;;  %v1853_v57 = vld [vmem:[#allocation4 + $0x3748] sm:$0xff]  ;;  %v17138_v28 = vcombine.high %v1725_v2, %v1729_v35  ;;  %v17137_v19 = vcombine.low %v1725_v2, %v1729_v35 }
 0x3d8   :  { %13729 = vmatprep.subr.bf16.mxu1 %v17162_v41  ;;  %v1857_v1 = vld [vmem:[#allocation4 + $0x3768] sm:$0xff] }
 0x3d9   :  { %13689 = vmatpush1.bf16.msra.mxu0 %v17033_v63  ;;  %v17266_v12 = vcombine.high %v1853_v57, %v1857_v1  ;;  %v1717_v3 = vld [vmem:[#allocation4 + $0x3308] sm:$0xff]  ;;  %v17265_v34 = vcombine.low %v1853_v57, %v1857_v1 }
 0x3da   :  { %13690 = vmatprep.subr.bf16.mxu0 %v17154_v42  ;;  %v1721_v61 = vld [vmem:[#allocation4 + $0x3328] sm:$0xff] }
 0x3db   :  { %13730 = vmatpush1.bf16.msra.mxu1 %v17161_v50  ;;  %v1845_v41 = vld [vmem:[#allocation4 + $0x3708] sm:$0xff]  ;;  %v17130_v38 = vcombine.high %v1717_v3, %v1721_v61  ;;  %v17129_v30 = vcombine.low %v1717_v3, %v1721_v61 }
 0x3dc   :  { %13731 = vmatprep.subr.bf16.mxu1 %v17282_v33  ;;  %v1849_v24 = vld [vmem:[#allocation4 + $0x3728] sm:$0xff] }
 0x3dd   :  { %13691 = vmatpush2.bf16.msra.mxu0 %v17153_v51  ;;  %v17258_v63 = vcombine.high %v1845_v41, %v1849_v24  ;;  %v1709_v50 = vld [vmem:[#allocation4 + $0x32c8] sm:$0xff]  ;;  %v17257_v23 = vcombine.low %v1845_v41, %v1849_v24 }
 0x3de   :  { %13692 = vmatprep.subr.bf16.mxu0 %v17146_v46  ;;  %v1713_v42 = vld [vmem:[#allocation4 + $0x32e8] sm:$0xff] }
 0x3df   :  { %13732 = vmatpush2.bf16.msra.mxu1 %v17281_v60  ;;  %v1837_v33 = vld [vmem:[#allocation4 + $0x36c8] sm:$0xff]  ;;  %v17122_v39 = vcombine.high %v1709_v50, %v1713_v42  ;;  %v17121_v35 = vcombine.low %v1709_v50, %v1713_v42 }
 0x3e0   :  { %13733 = vmatprep.subr.bf16.mxu1 %v17274_v52  ;;  %v1841_v56 = vld [vmem:[#allocation4 + $0x36e8] sm:$0xff] }
 0x3e1   :  { %13693 = vmatpush2.bf16.msra.mxu0 %v17145_v17  ;;  %v17250_v51 = vcombine.high %v1837_v33, %v1841_v56  ;;  %v1701_v60 = vld [vmem:[#allocation4 + $0x3288] sm:$0xff]  ;;  %v17249_v57 = vcombine.low %v1837_v33, %v1841_v56 }
 0x3e2   :  { %13694 = vmatprep.subr.bf16.mxu0 %v17138_v28  ;;  %v1705_v46 = vld [vmem:[#allocation4 + $0x32a8] sm:$0xff] }
 0x3e3   :  { %13734 = vmatpush2.bf16.msra.mxu1 %v17273_v11  ;;  %v1829_v52 = vld [vmem:[#allocation4 + $0x3688] sm:$0xff]  ;;  %v17114_v1 = vcombine.high %v1701_v60, %v1705_v46  ;;  %v17113_v61 = vcombine.low %v1701_v60, %v1705_v46 }
 0x3e4   :  { %13735 = vmatprep.subr.bf16.mxu1 %v17266_v12  ;;  %v1833_v2 = vld [vmem:[#allocation4 + $0x36a8] sm:$0xff] }
 0x3e5   :  { %13695 = vmatpush2.bf16.msra.mxu0 %v17137_v19  ;;  %v17242_v17 = vcombine.high %v1829_v52, %v1833_v2  ;;  %v1693_v11 = vld [vmem:[#allocation4 + $0x3248] sm:$0xff]  ;;  %v17241_v41 = vcombine.low %v1829_v52, %v1833_v2 }
 0x3e6   :  { %13696 = vmatprep.subr.bf16.mxu0 %v17130_v38  ;;  %v1697_v28 = vld [vmem:[#allocation4 + $0x3268] sm:$0xff] }
 0x3e7   :  { %13736 = vmatpush2.bf16.msra.mxu1 %v17265_v34  ;;  %v1821_v12 = vld [vmem:[#allocation4 + $0x3648] sm:$0xff]  ;;  %v17106_v24 = vcombine.high %v1693_v11, %v1697_v28  ;;  %v17105_v42 = vcombine.low %v1693_v11, %v1697_v28 }
 0x3e8   :  { %13737 = vmatprep.subr.bf16.mxu1 %v17258_v63  ;;  %v1825_v3 = vld [vmem:[#allocation4 + $0x3668] sm:$0xff] }
 0x3e9   :  { %13697 = vmatpush2.bf16.msra.mxu0 %v17129_v30  ;;  %v17234_v19 = vcombine.high %v1821_v12, %v1825_v3  ;;  %v1685_v34 = vld [vmem:[#allocation4 + $0x3208] sm:$0xff]  ;;  %v17233_v33 = vcombine.low %v1821_v12, %v1825_v3 }
 0x3ea   :  { %13698 = vmatprep.subr.bf16.mxu0 %v17122_v39  ;;  %v1689_v38 = vld [vmem:[#allocation4 + $0x3228] sm:$0xff] }
 0x3eb   :  { %13738 = vmatpush2.bf16.msra.mxu1 %v17257_v23  ;;  %v1813_v63 = vld [vmem:[#allocation4 + $0x3608] sm:$0xff]  ;;  %v17098_v56 = vcombine.high %v1685_v34, %v1689_v38  ;;  %v17097_v46 = vcombine.low %v1685_v34, %v1689_v38 }
 0x3ec   :  { %13739 = vmatprep.subr.bf16.mxu1 %v17250_v51  ;;  %v1817_v50 = vld [vmem:[#allocation4 + $0x3628] sm:$0xff] }
 0x3ed   :  { %13699 = vmatpush2.bf16.msra.mxu0 %v17121_v35  ;;  %v17226_v30 = vcombine.high %v1813_v63, %v1817_v50  ;;  %v1933_v23 = vld [vmem:[#allocation4 + $0x39c8] sm:$0xff]  ;;  %v17225_v52 = vcombine.low %v1813_v63, %v1817_v50 }
 0x3ee   :  { %13700 = vmatprep.subr.bf16.mxu0 %v17114_v1  ;;  %v1937_v39 = vld [vmem:[#allocation4 + $0x39e8] sm:$0xff] }
 0x3ef   :  { %13740 = vmatpush2.bf16.msra.mxu1 %v17249_v57  ;;  %v2061_v51 = vld [vmem:[#allocation4 + $0x3dc8] sm:$0xff]  ;;  %v17346_v2 = vcombine.high %v1933_v23, %v1937_v39  ;;  %v17345_v28 = vcombine.low %v1933_v23, %v1937_v39 }
 0x3f0   :  { %13741 = vmatprep.subr.bf16.mxu1 %v17242_v17  ;;  %v2065_v60 = vld [vmem:[#allocation4 + $0x3de8] sm:$0xff] }
 0x3f1   :  { %13701 = vmatpush2.bf16.msra.mxu0 %v17113_v61  ;;  %v17474_v35 = vcombine.high %v2061_v51, %v2065_v60  ;;  %v1925_v57 = vld [vmem:[#allocation4 + $0x3988] sm:$0xff]  ;;  %v17473_v12 = vcombine.low %v2061_v51, %v2065_v60 }
 0x3f2   :  { %13702 = vmatprep.subr.bf16.mxu0 %v17106_v24  ;;  %v1929_v1 = vld [vmem:[#allocation4 + $0x39a8] sm:$0xff] }
 0x3f3   :  { %13742 = vmatpush2.bf16.msra.mxu1 %v17241_v41  ;;  %v2053_v17 = vld [vmem:[#allocation4 + $0x3d88] sm:$0xff]  ;;  %v17338_v3 = vcombine.high %v1925_v57, %v1929_v1 }
 0x3f4   :  { %13743 = vmatprep.subr.bf16.mxu1 %v17234_v19  ;;  %v2057_v11 = vld [vmem:[#allocation4 + $0x3da8] sm:$0xff] }
 0x3f5   :  { %13703 = vmatpush2.bf16.msra.mxu0 %v17105_v42  ;;  %v17466_v61 = vcombine.high %v2053_v17, %v2057_v11  ;;  %v1917_v41 = vld [vmem:[#allocation4 + $0x3948] sm:$0xff]  ;;  %v17337_v42 = vcombine.low %v1925_v57, %v1929_v1 }
 0x3f6   :  { %13704 = vmatprep.subr.bf16.mxu0 %v17098_v56  ;;  %v1921_v24 = vld [vmem:[#allocation4 + $0x3968] sm:$0xff]  ;;  %v17465_v56 = vcombine.low %v2053_v17, %v2057_v11 }
 0x3f7   :  { %13744 = vmatpush2.bf16.msra.mxu1 %v17233_v33  ;;  %v2045_v34 = vld [vmem:[#allocation4 + $0x3d48] sm:$0xff]  ;;  %v17329_v17 = vcombine.low %v1917_v41, %v1921_v24 }
 0x3f8   :  { %13745 = vmatprep.subr.bf16.mxu1 %v17226_v30  ;;  %v2049_v38 = vld [vmem:[#allocation4 + $0x3d68] sm:$0xff]  ;;  %v17330_v30 = vcombine.high %v1917_v41, %v1921_v24 }
 0x3f9   :  { %13705 = vmatpush2.bf16.msra.mxu0 %v17097_v46  ;;  %v17458_v60 = vcombine.high %v2045_v34, %v2049_v38  ;;  %v1909_v46 = vld [vmem:[#allocation4 + $0x3908] sm:$0xff] }
 0x3fa   :  { %13756 = vmatprep.subr.bf16.mxu0 %v17346_v2  ;;  %v2037_v2 = vld [vmem:[#allocation4 + $0x3d08] sm:$0xff] }
 0x3fb   :  { %13746 = vmatpush2.bf16.msra.mxu1 %v17225_v52  ;;  %v1913_v52 = vld [vmem:[#allocation4 + $0x3928] sm:$0xff] }
 0x3fc   :  { %13797 = vmatprep.subr.bf16.mxu1 %v17474_v35  ;;  %v13462_v19 = vpop.f32.mrf.mxu0  ;;  %13707 = vmatmul.mubr.bf16.vlgmr.msra.gmra.mxu0 %v17897_v53  ;;  %v2041_v35 = vld [vmem:[#allocation4 + $0x3d28] sm:$0xff] }
 0x3fd   :  { %v13463_v63 = vadd.f32 %v13462_v19, %v17999_v7  ;;  %13757 = vmatpush1.bf16.msra.mxu0 %v17345_v28  ;;  %13788 = vmatprep.mubr.bf16.mxu0 %v17909_v45  ;;  %v17322_v28 = vcombine.high %v1909_v46, %v1913_v52  ;;  %v1905_v19 = vld [vmem:[#allocation4 + $0x38e8] sm:$0xff] }
 0x3fe   :  { %v13503_v50 = vpop.f32.mrf.mxu1  ;;  %13748 = vmatmul.mubr.bf16.vlgmr.msra.gmra.mxu1 %v17903_v54  ;;  %v13464_v33 = vpop.f32.mrf.mxu0  ;;  %13758 = vmatprep.subr.bf16.mxu0 %v17338_v3  ;;  %v17450_v3 = vcombine.high %v2037_v2, %v2041_v35  ;;  %v1893_v24 = vld [vmem:[#allocation4 + $0x3888] sm:$0xff] }
 0x3ff   :  { %13798 = vmatpush1.bf16.msra.mxu1 %v17473_v12  ;;  %v18009_v23 = vadd.f32 %v13503_v50, %v13463_v63  ;;  %v13465_v39 = vadd.f32 %v13464_v33, %v18004_v0  ;;  %13829 = vmatprep.mubr.bf16.mxu1 %v17914_v48  ;;  %v17457_v0 = vcombine.low %v2045_v34, %v2049_v38  ;;  %v2029_v63 = vld [vmem:[#allocation4 + $0x3cc8] sm:$0xff] }
 0x400   :  { %v13505_v51 = vpop.f32.mrf.mxu1  ;;  %13799 = vmatprep.subr.bf16.mxu1 %v17466_v61  ;;  %v13466_v7 = vpop.f32.mrf.mxu0  ;;  %v1901_v61 = vld [vmem:[#allocation4 + $0x38c8] sm:$0xff]  ;;  %v17321_v33 = vcombine.low %v1909_v46, %v1913_v52 }
 0x401   :  { %v18014_v57 = vadd.f32 %v13505_v51, %v13465_v39  ;;  %13759 = vmatpush1.bf16.msra.mxu0 %v17337_v42  ;;  %v2033_v50 = vld [vmem:[#allocation4 + $0x3ce8] sm:$0xff]  ;;  %v17449_v39 = vcombine.low %v2037_v2, %v2041_v35  ;;  %v17314_v51 = vcombine.high %v1901_v61, %v1905_v19  ;;  %v17313_v38 = vcombine.low %v1901_v61, %v1905_v19 }
 0x402   :  { %v13507_v1 = vpop.f32.mrf.mxu1  ;;  %v13467_v11 = vpop.f32.mrf.mxu0  ;;  %13760 = vmatprep.subr.bf16.mxu0 %v17330_v30  ;;  %v17442_v41 = vcombine.high %v2029_v63, %v2033_v50  ;;  %v1897_v42 = vld [vmem:[#allocation4 + $0x38a8] sm:$0xff]  ;;  %v17441_v30 = vcombine.low %v2029_v63, %v2033_v50 }
 0x403   :  { %13800 = vmatpush1.bf16.msra.mxu1 %v17465_v56  ;;  %v2021_v56 = vld [vmem:[#allocation4 + $0x3c88] sm:$0xff]  ;;  %v17305_v2 = vcombine.low %v1893_v24, %v1897_v42 }
 0x404   :  { %v13508_v12 = vpop.f32.mrf.mxu1  ;;  %13801 = vmatprep.subr.bf16.mxu1 %v17458_v60  ;;  %v2025_v34 = vld [vmem:[#allocation4 + $0x3ca8] sm:$0xff]  ;;  %v17306_v60 = vcombine.high %v1893_v24, %v1897_v42 }
 0x405   :  { %13761 = vmatpush1.bf16.msra.mxu0 %v17329_v17  ;;  %v17434_v7 = vcombine.high %v2021_v56, %v2025_v34  ;;  %v1885_v1 = vld [vmem:[#allocation4 + $0x3848] sm:$0xff]  ;;  %v17433_v35 = vcombine.low %v2021_v56, %v2025_v34 }
 0x406   :  { %13762 = vmatprep.subr.bf16.mxu0 %v17322_v28  ;;  %v1889_v46 = vld [vmem:[#allocation4 + $0x3868] sm:$0xff] }
 0x407   :  { %13802 = vmatpush1.bf16.msra.mxu1 %v17457_v0  ;;  %v2013_v52 = vld [vmem:[#allocation4 + $0x3c48] sm:$0xff]  ;;  %v17298_v11 = vcombine.high %v1885_v1, %v1889_v46  ;;  %v17297_v19 = vcombine.low %v1885_v1, %v1889_v46 }
 0x408   :  { %13803 = vmatprep.subr.bf16.mxu1 %v17450_v3  ;;  %v2017_v17 = vld [vmem:[#allocation4 + $0x3c68] sm:$0xff] }
 0x409   :  { %13763 = vmatpush1.bf16.msra.mxu0 %v17321_v33  ;;  %v17426_v0 = vcombine.high %v2013_v52, %v2017_v17  ;;  %v1877_v28 = vld [vmem:[#allocation4 + $0x3808] sm:$0xff]  ;;  %v17425_v63 = vcombine.low %v2013_v52, %v2017_v17 }
 0x40a   :  { %13764 = vmatprep.subr.bf16.mxu0 %v17314_v51  ;;  %v1881_v12 = vld [vmem:[#allocation4 + $0x3828] sm:$0xff] }
 0x40b   :  { %13804 = vmatpush1.bf16.msra.mxu1 %v17449_v39  ;;  %v2005_v3 = vld [vmem:[#allocation4 + $0x3c08] sm:$0xff]  ;;  %v17290_v50 = vcombine.high %v1877_v28, %v1881_v12  ;;  %v17289_v42 = vcombine.low %v1877_v28, %v1881_v12 }
 0x40c   :  { %13805 = vmatprep.subr.bf16.mxu1 %v17442_v41  ;;  %v2009_v61 = vld [vmem:[#allocation4 + $0x3c28] sm:$0xff] }
 0x40d   :  { %13765 = vmatpush1.bf16.msra.mxu0 %v17313_v38  ;;  %v17418_v33 = vcombine.high %v2005_v3, %v2009_v61  ;;  %v1997_v39 = vld [vmem:[#allocation4 + $0x3bc8] sm:$0xff]  ;;  %v17417_v56 = vcombine.low %v2005_v3, %v2009_v61 }
 0x40e   :  { %13766 = vmatprep.subr.bf16.mxu0 %v17306_v60  ;;  %v2001_v51 = vld [vmem:[#allocation4 + $0x3be8] sm:$0xff] }
 0x40f   :  { %13806 = vmatpush1.bf16.msra.mxu1 %v17441_v30  ;;  %v2125_v41 = vld [vmem:[#allocation4 + $0x3fc8] sm:$0xff]  ;;  %v17410_v34 = vcombine.high %v1997_v39, %v2001_v51  ;;  %v17409_v46 = vcombine.low %v1997_v39, %v2001_v51 }
 0x410   :  { %13807 = vmatprep.subr.bf16.mxu1 %v17434_v7  ;;  %v2129_v24 = vld [vmem:[#allocation4 + $0x3fe8] sm:$0xff] }
 0x411   :  { %13767 = vmatpush1.bf16.msra.mxu0 %v17305_v2  ;;  %v17538_v38 = vcombine.high %v2125_v41, %v2129_v24  ;;  %v1989_v30 = vld [vmem:[#allocation4 + $0x3b88] sm:$0xff]  ;;  %v17537_v52 = vcombine.low %v2125_v41, %v2129_v24 }
 0x412   :  { %13768 = vmatprep.subr.bf16.mxu0 %v17298_v11  ;;  %v1993_v60 = vld [vmem:[#allocation4 + $0x3ba8] sm:$0xff] }
 0x413   :  { %13808 = vmatpush1.bf16.msra.mxu1 %v17433_v35  ;;  %v2117_v7 = vld [vmem:[#allocation4 + $0x3f88] sm:$0xff]  ;;  %v17402_v17 = vcombine.high %v1989_v30, %v1993_v60  ;;  %v17401_v12 = vcombine.low %v1989_v30, %v1993_v60 }
 0x414   :  { %13809 = vmatprep.subr.bf16.mxu1 %v17426_v0  ;;  %v2121_v1 = vld [vmem:[#allocation4 + $0x3fa8] sm:$0xff] }
 0x415   :  { %13769 = vmatpush1.bf16.msra.mxu0 %v17297_v19  ;;  %v17530_v2 = vcombine.high %v2117_v7, %v2121_v1  ;;  %v1981_v35 = vld [vmem:[#allocation4 + $0x3b48] sm:$0xff]  ;;  %v17529_v3 = vcombine.low %v2117_v7, %v2121_v1 }
 0x416   :  { %13770 = vmatprep.subr.bf16.mxu0 %v17290_v50  ;;  %v1985_v11 = vld [vmem:[#allocation4 + $0x3b68] sm:$0xff] }
 0x417   :  { %13810 = vmatpush1.bf16.msra.mxu1 %v17425_v63  ;;  %v2109_v0 = vld [vmem:[#allocation4 + $0x3f48] sm:$0xff]  ;;  %v17394_v61 = vcombine.high %v1981_v35, %v1985_v11  ;;  %v17393_v51 = vcombine.low %v1981_v35, %v1985_v11 }
 0x418   :  { %13811 = vmatprep.subr.bf16.mxu1 %v17418_v33  ;;  %v2113_v28 = vld [vmem:[#allocation4 + $0x3f68] sm:$0xff] }
 0x419   :  { %13771 = vmatpush1.bf16.msra.mxu0 %v17289_v42  ;;  %v17522_v19 = vcombine.high %v2109_v0, %v2113_v28  ;;  %v1973_v63 = vld [vmem:[#allocation4 + $0x3b08] sm:$0xff]  ;;  %v17521_v41 = vcombine.low %v2109_v0, %v2113_v28 }
 0x41a   :  { %13772 = vmatprep.subr.bf16.mxu0 %v17410_v34  ;;  %v1977_v50 = vld [vmem:[#allocation4 + $0x3b28] sm:$0xff] }
 0x41b   :  { %13812 = vmatpush1.bf16.msra.mxu1 %v17417_v56  ;;  %v2101_v33 = vld [vmem:[#allocation4 + $0x3f08] sm:$0xff]  ;;  %v17386_v24 = vcombine.high %v1973_v63, %v1977_v50  ;;  %v17385_v60 = vcombine.low %v1973_v63, %v1977_v50 }
 0x41c   :  { %13813 = vmatprep.subr.bf16.mxu1 %v17538_v38  ;;  %v2105_v39 = vld [vmem:[#allocation4 + $0x3f28] sm:$0xff] }
 0x41d   :  { %13773 = vmatpush2.bf16.msra.mxu0 %v17409_v46  ;;  %v17514_v42 = vcombine.high %v2101_v33, %v2105_v39  ;;  %v1965_v56 = vld [vmem:[#allocation4 + $0x3ac8] sm:$0xff]  ;;  %v17513_v7 = vcombine.low %v2101_v33, %v2105_v39 }
 0x41e   :  { %13774 = vmatprep.subr.bf16.mxu0 %v17402_v17  ;;  %v1969_v34 = vld [vmem:[#allocation4 + $0x3ae8] sm:$0xff] }
 0x41f   :  { %13814 = vmatpush2.bf16.msra.mxu1 %v17537_v52  ;;  %v2093_v38 = vld [vmem:[#allocation4 + $0x3ec8] sm:$0xff]  ;;  %v17378_v1 = vcombine.high %v1965_v56, %v1969_v34  ;;  %v17377_v11 = vcombine.low %v1965_v56, %v1969_v34 }
 0x420   :  { %13815 = vmatprep.subr.bf16.mxu1 %v17530_v2  ;;  %v2097_v30 = vld [vmem:[#allocation4 + $0x3ee8] sm:$0xff] }
 0x421   :  { %13775 = vmatpush2.bf16.msra.mxu0 %v17401_v12  ;;  %v17506_v46 = vcombine.high %v2093_v38, %v2097_v30  ;;  %v1957_v52 = vld [vmem:[#allocation4 + $0x3a88] sm:$0xff]  ;;  %v17505_v0 = vcombine.low %v2093_v38, %v2097_v30 }
 0x422   :  { %13776 = vmatprep.subr.bf16.mxu0 %v17394_v61  ;;  %v1961_v17 = vld [vmem:[#allocation4 + $0x3aa8] sm:$0xff] }
 0x423   :  { %13816 = vmatpush2.bf16.msra.mxu1 %v17529_v3  ;;  %v2085_v2 = vld [vmem:[#allocation4 + $0x3e88] sm:$0xff]  ;;  %v17370_v28 = vcombine.high %v1957_v52, %v1961_v17  ;;  %v17369_v50 = vcombine.low %v1957_v52, %v1961_v17  ;;  %v274_v52 = vld [vmem:[#allocation4 + $0x5f0] sm:$0xff] }
 0x424   :  { %13817 = vmatprep.subr.bf16.mxu1 %v17522_v19  ;;  %v2089_v35 = vld [vmem:[#allocation4 + $0x3ea8] sm:$0xff] }
 0x425   :  { %13777 = vmatpush2.bf16.msra.mxu0 %v17393_v51  ;;  %v17498_v12 = vcombine.high %v2085_v2, %v2089_v35  ;;  %v1949_v3 = vld [vmem:[#allocation4 + $0x3a48] sm:$0xff]  ;;  %v17497_v33 = vcombine.low %v2085_v2, %v2089_v35 }
 0x426   :  { %13778 = vmatprep.subr.bf16.mxu0 %v17386_v24  ;;  %v1953_v61 = vld [vmem:[#allocation4 + $0x3a68] sm:$0xff] }
 0x427   :  { %13818 = vmatpush2.bf16.msra.mxu1 %v17521_v41  ;;  %v2077_v19 = vld [vmem:[#allocation4 + $0x3e48] sm:$0xff]  ;;  %v17362_v39 = vcombine.high %v1949_v3, %v1953_v61  ;;  %v17361_v34 = vcombine.low %v1949_v3, %v1953_v61  ;;  %v266_v3 = vld [vmem:[#allocation4 + $0x5b0] sm:$0xff] }
 0x428   :  { %13819 = vmatprep.subr.bf16.mxu1 %v17514_v42  ;;  %v2081_v63 = vld [vmem:[#allocation4 + $0x3e68] sm:$0xff] }
 0x429   :  { %13779 = vmatpush2.bf16.msra.mxu0 %v17385_v60  ;;  %v17490_v51 = vcombine.high %v2077_v19, %v2081_v63  ;;  %v1941_v41 = vld [vmem:[#allocation4 + $0x3a08] sm:$0xff]  ;;  %v17489_v38 = vcombine.low %v2077_v19, %v2081_v63 }
 0x42a   :  { %13780 = vmatprep.subr.bf16.mxu0 %v17378_v1  ;;  %v1945_v24 = vld [vmem:[#allocation4 + $0x3a28] sm:$0xff]  ;;  %v146_v1 = vld [vmem:[#allocation4 + $0x1f0] sm:$0xff] }
 0x42b   :  { %13820 = vmatpush2.bf16.msra.mxu1 %v17513_v7  ;;  %v2069_v42 = vld [vmem:[#allocation4 + $0x3e08] sm:$0xff]  ;;  %v17354_v30 = vcombine.high %v1941_v41, %v1945_v24  ;;  %v142_v7 = vld [vmem:[#allocation4 + $0x1d0] sm:$0xff]  ;;  %v17353_v17 = vcombine.low %v1941_v41, %v1945_v24 }
 0x42c   :  { %13821 = vmatprep.subr.bf16.mxu1 %v17506_v46  ;;  %v2073_v56 = vld [vmem:[#allocation4 + $0x3e28] sm:$0xff]  ;;  %v270_v46 = vld [vmem:[#allocation4 + $0x5d0] sm:$0xff]  ;;  %v15556_v35 = vcombine.high %v142_v7, %v146_v1  ;;  %v15555_v61 = vcombine.low %v142_v7, %v146_v1 }
 0x42d   :  { %13781 = vmatpush2.bf16.msra.mxu0 %v17377_v11  ;;  %v17482_v60 = vcombine.high %v2069_v42, %v2073_v56  ;;  %v17481_v2 = vcombine.low %v2069_v42, %v2073_v56  ;;  %v15684_v11 = vcombine.high %v270_v46, %v274_v52  ;;  %v15683_v19 = vcombine.low %v270_v46, %v274_v52  ;;  %v254_v41 = vld [vmem:[#allocation4 + $0x550] sm:$0xff] }
 0x42e   :  { %13782 = vmatprep.subr.bf16.mxu0 %v17370_v28  ;;  %v138_v28 = vld [vmem:[#allocation4 + $0x1b0] sm:$0xff] }
 0x42f   :  { %13822 = vmatpush2.bf16.msra.mxu1 %v17505_v0  ;;  %v134_v0 = vld [vmem:[#allocation4 + $0x190] sm:$0xff] }
 0x430   :  { %13823 = vmatprep.subr.bf16.mxu1 %v17498_v12  ;;  %v262_v12 = vld [vmem:[#allocation4 + $0x590] sm:$0xff]  ;;  %v15548_v63 = vcombine.high %v134_v0, %v138_v28 }
 0x431   :  { %13783 = vmatpush2.bf16.msra.mxu0 %v17369_v50  ;;  %v15676_v50 = vcombine.high %v262_v12, %v266_v3  ;;  %v258_v24 = vld [vmem:[#allocation4 + $0x570] sm:$0xff] }
 0x432   :  { %13784 = vmatprep.subr.bf16.mxu0 %v17362_v39  ;;  %v130_v39 = vld [vmem:[#allocation4 + $0x170] sm:$0xff]  ;;  %v15668_v52 = vcombine.high %v254_v41, %v258_v24 }
 0x433   :  { %13824 = vmatpush2.bf16.msra.mxu1 %v17497_v33  ;;  %v126_v33 = vld [vmem:[#allocation4 + $0x150] sm:$0xff] }
 0x434   :  { %13825 = vmatprep.subr.bf16.mxu1 %v17490_v51 }
 0x435   :  { %13785 = vmatpush2.bf16.msra.mxu0 %v17361_v34  ;;  %v15547_v34 = vcombine.low %v134_v0, %v138_v28 }
 0x436   :  { %13786 = vmatprep.subr.bf16.mxu0 %v17354_v30  ;;  %v15675_v30 = vcombine.low %v262_v12, %v266_v3  ;;  %v15539_v12 = vcombine.low %v126_v33, %v130_v39 }
 0x437   :  { %13826 = vmatpush2.bf16.msra.mxu1 %v17489_v38 }
 0x438   :  { %13827 = vmatprep.subr.bf16.mxu1 %v17482_v60  ;;  %v15540_v60 = vcombine.high %v126_v33, %v130_v39  ;;  %v102_v39 = vld [vmem:[#allocation4 + $0x90] sm:$0xff] }
 0x439   :  { %13787 = vmatpush2.bf16.msra.mxu0 %v17353_v17  ;;  %v118_v17 = vld [vmem:[#allocation4 + $0x110] sm:$0xff] }
 0x43a   :  { %13838 = vmatprep.subr.bf16.mxu0 %v15556_v35  ;;  %v246_v35 = vld [vmem:[#allocation4 + $0x510] sm:$0xff] }
 0x43b   :  { %13828 = vmatpush2.bf16.msra.mxu1 %v17481_v2  ;;  %v122_v2 = vld [vmem:[#allocation4 + $0x130] sm:$0xff] }
 0x43c   :  { %13879 = vmatprep.subr.bf16.mxu1 %v15684_v11  ;;  %v13544_v51 = vpop.f32.mrf.mxu0  ;;  %13789 = vmatmul.mubr.bf16.vlgmr.msra.gmra.mxu0 %v17927_v44  ;;  %v250_v11 = vld [vmem:[#allocation4 + $0x530] sm:$0xff] }
 0x43d   :  { %v13545_v42 = vadd.f32 %v13544_v51, %v18009_v23  ;;  %13839 = vmatpush1.bf16.msra.mxu0 %v15555_v61  ;;  %13870 = vmatprep.mubr.bf16.mxu0 %v17723_v58  ;;  %v15532_v61 = vcombine.high %v118_v17, %v122_v2  ;;  %v114_v51 = vld [vmem:[#allocation4 + $0xf0] sm:$0xff] }
 0x43e   :  { %v13585_v56 = vpop.f32.mrf.mxu1  ;;  %13830 = vmatmul.mubr.bf16.vlgmr.msra.gmra.mxu1 %v17931_v14  ;;  %v13546_v38 = vpop.f32.mrf.mxu0  ;;  %13840 = vmatprep.subr.bf16.mxu0 %v15548_v63  ;;  %v15660_v63 = vcombine.high %v246_v35, %v250_v11 }
 0x43f   :  { %13880 = vmatpush1.bf16.msra.mxu1 %v15683_v19  ;;  %v18019_v7 = vadd.f32 %v13585_v56, %v13545_v42  ;;  %v13547_v1 = vadd.f32 %v13546_v38, %v18014_v57  ;;  %13911 = vmatprep.mubr.bf16.mxu1 %v17727_v59  ;;  %v15667_v57 = vcombine.low %v254_v41, %v258_v24  ;;  %v238_v42 = vld [vmem:[#allocation4 + $0x4d0] sm:$0xff] }
 0x440   :  { %v13587_v46 = vpop.f32.mrf.mxu1  ;;  %13881 = vmatprep.subr.bf16.mxu1 %v15676_v50  ;;  %v13548_v23 = vpop.f32.mrf.mxu0  ;;  %v110_v50 = vld [vmem:[#allocation4 + $0xd0] sm:$0xff]  ;;  %v15531_v38 = vcombine.low %v118_v17, %v122_v2 }
 0x441   :  { %v18024_v0 = vadd.f32 %v13587_v46, %v13547_v1  ;;  %13841 = vmatpush1.bf16.msra.mxu0 %v15547_v34  ;;  %v242_v56 = vld [vmem:[#allocation4 + $0x4f0] sm:$0xff]  ;;  %v15659_v1 = vcombine.low %v246_v35, %v250_v11  ;;  %v15524_v46 = vcombine.high %v110_v50, %v114_v51  ;;  %v15523_v24 = vcombine.low %v110_v50, %v114_v51 }
 0x442   :  { %v13589_v28 = vpop.f32.mrf.mxu1  ;;  %v13549_v3 = vpop.f32.mrf.mxu0  ;;  %13842 = vmatprep.subr.bf16.mxu0 %v15540_v60  ;;  %v15652_v33 = vcombine.high %v238_v42, %v242_v56  ;;  %v106_v34 = vld [vmem:[#allocation4 + $0xb0] sm:$0xff]  ;;  %v15651_v60 = vcombine.low %v238_v42, %v242_v56 }
 0x443   :  { %13882 = vmatpush1.bf16.msra.mxu1 %v15675_v30  ;;  %v230_v30 = vld [vmem:[#allocation4 + $0x490] sm:$0xff]  ;;  %v15515_v35 = vcombine.low %v102_v39, %v106_v34 }
 0x444   :  { %v13590_v19 = vpop.f32.mrf.mxu1  ;;  %13883 = vmatprep.subr.bf16.mxu1 %v15668_v52  ;;  %v234_v41 = vld [vmem:[#allocation4 + $0x4b0] sm:$0xff]  ;;  %v15516_v52 = vcombine.high %v102_v39, %v106_v34 }
 0x445   :  { %13843 = vmatpush1.bf16.msra.mxu0 %v15539_v12  ;;  %v15644_v23 = vcombine.high %v230_v30, %v234_v41  ;;  %v94_v28 = vld [vmem:[#allocation4 + $0x50] sm:$0xff]  ;;  %v15643_v11 = vcombine.low %v230_v30, %v234_v41 }
 0x446   :  { %13844 = vmatprep.subr.bf16.mxu0 %v15532_v61  ;;  %v98_v17 = vld [vmem:[#allocation4 + $0x70] sm:$0xff] }
 0x447   :  { %13884 = vmatpush1.bf16.msra.mxu1 %v15667_v57  ;;  %v222_v2 = vld [vmem:[#allocation4 + $0x450] sm:$0xff]  ;;  %v15508_v3 = vcombine.high %v94_v28, %v98_v17  ;;  %v15507_v51 = vcombine.low %v94_v28, %v98_v17 }
 0x448   :  { %13885 = vmatprep.subr.bf16.mxu1 %v15660_v63  ;;  %v226_v12 = vld [vmem:[#allocation4 + $0x470] sm:$0xff] }
 0x449   :  { %13845 = vmatpush1.bf16.msra.mxu0 %v15531_v38  ;;  %v15636_v57 = vcombine.high %v222_v2, %v226_v12  ;;  %v86_v61 = vld [vmem:[#allocation4 + $0x10] sm:$0xff]  ;;  %v15635_v42 = vcombine.low %v222_v2, %v226_v12 }
 0x44a   :  { %13846 = vmatprep.subr.bf16.mxu0 %v15524_v46  ;;  %v90_v19 = vld [vmem:[#allocation4 + $0x30] sm:$0xff] }
 0x44b   :  { %13886 = vmatpush1.bf16.msra.mxu1 %v15659_v1  ;;  %v214_v63 = vld [vmem:[#allocation4 + $0x410] sm:$0xff]  ;;  %v15500_v56 = vcombine.high %v86_v61, %v90_v19  ;;  %v15499_v34 = vcombine.low %v86_v61, %v90_v19 }
 0x44c   :  { %13887 = vmatprep.subr.bf16.mxu1 %v15652_v33  ;;  %v218_v50 = vld [vmem:[#allocation4 + $0x430] sm:$0xff] }
 0x44d   :  { %13847 = vmatpush1.bf16.msra.mxu0 %v15523_v24  ;;  %v15628_v38 = vcombine.high %v214_v63, %v218_v50  ;;  %v206_v1 = vld [vmem:[#allocation4 + $0x3d0] sm:$0xff]  ;;  %v15627_v30 = vcombine.low %v214_v63, %v218_v50 }
 0x44e   :  { %13848 = vmatprep.subr.bf16.mxu0 %v15516_v52  ;;  %v210_v46 = vld [vmem:[#allocation4 + $0x3f0] sm:$0xff] }
 0x44f   :  { %13888 = vmatpush1.bf16.msra.mxu1 %v15651_v60  ;;  %v334_v33 = vld [vmem:[#allocation4 + $0x7d0] sm:$0xff]  ;;  %v15620_v41 = vcombine.high %v206_v1, %v210_v46  ;;  %v15619_v17 = vcombine.low %v206_v1, %v210_v46 }
 0x450   :  { %13889 = vmatprep.subr.bf16.mxu1 %v15644_v23  ;;  %v338_v39 = vld [vmem:[#allocation4 + $0x7f0] sm:$0xff] }
 0x451   :  { %13849 = vmatpush1.bf16.msra.mxu0 %v15515_v35  ;;  %v15748_v24 = vcombine.high %v334_v33, %v338_v39  ;;  %v198_v60 = vld [vmem:[#allocation4 + $0x390] sm:$0xff]  ;;  %v15747_v2 = vcombine.low %v334_v33, %v338_v39 }
 0x452   :  { %13850 = vmatprep.subr.bf16.mxu0 %v15508_v3  ;;  %v202_v52 = vld [vmem:[#allocation4 + $0x3b0] sm:$0xff] }
 0x453   :  { %13890 = vmatpush1.bf16.msra.mxu1 %v15643_v11  ;;  %v326_v23 = vld [vmem:[#allocation4 + $0x790] sm:$0xff]  ;;  %v15612_v12 = vcombine.high %v198_v60, %v202_v52  ;;  %v15611_v19 = vcombine.low %v198_v60, %v202_v52 }
 0x454   :  { %13891 = vmatprep.subr.bf16.mxu1 %v15636_v57  ;;  %v330_v28 = vld [vmem:[#allocation4 + $0x7b0] sm:$0xff] }
 0x455   :  { %13851 = vmatpush1.bf16.msra.mxu0 %v15507_v51  ;;  %v15740_v35 = vcombine.high %v326_v23, %v330_v28  ;;  %v190_v11 = vld [vmem:[#allocation4 + $0x350] sm:$0xff]  ;;  %v15739_v63 = vcombine.low %v326_v23, %v330_v28 }
 0x456   :  { %13852 = vmatprep.subr.bf16.mxu0 %v15500_v56  ;;  %v194_v3 = vld [vmem:[#allocation4 + $0x370] sm:$0xff] }
 0x457   :  { %13892 = vmatpush1.bf16.msra.mxu1 %v15635_v42  ;;  %v318_v57 = vld [vmem:[#allocation4 + $0x750] sm:$0xff]  ;;  %v15604_v50 = vcombine.high %v190_v11, %v194_v3  ;;  %v15603_v46 = vcombine.low %v190_v11, %v194_v3 }
 0x458   :  { %13893 = vmatprep.subr.bf16.mxu1 %v15628_v38  ;;  %v322_v61 = vld [vmem:[#allocation4 + $0x770] sm:$0xff] }
 0x459   :  { %13853 = vmatpush1.bf16.msra.mxu0 %v15499_v34  ;;  %v15732_v51 = vcombine.high %v318_v57, %v322_v61  ;;  %v182_v42 = vld [vmem:[#allocation4 + $0x310] sm:$0xff]  ;;  %v15731_v33 = vcombine.low %v318_v57, %v322_v61 }
 0x45a   :  { %13854 = vmatprep.subr.bf16.mxu0 %v15620_v41  ;;  %v186_v56 = vld [vmem:[#allocation4 + $0x330] sm:$0xff] }
 0x45b   :  { %13894 = vmatpush1.bf16.msra.mxu1 %v15627_v30  ;;  %v310_v38 = vld [vmem:[#allocation4 + $0x710] sm:$0xff]  ;;  %v15596_v39 = vcombine.high %v182_v42, %v186_v56  ;;  %v15595_v52 = vcombine.low %v182_v42, %v186_v56 }
 0x45c   :  { %13895 = vmatprep.subr.bf16.mxu1 %v15748_v24  ;;  %v314_v1 = vld [vmem:[#allocation4 + $0x730] sm:$0xff] }
 0x45d   :  { %13855 = vmatpush2.bf16.msra.mxu0 %v15619_v17  ;;  %v15724_v34 = vcombine.high %v310_v38, %v314_v1  ;;  %v174_v30 = vld [vmem:[#allocation4 + $0x2d0] sm:$0xff]  ;;  %v15723_v23 = vcombine.low %v310_v38, %v314_v1 }
 0x45e   :  { %13856 = vmatprep.subr.bf16.mxu0 %v15612_v12  ;;  %v178_v41 = vld [vmem:[#allocation4 + $0x2f0] sm:$0xff] }
 0x45f   :  { %13896 = vmatpush2.bf16.msra.mxu1 %v15747_v2  ;;  %v302_v24 = vld [vmem:[#allocation4 + $0x6d0] sm:$0xff]  ;;  %v15588_v28 = vcombine.high %v174_v30, %v178_v41  ;;  %v15587_v3 = vcombine.low %v174_v30, %v178_v41 }
 0x460   :  { %13897 = vmatprep.subr.bf16.mxu1 %v15740_v35  ;;  %v306_v60 = vld [vmem:[#allocation4 + $0x6f0] sm:$0xff] }
 0x461   :  { %13857 = vmatpush2.bf16.msra.mxu0 %v15611_v19  ;;  %v15716_v17 = vcombine.high %v302_v24, %v306_v60  ;;  %v166_v2 = vld [vmem:[#allocation4 + $0x290] sm:$0xff]  ;;  %v15715_v57 = vcombine.low %v302_v24, %v306_v60 }
 0x462   :  { %13858 = vmatprep.subr.bf16.mxu0 %v15604_v50  ;;  %v170_v12 = vld [vmem:[#allocation4 + $0x2b0] sm:$0xff] }
 0x463   :  { %13898 = vmatpush2.bf16.msra.mxu1 %v15739_v63  ;;  %v294_v35 = vld [vmem:[#allocation4 + $0x690] sm:$0xff]  ;;  %v15580_v61 = vcombine.high %v166_v2, %v170_v12  ;;  %v15579_v56 = vcombine.low %v166_v2, %v170_v12 }
 0x464   :  { %13899 = vmatprep.subr.bf16.mxu1 %v15732_v51  ;;  %v298_v11 = vld [vmem:[#allocation4 + $0x6b0] sm:$0xff] }
 0x465   :  { %13859 = vmatpush2.bf16.msra.mxu0 %v15603_v46  ;;  %v15708_v19 = vcombine.high %v294_v35, %v298_v11  ;;  %v158_v63 = vld [vmem:[#allocation4 + $0x250] sm:$0xff]  ;;  %v15707_v38 = vcombine.low %v294_v35, %v298_v11 }
 0x466   :  { %13860 = vmatprep.subr.bf16.mxu0 %v15596_v39  ;;  %v162_v50 = vld [vmem:[#allocation4 + $0x270] sm:$0xff] }
 0x467   :  { %13900 = vmatpush2.bf16.msra.mxu1 %v15731_v33  ;;  %v286_v51 = vld [vmem:[#allocation4 + $0x650] sm:$0xff]  ;;  %v15572_v1 = vcombine.high %v158_v63, %v162_v50  ;;  %v15571_v41 = vcombine.low %v158_v63, %v162_v50 }
 0x468   :  { %13901 = vmatprep.subr.bf16.mxu1 %v15724_v34  ;;  %v290_v42 = vld [vmem:[#allocation4 + $0x670] sm:$0xff] }
 0x469   :  { %13861 = vmatpush2.bf16.msra.mxu0 %v15595_v52  ;;  %v15700_v46 = vcombine.high %v286_v51, %v290_v42  ;;  %v150_v33 = vld [vmem:[#allocation4 + $0x210] sm:$0xff]  ;;  %v15699_v24 = vcombine.low %v286_v51, %v290_v42 }
 0x46a   :  { %13862 = vmatprep.subr.bf16.mxu0 %v15588_v28  ;;  %v154_v39 = vld [vmem:[#allocation4 + $0x230] sm:$0xff] }
 0x46b   :  { %13902 = vmatpush2.bf16.msra.mxu1 %v15723_v23  ;;  %v278_v34 = vld [vmem:[#allocation4 + $0x610] sm:$0xff]  ;;  %v15564_v60 = vcombine.high %v150_v33, %v154_v39  ;;  %v15563_v12 = vcombine.low %v150_v33, %v154_v39 }
 0x46c   :  { %13903 = vmatprep.subr.bf16.mxu1 %v15716_v17  ;;  %v282_v30 = vld [vmem:[#allocation4 + $0x630] sm:$0xff] }
 0x46d   :  { %13863 = vmatpush2.bf16.msra.mxu0 %v15587_v3  ;;  %v15692_v52 = vcombine.high %v278_v34, %v282_v30  ;;  %v398_v23 = vld [vmem:[#allocation4 + $0x9d0] sm:$0xff]  ;;  %v15691_v35 = vcombine.low %v278_v34, %v282_v30 }
 0x46e   :  { %13864 = vmatprep.subr.bf16.mxu0 %v15580_v61  ;;  %v402_v28 = vld [vmem:[#allocation4 + $0x9f0] sm:$0xff] }
 0x46f   :  { %13904 = vmatpush2.bf16.msra.mxu1 %v15715_v57  ;;  %v526_v17 = vld [vmem:[#allocation4 + $0xdd0] sm:$0xff]  ;;  %v15812_v11 = vcombine.high %v398_v23, %v402_v28  ;;  %v15811_v50 = vcombine.low %v398_v23, %v402_v28 }
 0x470   :  { %13905 = vmatprep.subr.bf16.mxu1 %v15708_v19  ;;  %v530_v2 = vld [vmem:[#allocation4 + $0xdf0] sm:$0xff] }
 0x471   :  { %13865 = vmatpush2.bf16.msra.mxu0 %v15579_v56  ;;  %v15940_v3 = vcombine.high %v526_v17, %v530_v2  ;;  %v390_v57 = vld [vmem:[#allocation4 + $0x990] sm:$0xff]  ;;  %v15939_v51 = vcombine.low %v526_v17, %v530_v2 }
 0x472   :  { %13866 = vmatprep.subr.bf16.mxu0 %v15572_v1  ;;  %v394_v61 = vld [vmem:[#allocation4 + $0x9b0] sm:$0xff] }
 0x473   :  { %13906 = vmatpush2.bf16.msra.mxu1 %v15707_v38  ;;  %v518_v19 = vld [vmem:[#allocation4 + $0xd90] sm:$0xff]  ;;  %v15804_v42 = vcombine.high %v390_v57, %v394_v61 }
 0x474   :  { %13907 = vmatprep.subr.bf16.mxu1 %v15700_v46  ;;  %v522_v63 = vld [vmem:[#allocation4 + $0xdb0] sm:$0xff] }
 0x475   :  { %13867 = vmatpush2.bf16.msra.mxu0 %v15571_v41  ;;  %v15932_v56 = vcombine.high %v518_v19, %v522_v63  ;;  %v382_v38 = vld [vmem:[#allocation4 + $0x950] sm:$0xff]  ;;  %v15803_v41 = vcombine.low %v390_v57, %v394_v61 }
 0x476   :  { %13868 = vmatprep.subr.bf16.mxu0 %v15564_v60  ;;  %v386_v1 = vld [vmem:[#allocation4 + $0x970] sm:$0xff]  ;;  %v15931_v60 = vcombine.low %v518_v19, %v522_v63 }
 0x477   :  { %13908 = vmatpush2.bf16.msra.mxu1 %v15699_v24  ;;  %v510_v33 = vld [vmem:[#allocation4 + $0xd50] sm:$0xff]  ;;  %v15795_v19 = vcombine.low %v382_v38, %v386_v1 }
 0x478   :  { %13909 = vmatprep.subr.bf16.mxu1 %v15692_v52  ;;  %v514_v39 = vld [vmem:[#allocation4 + $0xd70] sm:$0xff]  ;;  %v15796_v52 = vcombine.high %v382_v38, %v386_v1 }
 0x479   :  { %13869 = vmatpush2.bf16.msra.mxu0 %v15563_v12  ;;  %v15924_v2 = vcombine.high %v510_v33, %v514_v39  ;;  %v374_v12 = vld [vmem:[#allocation4 + $0x910] sm:$0xff] }
 0x47a   :  { %13920 = vmatprep.subr.bf16.mxu0 %v15812_v11  ;;  %v502_v11 = vld [vmem:[#allocation4 + $0xd10] sm:$0xff] }
 0x47b   :  { %13910 = vmatpush2.bf16.msra.mxu1 %v15691_v35  ;;  %v378_v35 = vld [vmem:[#allocation4 + $0x930] sm:$0xff] }
 0x47c   :  { %13961 = vmatprep.subr.bf16.mxu1 %v15940_v3  ;;  %v13626_v46 = vpop.f32.mrf.mxu0  ;;  %13871 = vmatmul.mubr.bf16.vlgmr.msra.gmra.mxu0 %v17733_v16  ;;  %v506_v3 = vld [vmem:[#allocation4 + $0xd30] sm:$0xff] }
 0x47d   :  { %v13627_v34 = vadd.f32 %v13626_v46, %v18019_v7  ;;  %13921 = vmatpush1.bf16.msra.mxu0 %v15811_v50  ;;  %13952 = vmatprep.mubr.bf16.mxu0 %v17745_v27  ;;  %v15788_v50 = vcombine.high %v374_v12, %v378_v35  ;;  %v370_v46 = vld [vmem:[#allocation4 + $0x8f0] sm:$0xff] }
 0x47e   :  { %v13667_v30 = vpop.f32.mrf.mxu1  ;;  %13912 = vmatmul.mubr.bf16.vlgmr.msra.gmra.mxu1 %v17739_v20  ;;  %v13628_v24 = vpop.f32.mrf.mxu0  ;;  %13922 = vmatprep.subr.bf16.mxu0 %v15804_v42  ;;  %v15916_v42 = vcombine.high %v502_v11, %v506_v3  ;;  %v358_v1 = vld [vmem:[#allocation4 + $0x890] sm:$0xff] }
 0x47f   :  { %13962 = vmatpush1.bf16.msra.mxu1 %v15939_v51  ;;  %v18029_v23 = vadd.f32 %v13667_v30, %v13627_v34  ;;  %v13629_v28 = vadd.f32 %v13628_v24, %v18024_v0  ;;  %13993 = vmatprep.mubr.bf16.mxu1 %v17750_v29  ;;  %v15923_v0 = vcombine.low %v510_v33, %v514_v39  ;;  %v494_v34 = vld [vmem:[#allocation4 + $0xcd0] sm:$0xff] }
 0x480   :  { %v13669_v17 = vpop.f32.mrf.mxu1  ;;  %13963 = vmatprep.subr.bf16.mxu1 %v15932_v56  ;;  %v13630_v7 = vpop.f32.mrf.mxu0  ;;  %v366_v56 = vld [vmem:[#allocation4 + $0x8d0] sm:$0xff]  ;;  %v15787_v24 = vcombine.low %v374_v12, %v378_v35 }
 0x481   :  { %v18034_v57 = vadd.f32 %v13669_v17, %v13629_v28  ;;  %13923 = vmatpush1.bf16.msra.mxu0 %v15803_v41  ;;  %v498_v30 = vld [vmem:[#allocation4 + $0xcf0] sm:$0xff]  ;;  %v15915_v28 = vcombine.low %v502_v11, %v506_v3  ;;  %v15780_v17 = vcombine.high %v366_v56, %v370_v46  ;;  %v15779_v39 = vcombine.low %v366_v56, %v370_v46 }
 0x482   :  { %v13671_v61 = vpop.f32.mrf.mxu1  ;;  %v13631_v63 = vpop.f32.mrf.mxu0  ;;  %13924 = vmatprep.subr.bf16.mxu0 %v15796_v52  ;;  %v15908_v38 = vcombine.high %v494_v34, %v498_v30  ;;  %v362_v41 = vld [vmem:[#allocation4 + $0x8b0] sm:$0xff]  ;;  %v15907_v52 = vcombine.low %v494_v34, %v498_v30 }
 0x483   :  { %13964 = vmatpush1.bf16.msra.mxu1 %v15931_v60  ;;  %v486_v60 = vld [vmem:[#allocation4 + $0xc90] sm:$0xff]  ;;  %v15771_v11 = vcombine.low %v358_v1, %v362_v41 }
 0x484   :  { %v13672_v51 = vpop.f32.mrf.mxu1  ;;  %13965 = vmatprep.subr.bf16.mxu1 %v15924_v2  ;;  %v490_v33 = vld [vmem:[#allocation4 + $0xcb0] sm:$0xff]  ;;  %v15772_v2 = vcombine.high %v358_v1, %v362_v41 }
 0x485   :  { %13925 = vmatpush1.bf16.msra.mxu0 %v15795_v19  ;;  %v15900_v7 = vcombine.high %v486_v60, %v490_v33  ;;  %v350_v61 = vld [vmem:[#allocation4 + $0x850] sm:$0xff]  ;;  %v15899_v3 = vcombine.low %v486_v60, %v490_v33 }
 0x486   :  { %13926 = vmatprep.subr.bf16.mxu0 %v15788_v50  ;;  %v354_v12 = vld [vmem:[#allocation4 + $0x870] sm:$0xff] }
 0x487   :  { %13966 = vmatpush1.bf16.msra.mxu1 %v15923_v0  ;;  %v478_v35 = vld [vmem:[#allocation4 + $0xc50] sm:$0xff]  ;;  %v15764_v63 = vcombine.high %v350_v61, %v354_v12  ;;  %v15763_v46 = vcombine.low %v350_v61, %v354_v12 }
 0x488   :  { %13967 = vmatprep.subr.bf16.mxu1 %v15916_v42  ;;  %v482_v19 = vld [vmem:[#allocation4 + $0xc70] sm:$0xff] }
 0x489   :  { %13927 = vmatpush1.bf16.msra.mxu0 %v15787_v24  ;;  %v15892_v0 = vcombine.high %v478_v35, %v482_v19  ;;  %v342_v50 = vld [vmem:[#allocation4 + $0x810] sm:$0xff]  ;;  %v15891_v34 = vcombine.low %v478_v35, %v482_v19 }
 0x48a   :  { %13928 = vmatprep.subr.bf16.mxu0 %v15780_v17  ;;  %v346_v51 = vld [vmem:[#allocation4 + $0x830] sm:$0xff] }
 0x48b   :  { %13968 = vmatpush1.bf16.msra.mxu1 %v15915_v28  ;;  %v470_v42 = vld [vmem:[#allocation4 + $0xc10] sm:$0xff]  ;;  %v15756_v30 = vcombine.high %v342_v50, %v346_v51  ;;  %v15755_v41 = vcombine.low %v342_v50, %v346_v51 }
 0x48c   :  { %13969 = vmatprep.subr.bf16.mxu1 %v15908_v38  ;;  %v474_v56 = vld [vmem:[#allocation4 + $0xc30] sm:$0xff] }
 0x48d   :  { %13929 = vmatpush1.bf16.msra.mxu0 %v15779_v39  ;;  %v15884_v24 = vcombine.high %v470_v42, %v474_v56  ;;  %v462_v28 = vld [vmem:[#allocation4 + $0xbd0] sm:$0xff]  ;;  %v15883_v60 = vcombine.low %v470_v42, %v474_v56 }
 0x48e   :  { %13930 = vmatprep.subr.bf16.mxu0 %v15772_v2  ;;  %v466_v17 = vld [vmem:[#allocation4 + $0xbf0] sm:$0xff] }
 0x48f   :  { %13970 = vmatpush1.bf16.msra.mxu1 %v15907_v52  ;;  %v590_v38 = vld [vmem:[#allocation4 + $0xfd0] sm:$0xff]  ;;  %v15876_v33 = vcombine.high %v462_v28, %v466_v17  ;;  %v15875_v12 = vcombine.low %v462_v28, %v466_v17 }
 0x490   :  { %13971 = vmatprep.subr.bf16.mxu1 %v15900_v7  ;;  %v594_v1 = vld [vmem:[#allocation4 + $0xff0] sm:$0xff] }
 0x491   :  { %13931 = vmatpush1.bf16.msra.mxu0 %v15771_v11  ;;  %v16004_v39 = vcombine.high %v590_v38, %v594_v1  ;;  %v454_v52 = vld [vmem:[#allocation4 + $0xb90] sm:$0xff]  ;;  %v16003_v35 = vcombine.low %v590_v38, %v594_v1 }
 0x492   :  { %13932 = vmatprep.subr.bf16.mxu0 %v15764_v63  ;;  %v458_v2 = vld [vmem:[#allocation4 + $0xbb0] sm:$0xff] }
 0x493   :  { %13972 = vmatpush1.bf16.msra.mxu1 %v15899_v3  ;;  %v582_v7 = vld [vmem:[#allocation4 + $0xf90] sm:$0xff]  ;;  %v15868_v19 = vcombine.high %v454_v52, %v458_v2  ;;  %v15867_v51 = vcombine.low %v454_v52, %v458_v2 }
 0x494   :  { %13973 = vmatprep.subr.bf16.mxu1 %v15892_v0  ;;  %v586_v61 = vld [vmem:[#allocation4 + $0xfb0] sm:$0xff] }
 0x495   :  { %13933 = vmatpush1.bf16.msra.mxu0 %v15763_v46  ;;  %v15996_v11 = vcombine.high %v582_v7, %v586_v61  ;;  %v446_v3 = vld [vmem:[#allocation4 + $0xb50] sm:$0xff]  ;;  %v15995_v42 = vcombine.low %v582_v7, %v586_v61 }
 0x496   :  { %13934 = vmatprep.subr.bf16.mxu0 %v15756_v30  ;;  %v450_v63 = vld [vmem:[#allocation4 + $0xb70] sm:$0xff] }
 0x497   :  { %13974 = vmatpush1.bf16.msra.mxu1 %v15891_v34  ;;  %v574_v0 = vld [vmem:[#allocation4 + $0xf50] sm:$0xff]  ;;  %v15860_v56 = vcombine.high %v446_v3, %v450_v63  ;;  %v15859_v17 = vcombine.low %v446_v3, %v450_v63 }
 0x498   :  { %13975 = vmatprep.subr.bf16.mxu1 %v15884_v24  ;;  %v578_v50 = vld [vmem:[#allocation4 + $0xf70] sm:$0xff] }
 0x499   :  { %13935 = vmatpush1.bf16.msra.mxu0 %v15755_v41  ;;  %v15988_v46 = vcombine.high %v574_v0, %v578_v50  ;;  %v438_v34 = vld [vmem:[#allocation4 + $0xb10] sm:$0xff]  ;;  %v15987_v38 = vcombine.low %v574_v0, %v578_v50 }
 0x49a   :  { %13936 = vmatprep.subr.bf16.mxu0 %v15876_v33  ;;  %v442_v30 = vld [vmem:[#allocation4 + $0xb30] sm:$0xff] }
 0x49b   :  { %13976 = vmatpush1.bf16.msra.mxu1 %v15883_v60  ;;  %v566_v24 = vld [vmem:[#allocation4 + $0xf10] sm:$0xff]  ;;  %v15852_v1 = vcombine.high %v438_v34, %v442_v30  ;;  %v15851_v2 = vcombine.low %v438_v34, %v442_v30 }
 0x49c   :  { %13977 = vmatprep.subr.bf16.mxu1 %v16004_v39  ;;  %v570_v28 = vld [vmem:[#allocation4 + $0xf30] sm:$0xff] }
 0x49d   :  { %13937 = vmatpush2.bf16.msra.mxu0 %v15875_v12  ;;  %v15980_v41 = vcombine.high %v566_v24, %v570_v28  ;;  %v430_v60 = vld [vmem:[#allocation4 + $0xad0] sm:$0xff]  ;;  %v15979_v7 = vcombine.low %v566_v24, %v570_v28 }
 0x49e   :  { %13938 = vmatprep.subr.bf16.mxu0 %v15868_v19  ;;  %v434_v33 = vld [vmem:[#allocation4 + $0xaf0] sm:$0xff] }
 0x49f   :  { %13978 = vmatpush2.bf16.msra.mxu1 %v16003_v35  ;;  %v558_v39 = vld [vmem:[#allocation4 + $0xed0] sm:$0xff]  ;;  %v15844_v61 = vcombine.high %v430_v60, %v434_v33  ;;  %v15843_v63 = vcombine.low %v430_v60, %v434_v33 }
 0x4a0   :  { %13979 = vmatprep.subr.bf16.mxu1 %v15996_v11  ;;  %v562_v52 = vld [vmem:[#allocation4 + $0xef0] sm:$0xff] }
 0x4a1   :  { %13939 = vmatpush2.bf16.msra.mxu0 %v15867_v51  ;;  %v15972_v12 = vcombine.high %v558_v39, %v562_v52  ;;  %v422_v35 = vld [vmem:[#allocation4 + $0xa90] sm:$0xff]  ;;  %v15971_v0 = vcombine.low %v558_v39, %v562_v52 }
 0x4a2   :  { %13940 = vmatprep.subr.bf16.mxu0 %v15860_v56  ;;  %v426_v19 = vld [vmem:[#allocation4 + $0xab0] sm:$0xff] }
 0x4a3   :  { %13980 = vmatpush2.bf16.msra.mxu1 %v15995_v42  ;;  %v550_v11 = vld [vmem:[#allocation4 + $0xe90] sm:$0xff]  ;;  %v15836_v50 = vcombine.high %v422_v35, %v426_v19  ;;  %v15835_v30 = vcombine.low %v422_v35, %v426_v19 }
 0x4a4   :  { %13981 = vmatprep.subr.bf16.mxu1 %v15988_v46  ;;  %v554_v3 = vld [vmem:[#allocation4 + $0xeb0] sm:$0xff] }
 0x4a5   :  { %13941 = vmatpush2.bf16.msra.mxu0 %v15859_v17  ;;  %v15964_v51 = vcombine.high %v550_v11, %v554_v3  ;;  %v414_v42 = vld [vmem:[#allocation4 + $0xa50] sm:$0xff]  ;;  %v15963_v24 = vcombine.low %v550_v11, %v554_v3 }
 0x4a6   :  { %13942 = vmatprep.subr.bf16.mxu0 %v15852_v1  ;;  %v418_v56 = vld [vmem:[#allocation4 + $0xa70] sm:$0xff] }
 0x4a7   :  { %13982 = vmatpush2.bf16.msra.mxu1 %v15987_v38  ;;  %v542_v46 = vld [vmem:[#allocation4 + $0xe50] sm:$0xff]  ;;  %v15828_v28 = vcombine.high %v414_v42, %v418_v56  ;;  %v15827_v33 = vcombine.low %v414_v42, %v418_v56 }
 0x4a8   :  { %13983 = vmatprep.subr.bf16.mxu1 %v15980_v41  ;;  %v546_v34 = vld [vmem:[#allocation4 + $0xe70] sm:$0xff] }
 0x4a9   :  { %13943 = vmatpush2.bf16.msra.mxu0 %v15851_v2  ;;  %v15956_v17 = vcombine.high %v542_v46, %v546_v34  ;;  %v406_v38 = vld [vmem:[#allocation4 + $0xa10] sm:$0xff]  ;;  %v15955_v39 = vcombine.low %v542_v46, %v546_v34 }
 0x4aa   :  { %13944 = vmatprep.subr.bf16.mxu0 %v15844_v61  ;;  %v410_v1 = vld [vmem:[#allocation4 + $0xa30] sm:$0xff] }
 0x4ab   :  { %13984 = vmatpush2.bf16.msra.mxu1 %v15979_v7  ;;  %v534_v41 = vld [vmem:[#allocation4 + $0xe10] sm:$0xff]  ;;  %v15820_v52 = vcombine.high %v406_v38, %v410_v1  ;;  %v15819_v19 = vcombine.low %v406_v38, %v410_v1 }
 0x4ac   :  { %13985 = vmatprep.subr.bf16.mxu1 %v15972_v12  ;;  %v538_v60 = vld [vmem:[#allocation4 + $0xe30] sm:$0xff] }
 0x4ad   :  { %13945 = vmatpush2.bf16.msra.mxu0 %v15843_v63  ;;  %v15948_v2 = vcombine.high %v534_v41, %v538_v60  ;;  %v654_v7 = vld [vmem:[#allocation4 + $0x11d0] sm:$0xff]  ;;  %v15947_v11 = vcombine.low %v534_v41, %v538_v60 }
 0x4ae   :  { %13946 = vmatprep.subr.bf16.mxu0 %v15836_v50  ;;  %v658_v61 = vld [vmem:[#allocation4 + $0x11f0] sm:$0xff] }
 0x4af   :  { %13986 = vmatpush2.bf16.msra.mxu1 %v15971_v0  ;;  %v782_v12 = vld [vmem:[#allocation4 + $0x15d0] sm:$0xff]  ;;  %v16068_v3 = vcombine.high %v654_v7, %v658_v61  ;;  %v16067_v56 = vcombine.low %v654_v7, %v658_v61 }
 0x4b0   :  { %13987 = vmatprep.subr.bf16.mxu1 %v15964_v51  ;;  %v786_v35 = vld [vmem:[#allocation4 + $0x15f0] sm:$0xff] }
 0x4b1   :  { %13947 = vmatpush2.bf16.msra.mxu0 %v15835_v30  ;;  %v16196_v63 = vcombine.high %v782_v12, %v786_v35  ;;  %v646_v0 = vld [vmem:[#allocation4 + $0x1190] sm:$0xff]  ;;  %v16195_v46 = vcombine.low %v782_v12, %v786_v35 }
 0x4b2   :  { %13948 = vmatprep.subr.bf16.mxu0 %v15828_v28  ;;  %v650_v50 = vld [vmem:[#allocation4 + $0x11b0] sm:$0xff] }
 0x4b3   :  { %13988 = vmatpush2.bf16.msra.mxu1 %v15963_v24  ;;  %v774_v51 = vld [vmem:[#allocation4 + $0x1590] sm:$0xff]  ;;  %v16060_v34 = vcombine.high %v646_v0, %v650_v50 }
 0x4b4   :  { %13989 = vmatprep.subr.bf16.mxu1 %v15956_v17  ;;  %v778_v42 = vld [vmem:[#allocation4 + $0x15b0] sm:$0xff] }
 0x4b5   :  { %13949 = vmatpush2.bf16.msra.mxu0 %v15827_v33  ;;  %v16188_v30 = vcombine.high %v774_v51, %v778_v42  ;;  %v638_v24 = vld [vmem:[#allocation4 + $0x1150] sm:$0xff]  ;;  %v16059_v33 = vcombine.low %v646_v0, %v650_v50 }
 0x4b6   :  { %13950 = vmatprep.subr.bf16.mxu0 %v15820_v52  ;;  %v642_v28 = vld [vmem:[#allocation4 + $0x1170] sm:$0xff]  ;;  %v16187_v52 = vcombine.low %v774_v51, %v778_v42 }
 0x4b7   :  { %13990 = vmatpush2.bf16.msra.mxu1 %v15955_v39  ;;  %v766_v38 = vld [vmem:[#allocation4 + $0x1550] sm:$0xff]  ;;  %v16051_v51 = vcombine.low %v638_v24, %v642_v28 }
 0x4b8   :  { %13991 = vmatprep.subr.bf16.mxu1 %v15948_v2  ;;  %v770_v1 = vld [vmem:[#allocation4 + $0x1570] sm:$0xff]  ;;  %v16052_v2 = vcombine.high %v638_v24, %v642_v28 }
 0x4b9   :  { %13951 = vmatpush2.bf16.msra.mxu0 %v15819_v19  ;;  %v16180_v35 = vcombine.high %v766_v38, %v770_v1  ;;  %v630_v19 = vld [vmem:[#allocation4 + $0x1110] sm:$0xff] }
 0x4ba   :  { %14002 = vmatprep.subr.bf16.mxu0 %v16068_v3  ;;  %v758_v3 = vld [vmem:[#allocation4 + $0x1510] sm:$0xff] }
 0x4bb   :  { %13992 = vmatpush2.bf16.msra.mxu1 %v15947_v11  ;;  %v634_v11 = vld [vmem:[#allocation4 + $0x1130] sm:$0xff] }
 0x4bc   :  { %14043 = vmatprep.subr.bf16.mxu1 %v16196_v63  ;;  %v13708_v17 = vpop.f32.mrf.mxu0  ;;  %13953 = vmatmul.mubr.bf16.vlgmr.msra.gmra.mxu0 %v17757_v36  ;;  %v762_v63 = vld [vmem:[#allocation4 + $0x1530] sm:$0xff] }
 0x4bd   :  { %v13709_v41 = vadd.f32 %v13708_v17, %v18029_v23  ;;  %14003 = vmatpush1.bf16.msra.mxu0 %v16067_v56  ;;  %14034 = vmatprep.mubr.bf16.mxu0 %v17769_v47  ;;  %v16044_v56 = vcombine.high %v630_v19, %v634_v11  ;;  %v626_v17 = vld [vmem:[#allocation4 + $0x10f0] sm:$0xff] }
 0x4be   :  { %v13749_v60 = vpop.f32.mrf.mxu1  ;;  %13994 = vmatmul.mubr.bf16.vlgmr.msra.gmra.mxu1 %v17763_v40  ;;  %v13710_v39 = vpop.f32.mrf.mxu0  ;;  %14004 = vmatprep.subr.bf16.mxu0 %v16060_v34  ;;  %v16172_v34 = vcombine.high %v758_v3, %v762_v63  ;;  %v614_v28 = vld [vmem:[#allocation4 + $0x1090] sm:$0xff] }
 0x4bf   :  { %14044 = vmatpush1.bf16.msra.mxu1 %v16195_v46  ;;  %v18039_v7 = vadd.f32 %v13749_v60, %v13709_v41  ;;  %v13711_v61 = vadd.f32 %v13710_v39, %v18034_v57  ;;  %14075 = vmatprep.mubr.bf16.mxu1 %v17774_v49  ;;  %v16179_v57 = vcombine.low %v766_v38, %v770_v1  ;;  %v750_v41 = vld [vmem:[#allocation4 + $0x14d0] sm:$0xff] }
 0x4c0   :  { %v13751_v12 = vpop.f32.mrf.mxu1  ;;  %14045 = vmatprep.subr.bf16.mxu1 %v16188_v30  ;;  %v13712_v23 = vpop.f32.mrf.mxu0  ;;  %v622_v30 = vld [vmem:[#allocation4 + $0x10d0] sm:$0xff]  ;;  %v16043_v39 = vcombine.low %v630_v19, %v634_v11 }
 0x4c1   :  { %v18044_v0 = vadd.f32 %v13751_v12, %v13711_v61  ;;  %14005 = vmatpush1.bf16.msra.mxu0 %v16059_v33  ;;  %v754_v60 = vld [vmem:[#allocation4 + $0x14f0] sm:$0xff]  ;;  %v16171_v61 = vcombine.low %v758_v3, %v762_v63  ;;  %v16036_v12 = vcombine.high %v622_v30, %v626_v17  ;;  %v16035_v1 = vcombine.low %v622_v30, %v626_v17 }
 0x4c2   :  { %v13753_v50 = vpop.f32.mrf.mxu1  ;;  %v13713_v42 = vpop.f32.mrf.mxu0  ;;  %14006 = vmatprep.subr.bf16.mxu0 %v16052_v2  ;;  %v16164_v24 = vcombine.high %v750_v41, %v754_v60  ;;  %v618_v33 = vld [vmem:[#allocation4 + $0x10b0] sm:$0xff]  ;;  %v16163_v2 = vcombine.low %v750_v41, %v754_v60 }
 0x4c3   :  { %14046 = vmatpush1.bf16.msra.mxu1 %v16187_v52  ;;  %v742_v52 = vld [vmem:[#allocation4 + $0x1490] sm:$0xff]  ;;  %v16027_v3 = vcombine.low %v614_v28, %v618_v33 }
 0x4c4   :  { %v13754_v46 = vpop.f32.mrf.mxu1  ;;  %14047 = vmatprep.subr.bf16.mxu1 %v16180_v35  ;;  %v746_v38 = vld [vmem:[#allocation4 + $0x14b0] sm:$0xff]  ;;  %v16028_v35 = vcombine.high %v614_v28, %v618_v33 }
 0x4c5   :  { %14007 = vmatpush1.bf16.msra.mxu0 %v16051_v51  ;;  %v16156_v23 = vcombine.high %v742_v52, %v746_v38  ;;  %v606_v50 = vld [vmem:[#allocation4 + $0x1050] sm:$0xff]  ;;  %v16155_v63 = vcombine.low %v742_v52, %v746_v38 }
 0x4c6   :  { %14008 = vmatprep.subr.bf16.mxu0 %v16044_v56  ;;  %v610_v19 = vld [vmem:[#allocation4 + $0x1070] sm:$0xff] }
 0x4c7   :  { %14048 = vmatpush1.bf16.msra.mxu1 %v16179_v57  ;;  %v734_v11 = vld [vmem:[#allocation4 + $0x1450] sm:$0xff]  ;;  %v16020_v42 = vcombine.high %v606_v50, %v610_v19  ;;  %v16019_v17 = vcombine.low %v606_v50, %v610_v19 }
 0x4c8   :  { %14049 = vmatprep.subr.bf16.mxu1 %v16172_v34  ;;  %v738_v51 = vld [vmem:[#allocation4 + $0x1470] sm:$0xff] }
 0x4c9   :  { %14009 = vmatpush1.bf16.msra.mxu0 %v16043_v39  ;;  %v16148_v57 = vcombine.high %v734_v11, %v738_v51  ;;  %v598_v56 = vld [vmem:[#allocation4 + $0x1010] sm:$0xff]  ;;  %v16147_v41 = vcombine.low %v734_v11, %v738_v51 }
 0x4ca   :  { %14010 = vmatprep.subr.bf16.mxu0 %v16036_v12  ;;  %v602_v46 = vld [vmem:[#allocation4 + $0x1030] sm:$0xff] }
 0x4cb   :  { %14050 = vmatpush1.bf16.msra.mxu1 %v16171_v61  ;;  %v726_v34 = vld [vmem:[#allocation4 + $0x1410] sm:$0xff]  ;;  %v16012_v60 = vcombine.high %v598_v56, %v602_v46  ;;  %v16011_v33 = vcombine.low %v598_v56, %v602_v46 }
 0x4cc   :  { %14051 = vmatprep.subr.bf16.mxu1 %v16164_v24  ;;  %v730_v30 = vld [vmem:[#allocation4 + $0x1430] sm:$0xff] }
 0x4cd   :  { %14011 = vmatpush1.bf16.msra.mxu0 %v16035_v1  ;;  %v16140_v39 = vcombine.high %v726_v34, %v730_v30  ;;  %v718_v61 = vld [vmem:[#allocation4 + $0x13d0] sm:$0xff]  ;;  %v16139_v52 = vcombine.low %v726_v34, %v730_v30 }
 0x4ce   :  { %14012 = vmatprep.subr.bf16.mxu0 %v16028_v35  ;;  %v722_v12 = vld [vmem:[#allocation4 + $0x13f0] sm:$0xff] }
 0x4cf   :  { %14052 = vmatpush1.bf16.msra.mxu1 %v16163_v2  ;;  %v846_v24 = vld [vmem:[#allocation4 + $0x17d0] sm:$0xff]  ;;  %v16132_v38 = vcombine.high %v718_v61, %v722_v12  ;;  %v16131_v19 = vcombine.low %v718_v61, %v722_v12 }
 0x4d0   :  { %14053 = vmatprep.subr.bf16.mxu1 %v16156_v23  ;;  %v850_v28 = vld [vmem:[#allocation4 + $0x17f0] sm:$0xff] }
 0x4d1   :  { %14013 = vmatpush1.bf16.msra.mxu0 %v16027_v3  ;;  %v16260_v1 = vcombine.high %v846_v24, %v850_v28  ;;  %v710_v2 = vld [vmem:[#allocation4 + $0x1390] sm:$0xff]  ;;  %v16259_v11 = vcombine.low %v846_v24, %v850_v28 }
 0x4d2   :  { %14014 = vmatprep.subr.bf16.mxu0 %v16020_v42  ;;  %v714_v35 = vld [vmem:[#allocation4 + $0x13b0] sm:$0xff] }
 0x4d3   :  { %14054 = vmatpush1.bf16.msra.mxu1 %v16155_v63  ;;  %v838_v23 = vld [vmem:[#allocation4 + $0x1790] sm:$0xff]  ;;  %v16124_v51 = vcombine.high %v710_v2, %v714_v35  ;;  %v16123_v46 = vcombine.low %v710_v2, %v714_v35 }
 0x4d4   :  { %14055 = vmatprep.subr.bf16.mxu1 %v16148_v57  ;;  %v842_v50 = vld [vmem:[#allocation4 + $0x17b0] sm:$0xff] }
 0x4d5   :  { %14015 = vmatpush1.bf16.msra.mxu0 %v16019_v17  ;;  %v16252_v3 = vcombine.high %v838_v23, %v842_v50  ;;  %v702_v63 = vld [vmem:[#allocation4 + $0x1350] sm:$0xff]  ;;  %v16251_v34 = vcombine.low %v838_v23, %v842_v50 }
 0x4d6   :  { %14016 = vmatprep.subr.bf16.mxu0 %v16012_v60  ;;  %v706_v42 = vld [vmem:[#allocation4 + $0x1370] sm:$0xff] }
 0x4d7   :  { %14056 = vmatpush1.bf16.msra.mxu1 %v16147_v41  ;;  %v830_v57 = vld [vmem:[#allocation4 + $0x1750] sm:$0xff]  ;;  %v16116_v30 = vcombine.high %v702_v63, %v706_v42  ;;  %v16115_v12 = vcombine.low %v702_v63, %v706_v42 }
 0x4d8   :  { %14057 = vmatprep.subr.bf16.mxu1 %v16140_v39  ;;  %v834_v56 = vld [vmem:[#allocation4 + $0x1770] sm:$0xff] }
 0x4d9   :  { %14017 = vmatpush1.bf16.msra.mxu0 %v16011_v33  ;;  %v16244_v17 = vcombine.high %v830_v57, %v834_v56  ;;  %v694_v41 = vld [vmem:[#allocation4 + $0x1310] sm:$0xff]  ;;  %v16243_v24 = vcombine.low %v830_v57, %v834_v56 }
 0x4da   :  { %14018 = vmatprep.subr.bf16.mxu0 %v16132_v38  ;;  %v698_v60 = vld [vmem:[#allocation4 + $0x1330] sm:$0xff] }
 0x4db   :  { %14058 = vmatpush1.bf16.msra.mxu1 %v16139_v52  ;;  %v822_v39 = vld [vmem:[#allocation4 + $0x1710] sm:$0xff]  ;;  %v16108_v28 = vcombine.high %v694_v41, %v698_v60  ;;  %v16107_v35 = vcombine.low %v694_v41, %v698_v60 }
 0x4dc   :  { %14059 = vmatprep.subr.bf16.mxu1 %v16260_v1  ;;  %v826_v61 = vld [vmem:[#allocation4 + $0x1730] sm:$0xff] }
 0x4dd   :  { %14019 = vmatpush2.bf16.msra.mxu0 %v16131_v19  ;;  %v16236_v33 = vcombine.high %v822_v39, %v826_v61  ;;  %v686_v52 = vld [vmem:[#allocation4 + $0x12d0] sm:$0xff]  ;;  %v16235_v23 = vcombine.low %v822_v39, %v826_v61 }
 0x4de   :  { %14020 = vmatprep.subr.bf16.mxu0 %v16124_v51  ;;  %v690_v38 = vld [vmem:[#allocation4 + $0x12f0] sm:$0xff] }
 0x4df   :  { %14060 = vmatpush2.bf16.msra.mxu1 %v16259_v11  ;;  %v814_v1 = vld [vmem:[#allocation4 + $0x16d0] sm:$0xff]  ;;  %v16100_v50 = vcombine.high %v686_v52, %v690_v38  ;;  %v16099_v42 = vcombine.low %v686_v52, %v690_v38 }
 0x4e0   :  { %14061 = vmatprep.subr.bf16.mxu1 %v16252_v3  ;;  %v818_v2 = vld [vmem:[#allocation4 + $0x16f0] sm:$0xff] }
 0x4e1   :  { %14021 = vmatpush2.bf16.msra.mxu0 %v16123_v46  ;;  %v16228_v19 = vcombine.high %v814_v1, %v818_v2  ;;  %v678_v11 = vld [vmem:[#allocation4 + $0x1290] sm:$0xff]  ;;  %v16227_v57 = vcombine.low %v814_v1, %v818_v2 }
 0x4e2   :  { %14022 = vmatprep.subr.bf16.mxu0 %v16116_v30  ;;  %v682_v51 = vld [vmem:[#allocation4 + $0x12b0] sm:$0xff] }
 0x4e3   :  { %14062 = vmatpush2.bf16.msra.mxu1 %v16251_v34  ;;  %v806_v3 = vld [vmem:[#allocation4 + $0x1690] sm:$0xff]  ;;  %v16092_v56 = vcombine.high %v678_v11, %v682_v51  ;;  %v16091_v60 = vcombine.low %v678_v11, %v682_v51 }
 0x4e4   :  { %14063 = vmatprep.subr.bf16.mxu1 %v16244_v17  ;;  %v810_v63 = vld [vmem:[#allocation4 + $0x16b0] sm:$0xff] }
 0x4e5   :  { %14023 = vmatpush2.bf16.msra.mxu0 %v16115_v12  ;;  %v16220_v46 = vcombine.high %v806_v3, %v810_v63  ;;  %v670_v34 = vld [vmem:[#allocation4 + $0x1250] sm:$0xff]  ;;  %v16219_v39 = vcombine.low %v806_v3, %v810_v63 }
 0x4e6   :  { %14024 = vmatprep.subr.bf16.mxu0 %v16108_v28  ;;  %v674_v30 = vld [vmem:[#allocation4 + $0x1270] sm:$0xff] }
 0x4e7   :  { %14064 = vmatpush2.bf16.msra.mxu1 %v16243_v24  ;;  %v798_v17 = vld [vmem:[#allocation4 + $0x1650] sm:$0xff]  ;;  %v16084_v61 = vcombine.high %v670_v34, %v674_v30  ;;  %v16083_v38 = vcombine.low %v670_v34, %v674_v30 }
 0x4e8   :  { %14065 = vmatprep.subr.bf16.mxu1 %v16236_v33  ;;  %v802_v41 = vld [vmem:[#allocation4 + $0x1670] sm:$0xff] }
 0x4e9   :  { %14025 = vmatpush2.bf16.msra.mxu0 %v16107_v35  ;;  %v16212_v12 = vcombine.high %v798_v17, %v802_v41  ;;  %v662_v24 = vld [vmem:[#allocation4 + $0x1210] sm:$0xff]  ;;  %v16211_v1 = vcombine.low %v798_v17, %v802_v41 }
 0x4ea   :  { %14026 = vmatprep.subr.bf16.mxu0 %v16100_v50  ;;  %v666_v28 = vld [vmem:[#allocation4 + $0x1230] sm:$0xff] }
 0x4eb   :  { %14066 = vmatpush2.bf16.msra.mxu1 %v16235_v23  ;;  %v790_v33 = vld [vmem:[#allocation4 + $0x1610] sm:$0xff]  ;;  %v16076_v2 = vcombine.high %v662_v24, %v666_v28  ;;  %v16075_v51 = vcombine.low %v662_v24, %v666_v28 }
 0x4ec   :  { %14067 = vmatprep.subr.bf16.mxu1 %v16228_v19  ;;  %v794_v52 = vld [vmem:[#allocation4 + $0x1630] sm:$0xff] }
 0x4ed   :  { %14027 = vmatpush2.bf16.msra.mxu0 %v16099_v42  ;;  %v16204_v35 = vcombine.high %v790_v33, %v794_v52  ;;  %v910_v23 = vld [vmem:[#allocation4 + $0x19d0] sm:$0xff]  ;;  %v16203_v3 = vcombine.low %v790_v33, %v794_v52 }
 0x4ee   :  { %14028 = vmatprep.subr.bf16.mxu0 %v16092_v56  ;;  %v914_v50 = vld [vmem:[#allocation4 + $0x19f0] sm:$0xff] }
 0x4ef   :  { %14068 = vmatpush2.bf16.msra.mxu1 %v16227_v57  ;;  %v1038_v19 = vld [vmem:[#allocation4 + $0x1dd0] sm:$0xff]  ;;  %v16324_v63 = vcombine.high %v910_v23, %v914_v50  ;;  %v16323_v30 = vcombine.low %v910_v23, %v914_v50 }
 0x4f0   :  { %14069 = vmatprep.subr.bf16.mxu1 %v16220_v46  ;;  %v1042_v11 = vld [vmem:[#allocation4 + $0x1df0] sm:$0xff] }
 0x4f1   :  { %14029 = vmatpush2.bf16.msra.mxu0 %v16091_v60  ;;  %v16452_v42 = vcombine.high %v1038_v19, %v1042_v11  ;;  %v902_v57 = vld [vmem:[#allocation4 + $0x1990] sm:$0xff]  ;;  %v16451_v17 = vcombine.low %v1038_v19, %v1042_v11 }
 0x4f2   :  { %14030 = vmatprep.subr.bf16.mxu0 %v16084_v61  ;;  %v906_v56 = vld [vmem:[#allocation4 + $0x19b0] sm:$0xff] }
 0x4f3   :  { %14070 = vmatpush2.bf16.msra.mxu1 %v16219_v39  ;;  %v1030_v46 = vld [vmem:[#allocation4 + $0x1d90] sm:$0xff]  ;;  %v16316_v41 = vcombine.high %v902_v57, %v906_v56 }
 0x4f4   :  { %14071 = vmatprep.subr.bf16.mxu1 %v16212_v12  ;;  %v1034_v34 = vld [vmem:[#allocation4 + $0x1db0] sm:$0xff] }
 0x4f5   :  { %14031 = vmatpush2.bf16.msra.mxu0 %v16083_v38  ;;  %v16444_v60 = vcombine.high %v1030_v46, %v1034_v34  ;;  %v894_v39 = vld [vmem:[#allocation4 + $0x1950] sm:$0xff]  ;;  %v16315_v38 = vcombine.low %v902_v57, %v906_v56 }
 0x4f6   :  { %14032 = vmatprep.subr.bf16.mxu0 %v16076_v2  ;;  %v898_v61 = vld [vmem:[#allocation4 + $0x1970] sm:$0xff]  ;;  %v16443_v2 = vcombine.low %v1030_v46, %v1034_v34 }
 0x4f7   :  { %14072 = vmatpush2.bf16.msra.mxu1 %v16211_v1  ;;  %v1022_v24 = vld [vmem:[#allocation4 + $0x1d50] sm:$0xff]  ;;  %v16307_v46 = vcombine.low %v894_v39, %v898_v61 }
 0x4f8   :  { %14073 = vmatprep.subr.bf16.mxu1 %v16204_v35  ;;  %v1026_v28 = vld [vmem:[#allocation4 + $0x1d70] sm:$0xff]  ;;  %v16308_v35 = vcombine.high %v894_v39, %v898_v61 }
 0x4f9   :  { %14033 = vmatpush2.bf16.msra.mxu0 %v16075_v51  ;;  %v16436_v11 = vcombine.high %v1022_v24, %v1026_v28  ;;  %v886_v51 = vld [vmem:[#allocation4 + $0x1910] sm:$0xff] }
 0x4fa   :  { %14084 = vmatprep.subr.bf16.mxu0 %v16324_v63  ;;  %v1014_v63 = vld [vmem:[#allocation4 + $0x1d10] sm:$0xff] }
 0x4fb   :  { %14074 = vmatpush2.bf16.msra.mxu1 %v16203_v3  ;;  %v890_v3 = vld [vmem:[#allocation4 + $0x1930] sm:$0xff] }
 0x4fc   :  { %14125 = vmatprep.subr.bf16.mxu1 %v16452_v42  ;;  %v13790_v12 = vpop.f32.mrf.mxu0  ;;  %14035 = vmatmul.mubr.bf16.vlgmr.msra.gmra.mxu0 %v17781_v4  ;;  %v1018_v42 = vld [vmem:[#allocation4 + $0x1d30] sm:$0xff] }
 0x4fd   :  { %v13791_v33 = vadd.f32 %v13790_v12, %v18039_v7  ;;  %14085 = vmatpush1.bf16.msra.mxu0 %v16323_v30  ;;  %14116 = vmatprep.mubr.bf16.mxu0 %v17793_v15  ;;  %v16300_v30 = vcombine.high %v886_v51, %v890_v3  ;;  %v882_v12 = vld [vmem:[#allocation4 + $0x18f0] sm:$0xff] }
 0x4fe   :  { %v13831_v52 = vpop.f32.mrf.mxu1  ;;  %14076 = vmatmul.mubr.bf16.vlgmr.msra.gmra.mxu1 %v17787_v8  ;;  %v13792_v1 = vpop.f32.mrf.mxu0  ;;  %14086 = vmatprep.subr.bf16.mxu0 %v16316_v41  ;;  %v16428_v41 = vcombine.high %v1014_v63, %v1018_v42  ;;  %v870_v61 = vld [vmem:[#allocation4 + $0x1890] sm:$0xff] }
 0x4ff   :  { %14126 = vmatpush1.bf16.msra.mxu1 %v16451_v17  ;;  %v18049_v23 = vadd.f32 %v13831_v52, %v13791_v33  ;;  %v13793_v50 = vadd.f32 %v13792_v1, %v18044_v0  ;;  %14157 = vmatprep.mubr.bf16.mxu1 %v17798_v18  ;;  %v16435_v0 = vcombine.low %v1022_v24, %v1026_v28  ;;  %v1006_v33 = vld [vmem:[#allocation4 + $0x1cd0] sm:$0xff] }
 0x500   :  { %v13833_v19 = vpop.f32.mrf.mxu1  ;;  %14127 = vmatprep.subr.bf16.mxu1 %v16444_v60  ;;  %v13794_v7 = vpop.f32.mrf.mxu0  ;;  %v878_v60 = vld [vmem:[#allocation4 + $0x18d0] sm:$0xff]  ;;  %v16299_v1 = vcombine.low %v886_v51, %v890_v3 }
 0x501   :  { %18194 = vst [vmem:[#allocation12_spill] sm:$0xff] %v18049_v23  ;;  %v18054_v57 = vadd.f32 %v13833_v19, %v13793_v50  ;;  %14087 = vmatpush1.bf16.msra.mxu0 %v16315_v38  ;;  %v1010_v52 = vld [vmem:[#allocation4 + $0x1cf0] sm:$0xff]  ;;  %v16427_v50 = vcombine.low %v1014_v63, %v1018_v42  ;;  %v16292_v19 = vcombine.high %v878_v60, %v882_v12 }
 0x502   :  { %v13835_v56 = vpop.f32.mrf.mxu1  ;;  %v13795_v34 = vpop.f32.mrf.mxu0  ;;  %14088 = vmatprep.subr.bf16.mxu0 %v16308_v35  ;;  %v16420_v39 = vcombine.high %v1006_v33, %v1010_v52  ;;  %v874_v38 = vld [vmem:[#allocation4 + $0x18b0] sm:$0xff]  ;;  %v16291_v28 = vcombine.low %v878_v60, %v882_v12  ;;  %v16419_v35 = vcombine.low %v1006_v33, %v1010_v52 }
 0x503   :  { %14128 = vmatpush1.bf16.msra.mxu1 %v16443_v2  ;;  %v998_v2 = vld [vmem:[#allocation4 + $0x1c90] sm:$0xff]  ;;  %v16283_v63 = vcombine.low %v870_v61, %v874_v38 }
 0x504   :  { %v13836_v17 = vpop.f32.mrf.mxu1  ;;  %14129 = vmatprep.subr.bf16.mxu1 %v16436_v11  ;;  %v1002_v24 = vld [vmem:[#allocation4 + $0x1cb0] sm:$0xff]  ;;  %v16284_v11 = vcombine.high %v870_v61, %v874_v38 }
 0x505   :  { %14089 = vmatpush1.bf16.msra.mxu0 %v16307_v46  ;;  %v16412_v7 = vcombine.high %v998_v2, %v1002_v24  ;;  %v862_v56 = vld [vmem:[#allocation4 + $0x1850] sm:$0xff]  ;;  %v16411_v42 = vcombine.low %v998_v2, %v1002_v24 }
 0x506   :  { %14090 = vmatprep.subr.bf16.mxu0 %v16300_v30  ;;  %v866_v51 = vld [vmem:[#allocation4 + $0x1870] sm:$0xff] }
 0x507   :  { %14130 = vmatpush1.bf16.msra.mxu1 %v16435_v0  ;;  %v990_v3 = vld [vmem:[#allocation4 + $0x1c50] sm:$0xff]  ;;  %v16276_v34 = vcombine.high %v862_v56, %v866_v51  ;;  %v16275_v12 = vcombine.low %v862_v56, %v866_v51 }
 0x508   :  { %14131 = vmatprep.subr.bf16.mxu1 %v16428_v41  ;;  %v994_v46 = vld [vmem:[#allocation4 + $0x1c70] sm:$0xff] }
 0x509   :  { %14091 = vmatpush1.bf16.msra.mxu0 %v16299_v1  ;;  %v16404_v0 = vcombine.high %v990_v3, %v994_v46  ;;  %v854_v30 = vld [vmem:[#allocation4 + $0x1810] sm:$0xff]  ;;  %v16403_v33 = vcombine.low %v990_v3, %v994_v46 }
 0x50a   :  { %14092 = vmatprep.subr.bf16.mxu0 %v16292_v19  ;;  %v858_v17 = vld [vmem:[#allocation4 + $0x1830] sm:$0xff] }
 0x50b   :  { %14132 = vmatpush1.bf16.msra.mxu1 %v16427_v50  ;;  %v982_v41 = vld [vmem:[#allocation4 + $0x1c10] sm:$0xff]  ;;  %v16268_v52 = vcombine.high %v854_v30, %v858_v17  ;;  %v16267_v38 = vcombine.low %v854_v30, %v858_v17 }
 0x50c   :  { %14133 = vmatprep.subr.bf16.mxu1 %v16420_v39  ;;  %v986_v60 = vld [vmem:[#allocation4 + $0x1c30] sm:$0xff] }
 0x50d   :  { %14093 = vmatpush1.bf16.msra.mxu0 %v16291_v28  ;;  %v16396_v1 = vcombine.high %v982_v41, %v986_v60  ;;  %v974_v50 = vld [vmem:[#allocation4 + $0x1bd0] sm:$0xff]  ;;  %v16395_v2 = vcombine.low %v982_v41, %v986_v60 }
 0x50e   :  { %14094 = vmatprep.subr.bf16.mxu0 %v16284_v11  ;;  %v978_v19 = vld [vmem:[#allocation4 + $0x1bf0] sm:$0xff] }
 0x50f   :  { %14134 = vmatpush1.bf16.msra.mxu1 %v16419_v35  ;;  %v1102_v39 = vld [vmem:[#allocation4 + $0x1fd0] sm:$0xff]  ;;  %v16388_v24 = vcombine.high %v974_v50, %v978_v19  ;;  %v16387_v51 = vcombine.low %v974_v50, %v978_v19 }
 0x510   :  { %14135 = vmatprep.subr.bf16.mxu1 %v16412_v7  ;;  %v1106_v61 = vld [vmem:[#allocation4 + $0x1ff0] sm:$0xff] }
 0x511   :  { %14095 = vmatpush1.bf16.msra.mxu0 %v16283_v63  ;;  %v16516_v28 = vcombine.high %v1102_v39, %v1106_v61  ;;  %v966_v35 = vld [vmem:[#allocation4 + $0x1b90] sm:$0xff]  ;;  %v16515_v3 = vcombine.low %v1102_v39, %v1106_v61 }
 0x512   :  { %14096 = vmatprep.subr.bf16.mxu0 %v16276_v34  ;;  %v970_v11 = vld [vmem:[#allocation4 + $0x1bb0] sm:$0xff] }
 0x513   :  { %14136 = vmatpush1.bf16.msra.mxu1 %v16411_v42  ;;  %v1094_v7 = vld [vmem:[#allocation4 + $0x1f90] sm:$0xff]  ;;  %v16380_v46 = vcombine.high %v966_v35, %v970_v11  ;;  %v16379_v17 = vcombine.low %v966_v35, %v970_v11 }
 0x514   :  { %14137 = vmatprep.subr.bf16.mxu1 %v16404_v0  ;;  %v1098_v56 = vld [vmem:[#allocation4 + $0x1fb0] sm:$0xff] }
 0x515   :  { %14097 = vmatpush1.bf16.msra.mxu0 %v16275_v12  ;;  %v16508_v63 = vcombine.high %v1094_v7, %v1098_v56  ;;  %v958_v42 = vld [vmem:[#allocation4 + $0x1b50] sm:$0xff]  ;;  %v16507_v41 = vcombine.low %v1094_v7, %v1098_v56 }
 0x516   :  { %14098 = vmatprep.subr.bf16.mxu0 %v16268_v52  ;;  %v962_v34 = vld [vmem:[#allocation4 + $0x1b70] sm:$0xff] }
 0x517   :  { %14138 = vmatpush1.bf16.msra.mxu1 %v16403_v33  ;;  %v1086_v0 = vld [vmem:[#allocation4 + $0x1f50] sm:$0xff]  ;;  %v16372_v60 = vcombine.high %v958_v42, %v962_v34  ;;  %v16371_v19 = vcombine.low %v958_v42, %v962_v34 }
 0x518   :  { %14139 = vmatprep.subr.bf16.mxu1 %v16396_v1  ;;  %v1090_v30 = vld [vmem:[#allocation4 + $0x1f70] sm:$0xff] }
 0x519   :  { %14099 = vmatpush1.bf16.msra.mxu0 %v16267_v38  ;;  %v16500_v12 = vcombine.high %v1086_v0, %v1090_v30  ;;  %v950_v33 = vld [vmem:[#allocation4 + $0x1b10] sm:$0xff]  ;;  %v16499_v39 = vcombine.low %v1086_v0, %v1090_v30 }
 0x51a   :  { %14100 = vmatprep.subr.bf16.mxu0 %v16388_v24  ;;  %v954_v52 = vld [vmem:[#allocation4 + $0x1b30] sm:$0xff] }
 0x51b   :  { %14140 = vmatpush1.bf16.msra.mxu1 %v16395_v2  ;;  %v1078_v1 = vld [vmem:[#allocation4 + $0x1f10] sm:$0xff]  ;;  %v16364_v61 = vcombine.high %v950_v33, %v954_v52  ;;  %v16363_v11 = vcombine.low %v950_v33, %v954_v52 }
 0x51c   :  { %14141 = vmatprep.subr.bf16.mxu1 %v16516_v28  ;;  %v1082_v50 = vld [vmem:[#allocation4 + $0x1f30] sm:$0xff] }
 0x51d   :  { %14101 = vmatpush2.bf16.msra.mxu0 %v16387_v51  ;;  %v16492_v38 = vcombine.high %v1078_v1, %v1082_v50  ;;  %v942_v2 = vld [vmem:[#allocation4 + $0x1ad0] sm:$0xff]  ;;  %v16491_v7 = vcombine.low %v1078_v1, %v1082_v50 }
 0x51e   :  { %14102 = vmatprep.subr.bf16.mxu0 %v16380_v46  ;;  %v946_v24 = vld [vmem:[#allocation4 + $0x1af0] sm:$0xff] }
 0x51f   :  { %14142 = vmatpush2.bf16.msra.mxu1 %v16515_v3  ;;  %v1070_v28 = vld [vmem:[#allocation4 + $0x1ed0] sm:$0xff]  ;;  %v16356_v56 = vcombine.high %v942_v2, %v946_v24  ;;  %v16355_v34 = vcombine.low %v942_v2, %v946_v24 }
 0x520   :  { %14143 = vmatprep.subr.bf16.mxu1 %v16508_v63  ;;  %v1074_v35 = vld [vmem:[#allocation4 + $0x1ef0] sm:$0xff] }
 0x521   :  { %14103 = vmatpush2.bf16.msra.mxu0 %v16379_v17  ;;  %v16484_v51 = vcombine.high %v1070_v28, %v1074_v35  ;;  %v934_v3 = vld [vmem:[#allocation4 + $0x1a90] sm:$0xff]  ;;  %v16483_v0 = vcombine.low %v1070_v28, %v1074_v35 }
 0x522   :  { %14104 = vmatprep.subr.bf16.mxu0 %v16372_v60  ;;  %v938_v46 = vld [vmem:[#allocation4 + $0x1ab0] sm:$0xff] }
 0x523   :  { %14144 = vmatpush2.bf16.msra.mxu1 %v16507_v41  ;;  %v1062_v63 = vld [vmem:[#allocation4 + $0x1e90] sm:$0xff]  ;;  %v16348_v30 = vcombine.high %v934_v3, %v938_v46  ;;  %v16347_v52 = vcombine.low %v934_v3, %v938_v46 }
 0x524   :  { %14145 = vmatprep.subr.bf16.mxu1 %v16500_v12  ;;  %v1066_v42 = vld [vmem:[#allocation4 + $0x1eb0] sm:$0xff] }
 0x525   :  { %14105 = vmatpush2.bf16.msra.mxu0 %v16371_v19  ;;  %v16476_v17 = vcombine.high %v1062_v63, %v1066_v42  ;;  %v926_v41 = vld [vmem:[#allocation4 + $0x1a50] sm:$0xff]  ;;  %v16475_v1 = vcombine.low %v1062_v63, %v1066_v42  ;;  %v2152_v63 = vsub.s32 4, %v17803_v32 }
 0x526   :  { %14106 = vmatprep.subr.bf16.mxu0 %v16364_v61  ;;  %v930_v60 = vld [vmem:[#allocation4 + $0x1a70] sm:$0xff] }
 0x527   :  { %14146 = vmatpush2.bf16.msra.mxu1 %v16499_v39  ;;  %v1054_v12 = vld [vmem:[#allocation4 + $0x1e50] sm:$0xff]  ;;  %v16340_v50 = vcombine.high %v926_v41, %v930_v60  ;;  %v16339_v24 = vcombine.low %v926_v41, %v930_v60 }
 0x528   :  { %14147 = vmatprep.subr.bf16.mxu1 %v16492_v38  ;;  %v1058_v33 = vld [vmem:[#allocation4 + $0x1e70] sm:$0xff] }
 0x529   :  { %14107 = vmatpush2.bf16.msra.mxu0 %v16363_v11  ;;  %v16468_v19 = vcombine.high %v1054_v12, %v1058_v33  ;;  %v918_v39 = vld [vmem:[#allocation4 + $0x1a10] sm:$0xff]  ;;  %v16467_v28 = vcombine.low %v1054_v12, %v1058_v33  ;;  %v17584_v33 = vld [vmem:[#allocation6] sm:$0xff] }
 0x52a   :  { %14108 = vmatprep.subr.bf16.mxu0 %v16356_v56  ;;  %v922_v61 = vld [vmem:[#allocation4 + $0x1a30] sm:$0xff] }
 0x52b   :  { %14148 = vmatpush2.bf16.msra.mxu1 %v16491_v7  ;;  %v1046_v38 = vld [vmem:[#allocation4 + $0x1e10] sm:$0xff]  ;;  %v16332_v35 = vcombine.high %v918_v39, %v922_v61  ;;  %v16331_v46 = vcombine.low %v918_v39, %v922_v61 }
 0x52c   :  { %14149 = vmatprep.subr.bf16.mxu1 %v16484_v51  ;;  %v1050_v2 = vld [vmem:[#allocation4 + $0x1e30] sm:$0xff] }
 0x52d   :  { %14109 = vmatpush2.bf16.msra.mxu0 %v16355_v34  ;;  %v16460_v11 = vcombine.high %v1046_v38, %v1050_v2  ;;  %v1166_v7 = vld [vmem:[#allocation4 + $0x21d0] sm:$0xff]  ;;  %v16459_v42 = vcombine.low %v1046_v38, %v1050_v2 }
 0x52e   :  { %14110 = vmatprep.subr.bf16.mxu0 %v16348_v30  ;;  %v1170_v56 = vld [vmem:[#allocation4 + $0x21f0] sm:$0xff]  ;;  %v2156_v30 = vsub.s32 5, %v17803_v32 }
 0x52f   :  { %14150 = vmatpush2.bf16.msra.mxu1 %v16483_v0  ;;  %v1294_v51 = vld [vmem:[#allocation4 + $0x25d0] sm:$0xff]  ;;  %v16580_v34 = vcombine.high %v1166_v7, %v1170_v56 }
 0x530   :  { %14151 = vmatprep.subr.bf16.mxu1 %v16476_v17  ;;  %v1298_v3 = vld [vmem:[#allocation4 + $0x25f0] sm:$0xff]  ;;  %v2157_v39 = vrot.slane %v17584_v33, %v2156_v30 }
 0x531   :  { %14111 = vmatpush2.bf16.msra.mxu0 %v16347_v52  ;;  %v16708_v0 = vcombine.high %v1294_v51, %v1298_v3  ;;  %v1158_v17 = vld [vmem:[#allocation4 + $0x2190] sm:$0xff]  ;;  %v2153_v52 = vrot.slane %v17584_v33, %v2152_v63 }
 0x532   :  { %14112 = vmatprep.subr.bf16.mxu0 %v16340_v50  ;;  %v1162_v41 = vld [vmem:[#allocation4 + $0x21b0] sm:$0xff]  ;;  %v16707_v50 = vcombine.low %v1294_v51, %v1298_v3 }
 0x533   :  { %14152 = vmatpush2.bf16.msra.mxu1 %v16475_v1  ;;  %v1286_v60 = vld [vmem:[#allocation4 + $0x2590] sm:$0xff]  ;;  %v16579_v1 = vcombine.low %v1166_v7, %v1170_v56  ;;  %v16571_v7 = vcombine.low %v1158_v17, %v1162_v41 }
 0x534   :  { %14153 = vmatprep.subr.bf16.mxu1 %v16468_v19  ;;  %v1290_v12 = vld [vmem:[#allocation4 + $0x25b0] sm:$0xff]  ;;  %v16572_v19 = vcombine.high %v1158_v17, %v1162_v41 }
 0x535   :  { %14113 = vmatpush2.bf16.msra.mxu0 %v16339_v24  ;;  %v16700_v61 = vcombine.high %v1286_v60, %v1290_v12  ;;  %v1150_v38 = vld [vmem:[#allocation4 + $0x2150] sm:$0xff]  ;;  %v16699_v51 = vcombine.low %v1286_v60, %v1290_v12 }
 0x536   :  { %14114 = vmatprep.subr.bf16.mxu0 %v16332_v35  ;;  %v1154_v2 = vld [vmem:[#allocation4 + $0x2170] sm:$0xff] }
 0x537   :  { %14154 = vmatpush2.bf16.msra.mxu1 %v16467_v28  ;;  %v1278_v28 = vld [vmem:[#allocation4 + $0x2550] sm:$0xff]  ;;  %v16564_v3 = vcombine.high %v1150_v38, %v1154_v2  ;;  %v16563_v60 = vcombine.low %v1150_v38, %v1154_v2 }
 0x538   :  { %14155 = vmatprep.subr.bf16.mxu1 %v16460_v11  ;;  %v1282_v35 = vld [vmem:[#allocation4 + $0x2570] sm:$0xff] }
 0x539   :  { %14115 = vmatpush2.bf16.msra.mxu0 %v16331_v46  ;;  %v1146_v30 = vld [vmem:[#allocation4 + $0x2130] sm:$0xff]  ;;  %v16691_v12 = vcombine.low %v1278_v28, %v1282_v35 }
 0x53a   :  { %14166 = vmatprep.subr.bf16.mxu0 %v16580_v34  ;;  %v16692_v34 = vcombine.high %v1278_v28, %v1282_v35  ;;  %v1126_v2 = vld [vmem:[#allocation4 + $0x2090] sm:$0xff] }
 0x53b   :  { %14156 = vmatpush2.bf16.msra.mxu1 %v16459_v42  ;;  %v1258_v28 = vld [vmem:[#allocation4 + $0x24b0] sm:$0xff] }
 0x53c   :  { %14207 = vmatprep.subr.bf16.mxu1 %v16708_v0  ;;  %v13872_v24 = vpop.f32.mrf.mxu0  ;;  %14117 = vmatmul.mubr.bf16.vlgmr.msra.gmra.mxu0 %v17809_v55  ;;  %v1142_v0 = vld [vmem:[#allocation4 + $0x2110] sm:$0xff] }
 0x53d   :  { %v13873_v11 = vadd.f32 %v13872_v24, %v2153_v52  ;;  %14167 = vmatpush1.bf16.msra.mxu0 %v16579_v1  ;;  %14198 = vmatprep.mubr.bf16.mxu0 %v17821_v9  ;;  %v1270_v52 = vld [vmem:[#allocation4 + $0x2510] sm:$0xff]  ;;  %v16556_v1 = vcombine.high %v1142_v0, %v1146_v30 }
 0x53e   :  { %v13913_v23 = vpop.f32.mrf.mxu1  ;;  %14158 = vmatmul.mubr.bf16.vlgmr.msra.gmra.mxu1 %v17815_v62  ;;  %v13874_v56 = vpop.f32.mrf.mxu0  ;;  %14168 = vmatprep.subr.bf16.mxu0 %v16572_v19  ;;  %v1274_v24 = vld [vmem:[#allocation4 + $0x2530] sm:$0xff] }
 0x53f   :  { %14208 = vmatpush1.bf16.msra.mxu1 %v16707_v50  ;;  %v18060_v46 = vadd.f32 %v13913_v23, %v13873_v11  ;;  %v13875_v63 = vadd.f32 %v13874_v56, %v2157_v39  ;;  %14239 = vmatprep.mubr.bf16.mxu1 %v17826_v13  ;;  %v16684_v19 = vcombine.high %v1270_v52, %v1274_v24  ;;  %v1134_v39 = vld [vmem:[#allocation4 + $0x20d0] sm:$0xff] }
 0x540   :  { %v13915_v42 = vpop.f32.mrf.mxu1  ;;  %14209 = vmatprep.subr.bf16.mxu1 %v16700_v61  ;;  %v13876_v33 = vpop.f32.mrf.mxu0  ;;  %v1138_v61 = vld [vmem:[#allocation4 + $0x20f0] sm:$0xff] }
 0x541   :  { %v18064_v17 = vadd.f32 %v13915_v42, %v13875_v63  ;;  %14169 = vmatpush1.bf16.msra.mxu0 %v16571_v7  ;;  %v1262_v11 = vld [vmem:[#allocation4 + $0x24d0] sm:$0xff]  ;;  %v16555_v33 = vcombine.low %v1142_v0, %v1146_v30  ;;  %v16683_v63 = vcombine.low %v1270_v52, %v1274_v24  ;;  %v16548_v42 = vcombine.high %v1134_v39, %v1138_v61 }
 0x542   :  { %v13917_v41 = vpop.f32.mrf.mxu1  ;;  %v13877_v23 = vpop.f32.mrf.mxu0  ;;  %14170 = vmatprep.subr.bf16.mxu0 %v16564_v3  ;;  %v1266_v56 = vld [vmem:[#allocation4 + $0x24f0] sm:$0xff]  ;;  %v16547_v35 = vcombine.low %v1134_v39, %v1138_v61 }
 0x543   :  { %14210 = vmatpush1.bf16.msra.mxu1 %v16699_v51  ;;  %v16676_v38 = vcombine.high %v1262_v11, %v1266_v56  ;;  %v1130_v7 = vld [vmem:[#allocation4 + $0x20b0] sm:$0xff]  ;;  %v16675_v3 = vcombine.low %v1262_v11, %v1266_v56 }
 0x544   :  { %v13918_v50 = vpop.f32.mrf.mxu1  ;;  %14211 = vmatprep.subr.bf16.mxu1 %v16692_v34  ;;  %v1254_v51 = vld [vmem:[#allocation4 + $0x2490] sm:$0xff]  ;;  %v16540_v34 = vcombine.high %v1126_v2, %v1130_v7  ;;  %v16539_v52 = vcombine.low %v1126_v2, %v1130_v7 }
 0x545   :  { %14171 = vmatpush1.bf16.msra.mxu0 %v16563_v60  ;;  %v16668_v41 = vcombine.high %v1254_v51, %v1258_v28  ;;  %v1118_v60 = vld [vmem:[#allocation4 + $0x2050] sm:$0xff]  ;;  %v16667_v24 = vcombine.low %v1254_v51, %v1258_v28 }
 0x546   :  { %14172 = vmatprep.subr.bf16.mxu0 %v16556_v1  ;;  %v1122_v0 = vld [vmem:[#allocation4 + $0x2070] sm:$0xff] }
 0x547   :  { %14212 = vmatpush1.bf16.msra.mxu1 %v16691_v12  ;;  %v1246_v30 = vld [vmem:[#allocation4 + $0x2450] sm:$0xff]  ;;  %v16532_v12 = vcombine.high %v1118_v60, %v1122_v0  ;;  %v16531_v11 = vcombine.low %v1118_v60, %v1122_v0 }
 0x548   :  { %14213 = vmatprep.subr.bf16.mxu1 %v16684_v19  ;;  %v1250_v23 = vld [vmem:[#allocation4 + $0x2470] sm:$0xff] }
 0x549   :  { %14173 = vmatpush1.bf16.msra.mxu0 %v16555_v33  ;;  %v16660_v1 = vcombine.high %v1246_v30, %v1250_v23  ;;  %v1110_v50 = vld [vmem:[#allocation4 + $0x2010] sm:$0xff]  ;;  %v16659_v56 = vcombine.low %v1246_v30, %v1250_v23 }
 0x54a   :  { %14174 = vmatprep.subr.bf16.mxu0 %v16548_v42  ;;  %v1114_v19 = vld [vmem:[#allocation4 + $0x2030] sm:$0xff] }
 0x54b   :  { %14214 = vmatpush1.bf16.msra.mxu1 %v16683_v63  ;;  %v1238_v39 = vld [vmem:[#allocation4 + $0x2410] sm:$0xff]  ;;  %v16524_v33 = vcombine.high %v1110_v50, %v1114_v19  ;;  %v16523_v51 = vcombine.low %v1110_v50, %v1114_v19 }
 0x54c   :  { %14215 = vmatprep.subr.bf16.mxu1 %v16676_v38  ;;  %v1242_v61 = vld [vmem:[#allocation4 + $0x2430] sm:$0xff] }
 0x54d   :  { %14175 = vmatpush1.bf16.msra.mxu0 %v16547_v35  ;;  %v16652_v63 = vcombine.high %v1238_v39, %v1242_v61  ;;  %v1230_v42 = vld [vmem:[#allocation4 + $0x23d0] sm:$0xff]  ;;  %v16651_v28 = vcombine.low %v1238_v39, %v1242_v61 }
 0x54e   :  { %14176 = vmatprep.subr.bf16.mxu0 %v16540_v34  ;;  %v1234_v38 = vld [vmem:[#allocation4 + $0x23f0] sm:$0xff] }
 0x54f   :  { %14216 = vmatpush1.bf16.msra.mxu1 %v16675_v3  ;;  %v1358_v2 = vld [vmem:[#allocation4 + $0x27d0] sm:$0xff]  ;;  %v16644_v35 = vcombine.high %v1230_v42, %v1234_v38  ;;  %v16643_v30 = vcombine.low %v1230_v42, %v1234_v38 }
 0x550   :  { %14217 = vmatprep.subr.bf16.mxu1 %v16668_v41  ;;  %v1362_v7 = vld [vmem:[#allocation4 + $0x27f0] sm:$0xff] }
 0x551   :  { %14177 = vmatpush1.bf16.msra.mxu0 %v16539_v52  ;;  %v16772_v3 = vcombine.high %v1358_v2, %v1362_v7  ;;  %v1222_v34 = vld [vmem:[#allocation4 + $0x2390] sm:$0xff]  ;;  %v16771_v23 = vcombine.low %v1358_v2, %v1362_v7 }
 0x552   :  { %14178 = vmatprep.subr.bf16.mxu0 %v16532_v12  ;;  %v1226_v41 = vld [vmem:[#allocation4 + $0x23b0] sm:$0xff] }
 0x553   :  { %14218 = vmatpush1.bf16.msra.mxu1 %v16667_v24  ;;  %v1350_v60 = vld [vmem:[#allocation4 + $0x2790] sm:$0xff]  ;;  %v16636_v52 = vcombine.high %v1222_v34, %v1226_v41  ;;  %v16635_v39 = vcombine.low %v1222_v34, %v1226_v41 }
 0x554   :  { %14219 = vmatprep.subr.bf16.mxu1 %v16660_v1  ;;  %v1354_v0 = vld [vmem:[#allocation4 + $0x27b0] sm:$0xff] }
 0x555   :  { %14179 = vmatpush1.bf16.msra.mxu0 %v16531_v11  ;;  %v16764_v24 = vcombine.high %v1350_v60, %v1354_v0  ;;  %v1214_v12 = vld [vmem:[#allocation4 + $0x2350] sm:$0xff]  ;;  %v16763_v61 = vcombine.low %v1350_v60, %v1354_v0 }
 0x556   :  { %14180 = vmatprep.subr.bf16.mxu0 %v16524_v33  ;;  %v1218_v1 = vld [vmem:[#allocation4 + $0x2370] sm:$0xff] }
 0x557   :  { %14220 = vmatpush1.bf16.msra.mxu1 %v16659_v56  ;;  %v1342_v50 = vld [vmem:[#allocation4 + $0x2750] sm:$0xff]  ;;  %v16628_v11 = vcombine.high %v1214_v12, %v1218_v1  ;;  %v16627_v2 = vcombine.low %v1214_v12, %v1218_v1 }
 0x558   :  { %14221 = vmatprep.subr.bf16.mxu1 %v16652_v63  ;;  %v1346_v19 = vld [vmem:[#allocation4 + $0x2770] sm:$0xff] }
 0x559   :  { %14181 = vmatpush1.bf16.msra.mxu0 %v16523_v51  ;;  %v16756_v56 = vcombine.high %v1342_v50, %v1346_v19  ;;  %v1206_v33 = vld [vmem:[#allocation4 + $0x2310] sm:$0xff]  ;;  %v16755_v7 = vcombine.low %v1342_v50, %v1346_v19 }
 0x55a   :  { %14182 = vmatprep.subr.bf16.mxu0 %v16644_v35  ;;  %v1210_v63 = vld [vmem:[#allocation4 + $0x2330] sm:$0xff] }
 0x55b   :  { %14222 = vmatpush1.bf16.msra.mxu1 %v16651_v28  ;;  %v1334_v42 = vld [vmem:[#allocation4 + $0x2710] sm:$0xff]  ;;  %v16620_v51 = vcombine.high %v1206_v33, %v1210_v63  ;;  %v16619_v60 = vcombine.low %v1206_v33, %v1210_v63 }
 0x55c   :  { %14223 = vmatprep.subr.bf16.mxu1 %v16772_v3  ;;  %v1338_v38 = vld [vmem:[#allocation4 + $0x2730] sm:$0xff] }
 0x55d   :  { %14183 = vmatpush2.bf16.msra.mxu0 %v16643_v30  ;;  %v16748_v28 = vcombine.high %v1334_v42, %v1338_v38  ;;  %v1198_v35 = vld [vmem:[#allocation4 + $0x22d0] sm:$0xff]  ;;  %v16747_v0 = vcombine.low %v1334_v42, %v1338_v38 }
 0x55e   :  { %14184 = vmatprep.subr.bf16.mxu0 %v16636_v52  ;;  %v1202_v3 = vld [vmem:[#allocation4 + $0x22f0] sm:$0xff] }
 0x55f   :  { %14224 = vmatpush2.bf16.msra.mxu1 %v16771_v23  ;;  %v1326_v34 = vld [vmem:[#allocation4 + $0x26d0] sm:$0xff]  ;;  %v16612_v30 = vcombine.high %v1198_v35, %v1202_v3  ;;  %v16611_v50 = vcombine.low %v1198_v35, %v1202_v3 }
 0x560   :  { %14225 = vmatprep.subr.bf16.mxu1 %v16764_v24  ;;  %v1330_v41 = vld [vmem:[#allocation4 + $0x26f0] sm:$0xff] }
 0x561   :  { %14185 = vmatpush2.bf16.msra.mxu0 %v16635_v39  ;;  %v16740_v23 = vcombine.high %v1326_v34, %v1330_v41  ;;  %v1190_v52 = vld [vmem:[#allocation4 + $0x2290] sm:$0xff]  ;;  %v16739_v19 = vcombine.low %v1326_v34, %v1330_v41 }
 0x562   :  { %14186 = vmatprep.subr.bf16.mxu0 %v16628_v11  ;;  %v1194_v24 = vld [vmem:[#allocation4 + $0x22b0] sm:$0xff] }
 0x563   :  { %14226 = vmatpush2.bf16.msra.mxu1 %v16763_v61  ;;  %v1318_v12 = vld [vmem:[#allocation4 + $0x2690] sm:$0xff]  ;;  %v16604_v39 = vcombine.high %v1190_v52, %v1194_v24  ;;  %v16603_v42 = vcombine.low %v1190_v52, %v1194_v24 }
 0x564   :  { %14227 = vmatprep.subr.bf16.mxu1 %v16756_v56  ;;  %v1322_v1 = vld [vmem:[#allocation4 + $0x26b0] sm:$0xff] }
 0x565   :  { %14187 = vmatpush2.bf16.msra.mxu0 %v16627_v2  ;;  %v16732_v61 = vcombine.high %v1318_v12, %v1322_v1  ;;  %v1182_v11 = vld [vmem:[#allocation4 + $0x2250] sm:$0xff]  ;;  %v16731_v38 = vcombine.low %v1318_v12, %v1322_v1 }
 0x566   :  { %14188 = vmatprep.subr.bf16.mxu0 %v16620_v51  ;;  %v1186_v56 = vld [vmem:[#allocation4 + $0x2270] sm:$0xff] }
 0x567   :  { %14228 = vmatpush2.bf16.msra.mxu1 %v16755_v7  ;;  %v1310_v33 = vld [vmem:[#allocation4 + $0x2650] sm:$0xff]  ;;  %v16596_v2 = vcombine.high %v1182_v11, %v1186_v56  ;;  %v16595_v34 = vcombine.low %v1182_v11, %v1186_v56 }
 0x568   :  { %14229 = vmatprep.subr.bf16.mxu1 %v16748_v28  ;;  %v1314_v63 = vld [vmem:[#allocation4 + $0x2670] sm:$0xff] }
 0x569   :  { %14189 = vmatpush2.bf16.msra.mxu0 %v16619_v60  ;;  %v16724_v7 = vcombine.high %v1310_v33, %v1314_v63  ;;  %v1174_v51 = vld [vmem:[#allocation4 + $0x2210] sm:$0xff]  ;;  %v16723_v41 = vcombine.low %v1310_v33, %v1314_v63 }
 0x56a   :  { %14190 = vmatprep.subr.bf16.mxu0 %v16612_v30  ;;  %v1178_v28 = vld [vmem:[#allocation4 + $0x2230] sm:$0xff] }
 0x56b   :  { %14230 = vmatpush2.bf16.msra.mxu1 %v16747_v0  ;;  %v1302_v35 = vld [vmem:[#allocation4 + $0x2610] sm:$0xff]  ;;  %v16588_v60 = vcombine.high %v1174_v51, %v1178_v28  ;;  %v16587_v12 = vcombine.low %v1174_v51, %v1178_v28 }
 0x56c   :  { %14231 = vmatprep.subr.bf16.mxu1 %v16740_v23  ;;  %v1306_v3 = vld [vmem:[#allocation4 + $0x2630] sm:$0xff] }
 0x56d   :  { %14191 = vmatpush2.bf16.msra.mxu0 %v16611_v50  ;;  %v16716_v0 = vcombine.high %v1302_v35, %v1306_v3  ;;  %v1422_v30 = vld [vmem:[#allocation4 + $0x29d0] sm:$0xff]  ;;  %v16715_v1 = vcombine.low %v1302_v35, %v1306_v3 }
 0x56e   :  { %14192 = vmatprep.subr.bf16.mxu0 %v16604_v39  ;;  %v1426_v23 = vld [vmem:[#allocation4 + $0x29f0] sm:$0xff] }
 0x56f   :  { %14232 = vmatpush2.bf16.msra.mxu1 %v16739_v19  ;;  %v1550_v52 = vld [vmem:[#allocation4 + $0x2dd0] sm:$0xff]  ;;  %v16836_v50 = vcombine.high %v1422_v30, %v1426_v23  ;;  %v16835_v33 = vcombine.low %v1422_v30, %v1426_v23 }
 0x570   :  { %14233 = vmatprep.subr.bf16.mxu1 %v16732_v61  ;;  %v1554_v24 = vld [vmem:[#allocation4 + $0x2df0] sm:$0xff] }
 0x571   :  { %14193 = vmatpush2.bf16.msra.mxu0 %v16603_v42  ;;  %v16964_v19 = vcombine.high %v1550_v52, %v1554_v24  ;;  %v1414_v39 = vld [vmem:[#allocation4 + $0x2990] sm:$0xff]  ;;  %v16963_v63 = vcombine.low %v1550_v52, %v1554_v24 }
 0x572   :  { %14194 = vmatprep.subr.bf16.mxu0 %v16596_v2  ;;  %v1418_v61 = vld [vmem:[#allocation4 + $0x29b0] sm:$0xff] }
 0x573   :  { %14234 = vmatpush2.bf16.msra.mxu1 %v16731_v38  ;;  %v1542_v11 = vld [vmem:[#allocation4 + $0x2d90] sm:$0xff]  ;;  %v16828_v42 = vcombine.high %v1414_v39, %v1418_v61 }
 0x574   :  { %14235 = vmatprep.subr.bf16.mxu1 %v16724_v7  ;;  %v1546_v56 = vld [vmem:[#allocation4 + $0x2db0] sm:$0xff] }
 0x575   :  { %14195 = vmatpush2.bf16.msra.mxu0 %v16595_v34  ;;  %v16956_v38 = vcombine.high %v1542_v11, %v1546_v56  ;;  %v1406_v2 = vld [vmem:[#allocation4 + $0x2950] sm:$0xff] }
 0x576   :  { %14196 = vmatprep.subr.bf16.mxu0 %v16588_v60  ;;  %v1410_v7 = vld [vmem:[#allocation4 + $0x2970] sm:$0xff] }
 0x577   :  { %14236 = vmatpush2.bf16.msra.mxu1 %v16723_v41  ;;  %v1534_v28 = vld [vmem:[#allocation4 + $0x2d50] sm:$0xff]  ;;  %v16827_v41 = vcombine.low %v1414_v39, %v1418_v61  ;;  %v16820_v30 = vcombine.high %v1406_v2, %v1410_v7 }
 0x578   :  { %14237 = vmatprep.subr.bf16.mxu1 %v16716_v0  ;;  %v1538_v35 = vld [vmem:[#allocation4 + $0x2d70] sm:$0xff]  ;;  %v16955_v0 = vcombine.low %v1542_v11, %v1546_v56  ;;  %v16819_v11 = vcombine.low %v1406_v2, %v1410_v7 }
 0x579   :  { %14197 = vmatpush2.bf16.msra.mxu0 %v16587_v12  ;;  %v16948_v12 = vcombine.high %v1534_v28, %v1538_v35  ;;  %v1382_v7 = vld [vmem:[#allocation4 + $0x2890] sm:$0xff] }
 0x57a   :  { %14248 = vmatprep.subr.bf16.mxu0 %v16836_v50  ;;  %v1402_v50 = vld [vmem:[#allocation4 + $0x2930] sm:$0xff] }
 0x57b   :  { %14238 = vmatpush2.bf16.msra.mxu1 %v16715_v1  ;;  %v1398_v1 = vld [vmem:[#allocation4 + $0x2910] sm:$0xff] }
 0x57c   :  { %14289 = vmatprep.subr.bf16.mxu1 %v16964_v19  ;;  %v13954_v51 = vpop.f32.mrf.mxu0  ;;  %14199 = vmatmul.mubr.bf16.vlgmr.msra.gmra.mxu0 %v17837_v21  ;;  %v1526_v19 = vld [vmem:[#allocation4 + $0x2d10] sm:$0xff] }
 0x57d   :  { %v13955_v3 = vadd.f32 %v13954_v51, %v18060_v46  ;;  %14249 = vmatpush1.bf16.msra.mxu0 %v16835_v33  ;;  %14280 = vmatprep.mubr.bf16.mxu0 %v17849_v37  ;;  %v1530_v33 = vld [vmem:[#allocation4 + $0x2d30] sm:$0xff] }
 0x57e   :  { %v13995_v34 = vpop.f32.mrf.mxu1  ;;  %14240 = vmatmul.mubr.bf16.vlgmr.msra.gmra.mxu1 %v17843_v26  ;;  %v13956_v60 = vpop.f32.mrf.mxu0  ;;  %14250 = vmatprep.subr.bf16.mxu0 %v16828_v42  ;;  %v1390_v51 = vld [vmem:[#allocation4 + $0x28d0] sm:$0xff] }
 0x57f   :  { %14290 = vmatpush1.bf16.msra.mxu1 %v16963_v63  ;;  %v18069_v23 = vadd.f32 %v13995_v34, %v13955_v3  ;;  %v13957_v52 = vadd.f32 %v13956_v60, %v18064_v17  ;;  %14321 = vmatprep.mubr.bf16.mxu1 %v17854_v43  ;;  %v16947_v17 = vcombine.low %v1534_v28, %v1538_v35  ;;  %v1394_v3 = vld [vmem:[#allocation4 + $0x28f0] sm:$0xff] }
 0x580   :  { %v13997_v24 = vpop.f32.mrf.mxu1  ;;  %14291 = vmatprep.subr.bf16.mxu1 %v16956_v38  ;;  %v13958_v46 = vpop.f32.mrf.mxu0  ;;  %v16812_v63 = vcombine.high %v1398_v1, %v1402_v50  ;;  %v16940_v38 = vcombine.high %v1526_v19, %v1530_v33  ;;  %v1518_v34 = vld [vmem:[#allocation4 + $0x2cd0] sm:$0xff]  ;;  %v16803_v35 = vcombine.low %v1390_v51, %v1394_v3 }
 0x581   :  { %v18074_v39 = vadd.f32 %v13997_v24, %v13957_v52  ;;  %14251 = vmatpush1.bf16.msra.mxu0 %v16827_v41  ;;  %v1522_v60 = vld [vmem:[#allocation4 + $0x2cf0] sm:$0xff]  ;;  %v16811_v46 = vcombine.low %v1398_v1, %v1402_v50  ;;  %v16939_v52 = vcombine.low %v1526_v19, %v1530_v33  ;;  %v16804_v24 = vcombine.high %v1390_v51, %v1394_v3 }
 0x582   :  { %v13999_v61 = vpop.f32.mrf.mxu1  ;;  %v13959_v56 = vpop.f32.mrf.mxu0  ;;  %14252 = vmatprep.subr.bf16.mxu0 %v16820_v30  ;;  %v16932_v2 = vcombine.high %v1518_v34, %v1522_v60  ;;  %v1386_v41 = vld [vmem:[#allocation4 + $0x28b0] sm:$0xff]  ;;  %v16931_v30 = vcombine.low %v1518_v34, %v1522_v60 }
 0x583   :  { %14292 = vmatpush1.bf16.msra.mxu1 %v16955_v0  ;;  %v1510_v0 = vld [vmem:[#allocation4 + $0x2c90] sm:$0xff]  ;;  %v16795_v19 = vcombine.low %v1382_v7, %v1386_v41 }
 0x584   :  { %v14000_v42 = vpop.f32.mrf.mxu1  ;;  %14293 = vmatprep.subr.bf16.mxu1 %v16948_v12  ;;  %v1514_v28 = vld [vmem:[#allocation4 + $0x2cb0] sm:$0xff]  ;;  %v16796_v12 = vcombine.high %v1382_v7, %v1386_v41 }
 0x585   :  { %14253 = vmatpush1.bf16.msra.mxu0 %v16819_v11  ;;  %v16924_v61 = vcombine.high %v1510_v0, %v1514_v28  ;;  %v1374_v11 = vld [vmem:[#allocation4 + $0x2850] sm:$0xff]  ;;  %v16923_v33 = vcombine.low %v1510_v0, %v1514_v28 }
 0x586   :  { %14254 = vmatprep.subr.bf16.mxu0 %v16812_v63  ;;  %v1378_v1 = vld [vmem:[#allocation4 + $0x2870] sm:$0xff] }
 0x587   :  { %14294 = vmatpush1.bf16.msra.mxu1 %v16947_v17  ;;  %v1502_v50 = vld [vmem:[#allocation4 + $0x2c50] sm:$0xff]  ;;  %v16788_v17 = vcombine.high %v1374_v11, %v1378_v1  ;;  %v16787_v34 = vcombine.low %v1374_v11, %v1378_v1 }
 0x588   :  { %14295 = vmatprep.subr.bf16.mxu1 %v16940_v38  ;;  %v1506_v56 = vld [vmem:[#allocation4 + $0x2c70] sm:$0xff] }
 0x589   :  { %14255 = vmatpush1.bf16.msra.mxu0 %v16811_v46  ;;  %v16916_v63 = vcombine.high %v1502_v50, %v1506_v56  ;;  %v1366_v42 = vld [vmem:[#allocation4 + $0x2810] sm:$0xff]  ;;  %v16915_v60 = vcombine.low %v1502_v50, %v1506_v56 }
 0x58a   :  { %14256 = vmatprep.subr.bf16.mxu0 %v16804_v24  ;;  %v1370_v38 = vld [vmem:[#allocation4 + $0x2830] sm:$0xff] }
 0x58b   :  { %14296 = vmatpush1.bf16.msra.mxu1 %v16939_v52  ;;  %v1494_v51 = vld [vmem:[#allocation4 + $0x2c10] sm:$0xff]  ;;  %v16780_v46 = vcombine.high %v1366_v42, %v1370_v38  ;;  %v16779_v0 = vcombine.low %v1366_v42, %v1370_v38 }
 0x58c   :  { %14297 = vmatprep.subr.bf16.mxu1 %v16932_v2  ;;  %v1498_v3 = vld [vmem:[#allocation4 + $0x2c30] sm:$0xff] }
 0x58d   :  { %14257 = vmatpush1.bf16.msra.mxu0 %v16803_v35  ;;  %v16908_v52 = vcombine.high %v1494_v51, %v1498_v3  ;;  %v1486_v24 = vld [vmem:[#allocation4 + $0x2bd0] sm:$0xff]  ;;  %v16907_v28 = vcombine.low %v1494_v51, %v1498_v3 }
 0x58e   :  { %14258 = vmatprep.subr.bf16.mxu0 %v16796_v12  ;;  %v1490_v2 = vld [vmem:[#allocation4 + $0x2bf0] sm:$0xff] }
 0x58f   :  { %14298 = vmatpush1.bf16.msra.mxu1 %v16931_v30  ;;  %v1614_v7 = vld [vmem:[#allocation4 + $0x2fd0] sm:$0xff]  ;;  %v16900_v35 = vcombine.high %v1486_v24, %v1490_v2  ;;  %v16899_v50 = vcombine.low %v1486_v24, %v1490_v2 }
 0x590   :  { %14299 = vmatprep.subr.bf16.mxu1 %v16924_v61  ;;  %v1618_v41 = vld [vmem:[#allocation4 + $0x2ff0] sm:$0xff] }
 0x591   :  { %14259 = vmatpush1.bf16.msra.mxu0 %v16795_v19  ;;  %v17028_v30 = vcombine.high %v1614_v7, %v1618_v41  ;;  %v1478_v12 = vld [vmem:[#allocation4 + $0x2b90] sm:$0xff]  ;;  %v17027_v56 = vcombine.low %v1614_v7, %v1618_v41 }
 0x592   :  { %14260 = vmatprep.subr.bf16.mxu0 %v16788_v17  ;;  %v1482_v61 = vld [vmem:[#allocation4 + $0x2bb0] sm:$0xff] }
 0x593   :  { %14300 = vmatpush1.bf16.msra.mxu1 %v16923_v33  ;;  %v1606_v11 = vld [vmem:[#allocation4 + $0x2f90] sm:$0xff]  ;;  %v16892_v19 = vcombine.high %v1478_v12, %v1482_v61  ;;  %v16891_v51 = vcombine.low %v1478_v12, %v1482_v61 }
 0x594   :  { %14301 = vmatprep.subr.bf16.mxu1 %v16916_v63  ;;  %v1610_v1 = vld [vmem:[#allocation4 + $0x2fb0] sm:$0xff] }
 0x595   :  { %14261 = vmatpush1.bf16.msra.mxu0 %v16787_v34  ;;  %v17020_v33 = vcombine.high %v1606_v11, %v1610_v1  ;;  %v1470_v17 = vld [vmem:[#allocation4 + $0x2b50] sm:$0xff]  ;;  %v17019_v3 = vcombine.low %v1606_v11, %v1610_v1 }
 0x596   :  { %14262 = vmatprep.subr.bf16.mxu0 %v16780_v46  ;;  %v1474_v63 = vld [vmem:[#allocation4 + $0x2b70] sm:$0xff] }
 0x597   :  { %14302 = vmatpush1.bf16.msra.mxu1 %v16915_v60  ;;  %v1598_v42 = vld [vmem:[#allocation4 + $0x2f50] sm:$0xff]  ;;  %v16884_v34 = vcombine.high %v1470_v17, %v1474_v63  ;;  %v16883_v7 = vcombine.low %v1470_v17, %v1474_v63 }
 0x598   :  { %14303 = vmatprep.subr.bf16.mxu1 %v16908_v52  ;;  %v1602_v38 = vld [vmem:[#allocation4 + $0x2f70] sm:$0xff] }
 0x599   :  { %14263 = vmatpush1.bf16.msra.mxu0 %v16779_v0  ;;  %v17012_v60 = vcombine.high %v1598_v42, %v1602_v38  ;;  %v1462_v46 = vld [vmem:[#allocation4 + $0x2b10] sm:$0xff]  ;;  %v17011_v41 = vcombine.low %v1598_v42, %v1602_v38 }
 0x59a   :  { %14264 = vmatprep.subr.bf16.mxu0 %v16900_v35  ;;  %v1466_v52 = vld [vmem:[#allocation4 + $0x2b30] sm:$0xff] }
 0x59b   :  { %14304 = vmatpush1.bf16.msra.mxu1 %v16907_v28  ;;  %v1590_v24 = vld [vmem:[#allocation4 + $0x2f10] sm:$0xff]  ;;  %v16876_v0 = vcombine.high %v1462_v46, %v1466_v52  ;;  %v16875_v11 = vcombine.low %v1462_v46, %v1466_v52 }
 0x59c   :  { %14305 = vmatprep.subr.bf16.mxu1 %v17028_v30  ;;  %v1594_v2 = vld [vmem:[#allocation4 + $0x2f30] sm:$0xff] }
 0x59d   :  { %14265 = vmatpush2.bf16.msra.mxu0 %v16899_v50  ;;  %v17004_v28 = vcombine.high %v1590_v24, %v1594_v2  ;;  %v1454_v35 = vld [vmem:[#allocation4 + $0x2ad0] sm:$0xff]  ;;  %v17003_v1 = vcombine.low %v1590_v24, %v1594_v2 }
 0x59e   :  { %14266 = vmatprep.subr.bf16.mxu0 %v16892_v19  ;;  %v1458_v30 = vld [vmem:[#allocation4 + $0x2af0] sm:$0xff] }
 0x59f   :  { %14306 = vmatpush2.bf16.msra.mxu1 %v17027_v56  ;;  %v1582_v12 = vld [vmem:[#allocation4 + $0x2ed0] sm:$0xff]  ;;  %v16868_v50 = vcombine.high %v1454_v35, %v1458_v30  ;;  %v16867_v42 = vcombine.low %v1454_v35, %v1458_v30 }
 0x5a0   :  { %14307 = vmatprep.subr.bf16.mxu1 %v17020_v33  ;;  %v1586_v61 = vld [vmem:[#allocation4 + $0x2ef0] sm:$0xff] }
 0x5a1   :  { %14267 = vmatpush2.bf16.msra.mxu0 %v16891_v51  ;;  %v16996_v56 = vcombine.high %v1582_v12, %v1586_v61  ;;  %v1446_v19 = vld [vmem:[#allocation4 + $0x2a90] sm:$0xff]  ;;  %v16995_v38 = vcombine.low %v1582_v12, %v1586_v61 }
 0x5a2   :  { %14268 = vmatprep.subr.bf16.mxu0 %v16884_v34  ;;  %v1450_v33 = vld [vmem:[#allocation4 + $0x2ab0] sm:$0xff] }
 0x5a3   :  { %14308 = vmatpush2.bf16.msra.mxu1 %v17019_v3  ;;  %v1574_v17 = vld [vmem:[#allocation4 + $0x2e90] sm:$0xff]  ;;  %v16860_v51 = vcombine.high %v1446_v19, %v1450_v33  ;;  %v16859_v24 = vcombine.low %v1446_v19, %v1450_v33 }
 0x5a4   :  { %14309 = vmatprep.subr.bf16.mxu1 %v17012_v60  ;;  %v1578_v63 = vld [vmem:[#allocation4 + $0x2eb0] sm:$0xff] }
 0x5a5   :  { %14269 = vmatpush2.bf16.msra.mxu0 %v16883_v7  ;;  %v16988_v3 = vcombine.high %v1574_v17, %v1578_v63  ;;  %v1438_v34 = vld [vmem:[#allocation4 + $0x2a50] sm:$0xff]  ;;  %v16987_v2 = vcombine.low %v1574_v17, %v1578_v63 }
 0x5a6   :  { %14270 = vmatprep.subr.bf16.mxu0 %v16876_v0  ;;  %v1442_v60 = vld [vmem:[#allocation4 + $0x2a70] sm:$0xff] }
 0x5a7   :  { %14310 = vmatpush2.bf16.msra.mxu1 %v17011_v41  ;;  %v1566_v46 = vld [vmem:[#allocation4 + $0x2e50] sm:$0xff]  ;;  %v16852_v7 = vcombine.high %v1438_v34, %v1442_v60  ;;  %v16851_v12 = vcombine.low %v1438_v34, %v1442_v60 }
 0x5a8   :  { %14311 = vmatprep.subr.bf16.mxu1 %v17004_v28  ;;  %v1570_v52 = vld [vmem:[#allocation4 + $0x2e70] sm:$0xff] }
 0x5a9   :  { %14271 = vmatpush2.bf16.msra.mxu0 %v16875_v11  ;;  %v16980_v41 = vcombine.high %v1566_v46, %v1570_v52  ;;  %v1430_v0 = vld [vmem:[#allocation4 + $0x2a10] sm:$0xff]  ;;  %v16979_v61 = vcombine.low %v1566_v46, %v1570_v52 }
 0x5aa   :  { %14272 = vmatprep.subr.bf16.mxu0 %v16868_v50  ;;  %v1434_v28 = vld [vmem:[#allocation4 + $0x2a30] sm:$0xff] }
 0x5ab   :  { %14312 = vmatpush2.bf16.msra.mxu1 %v17003_v1  ;;  %v1558_v35 = vld [vmem:[#allocation4 + $0x2e10] sm:$0xff]  ;;  %v16844_v11 = vcombine.high %v1430_v0, %v1434_v28  ;;  %v16843_v17 = vcombine.low %v1430_v0, %v1434_v28 }
 0x5ac   :  { %14313 = vmatprep.subr.bf16.mxu1 %v16996_v56  ;;  %v1562_v30 = vld [vmem:[#allocation4 + $0x2e30] sm:$0xff] }
 0x5ad   :  { %14273 = vmatpush2.bf16.msra.mxu0 %v16867_v42  ;;  %v16972_v1 = vcombine.high %v1558_v35, %v1562_v30  ;;  %v1678_v50 = vld [vmem:[#allocation4 + $0x31d0] sm:$0xff]  ;;  %v16971_v63 = vcombine.low %v1558_v35, %v1562_v30 }
 0x5ae   :  { %14274 = vmatprep.subr.bf16.mxu0 %v16860_v51  ;;  %v1682_v56 = vld [vmem:[#allocation4 + $0x31f0] sm:$0xff] }
 0x5af   :  { %14314 = vmatpush2.bf16.msra.mxu1 %v16995_v38  ;;  %v1806_v19 = vld [vmem:[#allocation4 + $0x35d0] sm:$0xff]  ;;  %v17092_v42 = vcombine.high %v1678_v50, %v1682_v56  ;;  %v17091_v46 = vcombine.low %v1678_v50, %v1682_v56 }
 0x5b0   :  { %14315 = vmatprep.subr.bf16.mxu1 %v16988_v3  ;;  %v1810_v33 = vld [vmem:[#allocation4 + $0x35f0] sm:$0xff] }
 0x5b1   :  { %14275 = vmatpush2.bf16.msra.mxu0 %v16859_v24  ;;  %v17220_v38 = vcombine.high %v1806_v19, %v1810_v33  ;;  %v1670_v51 = vld [vmem:[#allocation4 + $0x3190] sm:$0xff]  ;;  %v17219_v52 = vcombine.low %v1806_v19, %v1810_v33 }
 0x5b2   :  { %14276 = vmatprep.subr.bf16.mxu0 %v16852_v7  ;;  %v1674_v3 = vld [vmem:[#allocation4 + $0x31b0] sm:$0xff] }
 0x5b3   :  { %14316 = vmatpush2.bf16.msra.mxu1 %v16987_v2  ;;  %v1798_v34 = vld [vmem:[#allocation4 + $0x3590] sm:$0xff]  ;;  %v17084_v24 = vcombine.high %v1670_v51, %v1674_v3 }
 0x5b4   :  { %14317 = vmatprep.subr.bf16.mxu1 %v16980_v41  ;;  %v1802_v60 = vld [vmem:[#allocation4 + $0x35b0] sm:$0xff] }
 0x5b5   :  { %14277 = vmatpush2.bf16.msra.mxu0 %v16851_v12  ;;  %v17212_v2 = vcombine.high %v1798_v34, %v1802_v60  ;;  %v1662_v7 = vld [vmem:[#allocation4 + $0x3150] sm:$0xff] }
 0x5b6   :  { %14278 = vmatprep.subr.bf16.mxu0 %v16844_v11  ;;  %v1666_v41 = vld [vmem:[#allocation4 + $0x3170] sm:$0xff] }
 0x5b7   :  { %14318 = vmatpush2.bf16.msra.mxu1 %v16979_v61  ;;  %v1790_v28 = vld [vmem:[#allocation4 + $0x3550] sm:$0xff]  ;;  %v17083_v61 = vcombine.low %v1670_v51, %v1674_v3  ;;  %v17076_v50 = vcombine.high %v1662_v7, %v1666_v41 }
 0x5b8   :  { %14319 = vmatprep.subr.bf16.mxu1 %v16972_v1  ;;  %v1794_v35 = vld [vmem:[#allocation4 + $0x3570] sm:$0xff]  ;;  %v17211_v1 = vcombine.low %v1798_v34, %v1802_v60  ;;  %v17075_v34 = vcombine.low %v1662_v7, %v1666_v41 }
 0x5b9   :  { %14279 = vmatpush2.bf16.msra.mxu0 %v16843_v17  ;;  %v17204_v17 = vcombine.high %v1790_v28, %v1794_v35  ;;  %v1638_v41 = vld [vmem:[#allocation4 + $0x3090] sm:$0xff] }
 0x5ba   :  { %14330 = vmatprep.subr.bf16.mxu0 %v17092_v42  ;;  %v1658_v42 = vld [vmem:[#allocation4 + $0x3130] sm:$0xff] }
 0x5bb   :  { %14320 = vmatpush2.bf16.msra.mxu1 %v16971_v63  ;;  %v1654_v63 = vld [vmem:[#allocation4 + $0x3110] sm:$0xff] }
 0x5bc   :  { %14371 = vmatprep.subr.bf16.mxu1 %v17220_v38  ;;  %v14036_v0 = vpop.f32.mrf.mxu0  ;;  %14281 = vmatmul.mubr.bf16.vlgmr.msra.gmra.mxu0 %v17867_v5  ;;  %v1782_v38 = vld [vmem:[#allocation4 + $0x3510] sm:$0xff] }
 0x5bd   :  { %v14037_v30 = vadd.f32 %v14036_v0, %v18069_v23  ;;  %14331 = vmatpush1.bf16.msra.mxu0 %v17091_v46  ;;  %14362 = vmatprep.mubr.bf16.mxu0 %v17879_v25  ;;  %v1786_v46 = vld [vmem:[#allocation4 + $0x3530] sm:$0xff] }
 0x5be   :  { %v14077_v12 = vpop.f32.mrf.mxu1  ;;  %14322 = vmatmul.mubr.bf16.vlgmr.msra.gmra.mxu1 %v17873_v10  ;;  %v14038_v11 = vpop.f32.mrf.mxu0  ;;  %14332 = vmatprep.subr.bf16.mxu0 %v17084_v24  ;;  %v1646_v0 = vld [vmem:[#allocation4 + $0x30d0] sm:$0xff] }
 0x5bf   :  { %14372 = vmatpush1.bf16.msra.mxu1 %v17219_v52  ;;  %v18079_v56 = vadd.f32 %v14077_v12, %v14037_v30  ;;  %v14039_v19 = vadd.f32 %v14038_v11, %v18074_v39  ;;  %14403 = vmatprep.mubr.bf16.mxu1 %v17884_v31  ;;  %v17203_v39 = vcombine.low %v1790_v28, %v1794_v35  ;;  %v1650_v30 = vld [vmem:[#allocation4 + $0x30f0] sm:$0xff] }
 0x5c0   :  { %v14079_v33 = vpop.f32.mrf.mxu1  ;;  %14373 = vmatprep.subr.bf16.mxu1 %v17212_v2  ;;  %v14040_v23 = vpop.f32.mrf.mxu0  ;;  %v17068_v52 = vcombine.high %v1654_v63, %v1658_v42  ;;  %v17196_v2 = vcombine.high %v1782_v38, %v1786_v46  ;;  %v1774_v12 = vld [vmem:[#allocation4 + $0x34d0] sm:$0xff]  ;;  %v17059_v35 = vcombine.low %v1646_v0, %v1650_v30 }
 0x5c1   :  { %v18084_v51 = vadd.f32 %v14079_v33, %v14039_v19  ;;  %14333 = vmatpush1.bf16.msra.mxu0 %v17083_v61  ;;  %v1778_v11 = vld [vmem:[#allocation4 + $0x34f0] sm:$0xff]  ;;  %v17067_v23 = vcombine.low %v1654_v63, %v1658_v42  ;;  %v17195_v19 = vcombine.low %v1782_v38, %v1786_v46  ;;  %v17060_v33 = vcombine.high %v1646_v0, %v1650_v30 }
 0x5c2   :  { %v14081_v3 = vpop.f32.mrf.mxu1  ;;  %v14041_v60 = vpop.f32.mrf.mxu0  ;;  %14334 = vmatprep.subr.bf16.mxu0 %v17076_v50  ;;  %v17188_v7 = vcombine.high %v1774_v12, %v1778_v11  ;;  %v1642_v61 = vld [vmem:[#allocation4 + $0x30b0] sm:$0xff]  ;;  %v17187_v50 = vcombine.low %v1774_v12, %v1778_v11 }
 0x5c3   :  { %14374 = vmatpush1.bf16.msra.mxu1 %v17211_v1  ;;  %v1766_v1 = vld [vmem:[#allocation4 + $0x3490] sm:$0xff]  ;;  %v17051_v38 = vcombine.low %v1638_v41, %v1642_v61 }
 0x5c4   :  { %v14082_v24 = vpop.f32.mrf.mxu1  ;;  %14375 = vmatprep.subr.bf16.mxu1 %v17204_v17  ;;  %v1770_v28 = vld [vmem:[#allocation4 + $0x34b0] sm:$0xff]  ;;  %v17052_v17 = vcombine.high %v1638_v41, %v1642_v61 }
 0x5c5   :  { %14335 = vmatpush1.bf16.msra.mxu0 %v17075_v34  ;;  %v17180_v3 = vcombine.high %v1766_v1, %v1770_v28  ;;  %v1630_v34 = vld [vmem:[#allocation4 + $0x3050] sm:$0xff]  ;;  %v17179_v46 = vcombine.low %v1766_v1, %v1770_v28 }
 0x5c6   :  { %14336 = vmatprep.subr.bf16.mxu0 %v17068_v52  ;;  %v1634_v63 = vld [vmem:[#allocation4 + $0x3070] sm:$0xff] }
 0x5c7   :  { %14376 = vmatpush1.bf16.msra.mxu1 %v17203_v39  ;;  %v1758_v42 = vld [vmem:[#allocation4 + $0x3450] sm:$0xff]  ;;  %v17044_v39 = vcombine.high %v1630_v34, %v1634_v63  ;;  %v17043_v12 = vcombine.low %v1630_v34, %v1634_v63 }
 0x5c8   :  { %14377 = vmatprep.subr.bf16.mxu1 %v17196_v2  ;;  %v1762_v60 = vld [vmem:[#allocation4 + $0x3470] sm:$0xff] }
 0x5c9   :  { %14337 = vmatpush1.bf16.msra.mxu0 %v17067_v23  ;;  %v17172_v52 = vcombine.high %v1758_v42, %v1762_v60  ;;  %v1622_v24 = vld [vmem:[#allocation4 + $0x3010] sm:$0xff]  ;;  %v17171_v11 = vcombine.low %v1758_v42, %v1762_v60 }
 0x5ca   :  { %14338 = vmatprep.subr.bf16.mxu0 %v17060_v33  ;;  %v1626_v2 = vld [vmem:[#allocation4 + $0x3030] sm:$0xff] }
 0x5cb   :  { %14378 = vmatpush1.bf16.msra.mxu1 %v17195_v19  ;;  %v1750_v0 = vld [vmem:[#allocation4 + $0x3410] sm:$0xff]  ;;  %v17036_v23 = vcombine.high %v1622_v24, %v1626_v2  ;;  %v17035_v1 = vcombine.low %v1622_v24, %v1626_v2 }
 0x5cc   :  { %14379 = vmatprep.subr.bf16.mxu1 %v17188_v7  ;;  %v1754_v30 = vld [vmem:[#allocation4 + $0x3430] sm:$0xff] }
 0x5cd   :  { %14339 = vmatpush1.bf16.msra.mxu0 %v17059_v35  ;;  %v17164_v19 = vcombine.high %v1750_v0, %v1754_v30  ;;  %v1742_v33 = vld [vmem:[#allocation4 + $0x33d0] sm:$0xff]  ;;  %v17163_v28 = vcombine.low %v1750_v0, %v1754_v30 }
 0x5ce   :  { %14340 = vmatprep.subr.bf16.mxu0 %v17052_v17  ;;  %v1746_v7 = vld [vmem:[#allocation4 + $0x33f0] sm:$0xff] }
 0x5cf   :  { %14380 = vmatpush1.bf16.msra.mxu1 %v17187_v50  ;;  %v1870_v41 = vld [vmem:[#allocation4 + $0x37d0] sm:$0xff]  ;;  %v17156_v35 = vcombine.high %v1742_v33, %v1746_v7  ;;  %v17155_v42 = vcombine.low %v1742_v33, %v1746_v7 }
 0x5d0   :  { %14381 = vmatprep.subr.bf16.mxu1 %v17180_v3  ;;  %v1874_v61 = vld [vmem:[#allocation4 + $0x37f0] sm:$0xff] }
 0x5d1   :  { %14341 = vmatpush1.bf16.msra.mxu0 %v17051_v38  ;;  %v17284_v50 = vcombine.high %v1870_v41, %v1874_v61  ;;  %v1734_v17 = vld [vmem:[#allocation4 + $0x3390] sm:$0xff]  ;;  %v17283_v60 = vcombine.low %v1870_v41, %v1874_v61 }
 0x5d2   :  { %14342 = vmatprep.subr.bf16.mxu0 %v17044_v39  ;;  %v1738_v3 = vld [vmem:[#allocation4 + $0x33b0] sm:$0xff] }
 0x5d3   :  { %14382 = vmatpush1.bf16.msra.mxu1 %v17179_v46  ;;  %v1862_v34 = vld [vmem:[#allocation4 + $0x3790] sm:$0xff]  ;;  %v17148_v38 = vcombine.high %v1734_v17, %v1738_v3  ;;  %v17147_v0 = vcombine.low %v1734_v17, %v1738_v3 }
 0x5d4   :  { %14383 = vmatprep.subr.bf16.mxu1 %v17172_v52  ;;  %v1866_v63 = vld [vmem:[#allocation4 + $0x37b0] sm:$0xff] }
 0x5d5   :  { %14343 = vmatpush1.bf16.msra.mxu0 %v17043_v12  ;;  %v17276_v46 = vcombine.high %v1862_v34, %v1866_v63  ;;  %v1726_v39 = vld [vmem:[#allocation4 + $0x3350] sm:$0xff]  ;;  %v17275_v30 = vcombine.low %v1862_v34, %v1866_v63 }
 0x5d6   :  { %14344 = vmatprep.subr.bf16.mxu0 %v17036_v23  ;;  %v1730_v52 = vld [vmem:[#allocation4 + $0x3370] sm:$0xff] }
 0x5d7   :  { %14384 = vmatpush1.bf16.msra.mxu1 %v17171_v11  ;;  %v1854_v24 = vld [vmem:[#allocation4 + $0x3750] sm:$0xff]  ;;  %v17140_v12 = vcombine.high %v1726_v39, %v1730_v52  ;;  %v17139_v41 = vcombine.low %v1726_v39, %v1730_v52 }
 0x5d8   :  { %14385 = vmatprep.subr.bf16.mxu1 %v17164_v19  ;;  %v1858_v2 = vld [vmem:[#allocation4 + $0x3770] sm:$0xff] }
 0x5d9   :  { %14345 = vmatpush1.bf16.msra.mxu0 %v17035_v1  ;;  %v17268_v11 = vcombine.high %v1854_v24, %v1858_v2  ;;  %v1718_v23 = vld [vmem:[#allocation4 + $0x3310] sm:$0xff]  ;;  %v17267_v61 = vcombine.low %v1854_v24, %v1858_v2 }
 0x5da   :  { %14346 = vmatprep.subr.bf16.mxu0 %v17156_v35  ;;  %v1722_v19 = vld [vmem:[#allocation4 + $0x3330] sm:$0xff] }
 0x5db   :  { %14386 = vmatpush1.bf16.msra.mxu1 %v17163_v28  ;;  %v1846_v33 = vld [vmem:[#allocation4 + $0x3710] sm:$0xff]  ;;  %v17132_v1 = vcombine.high %v1718_v23, %v1722_v19  ;;  %v17131_v34 = vcombine.low %v1718_v23, %v1722_v19 }
 0x5dc   :  { %14387 = vmatprep.subr.bf16.mxu1 %v17284_v50  ;;  %v1850_v7 = vld [vmem:[#allocation4 + $0x3730] sm:$0xff] }
 0x5dd   :  { %14347 = vmatpush2.bf16.msra.mxu0 %v17155_v42  ;;  %v17260_v28 = vcombine.high %v1846_v33, %v1850_v7  ;;  %v1710_v35 = vld [vmem:[#allocation4 + $0x32d0] sm:$0xff]  ;;  %v17259_v63 = vcombine.low %v1846_v33, %v1850_v7 }
 0x5de   :  { %14348 = vmatprep.subr.bf16.mxu0 %v17148_v38  ;;  %v1714_v50 = vld [vmem:[#allocation4 + $0x32f0] sm:$0xff] }
 0x5df   :  { %14388 = vmatpush2.bf16.msra.mxu1 %v17283_v60  ;;  %v1838_v17 = vld [vmem:[#allocation4 + $0x36d0] sm:$0xff]  ;;  %v17124_v42 = vcombine.high %v1710_v35, %v1714_v50  ;;  %v17123_v24 = vcombine.low %v1710_v35, %v1714_v50 }
 0x5e0   :  { %14389 = vmatprep.subr.bf16.mxu1 %v17276_v46  ;;  %v1842_v3 = vld [vmem:[#allocation4 + $0x36f0] sm:$0xff] }
 0x5e1   :  { %14349 = vmatpush2.bf16.msra.mxu0 %v17147_v0  ;;  %v17252_v60 = vcombine.high %v1838_v17, %v1842_v3  ;;  %v1702_v38 = vld [vmem:[#allocation4 + $0x3290] sm:$0xff]  ;;  %v17251_v2 = vcombine.low %v1838_v17, %v1842_v3 }
 0x5e2   :  { %14350 = vmatprep.subr.bf16.mxu0 %v17140_v12  ;;  %v1706_v46 = vld [vmem:[#allocation4 + $0x32b0] sm:$0xff] }
 0x5e3   :  { %14390 = vmatpush2.bf16.msra.mxu1 %v17275_v30  ;;  %v1830_v39 = vld [vmem:[#allocation4 + $0x3690] sm:$0xff]  ;;  %v17116_v0 = vcombine.high %v1702_v38, %v1706_v46  ;;  %v17115_v33 = vcombine.low %v1702_v38, %v1706_v46 }
 0x5e4   :  { %14391 = vmatprep.subr.bf16.mxu1 %v17268_v11  ;;  %v1834_v52 = vld [vmem:[#allocation4 + $0x36b0] sm:$0xff] }
 0x5e5   :  { %14351 = vmatpush2.bf16.msra.mxu0 %v17139_v41  ;;  %v17244_v30 = vcombine.high %v1830_v39, %v1834_v52  ;;  %v1694_v12 = vld [vmem:[#allocation4 + $0x3250] sm:$0xff]  ;;  %v17243_v7 = vcombine.low %v1830_v39, %v1834_v52 }
 0x5e6   :  { %14352 = vmatprep.subr.bf16.mxu0 %v17132_v1  ;;  %v1698_v11 = vld [vmem:[#allocation4 + $0x3270] sm:$0xff] }
 0x5e7   :  { %14392 = vmatpush2.bf16.msra.mxu1 %v17267_v61  ;;  %v1822_v23 = vld [vmem:[#allocation4 + $0x3650] sm:$0xff]  ;;  %v17108_v41 = vcombine.high %v1694_v12, %v1698_v11  ;;  %v17107_v17 = vcombine.low %v1694_v12, %v1698_v11 }
 0x5e8   :  { %14393 = vmatprep.subr.bf16.mxu1 %v17260_v28  ;;  %v1826_v19 = vld [vmem:[#allocation4 + $0x3670] sm:$0xff] }
 0x5e9   :  { %14353 = vmatpush2.bf16.msra.mxu0 %v17131_v34  ;;  %v17236_v61 = vcombine.high %v1822_v23, %v1826_v19  ;;  %v1686_v1 = vld [vmem:[#allocation4 + $0x3210] sm:$0xff]  ;;  %v17235_v3 = vcombine.low %v1822_v23, %v1826_v19 }
 0x5ea   :  { %14354 = vmatprep.subr.bf16.mxu0 %v17124_v42  ;;  %v1690_v28 = vld [vmem:[#allocation4 + $0x3230] sm:$0xff] }
 0x5eb   :  { %14394 = vmatpush2.bf16.msra.mxu1 %v17259_v63  ;;  %v1814_v35 = vld [vmem:[#allocation4 + $0x3610] sm:$0xff]  ;;  %v17100_v34 = vcombine.high %v1686_v1, %v1690_v28  ;;  %v17099_v39 = vcombine.low %v1686_v1, %v1690_v28 }
 0x5ec   :  { %14395 = vmatprep.subr.bf16.mxu1 %v17252_v60  ;;  %v1818_v50 = vld [vmem:[#allocation4 + $0x3630] sm:$0xff] }
 0x5ed   :  { %14355 = vmatpush2.bf16.msra.mxu0 %v17123_v24  ;;  %v17228_v63 = vcombine.high %v1814_v35, %v1818_v50  ;;  %v1934_v42 = vld [vmem:[#allocation4 + $0x39d0] sm:$0xff]  ;;  %v17227_v52 = vcombine.low %v1814_v35, %v1818_v50 }
 0x5ee   :  { %14356 = vmatprep.subr.bf16.mxu0 %v17116_v0  ;;  %v1938_v60 = vld [vmem:[#allocation4 + $0x39f0] sm:$0xff] }
 0x5ef   :  { %14396 = vmatpush2.bf16.msra.mxu1 %v17251_v2  ;;  %v2062_v38 = vld [vmem:[#allocation4 + $0x3dd0] sm:$0xff]  ;;  %v17348_v24 = vcombine.high %v1934_v42, %v1938_v60  ;;  %v17347_v23 = vcombine.low %v1934_v42, %v1938_v60 }
 0x5f0   :  { %14397 = vmatprep.subr.bf16.mxu1 %v17244_v30  ;;  %v2066_v46 = vld [vmem:[#allocation4 + $0x3df0] sm:$0xff] }
 0x5f1   :  { %14357 = vmatpush2.bf16.msra.mxu0 %v17115_v33  ;;  %v17476_v2 = vcombine.high %v2062_v38, %v2066_v46  ;;  %v1926_v0 = vld [vmem:[#allocation4 + $0x3990] sm:$0xff]  ;;  %v17475_v19 = vcombine.low %v2062_v38, %v2066_v46 }
 0x5f2   :  { %14358 = vmatprep.subr.bf16.mxu0 %v17108_v41  ;;  %v1930_v30 = vld [vmem:[#allocation4 + $0x39b0] sm:$0xff] }
 0x5f3   :  { %14398 = vmatpush2.bf16.msra.mxu1 %v17243_v7  ;;  %v2054_v12 = vld [vmem:[#allocation4 + $0x3d90] sm:$0xff]  ;;  %v17340_v33 = vcombine.high %v1926_v0, %v1930_v30 }
 0x5f4   :  { %14399 = vmatprep.subr.bf16.mxu1 %v17236_v61  ;;  %v2058_v11 = vld [vmem:[#allocation4 + $0x3db0] sm:$0xff] }
 0x5f5   :  { %14359 = vmatpush2.bf16.msra.mxu0 %v17107_v17  ;;  %v17468_v7 = vcombine.high %v2054_v12, %v2058_v11  ;;  %v1918_v41 = vld [vmem:[#allocation4 + $0x3950] sm:$0xff] }
 0x5f6   :  { %14360 = vmatprep.subr.bf16.mxu0 %v17100_v34  ;;  %v1922_v61 = vld [vmem:[#allocation4 + $0x3970] sm:$0xff] }
 0x5f7   :  { %14400 = vmatpush2.bf16.msra.mxu1 %v17235_v3  ;;  %v2046_v28 = vld [vmem:[#allocation4 + $0x3d50] sm:$0xff]  ;;  %v17339_v3 = vcombine.low %v1926_v0, %v1930_v30  ;;  %v17332_v42 = vcombine.high %v1918_v41, %v1922_v61 }
 0x5f8   :  { %14401 = vmatprep.subr.bf16.mxu1 %v17228_v63  ;;  %v2050_v35 = vld [vmem:[#allocation4 + $0x3d70] sm:$0xff]  ;;  %v17467_v63 = vcombine.low %v2054_v12, %v2058_v11  ;;  %v17331_v12 = vcombine.low %v1918_v41, %v1922_v61 }
 0x5f9   :  { %14361 = vmatpush2.bf16.msra.mxu0 %v17099_v39  ;;  %v17460_v39 = vcombine.high %v2046_v28, %v2050_v35  ;;  %v1894_v61 = vld [vmem:[#allocation4 + $0x3890] sm:$0xff] }
 0x5fa   :  { %14412 = vmatprep.subr.bf16.mxu0 %v17348_v24  ;;  %v1914_v24 = vld [vmem:[#allocation4 + $0x3930] sm:$0xff] }
 0x5fb   :  { %14402 = vmatpush2.bf16.msra.mxu1 %v17227_v52  ;;  %v1910_v52 = vld [vmem:[#allocation4 + $0x3910] sm:$0xff] }
 0x5fc   :  { %14453 = vmatprep.subr.bf16.mxu1 %v17476_v2  ;;  %v14118_v1 = vpop.f32.mrf.mxu0  ;;  %14363 = vmatmul.mubr.bf16.vlgmr.msra.gmra.mxu0 %v17897_v53  ;;  %v2038_v2 = vld [vmem:[#allocation4 + $0x3d10] sm:$0xff] }
 0x5fd   :  { %v14119_v50 = vadd.f32 %v14118_v1, %v18079_v56  ;;  %14413 = vmatpush1.bf16.msra.mxu0 %v17347_v23  ;;  %14444 = vmatprep.mubr.bf16.mxu0 %v17909_v45  ;;  %v2042_v23 = vld [vmem:[#allocation4 + $0x3d30] sm:$0xff] }
 0x5fe   :  { %v14159_v17 = vpop.f32.mrf.mxu1  ;;  %14404 = vmatmul.mubr.bf16.vlgmr.msra.gmra.mxu1 %v17903_v54  ;;  %v14120_v34 = vpop.f32.mrf.mxu0  ;;  %14414 = vmatprep.subr.bf16.mxu0 %v17340_v33  ;;  %v1902_v1 = vld [vmem:[#allocation4 + $0x38d0] sm:$0xff] }
 0x5ff   :  { %14454 = vmatpush1.bf16.msra.mxu1 %v17475_v19  ;;  %v18089_v60 = vadd.f32 %v14159_v17, %v14119_v50  ;;  %v14121_v38 = vadd.f32 %v14120_v34, %v18084_v51  ;;  %14485 = vmatprep.mubr.bf16.mxu1 %v17914_v48  ;;  %v17459_v51 = vcombine.low %v2046_v28, %v2050_v35  ;;  %v1906_v50 = vld [vmem:[#allocation4 + $0x38f0] sm:$0xff] }
 0x600   :  { %v14161_v46 = vpop.f32.mrf.mxu1  ;;  %14455 = vmatprep.subr.bf16.mxu1 %v17468_v7  ;;  %v14122_v56 = vpop.f32.mrf.mxu0  ;;  %v17324_v19 = vcombine.high %v1910_v52, %v1914_v24  ;;  %v17452_v7 = vcombine.high %v2038_v2, %v2042_v23  ;;  %v2030_v17 = vld [vmem:[#allocation4 + $0x3cd0] sm:$0xff]  ;;  %v17315_v35 = vcombine.low %v1902_v1, %v1906_v50 }
 0x601   :  { %v18094_v0 = vadd.f32 %v14161_v46, %v14121_v38  ;;  %14415 = vmatpush1.bf16.msra.mxu0 %v17339_v3  ;;  %v2034_v34 = vld [vmem:[#allocation4 + $0x3cf0] sm:$0xff]  ;;  %v17323_v56 = vcombine.low %v1910_v52, %v1914_v24  ;;  %v17451_v38 = vcombine.low %v2038_v2, %v2042_v23  ;;  %v17316_v46 = vcombine.high %v1902_v1, %v1906_v50 }
 0x602   :  { %v14163_v30 = vpop.f32.mrf.mxu1  ;;  %v14123_v11 = vpop.f32.mrf.mxu0  ;;  %14416 = vmatprep.subr.bf16.mxu0 %v17332_v42  ;;  %v17444_v41 = vcombine.high %v2030_v17, %v2034_v34  ;;  %v1898_v3 = vld [vmem:[#allocation4 + $0x38b0] sm:$0xff]  ;;  %v17443_v42 = vcombine.low %v2030_v17, %v2034_v34 }
 0x603   :  { %14456 = vmatpush1.bf16.msra.mxu1 %v17467_v63  ;;  %v2022_v63 = vld [vmem:[#allocation4 + $0x3c90] sm:$0xff]  ;;  %v17307_v2 = vcombine.low %v1894_v61, %v1898_v3 }
 0x604   :  { %v14164_v33 = vpop.f32.mrf.mxu1  ;;  %14457 = vmatprep.subr.bf16.mxu1 %v17460_v39  ;;  %v2026_v28 = vld [vmem:[#allocation4 + $0x3cb0] sm:$0xff]  ;;  %v17308_v39 = vcombine.high %v1894_v61, %v1898_v3 }
 0x605   :  { %14417 = vmatpush1.bf16.msra.mxu0 %v17331_v12  ;;  %v17436_v30 = vcombine.high %v2022_v63, %v2026_v28  ;;  %v1886_v12 = vld [vmem:[#allocation4 + $0x3850] sm:$0xff]  ;;  %v17435_v23 = vcombine.low %v2022_v63, %v2026_v28 }
 0x606   :  { %14418 = vmatprep.subr.bf16.mxu0 %v17324_v19  ;;  %v1890_v52 = vld [vmem:[#allocation4 + $0x3870] sm:$0xff] }
 0x607   :  { %14458 = vmatpush1.bf16.msra.mxu1 %v17459_v51  ;;  %v2014_v24 = vld [vmem:[#allocation4 + $0x3c50] sm:$0xff]  ;;  %v17300_v51 = vcombine.high %v1886_v12, %v1890_v52  ;;  %v17299_v17 = vcombine.low %v1886_v12, %v1890_v52 }
 0x608   :  { %14459 = vmatprep.subr.bf16.mxu1 %v17452_v7  ;;  %v2018_v11 = vld [vmem:[#allocation4 + $0x3c70] sm:$0xff] }
 0x609   :  { %14419 = vmatpush1.bf16.msra.mxu0 %v17323_v56  ;;  %v17428_v19 = vcombine.high %v2014_v24, %v2018_v11  ;;  %v1878_v33 = vld [vmem:[#allocation4 + $0x3810] sm:$0xff]  ;;  %v17427_v34 = vcombine.low %v2014_v24, %v2018_v11 }
 0x60a   :  { %14420 = vmatprep.subr.bf16.mxu0 %v17316_v46  ;;  %v1882_v7 = vld [vmem:[#allocation4 + $0x3830] sm:$0xff] }
 0x60b   :  { %14460 = vmatpush1.bf16.msra.mxu1 %v17451_v38  ;;  %v2006_v1 = vld [vmem:[#allocation4 + $0x3c10] sm:$0xff]  ;;  %v17292_v56 = vcombine.high %v1878_v33, %v1882_v7  ;;  %v17291_v63 = vcombine.low %v1878_v33, %v1882_v7 }
 0x60c   :  { %14461 = vmatprep.subr.bf16.mxu1 %v17444_v41  ;;  %v2010_v50 = vld [vmem:[#allocation4 + $0x3c30] sm:$0xff] }
 0x60d   :  { %14421 = vmatpush1.bf16.msra.mxu0 %v17315_v35  ;;  %v17420_v38 = vcombine.high %v2006_v1, %v2010_v50  ;;  %v1998_v46 = vld [vmem:[#allocation4 + $0x3bd0] sm:$0xff]  ;;  %v17419_v28 = vcombine.low %v2006_v1, %v2010_v50 }
 0x60e   :  { %14422 = vmatprep.subr.bf16.mxu0 %v17308_v39  ;;  %v2002_v41 = vld [vmem:[#allocation4 + $0x3bf0] sm:$0xff] }
 0x60f   :  { %14462 = vmatpush1.bf16.msra.mxu1 %v17443_v42  ;;  %v2126_v61 = vld [vmem:[#allocation4 + $0x3fd0] sm:$0xff]  ;;  %v17412_v35 = vcombine.high %v1998_v46, %v2002_v41  ;;  %v17411_v24 = vcombine.low %v1998_v46, %v2002_v41 }
 0x610   :  { %14463 = vmatprep.subr.bf16.mxu1 %v17436_v30  ;;  %v2130_v3 = vld [vmem:[#allocation4 + $0x3ff0] sm:$0xff] }
 0x611   :  { %14423 = vmatpush1.bf16.msra.mxu0 %v17307_v2  ;;  %v17540_v42 = vcombine.high %v2126_v61, %v2130_v3  ;;  %v1990_v39 = vld [vmem:[#allocation4 + $0x3b90] sm:$0xff]  ;;  %v17539_v11 = vcombine.low %v2126_v61, %v2130_v3 }
 0x612   :  { %14424 = vmatprep.subr.bf16.mxu0 %v17300_v51  ;;  %v1994_v30 = vld [vmem:[#allocation4 + $0x3bb0] sm:$0xff] }
 0x613   :  { %14464 = vmatpush1.bf16.msra.mxu1 %v17435_v23  ;;  %v2118_v12 = vld [vmem:[#allocation4 + $0x3f90] sm:$0xff]  ;;  %v17404_v2 = vcombine.high %v1990_v39, %v1994_v30  ;;  %v17403_v1 = vcombine.low %v1990_v39, %v1994_v30 }
 0x614   :  { %14465 = vmatprep.subr.bf16.mxu1 %v17428_v19  ;;  %v2122_v52 = vld [vmem:[#allocation4 + $0x3fb0] sm:$0xff] }
 0x615   :  { %14425 = vmatpush1.bf16.msra.mxu0 %v17299_v17  ;;  %v17532_v23 = vcombine.high %v2118_v12, %v2122_v52  ;;  %v1982_v51 = vld [vmem:[#allocation4 + $0x3b50] sm:$0xff]  ;;  %v17531_v50 = vcombine.low %v2118_v12, %v2122_v52 }
 0x616   :  { %14426 = vmatprep.subr.bf16.mxu0 %v17292_v56  ;;  %v1986_v19 = vld [vmem:[#allocation4 + $0x3b70] sm:$0xff] }
 0x617   :  { %14466 = vmatpush1.bf16.msra.mxu1 %v17427_v34  ;;  %v2110_v33 = vld [vmem:[#allocation4 + $0x3f50] sm:$0xff]  ;;  %v17396_v17 = vcombine.high %v1982_v51, %v1986_v19  ;;  %v17395_v61 = vcombine.low %v1982_v51, %v1986_v19 }
 0x618   :  { %14467 = vmatprep.subr.bf16.mxu1 %v17420_v38  ;;  %v2114_v7 = vld [vmem:[#allocation4 + $0x3f70] sm:$0xff] }
 0x619   :  { %14427 = vmatpush1.bf16.msra.mxu0 %v17291_v63  ;;  %v17524_v34 = vcombine.high %v2110_v33, %v2114_v7  ;;  %v1974_v56 = vld [vmem:[#allocation4 + $0x3b10] sm:$0xff]  ;;  %v17523_v3 = vcombine.low %v2110_v33, %v2114_v7 }
 0x61a   :  { %14428 = vmatprep.subr.bf16.mxu0 %v17412_v35  ;;  %v1978_v38 = vld [vmem:[#allocation4 + $0x3b30] sm:$0xff] }
 0x61b   :  { %14468 = vmatpush1.bf16.msra.mxu1 %v17419_v28  ;;  %v2102_v46 = vld [vmem:[#allocation4 + $0x3f10] sm:$0xff]  ;;  %v17388_v63 = vcombine.high %v1974_v56, %v1978_v38  ;;  %v17387_v12 = vcombine.low %v1974_v56, %v1978_v38 }
 0x61c   :  { %14469 = vmatprep.subr.bf16.mxu1 %v17540_v42  ;;  %v2106_v41 = vld [vmem:[#allocation4 + $0x3f30] sm:$0xff] }
 0x61d   :  { %14429 = vmatpush2.bf16.msra.mxu0 %v17411_v24  ;;  %v17516_v28 = vcombine.high %v2102_v46, %v2106_v41  ;;  %v1966_v35 = vld [vmem:[#allocation4 + $0x3ad0] sm:$0xff]  ;;  %v17515_v52 = vcombine.low %v2102_v46, %v2106_v41 }
 0x61e   :  { %14430 = vmatprep.subr.bf16.mxu0 %v17404_v2  ;;  %v1970_v42 = vld [vmem:[#allocation4 + $0x3af0] sm:$0xff] }
 0x61f   :  { %14470 = vmatpush2.bf16.msra.mxu1 %v17539_v11  ;;  %v2094_v39 = vld [vmem:[#allocation4 + $0x3ed0] sm:$0xff]  ;;  %v17380_v24 = vcombine.high %v1966_v35, %v1970_v42  ;;  %v17379_v33 = vcombine.low %v1966_v35, %v1970_v42 }
 0x620   :  { %14471 = vmatprep.subr.bf16.mxu1 %v17532_v23  ;;  %v2098_v30 = vld [vmem:[#allocation4 + $0x3ef0] sm:$0xff] }
 0x621   :  { %14431 = vmatpush2.bf16.msra.mxu0 %v17403_v1  ;;  %v17508_v11 = vcombine.high %v2094_v39, %v2098_v30  ;;  %v1958_v2 = vld [vmem:[#allocation4 + $0x3a90] sm:$0xff]  ;;  %v17507_v7 = vcombine.low %v2094_v39, %v2098_v30 }
 0x622   :  { %14432 = vmatprep.subr.bf16.mxu0 %v17396_v17  ;;  %v1962_v23 = vld [vmem:[#allocation4 + $0x3ab0] sm:$0xff] }
 0x623   :  { %14472 = vmatpush2.bf16.msra.mxu1 %v17531_v50  ;;  %v2086_v51 = vld [vmem:[#allocation4 + $0x3e90] sm:$0xff]  ;;  %v17372_v1 = vcombine.high %v1958_v2, %v1962_v23  ;;  %v17371_v46 = vcombine.low %v1958_v2, %v1962_v23  ;;  %v271_v2 = vld [vmem:[#allocation4 + $0x5d8] sm:$0xff] }
 0x624   :  { %14473 = vmatprep.subr.bf16.mxu1 %v17524_v34  ;;  %v2090_v19 = vld [vmem:[#allocation4 + $0x3eb0] sm:$0xff]  ;;  %v275_v23 = vld [vmem:[#allocation4 + $0x5f8] sm:$0xff] }
 0x625   :  { %14433 = vmatpush2.bf16.msra.mxu0 %v17395_v61  ;;  %v17500_v50 = vcombine.high %v2086_v51, %v2090_v19  ;;  %v1950_v17 = vld [vmem:[#allocation4 + $0x3a50] sm:$0xff]  ;;  %v17499_v41 = vcombine.low %v2086_v51, %v2090_v19 }
 0x626   :  { %14434 = vmatprep.subr.bf16.mxu0 %v17388_v63  ;;  %v1954_v34 = vld [vmem:[#allocation4 + $0x3a70] sm:$0xff] }
 0x627   :  { %14474 = vmatpush2.bf16.msra.mxu1 %v17523_v3  ;;  %v2078_v56 = vld [vmem:[#allocation4 + $0x3e50] sm:$0xff]  ;;  %v17364_v61 = vcombine.high %v1950_v17, %v1954_v34  ;;  %v17363_v39 = vcombine.low %v1950_v17, %v1954_v34  ;;  %v263_v17 = vld [vmem:[#allocation4 + $0x598] sm:$0xff] }
 0x628   :  { %14475 = vmatprep.subr.bf16.mxu1 %v17516_v28  ;;  %v2082_v38 = vld [vmem:[#allocation4 + $0x3e70] sm:$0xff]  ;;  %v267_v34 = vld [vmem:[#allocation4 + $0x5b8] sm:$0xff] }
 0x629   :  { %14435 = vmatpush2.bf16.msra.mxu0 %v17387_v12  ;;  %v17492_v3 = vcombine.high %v2078_v56, %v2082_v38  ;;  %v1942_v63 = vld [vmem:[#allocation4 + $0x3a10] sm:$0xff]  ;;  %v17491_v30 = vcombine.low %v2078_v56, %v2082_v38  ;;  %v15685_v38 = vcombine.low %v271_v2, %v275_v23 }
 0x62a   :  { %14436 = vmatprep.subr.bf16.mxu0 %v17380_v24  ;;  %v1946_v28 = vld [vmem:[#allocation4 + $0x3a30] sm:$0xff]  ;;  %v143_v24 = vld [vmem:[#allocation4 + $0x1d8] sm:$0xff] }
 0x62b   :  { %14476 = vmatpush2.bf16.msra.mxu1 %v17515_v52  ;;  %v2070_v35 = vld [vmem:[#allocation4 + $0x3e10] sm:$0xff]  ;;  %v17356_v12 = vcombine.high %v1942_v63, %v1946_v28  ;;  %v17355_v51 = vcombine.low %v1942_v63, %v1946_v28  ;;  %v255_v28 = vld [vmem:[#allocation4 + $0x558] sm:$0xff] }
 0x62c   :  { %14477 = vmatprep.subr.bf16.mxu1 %v17508_v11  ;;  %v2074_v42 = vld [vmem:[#allocation4 + $0x3e30] sm:$0xff]  ;;  %v147_v11 = vld [vmem:[#allocation4 + $0x1f8] sm:$0xff] }
 0x62d   :  { %14437 = vmatpush2.bf16.msra.mxu0 %v17379_v33  ;;  %v17484_v52 = vcombine.high %v2070_v35, %v2074_v42  ;;  %v17483_v19 = vcombine.low %v2070_v35, %v2074_v42  ;;  %v15558_v33 = vcombine.high %v143_v24, %v147_v11  ;;  %v15557_v56 = vcombine.low %v143_v24, %v147_v11  ;;  %v259_v35 = vld [vmem:[#allocation4 + $0x578] sm:$0xff] }
 0x62e   :  { %14438 = vmatprep.subr.bf16.mxu0 %v17372_v1  ;;  %v135_v1 = vld [vmem:[#allocation4 + $0x198] sm:$0xff] }
 0x62f   :  { %14478 = vmatpush2.bf16.msra.mxu1 %v17507_v7  ;;  %v15686_v7 = vcombine.high %v271_v2, %v275_v23 }
 0x630   :  { %14479 = vmatprep.subr.bf16.mxu1 %v17500_v50  ;;  %v139_v50 = vld [vmem:[#allocation4 + $0x1b8] sm:$0xff] }
 0x631   :  { %14439 = vmatpush2.bf16.msra.mxu0 %v17371_v46  ;;  %v15550_v46 = vcombine.high %v135_v1, %v139_v50 }
 0x632   :  { %14440 = vmatprep.subr.bf16.mxu0 %v17364_v61  ;;  %v127_v61 = vld [vmem:[#allocation4 + $0x158] sm:$0xff] }
 0x633   :  { %14480 = vmatpush2.bf16.msra.mxu1 %v17499_v41  ;;  %v15678_v41 = vcombine.high %v263_v17, %v267_v34 }
 0x634   :  { %14481 = vmatprep.subr.bf16.mxu1 %v17492_v3  ;;  %v131_v3 = vld [vmem:[#allocation4 + $0x178] sm:$0xff] }
 0x635   :  { %14441 = vmatpush2.bf16.msra.mxu0 %v17363_v39  ;;  %v15542_v24 = vcombine.high %v127_v61, %v131_v3 }
 0x636   :  { %14442 = vmatprep.subr.bf16.mxu0 %v17356_v12 }
 0x637   :  { %14482 = vmatpush2.bf16.msra.mxu1 %v17491_v30  ;;  %v15549_v30 = vcombine.low %v135_v1, %v139_v50 }
 0x638   :  { %14483 = vmatprep.subr.bf16.mxu1 %v17484_v52  ;;  %v15677_v52 = vcombine.low %v263_v17, %v267_v34  ;;  %v15541_v17 = vcombine.low %v127_v61, %v131_v3  ;;  %v103_v3 = vld [vmem:[#allocation4 + $0x98] sm:$0xff] }
 0x639   :  { %14443 = vmatpush2.bf16.msra.mxu0 %v17355_v51  ;;  %v15670_v51 = vcombine.high %v255_v28, %v259_v35 }
 0x63a   :  { %14494 = vmatprep.subr.bf16.mxu0 %v15558_v33  ;;  %v123_v33 = vld [vmem:[#allocation4 + $0x138] sm:$0xff] }
 0x63b   :  { %14484 = vmatpush2.bf16.msra.mxu1 %v17483_v19  ;;  %v119_v19 = vld [vmem:[#allocation4 + $0x118] sm:$0xff] }
 0x63c   :  { %14535 = vmatprep.subr.bf16.mxu1 %v15686_v7  ;;  %v14200_v63 = vpop.f32.mrf.mxu0  ;;  %14445 = vmatmul.mubr.bf16.vlgmr.msra.gmra.mxu0 %v17927_v44  ;;  %v247_v7 = vld [vmem:[#allocation4 + $0x518] sm:$0xff] }
 0x63d   :  { %v14201_v42 = vadd.f32 %v14200_v63, %v18089_v60  ;;  %14495 = vmatpush1.bf16.msra.mxu0 %v15557_v56  ;;  %14526 = vmatprep.mubr.bf16.mxu0 %v17723_v58  ;;  %v251_v56 = vld [vmem:[#allocation4 + $0x538] sm:$0xff] }
 0x63e   :  { %v14241_v39 = vpop.f32.mrf.mxu1  ;;  %14486 = vmatmul.mubr.bf16.vlgmr.msra.gmra.mxu1 %v17931_v14  ;;  %v14202_v12 = vpop.f32.mrf.mxu0  ;;  %14496 = vmatprep.subr.bf16.mxu0 %v15550_v46  ;;  %v111_v63 = vld [vmem:[#allocation4 + $0xd8] sm:$0xff] }
 0x63f   :  { %14536 = vmatpush1.bf16.msra.mxu1 %v15685_v38  ;;  %v18099_v11 = vadd.f32 %v14241_v39, %v14201_v42  ;;  %v14203_v2 = vadd.f32 %v14202_v12, %v18094_v0  ;;  %14567 = vmatprep.mubr.bf16.mxu1 %v17727_v59  ;;  %v15669_v0 = vcombine.low %v255_v28, %v259_v35  ;;  %v115_v58 = vld [vmem:[#allocation4 + $0xf8] sm:$0xff] }
 0x640   :  { %v14243_v23 = vpop.f32.mrf.mxu1  ;;  %14537 = vmatprep.subr.bf16.mxu1 %v15678_v41  ;;  %v14204_v60 = vpop.f32.mrf.mxu0  ;;  %v15534_v38 = vcombine.high %v119_v19, %v123_v33  ;;  %v15662_v41 = vcombine.high %v247_v7, %v251_v56  ;;  %v239_v42 = vld [vmem:[#allocation4 + $0x4d8] sm:$0xff]  ;;  %v15533_v12 = vcombine.low %v119_v19, %v123_v33  ;;  %v15661_v59 = vcombine.low %v247_v7, %v251_v56 }
 0x641   :  { %v18104_v1 = vadd.f32 %v14243_v23, %v14203_v2  ;;  %14497 = vmatpush1.bf16.msra.mxu0 %v15549_v30  ;;  %v243_v39 = vld [vmem:[#allocation4 + $0x4f8] sm:$0xff]  ;;  %v15526_v2 = vcombine.high %v111_v63, %v115_v58  ;;  %v15525_v35 = vcombine.low %v111_v63, %v115_v58 }
 0x642   :  { %v14245_v50 = vpop.f32.mrf.mxu1  ;;  %v14205_v34 = vpop.f32.mrf.mxu0  ;;  %14498 = vmatprep.subr.bf16.mxu0 %v15542_v24  ;;  %v15654_v61 = vcombine.high %v239_v42, %v243_v39  ;;  %v107_v30 = vld [vmem:[#allocation4 + $0xb8] sm:$0xff]  ;;  %v15653_v24 = vcombine.low %v239_v42, %v243_v39 }
 0x643   :  { %14538 = vmatpush1.bf16.msra.mxu1 %v15677_v52  ;;  %v231_v52 = vld [vmem:[#allocation4 + $0x498] sm:$0xff]  ;;  %v15518_v23 = vcombine.high %v103_v3, %v107_v30  ;;  %v15517_v7 = vcombine.low %v103_v3, %v107_v30 }
 0x644   :  { %v14246_v46 = vpop.f32.mrf.mxu1  ;;  %14539 = vmatprep.subr.bf16.mxu1 %v15670_v51  ;;  %v235_v28 = vld [vmem:[#allocation4 + $0x4b8] sm:$0xff] }
 0x645   :  { %14499 = vmatpush1.bf16.msra.mxu0 %v15541_v17  ;;  %v15646_v51 = vcombine.high %v231_v52, %v235_v28  ;;  %v95_v60 = vld [vmem:[#allocation4 + $0x58] sm:$0xff]  ;;  %v15645_v56 = vcombine.low %v231_v52, %v235_v28 }
 0x646   :  { %14500 = vmatprep.subr.bf16.mxu0 %v15534_v38  ;;  %v99_v19 = vld [vmem:[#allocation4 + $0x78] sm:$0xff] }
 0x647   :  { %14540 = vmatpush1.bf16.msra.mxu1 %v15669_v0  ;;  %v223_v33 = vld [vmem:[#allocation4 + $0x458] sm:$0xff]  ;;  %v15510_v17 = vcombine.high %v95_v60, %v99_v19  ;;  %v15509_v63 = vcombine.low %v95_v60, %v99_v19 }
 0x648   :  { %14541 = vmatprep.subr.bf16.mxu1 %v15662_v41  ;;  %v227_v50 = vld [vmem:[#allocation4 + $0x478] sm:$0xff] }
 0x649   :  { %14501 = vmatpush1.bf16.msra.mxu0 %v15533_v12  ;;  %v15638_v34 = vcombine.high %v223_v33, %v227_v50  ;;  %v87_v0 = vld [vmem:[#allocation4 + $0x18] sm:$0xff]  ;;  %v15637_v58 = vcombine.low %v223_v33, %v227_v50 }
 0x64a   :  { %14502 = vmatprep.subr.bf16.mxu0 %v15526_v2  ;;  %v91_v38 = vld [vmem:[#allocation4 + $0x38] sm:$0xff] }
 0x64b   :  { %14542 = vmatpush1.bf16.msra.mxu1 %v15661_v59  ;;  %v215_v46 = vld [vmem:[#allocation4 + $0x418] sm:$0xff]  ;;  %v15502_v42 = vcombine.high %v87_v0, %v91_v38  ;;  %v15501_v3 = vcombine.low %v87_v0, %v91_v38 }
 0x64c   :  { %14543 = vmatprep.subr.bf16.mxu1 %v15654_v61  ;;  %v219_v41 = vld [vmem:[#allocation4 + $0x438] sm:$0xff] }
 0x64d   :  { %14503 = vmatpush1.bf16.msra.mxu0 %v15525_v35  ;;  %v15630_v39 = vcombine.high %v215_v46, %v219_v41  ;;  %v207_v12 = vld [vmem:[#allocation4 + $0x3d8] sm:$0xff]  ;;  %v15629_v30 = vcombine.low %v215_v46, %v219_v41 }
 0x64e   :  { %14504 = vmatprep.subr.bf16.mxu0 %v15518_v23  ;;  %v211_v59 = vld [vmem:[#allocation4 + $0x3f8] sm:$0xff] }
 0x64f   :  { %14544 = vmatpush1.bf16.msra.mxu1 %v15653_v24  ;;  %v335_v2 = vld [vmem:[#allocation4 + $0x7d8] sm:$0xff]  ;;  %v15622_v52 = vcombine.high %v207_v12, %v211_v59  ;;  %v15621_v60 = vcombine.low %v207_v12, %v211_v59 }
 0x650   :  { %14545 = vmatprep.subr.bf16.mxu1 %v15646_v51  ;;  %v339_v61 = vld [vmem:[#allocation4 + $0x7f8] sm:$0xff] }
 0x651   :  { %14505 = vmatpush1.bf16.msra.mxu0 %v15517_v7  ;;  %v15750_v28 = vcombine.high %v335_v2, %v339_v61  ;;  %v199_v35 = vld [vmem:[#allocation4 + $0x398] sm:$0xff]  ;;  %v15749_v19 = vcombine.low %v335_v2, %v339_v61 }
 0x652   :  { %14506 = vmatprep.subr.bf16.mxu0 %v15510_v17  ;;  %v203_v24 = vld [vmem:[#allocation4 + $0x3b8] sm:$0xff] }
 0x653   :  { %14546 = vmatpush1.bf16.msra.mxu1 %v15645_v56  ;;  %v327_v23 = vld [vmem:[#allocation4 + $0x798] sm:$0xff]  ;;  %v15614_v33 = vcombine.high %v199_v35, %v203_v24  ;;  %v15613_v0 = vcombine.low %v199_v35, %v203_v24 }
 0x654   :  { %14547 = vmatprep.subr.bf16.mxu1 %v15638_v34  ;;  %v331_v51 = vld [vmem:[#allocation4 + $0x7b8] sm:$0xff] }
 0x655   :  { %14507 = vmatpush1.bf16.msra.mxu0 %v15509_v63  ;;  %v15742_v50 = vcombine.high %v327_v23, %v331_v51  ;;  %v191_v7 = vld [vmem:[#allocation4 + $0x358] sm:$0xff]  ;;  %v15741_v38 = vcombine.low %v327_v23, %v331_v51 }
 0x656   :  { %14508 = vmatprep.subr.bf16.mxu0 %v15502_v42  ;;  %v195_v56 = vld [vmem:[#allocation4 + $0x378] sm:$0xff] }
 0x657   :  { %14548 = vmatpush1.bf16.msra.mxu1 %v15637_v58  ;;  %v319_v17 = vld [vmem:[#allocation4 + $0x758] sm:$0xff]  ;;  %v15606_v46 = vcombine.high %v191_v7, %v195_v56  ;;  %v15605_v12 = vcombine.low %v191_v7, %v195_v56 }
 0x658   :  { %14549 = vmatprep.subr.bf16.mxu1 %v15630_v39  ;;  %v323_v34 = vld [vmem:[#allocation4 + $0x778] sm:$0xff] }
 0x659   :  { %14509 = vmatpush1.bf16.msra.mxu0 %v15501_v3  ;;  %v15734_v41 = vcombine.high %v319_v17, %v323_v34  ;;  %v183_v63 = vld [vmem:[#allocation4 + $0x318] sm:$0xff]  ;;  %v15733_v59 = vcombine.low %v319_v17, %v323_v34 }
 0x65a   :  { %14510 = vmatprep.subr.bf16.mxu0 %v15622_v52  ;;  %v187_v58 = vld [vmem:[#allocation4 + $0x338] sm:$0xff] }
 0x65b   :  { %14550 = vmatpush1.bf16.msra.mxu1 %v15629_v30  ;;  %v311_v42 = vld [vmem:[#allocation4 + $0x718] sm:$0xff]  ;;  %v15598_v2 = vcombine.high %v183_v63, %v187_v58  ;;  %v15597_v35 = vcombine.low %v183_v63, %v187_v58 }
 0x65c   :  { %14551 = vmatprep.subr.bf16.mxu1 %v15750_v28  ;;  %v315_v39 = vld [vmem:[#allocation4 + $0x738] sm:$0xff] }
 0x65d   :  { %14511 = vmatpush2.bf16.msra.mxu0 %v15621_v60  ;;  %v15726_v61 = vcombine.high %v311_v42, %v315_v39  ;;  %v175_v3 = vld [vmem:[#allocation4 + $0x2d8] sm:$0xff]  ;;  %v15725_v24 = vcombine.low %v311_v42, %v315_v39 }
 0x65e   :  { %14512 = vmatprep.subr.bf16.mxu0 %v15614_v33  ;;  %v179_v30 = vld [vmem:[#allocation4 + $0x2f8] sm:$0xff] }
 0x65f   :  { %14552 = vmatpush2.bf16.msra.mxu1 %v15749_v19  ;;  %v303_v52 = vld [vmem:[#allocation4 + $0x6d8] sm:$0xff]  ;;  %v15590_v23 = vcombine.high %v175_v3, %v179_v30  ;;  %v15589_v7 = vcombine.low %v175_v3, %v179_v30 }
 0x660   :  { %14553 = vmatprep.subr.bf16.mxu1 %v15742_v50  ;;  %v307_v28 = vld [vmem:[#allocation4 + $0x6f8] sm:$0xff] }
 0x661   :  { %14513 = vmatpush2.bf16.msra.mxu0 %v15613_v0  ;;  %v15718_v51 = vcombine.high %v303_v52, %v307_v28  ;;  %v167_v60 = vld [vmem:[#allocation4 + $0x298] sm:$0xff]  ;;  %v15717_v56 = vcombine.low %v303_v52, %v307_v28 }
 0x662   :  { %14514 = vmatprep.subr.bf16.mxu0 %v15606_v46  ;;  %v171_v19 = vld [vmem:[#allocation4 + $0x2b8] sm:$0xff] }
 0x663   :  { %14554 = vmatpush2.bf16.msra.mxu1 %v15741_v38  ;;  %v295_v33 = vld [vmem:[#allocation4 + $0x698] sm:$0xff]  ;;  %v15582_v17 = vcombine.high %v167_v60, %v171_v19  ;;  %v15581_v63 = vcombine.low %v167_v60, %v171_v19 }
 0x664   :  { %14555 = vmatprep.subr.bf16.mxu1 %v15734_v41  ;;  %v299_v50 = vld [vmem:[#allocation4 + $0x6b8] sm:$0xff] }
 0x665   :  { %14515 = vmatpush2.bf16.msra.mxu0 %v15605_v12  ;;  %v15710_v34 = vcombine.high %v295_v33, %v299_v50  ;;  %v159_v0 = vld [vmem:[#allocation4 + $0x258] sm:$0xff]  ;;  %v15709_v58 = vcombine.low %v295_v33, %v299_v50 }
 0x666   :  { %14516 = vmatprep.subr.bf16.mxu0 %v15598_v2  ;;  %v163_v38 = vld [vmem:[#allocation4 + $0x278] sm:$0xff] }
 0x667   :  { %14556 = vmatpush2.bf16.msra.mxu1 %v15733_v59  ;;  %v287_v46 = vld [vmem:[#allocation4 + $0x658] sm:$0xff]  ;;  %v15574_v42 = vcombine.high %v159_v0, %v163_v38  ;;  %v15573_v3 = vcombine.low %v159_v0, %v163_v38 }
 0x668   :  { %14557 = vmatprep.subr.bf16.mxu1 %v15726_v61  ;;  %v291_v41 = vld [vmem:[#allocation4 + $0x678] sm:$0xff] }
 0x669   :  { %14517 = vmatpush2.bf16.msra.mxu0 %v15597_v35  ;;  %v15702_v39 = vcombine.high %v287_v46, %v291_v41  ;;  %v151_v12 = vld [vmem:[#allocation4 + $0x218] sm:$0xff]  ;;  %v15701_v30 = vcombine.low %v287_v46, %v291_v41 }
 0x66a   :  { %14518 = vmatprep.subr.bf16.mxu0 %v15590_v23  ;;  %v155_v59 = vld [vmem:[#allocation4 + $0x238] sm:$0xff] }
 0x66b   :  { %14558 = vmatpush2.bf16.msra.mxu1 %v15725_v24  ;;  %v279_v2 = vld [vmem:[#allocation4 + $0x618] sm:$0xff]  ;;  %v15566_v52 = vcombine.high %v151_v12, %v155_v59  ;;  %v15565_v60 = vcombine.low %v151_v12, %v155_v59 }
 0x66c   :  { %14559 = vmatprep.subr.bf16.mxu1 %v15718_v51  ;;  %v283_v61 = vld [vmem:[#allocation4 + $0x638] sm:$0xff] }
 0x66d   :  { %14519 = vmatpush2.bf16.msra.mxu0 %v15589_v7  ;;  %v15694_v28 = vcombine.high %v279_v2, %v283_v61  ;;  %v399_v35 = vld [vmem:[#allocation4 + $0x9d8] sm:$0xff]  ;;  %v15693_v19 = vcombine.low %v279_v2, %v283_v61 }
 0x66e   :  { %14520 = vmatprep.subr.bf16.mxu0 %v15582_v17  ;;  %v403_v24 = vld [vmem:[#allocation4 + $0x9f8] sm:$0xff] }
 0x66f   :  { %14560 = vmatpush2.bf16.msra.mxu1 %v15717_v56  ;;  %v527_v23 = vld [vmem:[#allocation4 + $0xdd8] sm:$0xff]  ;;  %v15814_v33 = vcombine.high %v399_v35, %v403_v24  ;;  %v15813_v0 = vcombine.low %v399_v35, %v403_v24 }
 0x670   :  { %14561 = vmatprep.subr.bf16.mxu1 %v15710_v34  ;;  %v531_v51 = vld [vmem:[#allocation4 + $0xdf8] sm:$0xff] }
 0x671   :  { %14521 = vmatpush2.bf16.msra.mxu0 %v15581_v63  ;;  %v15942_v50 = vcombine.high %v527_v23, %v531_v51  ;;  %v391_v7 = vld [vmem:[#allocation4 + $0x998] sm:$0xff]  ;;  %v15941_v38 = vcombine.low %v527_v23, %v531_v51 }
 0x672   :  { %14522 = vmatprep.subr.bf16.mxu0 %v15574_v42  ;;  %v395_v56 = vld [vmem:[#allocation4 + $0x9b8] sm:$0xff] }
 0x673   :  { %14562 = vmatpush2.bf16.msra.mxu1 %v15709_v58  ;;  %v519_v17 = vld [vmem:[#allocation4 + $0xd98] sm:$0xff]  ;;  %v15806_v46 = vcombine.high %v391_v7, %v395_v56  ;;  %v15805_v61 = vcombine.low %v391_v7, %v395_v56 }
 0x674   :  { %14563 = vmatprep.subr.bf16.mxu1 %v15702_v39  ;;  %v523_v34 = vld [vmem:[#allocation4 + $0xdb8] sm:$0xff] }
 0x675   :  { %14523 = vmatpush2.bf16.msra.mxu0 %v15573_v3  ;;  %v15934_v41 = vcombine.high %v519_v17, %v523_v34  ;;  %v383_v63 = vld [vmem:[#allocation4 + $0x958] sm:$0xff] }
 0x676   :  { %14524 = vmatprep.subr.bf16.mxu0 %v15566_v52  ;;  %v387_v58 = vld [vmem:[#allocation4 + $0x978] sm:$0xff] }
 0x677   :  { %14564 = vmatpush2.bf16.msra.mxu1 %v15701_v30  ;;  %v511_v39 = vld [vmem:[#allocation4 + $0xd58] sm:$0xff]  ;;  %v15933_v30 = vcombine.low %v519_v17, %v523_v34  ;;  %v15798_v52 = vcombine.high %v383_v63, %v387_v58 }
 0x678   :  { %14565 = vmatprep.subr.bf16.mxu1 %v15694_v28  ;;  %v515_v12 = vld [vmem:[#allocation4 + $0xd78] sm:$0xff] }
 0x679   :  { %14525 = vmatpush2.bf16.msra.mxu0 %v15565_v60  ;;  %v375_v23 = vld [vmem:[#allocation4 + $0x918] sm:$0xff] }
 0x67a   :  { %14576 = vmatprep.subr.bf16.mxu0 %v15814_v33  ;;  %v379_v51 = vld [vmem:[#allocation4 + $0x938] sm:$0xff] }
 0x67b   :  { %14566 = vmatpush2.bf16.msra.mxu1 %v15693_v19  ;;  %v507_v60 = vld [vmem:[#allocation4 + $0xd38] sm:$0xff]  ;;  %v15790_v56 = vcombine.high %v375_v23, %v379_v51 }
 0x67c   :  { %14617 = vmatprep.subr.bf16.mxu1 %v15942_v50  ;;  %v14282_v42 = vpop.f32.mrf.mxu0  ;;  %14527 = vmatmul.mubr.bf16.vlgmr.msra.gmra.mxu0 %v17733_v16  ;;  %v15926_v16 = vcombine.high %v511_v39, %v515_v12  ;;  %v15797_v50 = vcombine.low %v383_v63, %v387_v58  ;;  %v359_v58 = vld [vmem:[#allocation4 + $0x898] sm:$0xff] }
 0x67d   :  { %v14283_v59 = vadd.f32 %v14282_v42, %v18099_v11  ;;  %14577 = vmatpush1.bf16.msra.mxu0 %v15813_v0  ;;  %14608 = vmatprep.mubr.bf16.mxu0 %v17745_v27  ;;  %v367_v0 = vld [vmem:[#allocation4 + $0x8d8] sm:$0xff] }
 0x67e   :  { %v14323_v2 = vpop.f32.mrf.mxu1  ;;  %14568 = vmatmul.mubr.bf16.vlgmr.msra.gmra.mxu1 %v17739_v20  ;;  %v14284_v3 = vpop.f32.mrf.mxu0  ;;  %14578 = vmatprep.subr.bf16.mxu0 %v15806_v46  ;;  %v503_v20 = vld [vmem:[#allocation4 + $0xd18] sm:$0xff] }
 0x67f   :  { %14618 = vmatpush1.bf16.msra.mxu1 %v15941_v38  ;;  %v18109_v28 = vadd.f32 %v14323_v2, %v14283_v59  ;;  %v14285_v35 = vadd.f32 %v14284_v3, %v18104_v1  ;;  %14649 = vmatprep.mubr.bf16.mxu1 %v17750_v29  ;;  %v15925_v1 = vcombine.low %v511_v39, %v515_v12  ;;  %v371_v27 = vld [vmem:[#allocation4 + $0x8f8] sm:$0xff] }
 0x680   :  { %v14325_v24 = vpop.f32.mrf.mxu1  ;;  %14619 = vmatprep.subr.bf16.mxu1 %v15934_v41  ;;  %v14286_v11 = vpop.f32.mrf.mxu0  ;;  %v15918_v34 = vcombine.high %v503_v20, %v507_v60  ;;  %v495_v38 = vld [vmem:[#allocation4 + $0xcd8] sm:$0xff]  ;;  %v15789_v41 = vcombine.low %v375_v23, %v379_v51  ;;  %v15917_v29 = vcombine.low %v503_v20, %v507_v60  ;;  %v15782_v42 = vcombine.high %v367_v0, %v371_v27 }
 0x681   :  { %v18114_v19 = vadd.f32 %v14325_v24, %v14285_v35  ;;  %14579 = vmatpush1.bf16.msra.mxu0 %v15805_v61  ;;  %v499_v46 = vld [vmem:[#allocation4 + $0xcf8] sm:$0xff]  ;;  %v15781_v12 = vcombine.low %v367_v0, %v371_v27 }
 0x682   :  { %v14327_v33 = vpop.f32.mrf.mxu1  ;;  %v14287_v7 = vpop.f32.mrf.mxu0  ;;  %14580 = vmatprep.subr.bf16.mxu0 %v15798_v52  ;;  %v15910_v63 = vcombine.high %v495_v38, %v499_v46  ;;  %v363_v59 = vld [vmem:[#allocation4 + $0x8b8] sm:$0xff]  ;;  %v15909_v61 = vcombine.low %v495_v38, %v499_v46 }
 0x683   :  { %14620 = vmatpush1.bf16.msra.mxu1 %v15933_v30  ;;  %v487_v2 = vld [vmem:[#allocation4 + $0xc98] sm:$0xff]  ;;  %v15774_v3 = vcombine.high %v359_v58, %v363_v59  ;;  %v15773_v23 = vcombine.low %v359_v58, %v363_v59 }
 0x684   :  { %v14328_v17 = vpop.f32.mrf.mxu1  ;;  %14621 = vmatprep.subr.bf16.mxu1 %v15926_v16  ;;  %v491_v39 = vld [vmem:[#allocation4 + $0xcb8] sm:$0xff] }
 0x685   :  { %14581 = vmatpush1.bf16.msra.mxu0 %v15797_v50  ;;  %v15902_v30 = vcombine.high %v487_v2, %v491_v39  ;;  %v351_v52 = vld [vmem:[#allocation4 + $0x858] sm:$0xff]  ;;  %v15901_v51 = vcombine.low %v487_v2, %v491_v39 }
 0x686   :  { %14582 = vmatprep.subr.bf16.mxu0 %v15790_v56  ;;  %v355_v35 = vld [vmem:[#allocation4 + $0x878] sm:$0xff] }
 0x687   :  { %14622 = vmatpush1.bf16.msra.mxu1 %v15925_v1  ;;  %v479_v24 = vld [vmem:[#allocation4 + $0xc58] sm:$0xff]  ;;  %v15766_v11 = vcombine.high %v351_v52, %v355_v35  ;;  %v15765_v1 = vcombine.low %v351_v52, %v355_v35 }
 0x688   :  { %14623 = vmatprep.subr.bf16.mxu1 %v15918_v34  ;;  %v483_v16 = vld [vmem:[#allocation4 + $0xc78] sm:$0xff] }
 0x689   :  { %14583 = vmatpush1.bf16.msra.mxu0 %v15789_v41  ;;  %v15894_v20 = vcombine.high %v479_v24, %v483_v16  ;;  %v343_v60 = vld [vmem:[#allocation4 + $0x818] sm:$0xff]  ;;  %v15893_v56 = vcombine.low %v479_v24, %v483_v16 }
 0x68a   :  { %14584 = vmatprep.subr.bf16.mxu0 %v15782_v42  ;;  %v347_v33 = vld [vmem:[#allocation4 + $0x838] sm:$0xff] }
 0x68b   :  { %14624 = vmatpush1.bf16.msra.mxu1 %v15917_v29  ;;  %v471_v50 = vld [vmem:[#allocation4 + $0xc18] sm:$0xff]  ;;  %v15758_v17 = vcombine.high %v343_v60, %v347_v33  ;;  %v15757_v41 = vcombine.low %v343_v60, %v347_v33 }
 0x68c   :  { %14625 = vmatprep.subr.bf16.mxu1 %v15910_v63  ;;  %v475_v7 = vld [vmem:[#allocation4 + $0xc38] sm:$0xff] }
 0x68d   :  { %14585 = vmatpush1.bf16.msra.mxu0 %v15781_v12  ;;  %v15886_v34 = vcombine.high %v471_v50, %v475_v7  ;;  %v463_v0 = vld [vmem:[#allocation4 + $0xbd8] sm:$0xff]  ;;  %v15885_v29 = vcombine.low %v471_v50, %v475_v7 }
 0x68e   :  { %14586 = vmatprep.subr.bf16.mxu0 %v15774_v3  ;;  %v467_v27 = vld [vmem:[#allocation4 + $0xbf8] sm:$0xff] }
 0x68f   :  { %14626 = vmatpush1.bf16.msra.mxu1 %v15909_v61  ;;  %v591_v38 = vld [vmem:[#allocation4 + $0xfd8] sm:$0xff]  ;;  %v15878_v42 = vcombine.high %v463_v0, %v467_v27  ;;  %v15877_v12 = vcombine.low %v463_v0, %v467_v27 }
 0x690   :  { %14627 = vmatprep.subr.bf16.mxu1 %v15902_v30  ;;  %v595_v46 = vld [vmem:[#allocation4 + $0xff8] sm:$0xff] }
 0x691   :  { %14587 = vmatpush1.bf16.msra.mxu0 %v15773_v23  ;;  %v16006_v63 = vcombine.high %v591_v38, %v595_v46  ;;  %v455_v58 = vld [vmem:[#allocation4 + $0xb98] sm:$0xff]  ;;  %v16005_v61 = vcombine.low %v591_v38, %v595_v46 }
 0x692   :  { %14588 = vmatprep.subr.bf16.mxu0 %v15766_v11  ;;  %v459_v59 = vld [vmem:[#allocation4 + $0xbb8] sm:$0xff] }
 0x693   :  { %14628 = vmatpush1.bf16.msra.mxu1 %v15901_v51  ;;  %v583_v2 = vld [vmem:[#allocation4 + $0xf98] sm:$0xff]  ;;  %v15870_v3 = vcombine.high %v455_v58, %v459_v59  ;;  %v15869_v23 = vcombine.low %v455_v58, %v459_v59 }
 0x694   :  { %14629 = vmatprep.subr.bf16.mxu1 %v15894_v20  ;;  %v587_v39 = vld [vmem:[#allocation4 + $0xfb8] sm:$0xff] }
 0x695   :  { %14589 = vmatpush1.bf16.msra.mxu0 %v15765_v1  ;;  %v15998_v30 = vcombine.high %v583_v2, %v587_v39  ;;  %v447_v52 = vld [vmem:[#allocation4 + $0xb58] sm:$0xff]  ;;  %v15997_v51 = vcombine.low %v583_v2, %v587_v39 }
 0x696   :  { %14590 = vmatprep.subr.bf16.mxu0 %v15758_v17  ;;  %v451_v35 = vld [vmem:[#allocation4 + $0xb78] sm:$0xff] }
 0x697   :  { %14630 = vmatpush1.bf16.msra.mxu1 %v15893_v56  ;;  %v575_v24 = vld [vmem:[#allocation4 + $0xf58] sm:$0xff]  ;;  %v15862_v11 = vcombine.high %v447_v52, %v451_v35  ;;  %v15861_v1 = vcombine.low %v447_v52, %v451_v35 }
 0x698   :  { %14631 = vmatprep.subr.bf16.mxu1 %v15886_v34  ;;  %v579_v16 = vld [vmem:[#allocation4 + $0xf78] sm:$0xff] }
 0x699   :  { %14591 = vmatpush1.bf16.msra.mxu0 %v15757_v41  ;;  %v15990_v20 = vcombine.high %v575_v24, %v579_v16  ;;  %v439_v60 = vld [vmem:[#allocation4 + $0xb18] sm:$0xff]  ;;  %v15989_v56 = vcombine.low %v575_v24, %v579_v16 }
 0x69a   :  { %14592 = vmatprep.subr.bf16.mxu0 %v15878_v42  ;;  %v443_v33 = vld [vmem:[#allocation4 + $0xb38] sm:$0xff] }
 0x69b   :  { %14632 = vmatpush1.bf16.msra.mxu1 %v15885_v29  ;;  %v567_v50 = vld [vmem:[#allocation4 + $0xf18] sm:$0xff]  ;;  %v15854_v17 = vcombine.high %v439_v60, %v443_v33  ;;  %v15853_v41 = vcombine.low %v439_v60, %v443_v33 }
 0x69c   :  { %14633 = vmatprep.subr.bf16.mxu1 %v16006_v63  ;;  %v571_v7 = vld [vmem:[#allocation4 + $0xf38] sm:$0xff] }
 0x69d   :  { %14593 = vmatpush2.bf16.msra.mxu0 %v15877_v12  ;;  %v15982_v34 = vcombine.high %v567_v50, %v571_v7  ;;  %v431_v0 = vld [vmem:[#allocation4 + $0xad8] sm:$0xff]  ;;  %v15981_v29 = vcombine.low %v567_v50, %v571_v7 }
 0x69e   :  { %14594 = vmatprep.subr.bf16.mxu0 %v15870_v3  ;;  %v435_v27 = vld [vmem:[#allocation4 + $0xaf8] sm:$0xff] }
 0x69f   :  { %14634 = vmatpush2.bf16.msra.mxu1 %v16005_v61  ;;  %v559_v38 = vld [vmem:[#allocation4 + $0xed8] sm:$0xff]  ;;  %v15846_v42 = vcombine.high %v431_v0, %v435_v27  ;;  %v15845_v12 = vcombine.low %v431_v0, %v435_v27 }
 0x6a0   :  { %14635 = vmatprep.subr.bf16.mxu1 %v15998_v30  ;;  %v563_v46 = vld [vmem:[#allocation4 + $0xef8] sm:$0xff] }
 0x6a1   :  { %14595 = vmatpush2.bf16.msra.mxu0 %v15869_v23  ;;  %v15974_v63 = vcombine.high %v559_v38, %v563_v46  ;;  %v423_v58 = vld [vmem:[#allocation4 + $0xa98] sm:$0xff]  ;;  %v15973_v61 = vcombine.low %v559_v38, %v563_v46 }
 0x6a2   :  { %14596 = vmatprep.subr.bf16.mxu0 %v15862_v11  ;;  %v427_v59 = vld [vmem:[#allocation4 + $0xab8] sm:$0xff] }
 0x6a3   :  { %14636 = vmatpush2.bf16.msra.mxu1 %v15997_v51  ;;  %v551_v2 = vld [vmem:[#allocation4 + $0xe98] sm:$0xff]  ;;  %v15838_v3 = vcombine.high %v423_v58, %v427_v59  ;;  %v15837_v23 = vcombine.low %v423_v58, %v427_v59 }
 0x6a4   :  { %14637 = vmatprep.subr.bf16.mxu1 %v15990_v20  ;;  %v555_v39 = vld [vmem:[#allocation4 + $0xeb8] sm:$0xff] }
 0x6a5   :  { %14597 = vmatpush2.bf16.msra.mxu0 %v15861_v1  ;;  %v15966_v30 = vcombine.high %v551_v2, %v555_v39  ;;  %v415_v52 = vld [vmem:[#allocation4 + $0xa58] sm:$0xff]  ;;  %v15965_v51 = vcombine.low %v551_v2, %v555_v39 }
 0x6a6   :  { %14598 = vmatprep.subr.bf16.mxu0 %v15854_v17  ;;  %v419_v35 = vld [vmem:[#allocation4 + $0xa78] sm:$0xff] }
 0x6a7   :  { %14638 = vmatpush2.bf16.msra.mxu1 %v15989_v56  ;;  %v543_v24 = vld [vmem:[#allocation4 + $0xe58] sm:$0xff]  ;;  %v15830_v11 = vcombine.high %v415_v52, %v419_v35  ;;  %v15829_v1 = vcombine.low %v415_v52, %v419_v35 }
 0x6a8   :  { %14639 = vmatprep.subr.bf16.mxu1 %v15982_v34  ;;  %v547_v16 = vld [vmem:[#allocation4 + $0xe78] sm:$0xff] }
 0x6a9   :  { %14599 = vmatpush2.bf16.msra.mxu0 %v15853_v41  ;;  %v15958_v20 = vcombine.high %v543_v24, %v547_v16  ;;  %v407_v60 = vld [vmem:[#allocation4 + $0xa18] sm:$0xff]  ;;  %v15957_v56 = vcombine.low %v543_v24, %v547_v16 }
 0x6aa   :  { %14600 = vmatprep.subr.bf16.mxu0 %v15846_v42  ;;  %v411_v33 = vld [vmem:[#allocation4 + $0xa38] sm:$0xff] }
 0x6ab   :  { %14640 = vmatpush2.bf16.msra.mxu1 %v15981_v29  ;;  %v535_v50 = vld [vmem:[#allocation4 + $0xe18] sm:$0xff]  ;;  %v15822_v17 = vcombine.high %v407_v60, %v411_v33  ;;  %v15821_v41 = vcombine.low %v407_v60, %v411_v33 }
 0x6ac   :  { %14641 = vmatprep.subr.bf16.mxu1 %v15974_v63  ;;  %v539_v7 = vld [vmem:[#allocation4 + $0xe38] sm:$0xff] }
 0x6ad   :  { %14601 = vmatpush2.bf16.msra.mxu0 %v15845_v12  ;;  %v15950_v34 = vcombine.high %v535_v50, %v539_v7  ;;  %v655_v0 = vld [vmem:[#allocation4 + $0x11d8] sm:$0xff]  ;;  %v15949_v29 = vcombine.low %v535_v50, %v539_v7 }
 0x6ae   :  { %14602 = vmatprep.subr.bf16.mxu0 %v15838_v3  ;;  %v659_v27 = vld [vmem:[#allocation4 + $0x11f8] sm:$0xff] }
 0x6af   :  { %14642 = vmatpush2.bf16.msra.mxu1 %v15973_v61  ;;  %v783_v38 = vld [vmem:[#allocation4 + $0x15d8] sm:$0xff]  ;;  %v16070_v42 = vcombine.high %v655_v0, %v659_v27  ;;  %v16069_v12 = vcombine.low %v655_v0, %v659_v27 }
 0x6b0   :  { %14643 = vmatprep.subr.bf16.mxu1 %v15966_v30  ;;  %v787_v46 = vld [vmem:[#allocation4 + $0x15f8] sm:$0xff] }
 0x6b1   :  { %14603 = vmatpush2.bf16.msra.mxu0 %v15837_v23  ;;  %v16198_v63 = vcombine.high %v783_v38, %v787_v46  ;;  %v647_v58 = vld [vmem:[#allocation4 + $0x1198] sm:$0xff]  ;;  %v16197_v61 = vcombine.low %v783_v38, %v787_v46 }
 0x6b2   :  { %14604 = vmatprep.subr.bf16.mxu0 %v15830_v11  ;;  %v651_v59 = vld [vmem:[#allocation4 + $0x11b8] sm:$0xff] }
 0x6b3   :  { %14644 = vmatpush2.bf16.msra.mxu1 %v15965_v51  ;;  %v775_v2 = vld [vmem:[#allocation4 + $0x1598] sm:$0xff]  ;;  %v16062_v3 = vcombine.high %v647_v58, %v651_v59 }
 0x6b4   :  { %14645 = vmatprep.subr.bf16.mxu1 %v15958_v20  ;;  %v779_v39 = vld [vmem:[#allocation4 + $0x15b8] sm:$0xff]  ;;  %v16061_v20 = vcombine.low %v647_v58, %v651_v59 }
 0x6b5   :  { %14605 = vmatpush2.bf16.msra.mxu0 %v15829_v1  ;;  %v16190_v30 = vcombine.high %v775_v2, %v779_v39  ;;  %v639_v52 = vld [vmem:[#allocation4 + $0x1158] sm:$0xff]  ;;  %v16189_v33 = vcombine.low %v775_v2, %v779_v39 }
 0x6b6   :  { %14606 = vmatprep.subr.bf16.mxu0 %v15822_v17  ;;  %v643_v35 = vld [vmem:[#allocation4 + $0x1178] sm:$0xff] }
 0x6b7   :  { %14646 = vmatpush2.bf16.msra.mxu1 %v15957_v56  ;;  %v767_v16 = vld [vmem:[#allocation4 + $0x1558] sm:$0xff]  ;;  %v16054_v50 = vcombine.high %v639_v52, %v643_v35  ;;  %v16053_v46 = vcombine.low %v639_v52, %v643_v35 }
 0x6b8   :  { %14647 = vmatprep.subr.bf16.mxu1 %v15950_v34  ;;  %v771_v23 = vld [vmem:[#allocation4 + $0x1578] sm:$0xff] }
 0x6b9   :  { %14607 = vmatpush2.bf16.msra.mxu0 %v15821_v41  ;;  %v631_v17 = vld [vmem:[#allocation4 + $0x1118] sm:$0xff] }
 0x6ba   :  { %14658 = vmatprep.subr.bf16.mxu0 %v16070_v42  ;;  %v635_v34 = vld [vmem:[#allocation4 + $0x1138] sm:$0xff] }
 0x6bb   :  { %14648 = vmatpush2.bf16.msra.mxu1 %v15949_v29  ;;  %v763_v0 = vld [vmem:[#allocation4 + $0x1538] sm:$0xff]  ;;  %v16046_v29 = vcombine.high %v631_v17, %v635_v34  ;;  %v16045_v39 = vcombine.low %v631_v17, %v635_v34 }
 0x6bc   :  { %14699 = vmatprep.subr.bf16.mxu1 %v16198_v63  ;;  %v14364_v24 = vpop.f32.mrf.mxu0  ;;  %14609 = vmatmul.mubr.bf16.vlgmr.msra.gmra.mxu0 %v17757_v36  ;;  %v16182_v36 = vcombine.high %v767_v16, %v771_v23  ;;  %v623_v58 = vld [vmem:[#allocation4 + $0x10d8] sm:$0xff] }
 0x6bd   :  { %v14365_v51 = vadd.f32 %v14364_v24, %v18109_v28  ;;  %14659 = vmatpush1.bf16.msra.mxu0 %v16069_v12  ;;  %14690 = vmatprep.mubr.bf16.mxu0 %v17769_v47  ;;  %v627_v47 = vld [vmem:[#allocation4 + $0x10f8] sm:$0xff] }
 0x6be   :  { %v14405_v11 = vpop.f32.mrf.mxu1  ;;  %14650 = vmatmul.mubr.bf16.vlgmr.msra.gmra.mxu1 %v17763_v40  ;;  %v14366_v60 = vpop.f32.mrf.mxu0  ;;  %14660 = vmatprep.subr.bf16.mxu0 %v16062_v3  ;;  %v759_v40 = vld [vmem:[#allocation4 + $0x1518] sm:$0xff]  ;;  %v16038_v12 = vcombine.high %v623_v58, %v627_v47  ;;  %v16037_v24 = vcombine.low %v623_v58, %v627_v47 }
 0x6bf   :  { %14700 = vmatpush1.bf16.msra.mxu1 %v16197_v61  ;;  %v18119_v7 = vadd.f32 %v14405_v11, %v14365_v51  ;;  %v14367_v1 = vadd.f32 %v14366_v60, %v18114_v19  ;;  %14731 = vmatprep.mubr.bf16.mxu1 %v17774_v49  ;;  %v16181_v19 = vcombine.low %v767_v16, %v771_v23  ;;  %v751_v59 = vld [vmem:[#allocation4 + $0x14d8] sm:$0xff] }
 0x6c0   :  { %v14407_v56 = vpop.f32.mrf.mxu1  ;;  %14701 = vmatprep.subr.bf16.mxu1 %v16190_v30  ;;  %v14368_v28 = vpop.f32.mrf.mxu0  ;;  %v16174_v63 = vcombine.high %v759_v40, %v763_v0  ;;  %v755_v2 = vld [vmem:[#allocation4 + $0x14f8] sm:$0xff]  ;;  %v16173_v49 = vcombine.low %v759_v40, %v763_v0 }
 0x6c1   :  { %v18124_v27 = vadd.f32 %v14407_v56, %v14367_v1  ;;  %14661 = vmatpush1.bf16.msra.mxu0 %v16061_v20  ;;  %v16166_v61 = vcombine.high %v751_v59, %v755_v2  ;;  %v615_v3 = vld [vmem:[#allocation4 + $0x1098] sm:$0xff]  ;;  %v16165_v16 = vcombine.low %v751_v59, %v755_v2 }
 0x6c2   :  { %v14409_v38 = vpop.f32.mrf.mxu1  ;;  %v14369_v41 = vpop.f32.mrf.mxu0  ;;  %14662 = vmatprep.subr.bf16.mxu0 %v16054_v50  ;;  %v619_v30 = vld [vmem:[#allocation4 + $0x10b8] sm:$0xff] }
 0x6c3   :  { %14702 = vmatpush1.bf16.msra.mxu1 %v16189_v33  ;;  %v743_v52 = vld [vmem:[#allocation4 + $0x1498] sm:$0xff]  ;;  %v16030_v23 = vcombine.high %v615_v3, %v619_v30  ;;  %v16029_v50 = vcombine.low %v615_v3, %v619_v30 }
 0x6c4   :  { %v14410_v42 = vpop.f32.mrf.mxu1  ;;  %14703 = vmatprep.subr.bf16.mxu1 %v16182_v36  ;;  %v747_v35 = vld [vmem:[#allocation4 + $0x14b8] sm:$0xff] }
 0x6c5   :  { %14663 = vmatpush1.bf16.msra.mxu0 %v16053_v46  ;;  %v16158_v51 = vcombine.high %v743_v52, %v747_v35  ;;  %v607_v11 = vld [vmem:[#allocation4 + $0x1058] sm:$0xff]  ;;  %v16157_v1 = vcombine.low %v743_v52, %v747_v35 }
 0x6c6   :  { %14664 = vmatprep.subr.bf16.mxu0 %v16046_v29  ;;  %v611_v20 = vld [vmem:[#allocation4 + $0x1078] sm:$0xff] }
 0x6c7   :  { %14704 = vmatpush1.bf16.msra.mxu1 %v16181_v19  ;;  %v735_v60 = vld [vmem:[#allocation4 + $0x1458] sm:$0xff]  ;;  %v16022_v56 = vcombine.high %v607_v11, %v611_v20  ;;  %v16021_v0 = vcombine.low %v607_v11, %v611_v20 }
 0x6c8   :  { %14705 = vmatprep.subr.bf16.mxu1 %v16174_v63  ;;  %v739_v33 = vld [vmem:[#allocation4 + $0x1478] sm:$0xff] }
 0x6c9   :  { %14665 = vmatpush1.bf16.msra.mxu0 %v16045_v39  ;;  %v16150_v36 = vcombine.high %v735_v60, %v739_v33  ;;  %v599_v17 = vld [vmem:[#allocation4 + $0x1018] sm:$0xff]  ;;  %v16149_v38 = vcombine.low %v735_v60, %v739_v33 }
 0x6ca   :  { %14666 = vmatprep.subr.bf16.mxu0 %v16038_v12  ;;  %v603_v34 = vld [vmem:[#allocation4 + $0x1038] sm:$0xff] }
 0x6cb   :  { %14706 = vmatpush1.bf16.msra.mxu1 %v16173_v49  ;;  %v727_v28 = vld [vmem:[#allocation4 + $0x1418] sm:$0xff]  ;;  %v16014_v46 = vcombine.high %v599_v17, %v603_v34  ;;  %v16013_v58 = vcombine.low %v599_v17, %v603_v34 }
 0x6cc   :  { %14707 = vmatprep.subr.bf16.mxu1 %v16166_v61  ;;  %v731_v40 = vld [vmem:[#allocation4 + $0x1438] sm:$0xff] }
 0x6cd   :  { %14667 = vmatpush1.bf16.msra.mxu0 %v16037_v24  ;;  %v16142_v41 = vcombine.high %v727_v28, %v731_v40  ;;  %v719_v19 = vld [vmem:[#allocation4 + $0x13d8] sm:$0xff]  ;;  %v16141_v47 = vcombine.low %v727_v28, %v731_v40 }
 0x6ce   :  { %14668 = vmatprep.subr.bf16.mxu0 %v16030_v23  ;;  %v723_v29 = vld [vmem:[#allocation4 + $0x13f8] sm:$0xff] }
 0x6cf   :  { %14708 = vmatpush1.bf16.msra.mxu1 %v16165_v16  ;;  %v847_v42 = vld [vmem:[#allocation4 + $0x17d8] sm:$0xff]  ;;  %v16134_v59 = vcombine.high %v719_v19, %v723_v29  ;;  %v16133_v3 = vcombine.low %v719_v19, %v723_v29 }
 0x6d0   :  { %14709 = vmatprep.subr.bf16.mxu1 %v16158_v51  ;;  %v851_v63 = vld [vmem:[#allocation4 + $0x17f8] sm:$0xff] }
 0x6d1   :  { %14669 = vmatpush1.bf16.msra.mxu0 %v16029_v50  ;;  %v16262_v2 = vcombine.high %v847_v42, %v851_v63  ;;  %v711_v39 = vld [vmem:[#allocation4 + $0x1398] sm:$0xff]  ;;  %v16261_v30 = vcombine.low %v847_v42, %v851_v63 }
 0x6d2   :  { %14670 = vmatprep.subr.bf16.mxu0 %v16022_v56  ;;  %v715_v49 = vld [vmem:[#allocation4 + $0x13b8] sm:$0xff] }
 0x6d3   :  { %14710 = vmatpush1.bf16.msra.mxu1 %v16157_v1  ;;  %v839_v12 = vld [vmem:[#allocation4 + $0x1798] sm:$0xff]  ;;  %v16126_v52 = vcombine.high %v711_v39, %v715_v49  ;;  %v16125_v11 = vcombine.low %v711_v39, %v715_v49 }
 0x6d4   :  { %14711 = vmatprep.subr.bf16.mxu1 %v16150_v36  ;;  %v843_v61 = vld [vmem:[#allocation4 + $0x17b8] sm:$0xff] }
 0x6d5   :  { %14671 = vmatpush1.bf16.msra.mxu0 %v16021_v0  ;;  %v16254_v35 = vcombine.high %v839_v12, %v843_v61  ;;  %v703_v24 = vld [vmem:[#allocation4 + $0x1358] sm:$0xff]  ;;  %v16253_v20 = vcombine.low %v839_v12, %v843_v61 }
 0x6d6   :  { %14672 = vmatprep.subr.bf16.mxu0 %v16014_v46  ;;  %v707_v16 = vld [vmem:[#allocation4 + $0x1378] sm:$0xff] }
 0x6d7   :  { %14712 = vmatpush1.bf16.msra.mxu1 %v16149_v38  ;;  %v831_v23 = vld [vmem:[#allocation4 + $0x1758] sm:$0xff]  ;;  %v16118_v60 = vcombine.high %v703_v24, %v707_v16  ;;  %v16117_v17 = vcombine.low %v703_v24, %v707_v16 }
 0x6d8   :  { %14713 = vmatprep.subr.bf16.mxu1 %v16142_v41  ;;  %v835_v51 = vld [vmem:[#allocation4 + $0x1778] sm:$0xff] }
 0x6d9   :  { %14673 = vmatpush1.bf16.msra.mxu0 %v16013_v58  ;;  %v16246_v33 = vcombine.high %v831_v23, %v835_v51  ;;  %v695_v50 = vld [vmem:[#allocation4 + $0x1318] sm:$0xff]  ;;  %v16245_v34 = vcombine.low %v831_v23, %v835_v51 }
 0x6da   :  { %14674 = vmatprep.subr.bf16.mxu0 %v16134_v59  ;;  %v699_v1 = vld [vmem:[#allocation4 + $0x1338] sm:$0xff] }
 0x6db   :  { %14714 = vmatpush1.bf16.msra.mxu1 %v16141_v47  ;;  %v823_v56 = vld [vmem:[#allocation4 + $0x1718] sm:$0xff]  ;;  %v16110_v28 = vcombine.high %v695_v50, %v699_v1  ;;  %v16109_v19 = vcombine.low %v695_v50, %v699_v1 }
 0x6dc   :  { %14715 = vmatprep.subr.bf16.mxu1 %v16262_v2  ;;  %v827_v36 = vld [vmem:[#allocation4 + $0x1738] sm:$0xff] }
 0x6dd   :  { %14675 = vmatpush2.bf16.msra.mxu0 %v16133_v3  ;;  %v16238_v40 = vcombine.high %v823_v56, %v827_v36  ;;  %v687_v0 = vld [vmem:[#allocation4 + $0x12d8] sm:$0xff]  ;;  %v16237_v29 = vcombine.low %v823_v56, %v827_v36 }
 0x6de   :  { %14676 = vmatprep.subr.bf16.mxu0 %v16126_v52  ;;  %v691_v38 = vld [vmem:[#allocation4 + $0x12f8] sm:$0xff] }
 0x6df   :  { %14716 = vmatpush2.bf16.msra.mxu1 %v16261_v30  ;;  %v815_v46 = vld [vmem:[#allocation4 + $0x16d8] sm:$0xff]  ;;  %v16102_v42 = vcombine.high %v687_v0, %v691_v38  ;;  %v16101_v39 = vcombine.low %v687_v0, %v691_v38 }
 0x6e0   :  { %14717 = vmatprep.subr.bf16.mxu1 %v16254_v35  ;;  %v819_v41 = vld [vmem:[#allocation4 + $0x16f8] sm:$0xff] }
 0x6e1   :  { %14677 = vmatpush2.bf16.msra.mxu0 %v16125_v11  ;;  %v16230_v63 = vcombine.high %v815_v46, %v819_v41  ;;  %v679_v58 = vld [vmem:[#allocation4 + $0x1298] sm:$0xff]  ;;  %v16229_v49 = vcombine.low %v815_v46, %v819_v41 }
 0x6e2   :  { %14678 = vmatprep.subr.bf16.mxu0 %v16118_v60  ;;  %v683_v47 = vld [vmem:[#allocation4 + $0x12b8] sm:$0xff] }
 0x6e3   :  { %14718 = vmatpush2.bf16.msra.mxu1 %v16253_v20  ;;  %v807_v59 = vld [vmem:[#allocation4 + $0x1698] sm:$0xff]  ;;  %v16094_v12 = vcombine.high %v679_v58, %v683_v47  ;;  %v16093_v24 = vcombine.low %v679_v58, %v683_v47 }
 0x6e4   :  { %14719 = vmatprep.subr.bf16.mxu1 %v16246_v33  ;;  %v811_v2 = vld [vmem:[#allocation4 + $0x16b8] sm:$0xff] }
 0x6e5   :  { %14679 = vmatpush2.bf16.msra.mxu0 %v16117_v17  ;;  %v16222_v61 = vcombine.high %v807_v59, %v811_v2  ;;  %v671_v3 = vld [vmem:[#allocation4 + $0x1258] sm:$0xff]  ;;  %v16221_v16 = vcombine.low %v807_v59, %v811_v2 }
 0x6e6   :  { %14680 = vmatprep.subr.bf16.mxu0 %v16110_v28  ;;  %v675_v30 = vld [vmem:[#allocation4 + $0x1278] sm:$0xff] }
 0x6e7   :  { %14720 = vmatpush2.bf16.msra.mxu1 %v16245_v34  ;;  %v799_v52 = vld [vmem:[#allocation4 + $0x1658] sm:$0xff]  ;;  %v16086_v23 = vcombine.high %v671_v3, %v675_v30  ;;  %v16085_v50 = vcombine.low %v671_v3, %v675_v30 }
 0x6e8   :  { %14721 = vmatprep.subr.bf16.mxu1 %v16238_v40  ;;  %v803_v35 = vld [vmem:[#allocation4 + $0x1678] sm:$0xff] }
 0x6e9   :  { %14681 = vmatpush2.bf16.msra.mxu0 %v16109_v19  ;;  %v16214_v51 = vcombine.high %v799_v52, %v803_v35  ;;  %v663_v11 = vld [vmem:[#allocation4 + $0x1218] sm:$0xff]  ;;  %v16213_v1 = vcombine.low %v799_v52, %v803_v35 }
 0x6ea   :  { %14682 = vmatprep.subr.bf16.mxu0 %v16102_v42  ;;  %v667_v20 = vld [vmem:[#allocation4 + $0x1238] sm:$0xff] }
 0x6eb   :  { %14722 = vmatpush2.bf16.msra.mxu1 %v16237_v29  ;;  %v791_v60 = vld [vmem:[#allocation4 + $0x1618] sm:$0xff]  ;;  %v16078_v56 = vcombine.high %v663_v11, %v667_v20  ;;  %v16077_v0 = vcombine.low %v663_v11, %v667_v20 }
 0x6ec   :  { %14723 = vmatprep.subr.bf16.mxu1 %v16230_v63  ;;  %v795_v33 = vld [vmem:[#allocation4 + $0x1638] sm:$0xff] }
 0x6ed   :  { %14683 = vmatpush2.bf16.msra.mxu0 %v16101_v39  ;;  %v16206_v36 = vcombine.high %v791_v60, %v795_v33  ;;  %v911_v17 = vld [vmem:[#allocation4 + $0x19d8] sm:$0xff]  ;;  %v16205_v38 = vcombine.low %v791_v60, %v795_v33 }
 0x6ee   :  { %14684 = vmatprep.subr.bf16.mxu0 %v16094_v12  ;;  %v915_v34 = vld [vmem:[#allocation4 + $0x19f8] sm:$0xff] }
 0x6ef   :  { %14724 = vmatpush2.bf16.msra.mxu1 %v16229_v49  ;;  %v1039_v28 = vld [vmem:[#allocation4 + $0x1dd8] sm:$0xff]  ;;  %v16326_v46 = vcombine.high %v911_v17, %v915_v34  ;;  %v16325_v58 = vcombine.low %v911_v17, %v915_v34 }
 0x6f0   :  { %14725 = vmatprep.subr.bf16.mxu1 %v16222_v61  ;;  %v1043_v40 = vld [vmem:[#allocation4 + $0x1df8] sm:$0xff] }
 0x6f1   :  { %14685 = vmatpush2.bf16.msra.mxu0 %v16093_v24  ;;  %v16454_v41 = vcombine.high %v1039_v28, %v1043_v40  ;;  %v903_v19 = vld [vmem:[#allocation4 + $0x1998] sm:$0xff]  ;;  %v16453_v47 = vcombine.low %v1039_v28, %v1043_v40 }
 0x6f2   :  { %14686 = vmatprep.subr.bf16.mxu0 %v16086_v23  ;;  %v907_v29 = vld [vmem:[#allocation4 + $0x19b8] sm:$0xff] }
 0x6f3   :  { %14726 = vmatpush2.bf16.msra.mxu1 %v16221_v16  ;;  %v1031_v42 = vld [vmem:[#allocation4 + $0x1d98] sm:$0xff]  ;;  %v16318_v59 = vcombine.high %v903_v19, %v907_v29  ;;  %v16317_v35 = vcombine.low %v903_v19, %v907_v29 }
 0x6f4   :  { %14727 = vmatprep.subr.bf16.mxu1 %v16214_v51  ;;  %v1035_v63 = vld [vmem:[#allocation4 + $0x1db8] sm:$0xff] }
 0x6f5   :  { %14687 = vmatpush2.bf16.msra.mxu0 %v16085_v50  ;;  %v16446_v2 = vcombine.high %v1031_v42, %v1035_v63  ;;  %v895_v39 = vld [vmem:[#allocation4 + $0x1958] sm:$0xff]  ;;  %v16445_v16 = vcombine.low %v1031_v42, %v1035_v63 }
 0x6f6   :  { %14688 = vmatprep.subr.bf16.mxu0 %v16078_v56  ;;  %v899_v49 = vld [vmem:[#allocation4 + $0x1978] sm:$0xff] }
 0x6f7   :  { %14728 = vmatpush2.bf16.msra.mxu1 %v16213_v1  ;;  %v1023_v61 = vld [vmem:[#allocation4 + $0x1d58] sm:$0xff]  ;;  %v16310_v23 = vcombine.high %v895_v39, %v899_v49 }
 0x6f8   :  { %14729 = vmatprep.subr.bf16.mxu1 %v16206_v36  ;;  %v1027_v3 = vld [vmem:[#allocation4 + $0x1d78] sm:$0xff]  ;;  %v16309_v36 = vcombine.low %v895_v39, %v899_v49 }
 0x6f9   :  { %14689 = vmatpush2.bf16.msra.mxu0 %v16077_v0  ;;  %v887_v60 = vld [vmem:[#allocation4 + $0x1918] sm:$0xff] }
 0x6fa   :  { %14740 = vmatprep.subr.bf16.mxu0 %v16326_v46  ;;  %v891_v33 = vld [vmem:[#allocation4 + $0x1938] sm:$0xff] }
 0x6fb   :  { %14730 = vmatpush2.bf16.msra.mxu1 %v16205_v38  ;;  %v1019_v50 = vld [vmem:[#allocation4 + $0x1d38] sm:$0xff]  ;;  %v16302_v34 = vcombine.high %v887_v60, %v891_v33 }
 0x6fc   :  { %14781 = vmatprep.subr.bf16.mxu1 %v16454_v41  ;;  %v14446_v12 = vpop.f32.mrf.mxu0  ;;  %14691 = vmatmul.mubr.bf16.vlgmr.msra.gmra.mxu0 %v17781_v4  ;;  %v16438_v4 = vcombine.high %v1023_v61, %v1027_v3  ;;  %v879_v0 = vld [vmem:[#allocation4 + $0x18d8] sm:$0xff]  ;;  %v16301_v41 = vcombine.low %v887_v60, %v891_v33 }
 0x6fd   :  { %v14447_v30 = vadd.f32 %v14446_v12, %v18119_v7  ;;  %14741 = vmatpush1.bf16.msra.mxu0 %v16325_v58  ;;  %14772 = vmatprep.mubr.bf16.mxu0 %v17793_v15  ;;  %v883_v15 = vld [vmem:[#allocation4 + $0x18f8] sm:$0xff] }
 0x6fe   :  { %v14487_v52 = vpop.f32.mrf.mxu1  ;;  %14732 = vmatmul.mubr.bf16.vlgmr.msra.gmra.mxu1 %v17787_v8  ;;  %v14448_v24 = vpop.f32.mrf.mxu0  ;;  %14742 = vmatprep.subr.bf16.mxu0 %v16318_v59  ;;  %v1015_v8 = vld [vmem:[#allocation4 + $0x1d18] sm:$0xff]  ;;  %v16294_v19 = vcombine.high %v879_v0, %v883_v15  ;;  %v16293_v59 = vcombine.low %v879_v0, %v883_v15 }
 0x6ff   :  { %14782 = vmatpush1.bf16.msra.mxu1 %v16453_v47  ;;  %v18129_v51 = vadd.f32 %v14487_v52, %v14447_v30  ;;  %v14449_v11 = vadd.f32 %v14448_v24, %v18124_v27  ;;  %14813 = vmatprep.mubr.bf16.mxu1 %v17798_v18  ;;  %v16437_v27 = vcombine.low %v1023_v61, %v1027_v3  ;;  %v1007_v38 = vld [vmem:[#allocation4 + $0x1cd8] sm:$0xff] }
 0x700   :  { %v14489_v20 = vpop.f32.mrf.mxu1  ;;  %14783 = vmatprep.subr.bf16.mxu1 %v16446_v2  ;;  %v14450_v7 = vpop.f32.mrf.mxu0  ;;  %v16430_v40 = vcombine.high %v1015_v8, %v1019_v50  ;;  %v1011_v46 = vld [vmem:[#allocation4 + $0x1cf8] sm:$0xff]  ;;  %v16429_v18 = vcombine.low %v1015_v8, %v1019_v50 }
 0x701   :  { %v18134_v1 = vadd.f32 %v14489_v20, %v14449_v11  ;;  %14743 = vmatpush1.bf16.msra.mxu0 %v16317_v35  ;;  %v16422_v29 = vcombine.high %v1007_v38, %v1011_v46  ;;  %v871_v42 = vld [vmem:[#allocation4 + $0x1898] sm:$0xff]  ;;  %v16421_v2 = vcombine.low %v1007_v38, %v1011_v46 }
 0x702   :  { %v14491_v56 = vpop.f32.mrf.mxu1  ;;  %v14451_v17 = vpop.f32.mrf.mxu0  ;;  %14744 = vmatprep.subr.bf16.mxu0 %v16310_v23  ;;  %v875_v63 = vld [vmem:[#allocation4 + $0x18b8] sm:$0xff] }
 0x703   :  { %14784 = vmatpush1.bf16.msra.mxu1 %v16445_v16  ;;  %v999_v58 = vld [vmem:[#allocation4 + $0x1c98] sm:$0xff]  ;;  %v16286_v39 = vcombine.high %v871_v42, %v875_v63  ;;  %v16285_v52 = vcombine.low %v871_v42, %v875_v63 }
 0x704   :  { %v14492_v28 = vpop.f32.mrf.mxu1  ;;  %14785 = vmatprep.subr.bf16.mxu1 %v16438_v4  ;;  %v1003_v47 = vld [vmem:[#allocation4 + $0x1cb8] sm:$0xff] }
 0x705   :  { %14745 = vmatpush1.bf16.msra.mxu0 %v16309_v36  ;;  %v16414_v49 = vcombine.high %v999_v58, %v1003_v47  ;;  %v863_v12 = vld [vmem:[#allocation4 + $0x1858] sm:$0xff]  ;;  %v16413_v35 = vcombine.low %v999_v58, %v1003_v47 }
 0x706   :  { %14746 = vmatprep.subr.bf16.mxu0 %v16302_v34  ;;  %v867_v61 = vld [vmem:[#allocation4 + $0x1878] sm:$0xff] }
 0x707   :  { %14786 = vmatpush1.bf16.msra.mxu1 %v16437_v27  ;;  %v991_v3 = vld [vmem:[#allocation4 + $0x1c58] sm:$0xff]  ;;  %v16278_v24 = vcombine.high %v863_v12, %v867_v61  ;;  %v16277_v60 = vcombine.low %v863_v12, %v867_v61 }
 0x708   :  { %14787 = vmatprep.subr.bf16.mxu1 %v16430_v40  ;;  %v995_v30 = vld [vmem:[#allocation4 + $0x1c78] sm:$0xff] }
 0x709   :  { %14747 = vmatpush1.bf16.msra.mxu0 %v16301_v41  ;;  %v16406_v16 = vcombine.high %v991_v3, %v995_v30  ;;  %v855_v23 = vld [vmem:[#allocation4 + $0x1818] sm:$0xff]  ;;  %v16405_v33 = vcombine.low %v991_v3, %v995_v30 }
 0x70a   :  { %14748 = vmatprep.subr.bf16.mxu0 %v16294_v19  ;;  %v859_v11 = vld [vmem:[#allocation4 + $0x1838] sm:$0xff] }
 0x70b   :  { %14788 = vmatpush1.bf16.msra.mxu1 %v16429_v18  ;;  %v983_v20 = vld [vmem:[#allocation4 + $0x1c18] sm:$0xff]  ;;  %v16270_v7 = vcombine.high %v855_v23, %v859_v11  ;;  %v16269_v27 = vcombine.low %v855_v23, %v859_v11 }
 0x70c   :  { %14789 = vmatprep.subr.bf16.mxu1 %v16422_v29  ;;  %v987_v4 = vld [vmem:[#allocation4 + $0x1c38] sm:$0xff] }
 0x70d   :  { %14749 = vmatpush1.bf16.msra.mxu0 %v16293_v59  ;;  %v16398_v8 = vcombine.high %v983_v20, %v987_v4  ;;  %v975_v50 = vld [vmem:[#allocation4 + $0x1bd8] sm:$0xff]  ;;  %v16397_v34 = vcombine.low %v983_v20, %v987_v4 }
 0x70e   :  { %14750 = vmatprep.subr.bf16.mxu0 %v16286_v39  ;;  %v979_v56 = vld [vmem:[#allocation4 + $0x1bf8] sm:$0xff] }
 0x70f   :  { %14790 = vmatpush1.bf16.msra.mxu1 %v16421_v2  ;;  %v1103_v36 = vld [vmem:[#allocation4 + $0x1fd8] sm:$0xff]  ;;  %v16390_v28 = vcombine.high %v975_v50, %v979_v56  ;;  %v16389_v41 = vcombine.low %v975_v50, %v979_v56 }
 0x710   :  { %14791 = vmatprep.subr.bf16.mxu1 %v16414_v49  ;;  %v1107_v17 = vld [vmem:[#allocation4 + $0x1ff8] sm:$0xff] }
 0x711   :  { %14751 = vmatpush1.bf16.msra.mxu0 %v16285_v52  ;;  %v16518_v40 = vcombine.high %v1103_v36, %v1107_v17  ;;  %v967_v0 = vld [vmem:[#allocation4 + $0x1b98] sm:$0xff]  ;;  %v16517_v18 = vcombine.low %v1103_v36, %v1107_v17 }
 0x712   :  { %14752 = vmatprep.subr.bf16.mxu0 %v16278_v24  ;;  %v971_v15 = vld [vmem:[#allocation4 + $0x1bb8] sm:$0xff] }
 0x713   :  { %14792 = vmatpush1.bf16.msra.mxu1 %v16413_v35  ;;  %v1095_v38 = vld [vmem:[#allocation4 + $0x1f98] sm:$0xff]  ;;  %v16382_v19 = vcombine.high %v967_v0, %v971_v15  ;;  %v16381_v59 = vcombine.low %v967_v0, %v971_v15 }
 0x714   :  { %14793 = vmatprep.subr.bf16.mxu1 %v16406_v16  ;;  %v1099_v46 = vld [vmem:[#allocation4 + $0x1fb8] sm:$0xff] }
 0x715   :  { %14753 = vmatpush1.bf16.msra.mxu0 %v16277_v60  ;;  %v16510_v29 = vcombine.high %v1095_v38, %v1099_v46  ;;  %v959_v42 = vld [vmem:[#allocation4 + $0x1b58] sm:$0xff]  ;;  %v16509_v2 = vcombine.low %v1095_v38, %v1099_v46 }
 0x716   :  { %14754 = vmatprep.subr.bf16.mxu0 %v16270_v7  ;;  %v963_v63 = vld [vmem:[#allocation4 + $0x1b78] sm:$0xff] }
 0x717   :  { %14794 = vmatpush1.bf16.msra.mxu1 %v16405_v33  ;;  %v1087_v58 = vld [vmem:[#allocation4 + $0x1f58] sm:$0xff]  ;;  %v16374_v39 = vcombine.high %v959_v42, %v963_v63  ;;  %v16373_v52 = vcombine.low %v959_v42, %v963_v63 }
 0x718   :  { %14795 = vmatprep.subr.bf16.mxu1 %v16398_v8  ;;  %v1091_v47 = vld [vmem:[#allocation4 + $0x1f78] sm:$0xff] }
 0x719   :  { %14755 = vmatpush1.bf16.msra.mxu0 %v16269_v27  ;;  %v16502_v49 = vcombine.high %v1087_v58, %v1091_v47  ;;  %v951_v12 = vld [vmem:[#allocation4 + $0x1b18] sm:$0xff]  ;;  %v16501_v35 = vcombine.low %v1087_v58, %v1091_v47 }
 0x71a   :  { %14756 = vmatprep.subr.bf16.mxu0 %v16390_v28  ;;  %v955_v61 = vld [vmem:[#allocation4 + $0x1b38] sm:$0xff] }
 0x71b   :  { %14796 = vmatpush1.bf16.msra.mxu1 %v16397_v34  ;;  %v1079_v3 = vld [vmem:[#allocation4 + $0x1f18] sm:$0xff]  ;;  %v16366_v24 = vcombine.high %v951_v12, %v955_v61  ;;  %v16365_v60 = vcombine.low %v951_v12, %v955_v61 }
 0x71c   :  { %14797 = vmatprep.subr.bf16.mxu1 %v16518_v40  ;;  %v1083_v30 = vld [vmem:[#allocation4 + $0x1f38] sm:$0xff] }
 0x71d   :  { %14757 = vmatpush2.bf16.msra.mxu0 %v16389_v41  ;;  %v16494_v16 = vcombine.high %v1079_v3, %v1083_v30  ;;  %v943_v23 = vld [vmem:[#allocation4 + $0x1ad8] sm:$0xff]  ;;  %v16493_v33 = vcombine.low %v1079_v3, %v1083_v30 }
 0x71e   :  { %14758 = vmatprep.subr.bf16.mxu0 %v16382_v19  ;;  %v947_v11 = vld [vmem:[#allocation4 + $0x1af8] sm:$0xff] }
 0x71f   :  { %14798 = vmatpush2.bf16.msra.mxu1 %v16517_v18  ;;  %v1071_v20 = vld [vmem:[#allocation4 + $0x1ed8] sm:$0xff]  ;;  %v16358_v7 = vcombine.high %v943_v23, %v947_v11  ;;  %v16357_v27 = vcombine.low %v943_v23, %v947_v11  ;;  %v2164_v11 = vsub.s32 7, %v17803_v32 }
 0x720   :  { %14799 = vmatprep.subr.bf16.mxu1 %v16510_v29  ;;  %v1075_v4 = vld [vmem:[#allocation4 + $0x1ef8] sm:$0xff] }
 0x721   :  { %14759 = vmatpush2.bf16.msra.mxu0 %v16381_v59  ;;  %v16486_v8 = vcombine.high %v1071_v20, %v1075_v4  ;;  %v935_v50 = vld [vmem:[#allocation4 + $0x1a98] sm:$0xff]  ;;  %v16485_v34 = vcombine.low %v1071_v20, %v1075_v4 }
 0x722   :  { %14760 = vmatprep.subr.bf16.mxu0 %v16374_v39  ;;  %v939_v56 = vld [vmem:[#allocation4 + $0x1ab8] sm:$0xff] }
 0x723   :  { %14800 = vmatpush2.bf16.msra.mxu1 %v16509_v2  ;;  %v1063_v36 = vld [vmem:[#allocation4 + $0x1e98] sm:$0xff]  ;;  %v16350_v28 = vcombine.high %v935_v50, %v939_v56  ;;  %v16349_v41 = vcombine.low %v935_v50, %v939_v56 }
 0x724   :  { %14801 = vmatprep.subr.bf16.mxu1 %v16502_v49  ;;  %v1067_v17 = vld [vmem:[#allocation4 + $0x1eb8] sm:$0xff] }
 0x725   :  { %14761 = vmatpush2.bf16.msra.mxu0 %v16373_v52  ;;  %v16478_v40 = vcombine.high %v1063_v36, %v1067_v17  ;;  %v927_v0 = vld [vmem:[#allocation4 + $0x1a58] sm:$0xff]  ;;  %v16477_v18 = vcombine.low %v1063_v36, %v1067_v17 }
 0x726   :  { %14762 = vmatprep.subr.bf16.mxu0 %v16366_v24  ;;  %v931_v15 = vld [vmem:[#allocation4 + $0x1a78] sm:$0xff] }
 0x727   :  { %14802 = vmatpush2.bf16.msra.mxu1 %v16501_v35  ;;  %v1055_v38 = vld [vmem:[#allocation4 + $0x1e58] sm:$0xff]  ;;  %v16342_v19 = vcombine.high %v927_v0, %v931_v15  ;;  %v16341_v59 = vcombine.low %v927_v0, %v931_v15  ;;  %v2160_v35 = vsub.s32 6, %v17803_v32 }
 0x728   :  { %14803 = vmatprep.subr.bf16.mxu1 %v16494_v16  ;;  %v1059_v46 = vld [vmem:[#allocation4 + $0x1e78] sm:$0xff] }
 0x729   :  { %14763 = vmatpush2.bf16.msra.mxu0 %v16365_v60  ;;  %v16470_v29 = vcombine.high %v1055_v38, %v1059_v46  ;;  %v919_v42 = vld [vmem:[#allocation4 + $0x1a18] sm:$0xff]  ;;  %v16469_v2 = vcombine.low %v1055_v38, %v1059_v46 }
 0x72a   :  { %14764 = vmatprep.subr.bf16.mxu0 %v16358_v7  ;;  %v923_v63 = vld [vmem:[#allocation4 + $0x1a38] sm:$0xff]  ;;  %v17585_v7 = vld [vmem:[#allocation6] sm:$0xff] }
 0x72b   :  { %14804 = vmatpush2.bf16.msra.mxu1 %v16493_v33  ;;  %v1047_v58 = vld [vmem:[#allocation4 + $0x1e18] sm:$0xff]  ;;  %v16334_v39 = vcombine.high %v919_v42, %v923_v63  ;;  %v16333_v52 = vcombine.low %v919_v42, %v923_v63  ;;  %v2165_v17 = vrot.slane %v17585_v7, %v2164_v11 }
 0x72c   :  { %14805 = vmatprep.subr.bf16.mxu1 %v16486_v8  ;;  %v1051_v47 = vld [vmem:[#allocation4 + $0x1e38] sm:$0xff]  ;;  %v2161_v8 = vrot.slane %v17585_v7, %v2160_v35 }
 0x72d   :  { %14765 = vmatpush2.bf16.msra.mxu0 %v16357_v27  ;;  %v16462_v49 = vcombine.high %v1047_v58, %v1051_v47  ;;  %v1167_v12 = vld [vmem:[#allocation4 + $0x21d8] sm:$0xff]  ;;  %v16461_v24 = vcombine.low %v1047_v58, %v1051_v47 }
 0x72e   :  { %14766 = vmatprep.subr.bf16.mxu0 %v16350_v28  ;;  %v1171_v61 = vld [vmem:[#allocation4 + $0x21f8] sm:$0xff] }
 0x72f   :  { %14806 = vmatpush2.bf16.msra.mxu1 %v16485_v34  ;;  %v1295_v3 = vld [vmem:[#allocation4 + $0x25d8] sm:$0xff]  ;;  %v16582_v16 = vcombine.high %v1167_v12, %v1171_v61  ;;  %v16581_v50 = vcombine.low %v1167_v12, %v1171_v61 }
 0x730   :  { %14807 = vmatprep.subr.bf16.mxu1 %v16478_v40  ;;  %v1299_v30 = vld [vmem:[#allocation4 + $0x25f8] sm:$0xff] }
 0x731   :  { %14767 = vmatpush2.bf16.msra.mxu0 %v16349_v41  ;;  %v16710_v23 = vcombine.high %v1295_v3, %v1299_v30  ;;  %v1159_v20 = vld [vmem:[#allocation4 + $0x2198] sm:$0xff]  ;;  %v16709_v56 = vcombine.low %v1295_v3, %v1299_v30 }
 0x732   :  { %14768 = vmatprep.subr.bf16.mxu0 %v16342_v19  ;;  %v1163_v4 = vld [vmem:[#allocation4 + $0x21b8] sm:$0xff] }
 0x733   :  { %14808 = vmatpush2.bf16.msra.mxu1 %v16477_v18  ;;  %v1287_v60 = vld [vmem:[#allocation4 + $0x2598] sm:$0xff]  ;;  %v16574_v36 = vcombine.high %v1159_v20, %v1163_v4  ;;  %v16573_v46 = vcombine.low %v1159_v20, %v1163_v4 }
 0x734   :  { %14809 = vmatprep.subr.bf16.mxu1 %v16470_v29  ;;  %v1291_v33 = vld [vmem:[#allocation4 + $0x25b8] sm:$0xff] }
 0x735   :  { %14769 = vmatpush2.bf16.msra.mxu0 %v16341_v59  ;;  %v16702_v27 = vcombine.high %v1287_v60, %v1291_v33  ;;  %v1151_v34 = vld [vmem:[#allocation4 + $0x2158] sm:$0xff]  ;;  %v16701_v18 = vcombine.low %v1287_v60, %v1291_v33 }
 0x736   :  { %14770 = vmatprep.subr.bf16.mxu0 %v16334_v39  ;;  %v1155_v28 = vld [vmem:[#allocation4 + $0x2178] sm:$0xff] }
 0x737   :  { %14810 = vmatpush2.bf16.msra.mxu1 %v16469_v2  ;;  %v1279_v32 = vld [vmem:[#allocation4 + $0x2558] sm:$0xff]  ;;  %v16566_v19 = vcombine.high %v1151_v34, %v1155_v28  ;;  %v16565_v12 = vcombine.low %v1151_v34, %v1155_v28 }
 0x738   :  { %14811 = vmatprep.subr.bf16.mxu1 %v16462_v49  ;;  %v1283_v0 = vld [vmem:[#allocation4 + $0x2578] sm:$0xff] }
 0x739   :  { %14771 = vmatpush2.bf16.msra.mxu0 %v16333_v52  ;;  %v16694_v58 = vcombine.high %v1279_v32, %v1283_v0  ;;  %v1147_v47 = vld [vmem:[#allocation4 + $0x2138] sm:$0xff]  ;;  %v16693_v3 = vcombine.low %v1279_v32, %v1283_v0 }
 0x73a   :  { %14822 = vmatprep.subr.bf16.mxu0 %v16582_v16  ;;  %v1271_v2 = vld [vmem:[#allocation4 + $0x2518] sm:$0xff] }
 0x73b   :  { %14812 = vmatpush2.bf16.msra.mxu1 %v16461_v24  ;;  %v1135_v24 = vld [vmem:[#allocation4 + $0x20d8] sm:$0xff] }
 0x73c   :  { %14863 = vmatprep.subr.bf16.mxu1 %v16710_v23  ;;  %v14528_v40 = vpop.f32.mrf.mxu0  ;;  %14773 = vmatmul.mubr.bf16.vlgmr.msra.gmra.mxu0 %v17809_v55  ;;  %v1143_v55 = vld [vmem:[#allocation4 + $0x2118] sm:$0xff] }
 0x73d   :  { %v14529_v15 = vadd.f32 %v14528_v40, %v2161_v8  ;;  %14823 = vmatpush1.bf16.msra.mxu0 %v16581_v50  ;;  %14854 = vmatprep.mubr.bf16.mxu0 %v17821_v9  ;;  %v16558_v30 = vcombine.high %v1143_v55, %v1147_v47  ;;  %v1139_v9 = vld [vmem:[#allocation4 + $0x20f8] sm:$0xff]  ;;  %v16557_v11 = vcombine.low %v1143_v55, %v1147_v47 }
 0x73e   :  { %v14569_v38 = vpop.f32.mrf.mxu1  ;;  %14814 = vmatmul.mubr.bf16.vlgmr.msra.gmra.mxu1 %v17815_v62  ;;  %v14530_v41 = vpop.f32.mrf.mxu0  ;;  %14824 = vmatprep.subr.bf16.mxu0 %v16574_v36  ;;  %v1275_v62 = vld [vmem:[#allocation4 + $0x2538] sm:$0xff]  ;;  %v16550_v20 = vcombine.high %v1135_v24, %v1139_v9  ;;  %v16549_v50 = vcombine.low %v1135_v24, %v1139_v9 }
 0x73f   :  { %14864 = vmatpush1.bf16.msra.mxu1 %v16709_v56  ;;  %v18140_v29 = vadd.f32 %v14569_v38, %v14529_v15  ;;  %v14531_v42 = vadd.f32 %v14530_v41, %v2165_v17  ;;  %14895 = vmatprep.mubr.bf16.mxu1 %v17826_v13  ;;  %v16686_v35 = vcombine.high %v1271_v2, %v1275_v62  ;;  %v1263_v16 = vld [vmem:[#allocation4 + $0x24d8] sm:$0xff] }
 0x740   :  { %v14571_v63 = vpop.f32.mrf.mxu1  ;;  %14865 = vmatprep.subr.bf16.mxu1 %v16702_v27  ;;  %v14532_v59 = vpop.f32.mrf.mxu0  ;;  %v1267_v23 = vld [vmem:[#allocation4 + $0x24f8] sm:$0xff]  ;;  %v16685_v13 = vcombine.low %v1271_v2, %v1275_v62 }
 0x741   :  { %v18144_v39 = vadd.f32 %v14571_v63, %v14531_v42  ;;  %14825 = vmatpush1.bf16.msra.mxu0 %v16573_v46  ;;  %v16678_v4 = vcombine.high %v1263_v16, %v1267_v23  ;;  %v1127_v60 = vld [vmem:[#allocation4 + $0x2098] sm:$0xff]  ;;  %v16677_v56 = vcombine.low %v1263_v16, %v1267_v23 }
 0x742   :  { %v14573_v49 = vpop.f32.mrf.mxu1  ;;  %v14533_v61 = vpop.f32.mrf.mxu0  ;;  %14826 = vmatprep.subr.bf16.mxu0 %v16566_v19  ;;  %v1131_v33 = vld [vmem:[#allocation4 + $0x20b8] sm:$0xff] }
 0x743   :  { %14866 = vmatpush1.bf16.msra.mxu1 %v16701_v18  ;;  %v1255_v7 = vld [vmem:[#allocation4 + $0x2498] sm:$0xff]  ;;  %v16542_v36 = vcombine.high %v1127_v60, %v1131_v33  ;;  %v16541_v32 = vcombine.low %v1127_v60, %v1131_v33 }
 0x744   :  { %v14574_v52 = vpop.f32.mrf.mxu1  ;;  %14867 = vmatprep.subr.bf16.mxu1 %v16694_v58  ;;  %v1259_v8 = vld [vmem:[#allocation4 + $0x24b8] sm:$0xff] }
 0x745   :  { %14827 = vmatpush1.bf16.msra.mxu0 %v16565_v12  ;;  %v16670_v17 = vcombine.high %v1255_v7, %v1259_v8  ;;  %v1119_v27 = vld [vmem:[#allocation4 + $0x2058] sm:$0xff]  ;;  %v16669_v0 = vcombine.low %v1255_v7, %v1259_v8 }
 0x746   :  { %14828 = vmatprep.subr.bf16.mxu0 %v16558_v30  ;;  %v1123_v34 = vld [vmem:[#allocation4 + $0x2078] sm:$0xff] }
 0x747   :  { %14868 = vmatpush1.bf16.msra.mxu1 %v16693_v3  ;;  %v1247_v28 = vld [vmem:[#allocation4 + $0x2458] sm:$0xff]  ;;  %v16534_v15 = vcombine.high %v1119_v27, %v1123_v34  ;;  %v16533_v42 = vcombine.low %v1119_v27, %v1123_v34 }
 0x748   :  { %14869 = vmatprep.subr.bf16.mxu1 %v16686_v35  ;;  %v1251_v40 = vld [vmem:[#allocation4 + $0x2478] sm:$0xff] }
 0x749   :  { %14829 = vmatpush1.bf16.msra.mxu0 %v16557_v11  ;;  %v16662_v38 = vcombine.high %v1247_v28, %v1251_v40  ;;  %v1111_v46 = vld [vmem:[#allocation4 + $0x2018] sm:$0xff]  ;;  %v16661_v63 = vcombine.low %v1247_v28, %v1251_v40 }
 0x74a   :  { %14830 = vmatprep.subr.bf16.mxu0 %v16550_v20  ;;  %v1115_v41 = vld [vmem:[#allocation4 + $0x2038] sm:$0xff] }
 0x74b   :  { %14870 = vmatpush1.bf16.msra.mxu1 %v16685_v13  ;;  %v1239_v18 = vld [vmem:[#allocation4 + $0x2418] sm:$0xff]  ;;  %v16526_v58 = vcombine.high %v1111_v46, %v1115_v41  ;;  %v16525_v49 = vcombine.low %v1111_v46, %v1115_v41 }
 0x74c   :  { %14871 = vmatprep.subr.bf16.mxu1 %v16678_v4  ;;  %v1243_v19 = vld [vmem:[#allocation4 + $0x2438] sm:$0xff] }
 0x74d   :  { %14831 = vmatpush1.bf16.msra.mxu0 %v16549_v50  ;;  %v16654_v55 = vcombine.high %v1239_v18, %v1243_v19  ;;  %v1231_v47 = vld [vmem:[#allocation4 + $0x23d8] sm:$0xff]  ;;  %v16653_v12 = vcombine.low %v1239_v18, %v1243_v19 }
 0x74e   :  { %14832 = vmatprep.subr.bf16.mxu0 %v16542_v36  ;;  %v1235_v59 = vld [vmem:[#allocation4 + $0x23f8] sm:$0xff] }
 0x74f   :  { %14872 = vmatpush1.bf16.msra.mxu1 %v16677_v56  ;;  %v1359_v2 = vld [vmem:[#allocation4 + $0x27d8] sm:$0xff]  ;;  %v16646_v61 = vcombine.high %v1231_v47, %v1235_v59  ;;  %v16645_v9 = vcombine.low %v1231_v47, %v1235_v59 }
 0x750   :  { %14873 = vmatprep.subr.bf16.mxu1 %v16670_v17  ;;  %v1363_v62 = vld [vmem:[#allocation4 + $0x27f8] sm:$0xff] }
 0x751   :  { %14833 = vmatpush1.bf16.msra.mxu0 %v16541_v32  ;;  %v16774_v3 = vcombine.high %v1359_v2, %v1363_v62  ;;  %v1223_v30 = vld [vmem:[#allocation4 + $0x2398] sm:$0xff]  ;;  %v16773_v16 = vcombine.low %v1359_v2, %v1363_v62 }
 0x752   :  { %14834 = vmatprep.subr.bf16.mxu0 %v16534_v15  ;;  %v1227_v52 = vld [vmem:[#allocation4 + $0x23b8] sm:$0xff] }
 0x753   :  { %14874 = vmatpush1.bf16.msra.mxu1 %v16669_v0  ;;  %v1351_v35 = vld [vmem:[#allocation4 + $0x2798] sm:$0xff]  ;;  %v16638_v23 = vcombine.high %v1223_v30, %v1227_v52  ;;  %v16637_v33 = vcombine.low %v1223_v30, %v1227_v52 }
 0x754   :  { %14875 = vmatprep.subr.bf16.mxu1 %v16662_v38  ;;  %v1355_v24 = vld [vmem:[#allocation4 + $0x27b8] sm:$0xff] }
 0x755   :  { %14835 = vmatpush1.bf16.msra.mxu0 %v16533_v42  ;;  %v16766_v11 = vcombine.high %v1351_v35, %v1355_v24  ;;  %v1215_v13 = vld [vmem:[#allocation4 + $0x2358] sm:$0xff]  ;;  %v16765_v7 = vcombine.low %v1351_v35, %v1355_v24 }
 0x756   :  { %14836 = vmatprep.subr.bf16.mxu0 %v16526_v58  ;;  %v1219_v20 = vld [vmem:[#allocation4 + $0x2378] sm:$0xff] }
 0x757   :  { %14876 = vmatpush1.bf16.msra.mxu1 %v16661_v63  ;;  %v1343_v4 = vld [vmem:[#allocation4 + $0x2758] sm:$0xff]  ;;  %v16630_v8 = vcombine.high %v1215_v13, %v1219_v20  ;;  %v16629_v34 = vcombine.low %v1215_v13, %v1219_v20 }
 0x758   :  { %14877 = vmatprep.subr.bf16.mxu1 %v16654_v55  ;;  %v1347_v60 = vld [vmem:[#allocation4 + $0x2778] sm:$0xff] }
 0x759   :  { %14837 = vmatpush1.bf16.msra.mxu0 %v16525_v49  ;;  %v16758_v50 = vcombine.high %v1343_v4, %v1347_v60  ;;  %v1207_v56 = vld [vmem:[#allocation4 + $0x2318] sm:$0xff]  ;;  %v16757_v28 = vcombine.low %v1343_v4, %v1347_v60 }
 0x75a   :  { %14838 = vmatprep.subr.bf16.mxu0 %v16646_v61  ;;  %v1211_v36 = vld [vmem:[#allocation4 + $0x2338] sm:$0xff] }
 0x75b   :  { %14878 = vmatpush1.bf16.msra.mxu1 %v16653_v12  ;;  %v1335_v17 = vld [vmem:[#allocation4 + $0x2718] sm:$0xff]  ;;  %v16622_v40 = vcombine.high %v1207_v56, %v1211_v36  ;;  %v16621_v41 = vcombine.low %v1207_v56, %v1211_v36 }
 0x75c   :  { %14879 = vmatprep.subr.bf16.mxu1 %v16774_v3  ;;  %v1339_v27 = vld [vmem:[#allocation4 + $0x2738] sm:$0xff] }
 0x75d   :  { %14839 = vmatpush2.bf16.msra.mxu0 %v16645_v9  ;;  %v16750_v32 = vcombine.high %v1335_v17, %v1339_v27  ;;  %v1199_v0 = vld [vmem:[#allocation4 + $0x22d8] sm:$0xff]  ;;  %v16749_v18 = vcombine.low %v1335_v17, %v1339_v27 }
 0x75e   :  { %14840 = vmatprep.subr.bf16.mxu0 %v16638_v23  ;;  %v1203_v15 = vld [vmem:[#allocation4 + $0x22f8] sm:$0xff] }
 0x75f   :  { %14880 = vmatpush2.bf16.msra.mxu1 %v16773_v16  ;;  %v1327_v38 = vld [vmem:[#allocation4 + $0x26d8] sm:$0xff]  ;;  %v16614_v19 = vcombine.high %v1199_v0, %v1203_v15  ;;  %v16613_v59 = vcombine.low %v1199_v0, %v1203_v15 }
 0x760   :  { %14881 = vmatprep.subr.bf16.mxu1 %v16766_v11  ;;  %v1331_v46 = vld [vmem:[#allocation4 + $0x26f8] sm:$0xff] }
 0x761   :  { %14841 = vmatpush2.bf16.msra.mxu0 %v16637_v33  ;;  %v16742_v42 = vcombine.high %v1327_v38, %v1331_v46  ;;  %v1191_v63 = vld [vmem:[#allocation4 + $0x2298] sm:$0xff]  ;;  %v16741_v2 = vcombine.low %v1327_v38, %v1331_v46 }
 0x762   :  { %14842 = vmatprep.subr.bf16.mxu0 %v16630_v8  ;;  %v1195_v58 = vld [vmem:[#allocation4 + $0x22b8] sm:$0xff] }
 0x763   :  { %14882 = vmatpush2.bf16.msra.mxu1 %v16765_v7  ;;  %v1319_v55 = vld [vmem:[#allocation4 + $0x2698] sm:$0xff]  ;;  %v16606_v62 = vcombine.high %v1191_v63, %v1195_v58  ;;  %v16605_v52 = vcombine.low %v1191_v63, %v1195_v58 }
 0x764   :  { %14883 = vmatprep.subr.bf16.mxu1 %v16758_v50  ;;  %v1323_v47 = vld [vmem:[#allocation4 + $0x26b8] sm:$0xff] }
 0x765   :  { %14843 = vmatpush2.bf16.msra.mxu0 %v16629_v34  ;;  %v16734_v49 = vcombine.high %v1319_v55, %v1323_v47  ;;  %v1183_v12 = vld [vmem:[#allocation4 + $0x2258] sm:$0xff]  ;;  %v16733_v35 = vcombine.low %v1319_v55, %v1323_v47 }
 0x766   :  { %14844 = vmatprep.subr.bf16.mxu0 %v16622_v40  ;;  %v1187_v61 = vld [vmem:[#allocation4 + $0x2278] sm:$0xff] }
 0x767   :  { %14884 = vmatpush2.bf16.msra.mxu1 %v16757_v28  ;;  %v1311_v3 = vld [vmem:[#allocation4 + $0x2658] sm:$0xff]  ;;  %v16598_v24 = vcombine.high %v1183_v12, %v1187_v61  ;;  %v16597_v20 = vcombine.low %v1183_v12, %v1187_v61 }
 0x768   :  { %14885 = vmatprep.subr.bf16.mxu1 %v16750_v32  ;;  %v1315_v30 = vld [vmem:[#allocation4 + $0x2678] sm:$0xff] }
 0x769   :  { %14845 = vmatpush2.bf16.msra.mxu0 %v16621_v41  ;;  %v16726_v9 = vcombine.high %v1311_v3, %v1315_v30  ;;  %v1175_v16 = vld [vmem:[#allocation4 + $0x2218] sm:$0xff]  ;;  %v16725_v4 = vcombine.low %v1311_v3, %v1315_v30 }
 0x76a   :  { %14846 = vmatprep.subr.bf16.mxu0 %v16614_v19  ;;  %v1179_v23 = vld [vmem:[#allocation4 + $0x2238] sm:$0xff] }
 0x76b   :  { %14886 = vmatpush2.bf16.msra.mxu1 %v16749_v18  ;;  %v1303_v11 = vld [vmem:[#allocation4 + $0x2618] sm:$0xff]  ;;  %v16590_v60 = vcombine.high %v1175_v16, %v1179_v23  ;;  %v16589_v36 = vcombine.low %v1175_v16, %v1179_v23 }
 0x76c   :  { %14887 = vmatprep.subr.bf16.mxu1 %v16742_v42  ;;  %v1307_v13 = vld [vmem:[#allocation4 + $0x2638] sm:$0xff] }
 0x76d   :  { %14847 = vmatpush2.bf16.msra.mxu0 %v16613_v59  ;;  %v16718_v33 = vcombine.high %v1303_v11, %v1307_v13  ;;  %v1423_v7 = vld [vmem:[#allocation4 + $0x29d8] sm:$0xff]  ;;  %v16717_v17 = vcombine.low %v1303_v11, %v1307_v13 }
 0x76e   :  { %14848 = vmatprep.subr.bf16.mxu0 %v16606_v62  ;;  %v1427_v8 = vld [vmem:[#allocation4 + $0x29f8] sm:$0xff] }
 0x76f   :  { %14888 = vmatpush2.bf16.msra.mxu1 %v16741_v2  ;;  %v1551_v50 = vld [vmem:[#allocation4 + $0x2dd8] sm:$0xff]  ;;  %v16838_v27 = vcombine.high %v1423_v7, %v1427_v8  ;;  %v16837_v15 = vcombine.low %v1423_v7, %v1427_v8 }
 0x770   :  { %14889 = vmatprep.subr.bf16.mxu1 %v16734_v49  ;;  %v1555_v56 = vld [vmem:[#allocation4 + $0x2df8] sm:$0xff] }
 0x771   :  { %14849 = vmatpush2.bf16.msra.mxu0 %v16605_v52  ;;  %v16966_v34 = vcombine.high %v1551_v50, %v1555_v56  ;;  %v1415_v28 = vld [vmem:[#allocation4 + $0x2998] sm:$0xff]  ;;  %v16965_v38 = vcombine.low %v1551_v50, %v1555_v56 }
 0x772   :  { %14850 = vmatprep.subr.bf16.mxu0 %v16598_v24  ;;  %v1419_v40 = vld [vmem:[#allocation4 + $0x29b8] sm:$0xff] }
 0x773   :  { %14890 = vmatpush2.bf16.msra.mxu1 %v16733_v35  ;;  %v1543_v32 = vld [vmem:[#allocation4 + $0x2d98] sm:$0xff]  ;;  %v16830_v46 = vcombine.high %v1415_v28, %v1419_v40  ;;  %v16829_v59 = vcombine.low %v1415_v28, %v1419_v40 }
 0x774   :  { %14891 = vmatprep.subr.bf16.mxu1 %v16726_v9  ;;  %v1547_v0 = vld [vmem:[#allocation4 + $0x2db8] sm:$0xff] }
 0x775   :  { %14851 = vmatpush2.bf16.msra.mxu0 %v16597_v20  ;;  %v16958_v41 = vcombine.high %v1543_v32, %v1547_v0  ;;  %v1407_v18 = vld [vmem:[#allocation4 + $0x2958] sm:$0xff]  ;;  %v16957_v62 = vcombine.low %v1543_v32, %v1547_v0 }
 0x776   :  { %14852 = vmatprep.subr.bf16.mxu0 %v16590_v60  ;;  %v1411_v19 = vld [vmem:[#allocation4 + $0x2978] sm:$0xff] }
 0x777   :  { %14892 = vmatpush2.bf16.msra.mxu1 %v16725_v4  ;;  %v1535_v63 = vld [vmem:[#allocation4 + $0x2d58] sm:$0xff]  ;;  %v16822_v49 = vcombine.high %v1407_v18, %v1411_v19  ;;  %v16821_v16 = vcombine.low %v1407_v18, %v1411_v19 }
 0x778   :  { %14893 = vmatprep.subr.bf16.mxu1 %v16718_v33  ;;  %v1539_v58 = vld [vmem:[#allocation4 + $0x2d78] sm:$0xff] }
 0x779   :  { %14853 = vmatpush2.bf16.msra.mxu0 %v16589_v36  ;;  %v1399_v30 = vld [vmem:[#allocation4 + $0x2918] sm:$0xff] }
 0x77a   :  { %14904 = vmatprep.subr.bf16.mxu0 %v16838_v27  ;;  %v1403_v52 = vld [vmem:[#allocation4 + $0x2938] sm:$0xff] }
 0x77b   :  { %14894 = vmatpush2.bf16.msra.mxu1 %v16717_v17  ;;  %v1531_v35 = vld [vmem:[#allocation4 + $0x2d38] sm:$0xff]  ;;  %v16814_v11 = vcombine.high %v1399_v30, %v1403_v52  ;;  %v16813_v7 = vcombine.low %v1399_v30, %v1403_v52 }
 0x77c   :  { %14945 = vmatprep.subr.bf16.mxu1 %v16966_v34  ;;  %v14610_v42 = vpop.f32.mrf.mxu0  ;;  %14855 = vmatmul.mubr.bf16.vlgmr.msra.gmra.mxu0 %v17837_v21  ;;  %v16950_v21 = vcombine.high %v1535_v63, %v1539_v58  ;;  %v1391_v4 = vld [vmem:[#allocation4 + $0x28d8] sm:$0xff] }
 0x77d   :  { %v14611_v55 = vadd.f32 %v14610_v42, %v18140_v29  ;;  %14905 = vmatpush1.bf16.msra.mxu0 %v16837_v15  ;;  %14936 = vmatprep.mubr.bf16.mxu0 %v17849_v37  ;;  %v1395_v37 = vld [vmem:[#allocation4 + $0x28f8] sm:$0xff] }
 0x77e   :  { %v14651_v47 = vpop.f32.mrf.mxu1  ;;  %14896 = vmatmul.mubr.bf16.vlgmr.msra.gmra.mxu1 %v17843_v26  ;;  %v14612_v2 = vpop.f32.mrf.mxu0  ;;  %14906 = vmatprep.subr.bf16.mxu0 %v16830_v46  ;;  %v1527_v26 = vld [vmem:[#allocation4 + $0x2d18] sm:$0xff]  ;;  %v16806_v8 = vcombine.high %v1391_v4, %v1395_v37  ;;  %v16805_v34 = vcombine.low %v1391_v4, %v1395_v37 }
 0x77f   :  { %14946 = vmatpush1.bf16.msra.mxu1 %v16965_v38  ;;  %v18149_v12 = vadd.f32 %v14651_v47, %v14611_v55  ;;  %v14613_v61 = vadd.f32 %v14612_v2, %v18144_v39  ;;  %14977 = vmatprep.mubr.bf16.mxu1 %v17854_v43  ;;  %v16949_v39 = vcombine.low %v1535_v63, %v1539_v58  ;;  %v1519_v60 = vld [vmem:[#allocation4 + $0x2cd8] sm:$0xff] }
 0x780   :  { %v14653_v3 = vpop.f32.mrf.mxu1  ;;  %14947 = vmatprep.subr.bf16.mxu1 %v16958_v41  ;;  %v14614_v29 = vpop.f32.mrf.mxu0  ;;  %v16942_v20 = vcombine.high %v1527_v26, %v1531_v35  ;;  %v1523_v33 = vld [vmem:[#allocation4 + $0x2cf8] sm:$0xff]  ;;  %v16941_v43 = vcombine.low %v1527_v26, %v1531_v35 }
 0x781   :  { %v18154_v24 = vadd.f32 %v14653_v3, %v14613_v61  ;;  %14907 = vmatpush1.bf16.msra.mxu0 %v16829_v59  ;;  %v16934_v50 = vcombine.high %v1519_v60, %v1523_v33  ;;  %v1383_v56 = vld [vmem:[#allocation4 + $0x2898] sm:$0xff]  ;;  %v16933_v28 = vcombine.low %v1519_v60, %v1523_v33 }
 0x782   :  { %v14655_v9 = vpop.f32.mrf.mxu1  ;;  %v14615_v23 = vpop.f32.mrf.mxu0  ;;  %14908 = vmatprep.subr.bf16.mxu0 %v16822_v49  ;;  %v1387_v36 = vld [vmem:[#allocation4 + $0x28b8] sm:$0xff] }
 0x783   :  { %14948 = vmatpush1.bf16.msra.mxu1 %v16957_v62  ;;  %v1511_v17 = vld [vmem:[#allocation4 + $0x2c98] sm:$0xff]  ;;  %v16798_v40 = vcombine.high %v1383_v56, %v1387_v36  ;;  %v16797_v41 = vcombine.low %v1383_v56, %v1387_v36 }
 0x784   :  { %v14656_v13 = vpop.f32.mrf.mxu1  ;;  %14949 = vmatprep.subr.bf16.mxu1 %v16950_v21  ;;  %v1515_v27 = vld [vmem:[#allocation4 + $0x2cb8] sm:$0xff] }
 0x785   :  { %14909 = vmatpush1.bf16.msra.mxu0 %v16821_v16  ;;  %v16926_v32 = vcombine.high %v1511_v17, %v1515_v27  ;;  %v1375_v0 = vld [vmem:[#allocation4 + $0x2858] sm:$0xff]  ;;  %v16925_v18 = vcombine.low %v1511_v17, %v1515_v27 }
 0x786   :  { %14910 = vmatprep.subr.bf16.mxu0 %v16814_v11  ;;  %v1379_v15 = vld [vmem:[#allocation4 + $0x2878] sm:$0xff] }
 0x787   :  { %14950 = vmatpush1.bf16.msra.mxu1 %v16949_v39  ;;  %v1503_v38 = vld [vmem:[#allocation4 + $0x2c58] sm:$0xff]  ;;  %v16790_v19 = vcombine.high %v1375_v0, %v1379_v15  ;;  %v16789_v59 = vcombine.low %v1375_v0, %v1379_v15 }
 0x788   :  { %14951 = vmatprep.subr.bf16.mxu1 %v16942_v20  ;;  %v1507_v46 = vld [vmem:[#allocation4 + $0x2c78] sm:$0xff] }
 0x789   :  { %14911 = vmatpush1.bf16.msra.mxu0 %v16813_v7  ;;  %v16918_v42 = vcombine.high %v1503_v38, %v1507_v46  ;;  %v1367_v63 = vld [vmem:[#allocation4 + $0x2818] sm:$0xff]  ;;  %v16917_v2 = vcombine.low %v1503_v38, %v1507_v46 }
 0x78a   :  { %14912 = vmatprep.subr.bf16.mxu0 %v16806_v8  ;;  %v1371_v58 = vld [vmem:[#allocation4 + $0x2838] sm:$0xff] }
 0x78b   :  { %14952 = vmatpush1.bf16.msra.mxu1 %v16941_v43  ;;  %v1495_v55 = vld [vmem:[#allocation4 + $0x2c18] sm:$0xff]  ;;  %v16782_v62 = vcombine.high %v1367_v63, %v1371_v58  ;;  %v16781_v52 = vcombine.low %v1367_v63, %v1371_v58 }
 0x78c   :  { %14953 = vmatprep.subr.bf16.mxu1 %v16934_v50  ;;  %v1499_v47 = vld [vmem:[#allocation4 + $0x2c38] sm:$0xff] }
 0x78d   :  { %14913 = vmatpush1.bf16.msra.mxu0 %v16805_v34  ;;  %v16910_v49 = vcombine.high %v1495_v55, %v1499_v47  ;;  %v1487_v61 = vld [vmem:[#allocation4 + $0x2bd8] sm:$0xff]  ;;  %v16909_v29 = vcombine.low %v1495_v55, %v1499_v47 }
 0x78e   :  { %14914 = vmatprep.subr.bf16.mxu0 %v16798_v40  ;;  %v1491_v3 = vld [vmem:[#allocation4 + $0x2bf8] sm:$0xff] }
 0x78f   :  { %14954 = vmatpush1.bf16.msra.mxu1 %v16933_v28  ;;  %v1615_v21 = vld [vmem:[#allocation4 + $0x2fd8] sm:$0xff]  ;;  %v16902_v26 = vcombine.high %v1487_v61, %v1491_v3  ;;  %v16901_v11 = vcombine.low %v1487_v61, %v1491_v3 }
 0x790   :  { %14955 = vmatprep.subr.bf16.mxu1 %v16926_v32  ;;  %v1619_v30 = vld [vmem:[#allocation4 + $0x2ff8] sm:$0xff] }
 0x791   :  { %14915 = vmatpush1.bf16.msra.mxu0 %v16797_v41  ;;  %v17030_v35 = vcombine.high %v1615_v21, %v1619_v30  ;;  %v1479_v9 = vld [vmem:[#allocation4 + $0x2b98] sm:$0xff]  ;;  %v17029_v13 = vcombine.low %v1615_v21, %v1619_v30 }
 0x792   :  { %14916 = vmatprep.subr.bf16.mxu0 %v16790_v19  ;;  %v1483_v16 = vld [vmem:[#allocation4 + $0x2bb8] sm:$0xff] }
 0x793   :  { %14956 = vmatpush1.bf16.msra.mxu1 %v16925_v18  ;;  %v1607_v23 = vld [vmem:[#allocation4 + $0x2f98] sm:$0xff]  ;;  %v16894_v20 = vcombine.high %v1479_v9, %v1483_v16  ;;  %v16893_v43 = vcombine.low %v1479_v9, %v1483_v16 }
 0x794   :  { %14957 = vmatprep.subr.bf16.mxu1 %v16918_v42  ;;  %v1611_v39 = vld [vmem:[#allocation4 + $0x2fb8] sm:$0xff] }
 0x795   :  { %14917 = vmatpush1.bf16.msra.mxu0 %v16789_v59  ;;  %v17022_v4 = vcombine.high %v1607_v23, %v1611_v39  ;;  %v1471_v37 = vld [vmem:[#allocation4 + $0x2b58] sm:$0xff]  ;;  %v17021_v8 = vcombine.low %v1607_v23, %v1611_v39 }
 0x796   :  { %14918 = vmatprep.subr.bf16.mxu0 %v16782_v62  ;;  %v1475_v60 = vld [vmem:[#allocation4 + $0x2b78] sm:$0xff] }
 0x797   :  { %14958 = vmatpush1.bf16.msra.mxu1 %v16917_v2  ;;  %v1599_v33 = vld [vmem:[#allocation4 + $0x2f58] sm:$0xff]  ;;  %v16886_v50 = vcombine.high %v1471_v37, %v1475_v60  ;;  %v16885_v28 = vcombine.low %v1471_v37, %v1475_v60 }
 0x798   :  { %14959 = vmatprep.subr.bf16.mxu1 %v16910_v49  ;;  %v1603_v7 = vld [vmem:[#allocation4 + $0x2f78] sm:$0xff] }
 0x799   :  { %14919 = vmatpush1.bf16.msra.mxu0 %v16781_v52  ;;  %v17014_v56 = vcombine.high %v1599_v33, %v1603_v7  ;;  %v1463_v36 = vld [vmem:[#allocation4 + $0x2b18] sm:$0xff]  ;;  %v17013_v40 = vcombine.low %v1599_v33, %v1603_v7 }
 0x79a   :  { %14920 = vmatprep.subr.bf16.mxu0 %v16902_v26  ;;  %v1467_v17 = vld [vmem:[#allocation4 + $0x2b38] sm:$0xff] }
 0x79b   :  { %14960 = vmatpush1.bf16.msra.mxu1 %v16909_v29  ;;  %v1591_v27 = vld [vmem:[#allocation4 + $0x2f18] sm:$0xff]  ;;  %v16878_v32 = vcombine.high %v1463_v36, %v1467_v17  ;;  %v16877_v18 = vcombine.low %v1463_v36, %v1467_v17 }
 0x79c   :  { %14961 = vmatprep.subr.bf16.mxu1 %v17030_v35  ;;  %v1595_v34 = vld [vmem:[#allocation4 + $0x2f38] sm:$0xff] }
 0x79d   :  { %14921 = vmatpush2.bf16.msra.mxu0 %v16901_v11  ;;  %v17006_v0 = vcombine.high %v1591_v27, %v1595_v34  ;;  %v1455_v15 = vld [vmem:[#allocation4 + $0x2ad8] sm:$0xff]  ;;  %v17005_v19 = vcombine.low %v1591_v27, %v1595_v34 }
 0x79e   :  { %14922 = vmatprep.subr.bf16.mxu0 %v16894_v20  ;;  %v1459_v38 = vld [vmem:[#allocation4 + $0x2af8] sm:$0xff] }
 0x79f   :  { %14962 = vmatpush2.bf16.msra.mxu1 %v17029_v13  ;;  %v1583_v46 = vld [vmem:[#allocation4 + $0x2ed8] sm:$0xff]  ;;  %v16870_v42 = vcombine.high %v1455_v15, %v1459_v38  ;;  %v16869_v2 = vcombine.low %v1455_v15, %v1459_v38 }
 0x7a0   :  { %14963 = vmatprep.subr.bf16.mxu1 %v17022_v4  ;;  %v1587_v41 = vld [vmem:[#allocation4 + $0x2ef8] sm:$0xff] }
 0x7a1   :  { %14923 = vmatpush2.bf16.msra.mxu0 %v16893_v43  ;;  %v16998_v63 = vcombine.high %v1583_v46, %v1587_v41  ;;  %v1447_v58 = vld [vmem:[#allocation4 + $0x2a98] sm:$0xff]  ;;  %v16997_v62 = vcombine.low %v1583_v46, %v1587_v41 }
 0x7a2   :  { %14924 = vmatprep.subr.bf16.mxu0 %v16886_v50  ;;  %v1451_v55 = vld [vmem:[#allocation4 + $0x2ab8] sm:$0xff] }
 0x7a3   :  { %14964 = vmatpush2.bf16.msra.mxu1 %v17021_v8  ;;  %v1575_v47 = vld [vmem:[#allocation4 + $0x2e98] sm:$0xff]  ;;  %v16862_v49 = vcombine.high %v1447_v58, %v1451_v55  ;;  %v16861_v29 = vcombine.low %v1447_v58, %v1451_v55 }
 0x7a4   :  { %14965 = vmatprep.subr.bf16.mxu1 %v17014_v56  ;;  %v1579_v59 = vld [vmem:[#allocation4 + $0x2eb8] sm:$0xff] }
 0x7a5   :  { %14925 = vmatpush2.bf16.msra.mxu0 %v16885_v28  ;;  %v16990_v61 = vcombine.high %v1575_v47, %v1579_v59  ;;  %v1439_v3 = vld [vmem:[#allocation4 + $0x2a58] sm:$0xff]  ;;  %v16989_v26 = vcombine.low %v1575_v47, %v1579_v59 }
 0x7a6   :  { %14926 = vmatprep.subr.bf16.mxu0 %v16878_v32  ;;  %v1443_v21 = vld [vmem:[#allocation4 + $0x2a78] sm:$0xff] }
 0x7a7   :  { %14966 = vmatpush2.bf16.msra.mxu1 %v17013_v40  ;;  %v1567_v30 = vld [vmem:[#allocation4 + $0x2e58] sm:$0xff]  ;;  %v16854_v35 = vcombine.high %v1439_v3, %v1443_v21  ;;  %v16853_v13 = vcombine.low %v1439_v3, %v1443_v21 }
 0x7a8   :  { %14967 = vmatprep.subr.bf16.mxu1 %v17006_v0  ;;  %v1571_v52 = vld [vmem:[#allocation4 + $0x2e78] sm:$0xff] }
 0x7a9   :  { %14927 = vmatpush2.bf16.msra.mxu0 %v16877_v18  ;;  %v16982_v9 = vcombine.high %v1567_v30, %v1571_v52  ;;  %v1431_v16 = vld [vmem:[#allocation4 + $0x2a18] sm:$0xff]  ;;  %v16981_v20 = vcombine.low %v1567_v30, %v1571_v52 }
 0x7aa   :  { %14928 = vmatprep.subr.bf16.mxu0 %v16870_v42  ;;  %v1435_v23 = vld [vmem:[#allocation4 + $0x2a38] sm:$0xff] }
 0x7ab   :  { %14968 = vmatpush2.bf16.msra.mxu1 %v17005_v19  ;;  %v1559_v39 = vld [vmem:[#allocation4 + $0x2e18] sm:$0xff]  ;;  %v16846_v4 = vcombine.high %v1431_v16, %v1435_v23  ;;  %v16845_v8 = vcombine.low %v1431_v16, %v1435_v23 }
 0x7ac   :  { %14969 = vmatprep.subr.bf16.mxu1 %v16998_v63  ;;  %v1563_v11 = vld [vmem:[#allocation4 + $0x2e38] sm:$0xff] }
 0x7ad   :  { %14929 = vmatpush2.bf16.msra.mxu0 %v16869_v2  ;;  %v16974_v37 = vcombine.high %v1559_v39, %v1563_v11  ;;  %v1679_v60 = vld [vmem:[#allocation4 + $0x31d8] sm:$0xff]  ;;  %v16973_v50 = vcombine.low %v1559_v39, %v1563_v11 }
 0x7ae   :  { %14930 = vmatprep.subr.bf16.mxu0 %v16862_v49  ;;  %v1683_v33 = vld [vmem:[#allocation4 + $0x31f8] sm:$0xff] }
 0x7af   :  { %14970 = vmatpush2.bf16.msra.mxu1 %v16997_v62  ;;  %v1807_v7 = vld [vmem:[#allocation4 + $0x35d8] sm:$0xff]  ;;  %v17094_v56 = vcombine.high %v1679_v60, %v1683_v33  ;;  %v17093_v40 = vcombine.low %v1679_v60, %v1683_v33 }
 0x7b0   :  { %14971 = vmatprep.subr.bf16.mxu1 %v16990_v61  ;;  %v1811_v43 = vld [vmem:[#allocation4 + $0x35f8] sm:$0xff] }
 0x7b1   :  { %14931 = vmatpush2.bf16.msra.mxu0 %v16861_v29  ;;  %v17222_v36 = vcombine.high %v1807_v7, %v1811_v43  ;;  %v1671_v17 = vld [vmem:[#allocation4 + $0x3198] sm:$0xff]  ;;  %v17221_v32 = vcombine.low %v1807_v7, %v1811_v43 }
 0x7b2   :  { %14932 = vmatprep.subr.bf16.mxu0 %v16854_v35  ;;  %v1675_v27 = vld [vmem:[#allocation4 + $0x31b8] sm:$0xff] }
 0x7b3   :  { %14972 = vmatpush2.bf16.msra.mxu1 %v16989_v26  ;;  %v1799_v34 = vld [vmem:[#allocation4 + $0x3598] sm:$0xff]  ;;  %v17086_v0 = vcombine.high %v1671_v17, %v1675_v27  ;;  %v17085_v58 = vcombine.low %v1671_v17, %v1675_v27 }
 0x7b4   :  { %14973 = vmatprep.subr.bf16.mxu1 %v16982_v9  ;;  %v1803_v28 = vld [vmem:[#allocation4 + $0x35b8] sm:$0xff] }
 0x7b5   :  { %14933 = vmatpush2.bf16.msra.mxu0 %v16853_v13  ;;  %v17214_v15 = vcombine.high %v1799_v34, %v1803_v28  ;;  %v1663_v38 = vld [vmem:[#allocation4 + $0x3158] sm:$0xff]  ;;  %v17213_v47 = vcombine.low %v1799_v34, %v1803_v28 }
 0x7b6   :  { %14934 = vmatprep.subr.bf16.mxu0 %v16846_v4  ;;  %v1667_v46 = vld [vmem:[#allocation4 + $0x3178] sm:$0xff] }
 0x7b7   :  { %14974 = vmatpush2.bf16.msra.mxu1 %v16981_v20  ;;  %v1791_v18 = vld [vmem:[#allocation4 + $0x3558] sm:$0xff]  ;;  %v17078_v59 = vcombine.high %v1663_v38, %v1667_v46  ;;  %v17077_v29 = vcombine.low %v1663_v38, %v1667_v46 }
 0x7b8   :  { %14975 = vmatprep.subr.bf16.mxu1 %v16974_v37  ;;  %v1795_v19 = vld [vmem:[#allocation4 + $0x3578] sm:$0xff] }
 0x7b9   :  { %14935 = vmatpush2.bf16.msra.mxu0 %v16845_v8  ;;  %v1655_v61 = vld [vmem:[#allocation4 + $0x3118] sm:$0xff] }
 0x7ba   :  { %14986 = vmatprep.subr.bf16.mxu0 %v17094_v56  ;;  %v1659_v3 = vld [vmem:[#allocation4 + $0x3138] sm:$0xff] }
 0x7bb   :  { %14976 = vmatpush2.bf16.msra.mxu1 %v16973_v50  ;;  %v1787_v21 = vld [vmem:[#allocation4 + $0x3538] sm:$0xff]  ;;  %v17070_v35 = vcombine.high %v1655_v61, %v1659_v3  ;;  %v17069_v13 = vcombine.low %v1655_v61, %v1659_v3 }
 0x7bc   :  { %15027 = vmatprep.subr.bf16.mxu1 %v17222_v36  ;;  %v14692_v41 = vpop.f32.mrf.mxu0  ;;  %14937 = vmatmul.mubr.bf16.vlgmr.msra.gmra.mxu0 %v17867_v5  ;;  %v17206_v5 = vcombine.high %v1791_v18, %v1795_v19  ;;  %v1647_v23 = vld [vmem:[#allocation4 + $0x30d8] sm:$0xff] }
 0x7bd   :  { %v14693_v42 = vadd.f32 %v14692_v41, %v18149_v12  ;;  %14987 = vmatpush1.bf16.msra.mxu0 %v17093_v40  ;;  %15018 = vmatprep.mubr.bf16.mxu0 %v17879_v25  ;;  %v1651_v25 = vld [vmem:[#allocation4 + $0x30f8] sm:$0xff] }
 0x7be   :  { %v14733_v63 = vpop.f32.mrf.mxu1  ;;  %14978 = vmatmul.mubr.bf16.vlgmr.msra.gmra.mxu1 %v17873_v10  ;;  %v14694_v55 = vpop.f32.mrf.mxu0  ;;  %14988 = vmatprep.subr.bf16.mxu0 %v17086_v0  ;;  %v1783_v10 = vld [vmem:[#allocation4 + $0x3518] sm:$0xff]  ;;  %v17062_v20 = vcombine.high %v1647_v23, %v1651_v25  ;;  %v17061_v43 = vcombine.low %v1647_v23, %v1651_v25 }
 0x7bf   :  { %15028 = vmatpush1.bf16.msra.mxu1 %v17221_v32  ;;  %v18159_v2 = vadd.f32 %v14733_v63, %v14693_v42  ;;  %v14695_v62 = vadd.f32 %v14694_v55, %v18154_v24  ;;  %15059 = vmatprep.mubr.bf16.mxu1 %v17884_v31  ;;  %v17205_v24 = vcombine.low %v1791_v18, %v1795_v19  ;;  %v1775_v39 = vld [vmem:[#allocation4 + $0x34d8] sm:$0xff] }
 0x7c0   :  { %v14735_v49 = vpop.f32.mrf.mxu1  ;;  %15029 = vmatprep.subr.bf16.mxu1 %v17214_v15  ;;  %v14696_v12 = vpop.f32.mrf.mxu0  ;;  %v17198_v16 = vcombine.high %v1783_v10, %v1787_v21  ;;  %v1779_v11 = vld [vmem:[#allocation4 + $0x34f8] sm:$0xff]  ;;  %v17197_v31 = vcombine.low %v1783_v10, %v1787_v21 }
 0x7c1   :  { %v18164_v30 = vadd.f32 %v14735_v49, %v14695_v62  ;;  %14989 = vmatpush1.bf16.msra.mxu0 %v17085_v58  ;;  %v17190_v4 = vcombine.high %v1775_v39, %v1779_v11  ;;  %v1639_v37 = vld [vmem:[#allocation4 + $0x3098] sm:$0xff]  ;;  %v17189_v8 = vcombine.low %v1775_v39, %v1779_v11 }
 0x7c2   :  { %v14737_v52 = vpop.f32.mrf.mxu1  ;;  %v14697_v26 = vpop.f32.mrf.mxu0  ;;  %14990 = vmatprep.subr.bf16.mxu0 %v17078_v59  ;;  %v1643_v60 = vld [vmem:[#allocation4 + $0x30b8] sm:$0xff] }
 0x7c3   :  { %15030 = vmatpush1.bf16.msra.mxu1 %v17213_v47  ;;  %v1767_v33 = vld [vmem:[#allocation4 + $0x3498] sm:$0xff]  ;;  %v17054_v50 = vcombine.high %v1639_v37, %v1643_v60  ;;  %v17053_v28 = vcombine.low %v1639_v37, %v1643_v60 }
 0x7c4   :  { %v14738_v9 = vpop.f32.mrf.mxu1  ;;  %15031 = vmatprep.subr.bf16.mxu1 %v17206_v5  ;;  %v1771_v7 = vld [vmem:[#allocation4 + $0x34b8] sm:$0xff] }
 0x7c5   :  { %14991 = vmatpush1.bf16.msra.mxu0 %v17077_v29  ;;  %v17182_v56 = vcombine.high %v1767_v33, %v1771_v7  ;;  %v1631_v36 = vld [vmem:[#allocation4 + $0x3058] sm:$0xff]  ;;  %v17181_v40 = vcombine.low %v1767_v33, %v1771_v7 }
 0x7c6   :  { %14992 = vmatprep.subr.bf16.mxu0 %v17070_v35  ;;  %v1635_v17 = vld [vmem:[#allocation4 + $0x3078] sm:$0xff] }
 0x7c7   :  { %15032 = vmatpush1.bf16.msra.mxu1 %v17205_v24  ;;  %v1759_v27 = vld [vmem:[#allocation4 + $0x3458] sm:$0xff]  ;;  %v17046_v32 = vcombine.high %v1631_v36, %v1635_v17  ;;  %v17045_v18 = vcombine.low %v1631_v36, %v1635_v17 }
 0x7c8   :  { %15033 = vmatprep.subr.bf16.mxu1 %v17198_v16  ;;  %v1763_v34 = vld [vmem:[#allocation4 + $0x3478] sm:$0xff] }
 0x7c9   :  { %14993 = vmatpush1.bf16.msra.mxu0 %v17069_v13  ;;  %v17174_v0 = vcombine.high %v1759_v27, %v1763_v34  ;;  %v1623_v15 = vld [vmem:[#allocation4 + $0x3018] sm:$0xff]  ;;  %v17173_v19 = vcombine.low %v1759_v27, %v1763_v34 }
 0x7ca   :  { %14994 = vmatprep.subr.bf16.mxu0 %v17062_v20  ;;  %v1627_v38 = vld [vmem:[#allocation4 + $0x3038] sm:$0xff] }
 0x7cb   :  { %15034 = vmatpush1.bf16.msra.mxu1 %v17197_v31  ;;  %v1751_v46 = vld [vmem:[#allocation4 + $0x3418] sm:$0xff]  ;;  %v17038_v42 = vcombine.high %v1623_v15, %v1627_v38  ;;  %v17037_v62 = vcombine.low %v1623_v15, %v1627_v38 }
 0x7cc   :  { %15035 = vmatprep.subr.bf16.mxu1 %v17190_v4  ;;  %v1755_v41 = vld [vmem:[#allocation4 + $0x3438] sm:$0xff] }
 0x7cd   :  { %14995 = vmatpush1.bf16.msra.mxu0 %v17061_v43  ;;  %v17166_v63 = vcombine.high %v1751_v46, %v1755_v41  ;;  %v1743_v58 = vld [vmem:[#allocation4 + $0x33d8] sm:$0xff]  ;;  %v17165_v49 = vcombine.low %v1751_v46, %v1755_v41 }
 0x7ce   :  { %14996 = vmatprep.subr.bf16.mxu0 %v17054_v50  ;;  %v1747_v55 = vld [vmem:[#allocation4 + $0x33f8] sm:$0xff] }
 0x7cf   :  { %15036 = vmatpush1.bf16.msra.mxu1 %v17189_v8  ;;  %v1871_v47 = vld [vmem:[#allocation4 + $0x37d8] sm:$0xff]  ;;  %v17158_v5 = vcombine.high %v1743_v58, %v1747_v55  ;;  %v17157_v52 = vcombine.low %v1743_v58, %v1747_v55 }
 0x7d0   :  { %15037 = vmatprep.subr.bf16.mxu1 %v17182_v56  ;;  %v1875_v59 = vld [vmem:[#allocation4 + $0x37f8] sm:$0xff] }
 0x7d1   :  { %14997 = vmatpush1.bf16.msra.mxu0 %v17053_v28  ;;  %v17286_v61 = vcombine.high %v1871_v47, %v1875_v59  ;;  %v1735_v3 = vld [vmem:[#allocation4 + $0x3398] sm:$0xff]  ;;  %v17285_v29 = vcombine.low %v1871_v47, %v1875_v59 }
 0x7d2   :  { %14998 = vmatprep.subr.bf16.mxu0 %v17046_v32  ;;  %v1739_v12 = vld [vmem:[#allocation4 + $0x33b8] sm:$0xff] }
 0x7d3   :  { %15038 = vmatpush1.bf16.msra.mxu1 %v17181_v40  ;;  %v1863_v10 = vld [vmem:[#allocation4 + $0x3798] sm:$0xff]  ;;  %v17150_v26 = vcombine.high %v1735_v3, %v1739_v12  ;;  %v17149_v25 = vcombine.low %v1735_v3, %v1739_v12 }
 0x7d4   :  { %15039 = vmatprep.subr.bf16.mxu1 %v17174_v0  ;;  %v1867_v21 = vld [vmem:[#allocation4 + $0x37b8] sm:$0xff] }
 0x7d5   :  { %14999 = vmatpush1.bf16.msra.mxu0 %v17045_v18  ;;  %v17278_v24 = vcombine.high %v1863_v10, %v1867_v21  ;;  %v1727_v35 = vld [vmem:[#allocation4 + $0x3358] sm:$0xff]  ;;  %v17277_v39 = vcombine.low %v1863_v10, %v1867_v21 }
 0x7d6   :  { %15000 = vmatprep.subr.bf16.mxu0 %v17038_v42  ;;  %v1731_v9 = vld [vmem:[#allocation4 + $0x3378] sm:$0xff] }
 0x7d7   :  { %15040 = vmatpush1.bf16.msra.mxu1 %v17173_v19  ;;  %v1855_v16 = vld [vmem:[#allocation4 + $0x3758] sm:$0xff]  ;;  %v17142_v11 = vcombine.high %v1727_v35, %v1731_v9  ;;  %v17141_v60 = vcombine.low %v1727_v35, %v1731_v9 }
 0x7d8   :  { %15041 = vmatprep.subr.bf16.mxu1 %v17166_v63  ;;  %v1859_v23 = vld [vmem:[#allocation4 + $0x3778] sm:$0xff] }
 0x7d9   :  { %15001 = vmatpush1.bf16.msra.mxu0 %v17037_v62  ;;  %v17270_v13 = vcombine.high %v1855_v16, %v1859_v23  ;;  %v1719_v31 = vld [vmem:[#allocation4 + $0x3318] sm:$0xff]  ;;  %v17269_v33 = vcombine.low %v1855_v16, %v1859_v23 }
 0x7da   :  { %15002 = vmatprep.subr.bf16.mxu0 %v17158_v5  ;;  %v1723_v20 = vld [vmem:[#allocation4 + $0x3338] sm:$0xff] }
 0x7db   :  { %15042 = vmatpush1.bf16.msra.mxu1 %v17165_v49  ;;  %v1847_v4 = vld [vmem:[#allocation4 + $0x3718] sm:$0xff]  ;;  %v17134_v7 = vcombine.high %v1719_v31, %v1723_v20  ;;  %v17133_v17 = vcombine.low %v1719_v31, %v1723_v20 }
 0x7dc   :  { %15043 = vmatprep.subr.bf16.mxu1 %v17286_v61  ;;  %v1851_v37 = vld [vmem:[#allocation4 + $0x3738] sm:$0xff] }
 0x7dd   :  { %15003 = vmatpush2.bf16.msra.mxu0 %v17157_v52  ;;  %v17262_v43 = vcombine.high %v1847_v4, %v1851_v37  ;;  %v1711_v8 = vld [vmem:[#allocation4 + $0x32d8] sm:$0xff]  ;;  %v17261_v27 = vcombine.low %v1847_v4, %v1851_v37 }
 0x7de   :  { %15004 = vmatprep.subr.bf16.mxu0 %v17150_v26  ;;  %v1715_v50 = vld [vmem:[#allocation4 + $0x32f8] sm:$0xff] }
 0x7df   :  { %15044 = vmatpush2.bf16.msra.mxu1 %v17285_v29  ;;  %v1839_v56 = vld [vmem:[#allocation4 + $0x36d8] sm:$0xff]  ;;  %v17126_v34 = vcombine.high %v1711_v8, %v1715_v50  ;;  %v17125_v38 = vcombine.low %v1711_v8, %v1715_v50 }
 0x7e0   :  { %15045 = vmatprep.subr.bf16.mxu1 %v17278_v24  ;;  %v1843_v36 = vld [vmem:[#allocation4 + $0x36f8] sm:$0xff] }
 0x7e1   :  { %15005 = vmatpush2.bf16.msra.mxu0 %v17149_v25  ;;  %v17254_v28 = vcombine.high %v1839_v56, %v1843_v36  ;;  %v1703_v40 = vld [vmem:[#allocation4 + $0x3298] sm:$0xff]  ;;  %v17253_v46 = vcombine.low %v1839_v56, %v1843_v36 }
 0x7e2   :  { %15006 = vmatprep.subr.bf16.mxu0 %v17142_v11  ;;  %v1707_v32 = vld [vmem:[#allocation4 + $0x32b8] sm:$0xff] }
 0x7e3   :  { %15046 = vmatpush2.bf16.msra.mxu1 %v17277_v39  ;;  %v1831_v0 = vld [vmem:[#allocation4 + $0x3698] sm:$0xff]  ;;  %v17118_v41 = vcombine.high %v1703_v40, %v1707_v32  ;;  %v17117_v55 = vcombine.low %v1703_v40, %v1707_v32 }
 0x7e4   :  { %15047 = vmatprep.subr.bf16.mxu1 %v17270_v13  ;;  %v1835_v15 = vld [vmem:[#allocation4 + $0x36b8] sm:$0xff] }
 0x7e5   :  { %15007 = vmatpush2.bf16.msra.mxu0 %v17141_v60  ;;  %v17246_v18 = vcombine.high %v1831_v0, %v1835_v15  ;;  %v1695_v19 = vld [vmem:[#allocation4 + $0x3258] sm:$0xff]  ;;  %v17245_v47 = vcombine.low %v1831_v0, %v1835_v15 }
 0x7e6   :  { %15008 = vmatprep.subr.bf16.mxu0 %v17134_v7  ;;  %v1699_v42 = vld [vmem:[#allocation4 + $0x3278] sm:$0xff] }
 0x7e7   :  { %15048 = vmatpush2.bf16.msra.mxu1 %v17269_v33  ;;  %v1823_v63 = vld [vmem:[#allocation4 + $0x3658] sm:$0xff]  ;;  %v17110_v59 = vcombine.high %v1695_v19, %v1699_v42  ;;  %v17109_v12 = vcombine.low %v1695_v19, %v1699_v42 }
 0x7e8   :  { %15049 = vmatprep.subr.bf16.mxu1 %v17262_v43  ;;  %v1827_v58 = vld [vmem:[#allocation4 + $0x3678] sm:$0xff] }
 0x7e9   :  { %15009 = vmatpush2.bf16.msra.mxu0 %v17133_v17  ;;  %v17238_v62 = vcombine.high %v1823_v63, %v1827_v58  ;;  %v1687_v49 = vld [vmem:[#allocation4 + $0x3218] sm:$0xff]  ;;  %v17237_v10 = vcombine.low %v1823_v63, %v1827_v58 }
 0x7ea   :  { %15010 = vmatprep.subr.bf16.mxu0 %v17126_v34  ;;  %v1691_v5 = vld [vmem:[#allocation4 + $0x3238] sm:$0xff] }
 0x7eb   :  { %15050 = vmatpush2.bf16.msra.mxu1 %v17261_v27  ;;  %v1815_v61 = vld [vmem:[#allocation4 + $0x3618] sm:$0xff]  ;;  %v17102_v21 = vcombine.high %v1687_v49, %v1691_v5  ;;  %v17101_v9 = vcombine.low %v1687_v49, %v1691_v5 }
 0x7ec   :  { %15051 = vmatprep.subr.bf16.mxu1 %v17254_v28  ;;  %v1819_v3 = vld [vmem:[#allocation4 + $0x3638] sm:$0xff] }
 0x7ed   :  { %15011 = vmatpush2.bf16.msra.mxu0 %v17125_v38  ;;  %v17230_v52 = vcombine.high %v1815_v61, %v1819_v3  ;;  %v1935_v29 = vld [vmem:[#allocation4 + $0x39d8] sm:$0xff]  ;;  %v17229_v16 = vcombine.low %v1815_v61, %v1819_v3 }
 0x7ee   :  { %15012 = vmatprep.subr.bf16.mxu0 %v17118_v41  ;;  %v1939_v26 = vld [vmem:[#allocation4 + $0x39f8] sm:$0xff] }
 0x7ef   :  { %15052 = vmatpush2.bf16.msra.mxu1 %v17253_v46  ;;  %v2063_v24 = vld [vmem:[#allocation4 + $0x3dd8] sm:$0xff]  ;;  %v17350_v23 = vcombine.high %v1935_v29, %v1939_v26  ;;  %v17349_v20 = vcombine.low %v1935_v29, %v1939_v26 }
 0x7f0   :  { %15053 = vmatprep.subr.bf16.mxu1 %v17246_v18  ;;  %v2067_v35 = vld [vmem:[#allocation4 + $0x3df8] sm:$0xff] }
 0x7f1   :  { %15013 = vmatpush2.bf16.msra.mxu0 %v17117_v55  ;;  %v17478_v25 = vcombine.high %v2063_v24, %v2067_v35  ;;  %v1927_v39 = vld [vmem:[#allocation4 + $0x3998] sm:$0xff]  ;;  %v17477_v4 = vcombine.low %v2063_v24, %v2067_v35 }
 0x7f2   :  { %15014 = vmatprep.subr.bf16.mxu0 %v17110_v59  ;;  %v1931_v11 = vld [vmem:[#allocation4 + $0x39b8] sm:$0xff] }
 0x7f3   :  { %15054 = vmatpush2.bf16.msra.mxu1 %v17245_v47  ;;  %v2055_v13 = vld [vmem:[#allocation4 + $0x3d98] sm:$0xff]  ;;  %v17342_v37 = vcombine.high %v1927_v39, %v1931_v11  ;;  %v17341_v17 = vcombine.low %v1927_v39, %v1931_v11 }
 0x7f4   :  { %15055 = vmatprep.subr.bf16.mxu1 %v17238_v62  ;;  %v2059_v31 = vld [vmem:[#allocation4 + $0x3db8] sm:$0xff] }
 0x7f5   :  { %15015 = vmatpush2.bf16.msra.mxu0 %v17109_v12  ;;  %v17470_v60 = vcombine.high %v2055_v13, %v2059_v31  ;;  %v1919_v33 = vld [vmem:[#allocation4 + $0x3958] sm:$0xff]  ;;  %v17469_v34 = vcombine.low %v2055_v13, %v2059_v31 }
 0x7f6   :  { %15016 = vmatprep.subr.bf16.mxu0 %v17102_v21  ;;  %v1923_v7 = vld [vmem:[#allocation4 + $0x3978] sm:$0xff] }
 0x7f7   :  { %15056 = vmatpush2.bf16.msra.mxu1 %v17237_v10  ;;  %v2047_v8 = vld [vmem:[#allocation4 + $0x3d58] sm:$0xff]  ;;  %v17334_v28 = vcombine.high %v1919_v33, %v1923_v7  ;;  %v17333_v19 = vcombine.low %v1919_v33, %v1923_v7 }
 0x7f8   :  { %15057 = vmatprep.subr.bf16.mxu1 %v17230_v52  ;;  %v2051_v50 = vld [vmem:[#allocation4 + $0x3d78] sm:$0xff] }
 0x7f9   :  { %15017 = vmatpush2.bf16.msra.mxu0 %v17101_v9  ;;  %v1911_v15 = vld [vmem:[#allocation4 + $0x3918] sm:$0xff] }
 0x7fa   :  { %15068 = vmatprep.subr.bf16.mxu0 %v17350_v23  ;;  %v1915_v38 = vld [vmem:[#allocation4 + $0x3938] sm:$0xff] }
 0x7fb   :  { %15058 = vmatpush2.bf16.msra.mxu1 %v17229_v16  ;;  %v2043_v46 = vld [vmem:[#allocation4 + $0x3d38] sm:$0xff]  ;;  %v17326_v63 = vcombine.high %v1911_v15, %v1915_v38  ;;  %v17325_v49 = vcombine.low %v1911_v15, %v1915_v38 }
 0x7fc   :  { %15109 = vmatprep.subr.bf16.mxu1 %v17478_v25  ;;  %v14774_v43 = vpop.f32.mrf.mxu0  ;;  %15019 = vmatmul.mubr.bf16.vlgmr.msra.gmra.mxu0 %v17897_v53  ;;  %v17462_v53 = vcombine.high %v2047_v8, %v2051_v50  ;;  %v1903_v47 = vld [vmem:[#allocation4 + $0x38d8] sm:$0xff] }
 0x7fd   :  { %v14775_v56 = vadd.f32 %v14774_v43, %v18159_v2  ;;  %15069 = vmatpush1.bf16.msra.mxu0 %v17349_v20  ;;  %15100 = vmatprep.mubr.bf16.mxu0 %v17909_v45  ;;  %v1907_v45 = vld [vmem:[#allocation4 + $0x38f8] sm:$0xff] }
 0x7fe   :  { %v14815_v36 = vpop.f32.mrf.mxu1  ;;  %15060 = vmatmul.mubr.bf16.vlgmr.msra.gmra.mxu1 %v17903_v54  ;;  %v14776_v27 = vpop.f32.mrf.mxu0  ;;  %15070 = vmatprep.subr.bf16.mxu0 %v17342_v37  ;;  %v2039_v54 = vld [vmem:[#allocation4 + $0x3d18] sm:$0xff]  ;;  %v17318_v5 = vcombine.high %v1903_v47, %v1907_v45  ;;  %v17317_v52 = vcombine.low %v1903_v47, %v1907_v45 }
 0x7ff   :  { %15110 = vmatpush1.bf16.msra.mxu1 %v17477_v4  ;;  %v18169_v40 = vadd.f32 %v14815_v36, %v14775_v56  ;;  %v14777_v32 = vadd.f32 %v14776_v27, %v18164_v30  ;;  %15141 = vmatprep.mubr.bf16.mxu1 %v17914_v48  ;;  %v17461_v30 = vcombine.low %v2047_v8, %v2051_v50  ;;  %v2031_v59 = vld [vmem:[#allocation4 + $0x3cd8] sm:$0xff] }
 0x800   :  { %v14817_v0 = vpop.f32.mrf.mxu1  ;;  %15111 = vmatprep.subr.bf16.mxu1 %v17470_v60  ;;  %v14778_v2 = vpop.f32.mrf.mxu0  ;;  %v17454_v55 = vcombine.high %v2039_v54, %v2043_v46  ;;  %v2035_v62 = vld [vmem:[#allocation4 + $0x3cf8] sm:$0xff]  ;;  %v17453_v48 = vcombine.low %v2039_v54, %v2043_v46 }
 0x801   :  { %v18174_v41 = vadd.f32 %v14817_v0, %v14777_v32  ;;  %15071 = vmatpush1.bf16.msra.mxu0 %v17341_v17  ;;  %v17446_v61 = vcombine.high %v2031_v59, %v2035_v62  ;;  %v1895_v3 = vld [vmem:[#allocation4 + $0x3898] sm:$0xff]  ;;  %v17445_v29 = vcombine.low %v2031_v59, %v2035_v62 }
 0x802   :  { %v14819_v18 = vpop.f32.mrf.mxu1  ;;  %v14779_v42 = vpop.f32.mrf.mxu0  ;;  %15072 = vmatprep.subr.bf16.mxu0 %v17334_v28  ;;  %v1899_v12 = vld [vmem:[#allocation4 + $0x38b8] sm:$0xff] }
 0x803   :  { %15112 = vmatpush1.bf16.msra.mxu1 %v17469_v34  ;;  %v2023_v10 = vld [vmem:[#allocation4 + $0x3c98] sm:$0xff]  ;;  %v17310_v26 = vcombine.high %v1895_v3, %v1899_v12  ;;  %v17309_v25 = vcombine.low %v1895_v3, %v1899_v12 }
 0x804   :  { %v14820_v58 = vpop.f32.mrf.mxu1  ;;  %15113 = vmatprep.subr.bf16.mxu1 %v17462_v53  ;;  %v2027_v21 = vld [vmem:[#allocation4 + $0x3cb8] sm:$0xff] }
 0x805   :  { %15073 = vmatpush1.bf16.msra.mxu0 %v17333_v19  ;;  %v17438_v24 = vcombine.high %v2023_v10, %v2027_v21  ;;  %v1887_v35 = vld [vmem:[#allocation4 + $0x3858] sm:$0xff]  ;;  %v17437_v39 = vcombine.low %v2023_v10, %v2027_v21 }
 0x806   :  { %15074 = vmatprep.subr.bf16.mxu0 %v17326_v63  ;;  %v1891_v9 = vld [vmem:[#allocation4 + $0x3878] sm:$0xff] }
 0x807   :  { %15114 = vmatpush1.bf16.msra.mxu1 %v17461_v30  ;;  %v2015_v16 = vld [vmem:[#allocation4 + $0x3c58] sm:$0xff]  ;;  %v17302_v11 = vcombine.high %v1887_v35, %v1891_v9  ;;  %v17301_v60 = vcombine.low %v1887_v35, %v1891_v9 }
 0x808   :  { %15115 = vmatprep.subr.bf16.mxu1 %v17454_v55  ;;  %v2019_v23 = vld [vmem:[#allocation4 + $0x3c78] sm:$0xff] }
 0x809   :  { %15075 = vmatpush1.bf16.msra.mxu0 %v17325_v49  ;;  %v17430_v13 = vcombine.high %v2015_v16, %v2019_v23  ;;  %v1879_v31 = vld [vmem:[#allocation4 + $0x3818] sm:$0xff]  ;;  %v17429_v33 = vcombine.low %v2015_v16, %v2019_v23 }
 0x80a   :  { %15076 = vmatprep.subr.bf16.mxu0 %v17318_v5  ;;  %v1883_v20 = vld [vmem:[#allocation4 + $0x3838] sm:$0xff] }
 0x80b   :  { %15116 = vmatpush1.bf16.msra.mxu1 %v17453_v48  ;;  %v2007_v4 = vld [vmem:[#allocation4 + $0x3c18] sm:$0xff]  ;;  %v17294_v7 = vcombine.high %v1879_v31, %v1883_v20  ;;  %v17293_v17 = vcombine.low %v1879_v31, %v1883_v20 }
 0x80c   :  { %15117 = vmatprep.subr.bf16.mxu1 %v17446_v61  ;;  %v2011_v37 = vld [vmem:[#allocation4 + $0x3c38] sm:$0xff] }
 0x80d   :  { %15077 = vmatpush1.bf16.msra.mxu0 %v17317_v52  ;;  %v17422_v43 = vcombine.high %v2007_v4, %v2011_v37  ;;  %v1999_v8 = vld [vmem:[#allocation4 + $0x3bd8] sm:$0xff]  ;;  %v17421_v27 = vcombine.low %v2007_v4, %v2011_v37 }
 0x80e   :  { %15078 = vmatprep.subr.bf16.mxu0 %v17310_v26  ;;  %v2003_v50 = vld [vmem:[#allocation4 + $0x3bf8] sm:$0xff] }
 0x80f   :  { %15118 = vmatpush1.bf16.msra.mxu1 %v17445_v29  ;;  %v2127_v56 = vld [vmem:[#allocation4 + $0x3fd8] sm:$0xff]  ;;  %v17414_v34 = vcombine.high %v1999_v8, %v2003_v50  ;;  %v17413_v38 = vcombine.low %v1999_v8, %v2003_v50 }
 0x810   :  { %15119 = vmatprep.subr.bf16.mxu1 %v17438_v24  ;;  %v2131_v36 = vld [vmem:[#allocation4 + $0x3ff8] sm:$0xff] }
 0x811   :  { %15079 = vmatpush1.bf16.msra.mxu0 %v17309_v25  ;;  %v17542_v28 = vcombine.high %v2127_v56, %v2131_v36  ;;  %v1991_v32 = vld [vmem:[#allocation4 + $0x3b98] sm:$0xff]  ;;  %v17541_v2 = vcombine.low %v2127_v56, %v2131_v36 }
 0x812   :  { %15080 = vmatprep.subr.bf16.mxu0 %v17302_v11  ;;  %v1995_v0 = vld [vmem:[#allocation4 + $0x3bb8] sm:$0xff] }
 0x813   :  { %15120 = vmatpush1.bf16.msra.mxu1 %v17437_v39  ;;  %v2119_v53 = vld [vmem:[#allocation4 + $0x3f98] sm:$0xff]  ;;  %v17406_v54 = vcombine.high %v1991_v32, %v1995_v0  ;;  %v17405_v63 = vcombine.low %v1991_v32, %v1995_v0 }
 0x814   :  { %15121 = vmatprep.subr.bf16.mxu1 %v17430_v13  ;;  %v2123_v15 = vld [vmem:[#allocation4 + $0x3fb8] sm:$0xff] }
 0x815   :  { %15081 = vmatpush1.bf16.msra.mxu0 %v17301_v60  ;;  %v17534_v46 = vcombine.high %v2119_v53, %v2123_v15  ;;  %v1983_v18 = vld [vmem:[#allocation4 + $0x3b58] sm:$0xff]  ;;  %v17533_v58 = vcombine.low %v2119_v53, %v2123_v15  ;;  %v15167_v15 = vld [vmem:[#allocation7 + $0x48] sm:$0xff] }
 0x816   :  { %15082 = vmatprep.subr.bf16.mxu0 %v17294_v7  ;;  %v1987_v19 = vld [vmem:[#allocation4 + $0x3b78] sm:$0xff] }
 0x817   :  { %15122 = vmatpush1.bf16.msra.mxu1 %v17429_v33  ;;  %v2111_v42 = vld [vmem:[#allocation4 + $0x3f58] sm:$0xff]  ;;  %v17398_v55 = vcombine.high %v1983_v18, %v1987_v19  ;;  %v17397_v48 = vcombine.low %v1983_v18, %v1987_v19  ;;  %v15159_v19 = vld [vmem:[#allocation7 + $0x8] sm:$0xff] }
 0x818   :  { %15123 = vmatprep.subr.bf16.mxu1 %v17422_v43  ;;  %v2115_v30 = vld [vmem:[#allocation4 + $0x3f78] sm:$0xff] }
 0x819   :  { %15083 = vmatpush1.bf16.msra.mxu0 %v17293_v17  ;;  %v17526_v47 = vcombine.high %v2111_v42, %v2115_v30  ;;  %v1975_v45 = vld [vmem:[#allocation4 + $0x3b18] sm:$0xff]  ;;  %v17525_v5 = vcombine.low %v2111_v42, %v2115_v30  ;;  %v15153_v42 = vmax.f32 %v18054_v57, 0.0 }
 0x81a   :  { %15084 = vmatprep.subr.bf16.mxu0 %v17414_v34  ;;  %v1979_v59 = vld [vmem:[#allocation4 + $0x3b38] sm:$0xff] }
 0x81b   :  { %15124 = vmatpush1.bf16.msra.mxu1 %v17421_v27  ;;  %v2103_v62 = vld [vmem:[#allocation4 + $0x3f18] sm:$0xff]  ;;  %v17390_v61 = vcombine.high %v1975_v45, %v1979_v59  ;;  %v17389_v29 = vcombine.low %v1975_v45, %v1979_v59 }
 0x81c   :  { %15125 = vmatprep.subr.bf16.mxu1 %v17542_v28  ;;  %v2107_v49 = vld [vmem:[#allocation4 + $0x3f38] sm:$0xff] }
 0x81d   :  { %15085 = vmatpush2.bf16.msra.mxu0 %v17413_v38  ;;  %v17518_v3 = vcombine.high %v2103_v62, %v2107_v49  ;;  %v1967_v12 = vld [vmem:[#allocation4 + $0x3ad8] sm:$0xff]  ;;  %v17517_v26 = vcombine.low %v2103_v62, %v2107_v49  ;;  %v15169_v38 = vld [vmem:[#allocation7 + $0x58] sm:$0xff]  ;;  %v15171_v62 = vld [vmem:[#allocation7 + $0x68] sm:$0xff] }
 0x81e   :  { %15086 = vmatprep.subr.bf16.mxu0 %v17406_v54  ;;  %v1971_v10 = vld [vmem:[#allocation4 + $0x3af8] sm:$0xff] }
 0x81f   :  { %15126 = vmatpush2.bf16.msra.mxu1 %v17541_v2  ;;  %v2095_v21 = vld [vmem:[#allocation4 + $0x3ed8] sm:$0xff]  ;;  %v17382_v24 = vcombine.high %v1967_v12, %v1971_v10  ;;  %v17381_v39 = vcombine.low %v1967_v12, %v1971_v10  ;;  %v15166_v2 = vld [vmem:[#allocation7 + $0x40] sm:$0xff]  ;;  %v15163_v10 = vld [vmem:[#allocation7 + $0x28] sm:$0xff] }
 0x820   :  { %15127 = vmatprep.subr.bf16.mxu1 %v17534_v46  ;;  %v2099_v52 = vld [vmem:[#allocation4 + $0x3ef8] sm:$0xff]  ;;  %v15151_v46 = vmax.f32 %v17974_v22, 0.0 }
 0x821   :  { %15087 = vmatpush2.bf16.msra.mxu0 %v17405_v63  ;;  %v17510_v35 = vcombine.high %v2095_v21, %v2099_v52  ;;  %v1959_v9 = vld [vmem:[#allocation4 + $0x3a98] sm:$0xff]  ;;  %v17509_v11 = vcombine.low %v2095_v21, %v2099_v52  ;;  %v15162_v21 = vld [vmem:[#allocation7 + $0x20] sm:$0xff]  ;;  %v15154_v52 = vmax.f32 %v18129_v51, 0.0 }
 0x822   :  { %15088 = vmatprep.subr.bf16.mxu0 %v17398_v55  ;;  %v1963_v16 = vld [vmem:[#allocation4 + $0x3ab8] sm:$0xff] }
 0x823   :  { %15128 = vmatpush2.bf16.msra.mxu1 %v17533_v58  ;;  %v2087_v23 = vld [vmem:[#allocation4 + $0x3e98] sm:$0xff]  ;;  %v17374_v13 = vcombine.high %v1959_v9, %v1963_v16  ;;  %v17373_v33 = vcombine.low %v1959_v9, %v1963_v16  ;;  %v15161_v58 = vld [vmem:[#allocation7 + $0x18] sm:$0xff] }
 0x824   :  { %15129 = vmatprep.subr.bf16.mxu1 %v17526_v47  ;;  %v2091_v25 = vld [vmem:[#allocation4 + $0x3eb8] sm:$0xff]  ;;  %v15158_v47 = vld [vmem:[#allocation7] sm:$0xff] }
 0x825   :  { %15089 = vmatpush2.bf16.msra.mxu0 %v17397_v48  ;;  %v17502_v31 = vcombine.high %v2087_v23, %v2091_v25  ;;  %v1951_v20 = vld [vmem:[#allocation4 + $0x3a58] sm:$0xff]  ;;  %v17501_v7 = vcombine.low %v2087_v23, %v2091_v25  ;;  %v15173_v23 = vld [vmem:[#allocation7 + $0x78] sm:$0xff] }
 0x826   :  { %15090 = vmatprep.subr.bf16.mxu0 %v17390_v61  ;;  %v1955_v4 = vld [vmem:[#allocation4 + $0x3a78] sm:$0xff]  ;;  %v18195_v61 = vld [vmem:[#allocation12_spill] sm:$0xff] }
 0x827   :  { %15130 = vmatpush2.bf16.msra.mxu1 %v17525_v5  ;;  %v2079_v37 = vld [vmem:[#allocation4 + $0x3e58] sm:$0xff]  ;;  %v17366_v43 = vcombine.high %v1951_v20, %v1955_v4  ;;  %v17365_v27 = vcombine.low %v1951_v20, %v1955_v4  ;;  %v15170_v5 = vld [vmem:[#allocation7 + $0x60] sm:$0xff]  ;;  %v15165_v20 = vld [vmem:[#allocation7 + $0x38] sm:$0xff] }
 0x828   :  { %15131 = vmatprep.subr.bf16.mxu1 %v17518_v3  ;;  %v2083_v60 = vld [vmem:[#allocation4 + $0x3e78] sm:$0xff]  ;;  %v15152_v3 = vmax.f32 %v18195_v61, 0.0 }
 0x829   :  { %15091 = vmatpush2.bf16.msra.mxu0 %v17389_v29  ;;  %v17494_v8 = vcombine.high %v2079_v37, %v2083_v60  ;;  %v1943_v50 = vld [vmem:[#allocation4 + $0x3a18] sm:$0xff]  ;;  %v17493_v34 = vcombine.low %v2079_v37, %v2083_v60 }
 0x82a   :  { %15092 = vmatprep.subr.bf16.mxu0 %v17382_v24  ;;  %v1947_v56 = vld [vmem:[#allocation4 + $0x3a38] sm:$0xff] }
 0x82b   :  { %15132 = vmatpush2.bf16.msra.mxu1 %v17517_v26  ;;  %v2071_v36 = vld [vmem:[#allocation4 + $0x3e18] sm:$0xff]  ;;  %v17358_v28 = vcombine.high %v1943_v50, %v1947_v56  ;;  %v17357_v0 = vcombine.low %v1943_v50, %v1947_v56 }
 0x82c   :  { %15133 = vmatprep.subr.bf16.mxu1 %v17510_v35  ;;  %v2075_v17 = vld [vmem:[#allocation4 + $0x3e38] sm:$0xff] }
 0x82d   :  { %15093 = vmatpush2.bf16.msra.mxu0 %v17381_v39  ;;  %v17486_v32 = vcombine.high %v2071_v36, %v2075_v17  ;;  %v17485_v53 = vcombine.low %v2071_v36, %v2075_v17  ;;  %v15168_v54 = vld [vmem:[#allocation7 + $0x50] sm:$0xff] }
 0x82e   :  { %15094 = vmatprep.subr.bf16.mxu0 %v17374_v13  ;;  %v15164_v4 = vld [vmem:[#allocation7 + $0x30] sm:$0xff] }
 0x82f   :  { %15134 = vmatpush2.bf16.msra.mxu1 %v17509_v11 }
 0x830   :  { %15135 = vmatprep.subr.bf16.mxu1 %v17502_v31 }
 0x831   :  { %15095 = vmatpush2.bf16.msra.mxu0 %v17373_v33 }
 0x832   :  { %15096 = vmatprep.subr.bf16.mxu0 %v17366_v43 }
 0x833   :  { %15136 = vmatpush2.bf16.msra.mxu1 %v17501_v7 }
 0x834   :  { %15137 = vmatprep.subr.bf16.mxu1 %v17494_v8 }
 0x835   :  { %15097 = vmatpush2.bf16.msra.mxu0 %v17365_v27 }
 0x836   :  { %15098 = vmatprep.subr.bf16.mxu0 %v17358_v28 }
 0x837   :  { %15138 = vmatpush2.bf16.msra.mxu1 %v17493_v34 }
 0x838   :  { %15139 = vmatprep.subr.bf16.mxu1 %v17486_v32 }
 0x839   :  { %15099 = vmatpush2.bf16.msra.mxu0 %v17357_v0 }
 0x83a   :  { %15202 = vmatprep.subr.mxu0 %v15167_v15 }
 0x83b   :  { %15140 = vmatpush2.bf16.msra.mxu1 %v17485_v53 }
 0x83c   :  { %15272 = vmatprep.subr.mxu1 %v15169_v38  ;;  %v14856_v18 = vpop.f32.mrf.mxu0  ;;  %15101 = vmatmul.mubr.bf16.vlgmr.msra.gmra.mxu0 %v17927_v44  ;;  %v15160_v44 = vld [vmem:[#allocation7 + $0x10] sm:$0xff] }
 0x83d   :  { %v14857_v30 = vadd.f32 %v14856_v18, %v18169_v40  ;;  %15203 = vmatpush1.xpose.msra.mxu0 %v15166_v2  ;;  %15238 = vmatprep.mubr.f32.mxu0 %v15151_v46 }
 0x83e   :  { %v14897_v63 = vpop.f32.mrf.mxu1  ;;  %15142 = vmatmul.mubr.bf16.vlgmr.msra.gmra.mxu1 %v17931_v14  ;;  %v14858_v55 = vpop.f32.mrf.mxu0  ;;  %15204 = vmatprep.subr.mxu0 %v15159_v19  ;;  %v15150_v14 = vmax.f32 %v17969_v6, 0.0 }
 0x83f   :  { %15273 = vmatpush1.xpose.msra.mxu1 %v15168_v54  ;;  %v14898_v45 = vadd.f32 %v14897_v63, %v14857_v30  ;;  %15308 = vmatprep.mubr.f32.mxu1 %v15153_v42  ;;  %v14859_v22 = vadd.f32 %v14858_v55, %v18174_v41  ;;  %v15155_v41 = vmax.f32 %v18134_v1, 0.0  ;;  %v15172_v1 = vld [vmem:[#allocation7 + $0x70] sm:$0xff] }
 0x840   :  { %v14899_v59 = vpop.f32.mrf.mxu1  ;;  %v14860_v57 = vpop.f32.mrf.mxu0  ;;  %15274 = vmatprep.subr.mxu1 %v15161_v58 }
 0x841   :  { %v14900_v40 = vadd.f32 %v14899_v59, %v14859_v22  ;;  %15205 = vmatpush1.xpose.msra.mxu0 %v15158_v47 }
 0x842   :  { %v14901_v49 = vpop.f32.mrf.mxu1  ;;  %v14861_v48 = vpop.f32.mrf.mxu0  ;;  %15342 = vmatprep.subr.mxu0 %v15171_v62 }
 0x843   :  { %15275 = vmatpush1.xpose.msra.mxu1 %v15160_v44 }
 0x844   :  { %v14902_v12 = vpop.f32.mrf.mxu1  ;;  %15239 = vmatmul.mubr.f32.vlgmr.msra.gmra.mxu0 %v15150_v14  ;;  %15412 = vmatprep.subr.mxu1 %v15173_v23 }
 0x845   :  { %15343 = vmatpush1.xpose.msra.mxu0 %v15170_v5  ;;  %15378 = vmatprep.mubr.f32.mxu0 %v15155_v41 }
 0x846   :  { %15309 = vmatmul.mubr.f32.vlgmr.msra.gmra.mxu1 %v15152_v3  ;;  %15344 = vmatprep.subr.mxu0 %v15163_v10 }
 0x847   :  { %15413 = vmatpush1.xpose.msra.mxu1 %v15172_v1 }
 0x848   :  { %15414 = vmatprep.subr.mxu1 %v15165_v20 }
 0x849   :  { %15345 = vmatpush1.xpose.msra.mxu0 %v15162_v21 }
 0x84b   :  { %15415 = vmatpush1.xpose.msra.mxu1 %v15164_v4 }
 0x84c   :  { %15379 = vmatmul.mubr.f32.vlgmr.msra.gmra.mxu0 %v15154_v52 }
 0x87c   :  { %v14938_v6 = vpop.f32.mrf.mxu0 }
 0x87d   :  { %v14939_v29 = vadd.f32 %v14938_v6, %v14898_v45 }
 0x87e   :  { %v14979_v26 = vpop.f32.mrf.mxu1  ;;  %v14940_v24 = vpop.f32.mrf.mxu0 }
 0x87f   :  { %v14980_v35 = vadd.f32 %v14979_v26, %v14939_v29  ;;  %v14941_v9 = vadd.f32 %v14940_v24, %v14900_v40 }
 0x880   :  { %v14981_v16 = vpop.f32.mrf.mxu1  ;;  %v14942_v25 = vpop.f32.mrf.mxu0 }
 0x881   :  { %v14982_v39 = vadd.f32 %v14981_v16, %v14941_v9 }
 0x882   :  { %v14983_v11 = vpop.f32.mrf.mxu1  ;;  %v14943_v13 = vpop.f32.mrf.mxu0 }
 0x884   :  { %v14984_v31 = vpop.f32.mrf.mxu1 }
 0x8bc   :  { %v15020_v51 = vpop.f32.mrf.mxu0 }
 0x8bd   :  { %v15021_v37 = vadd.f32 %v15020_v51, %v14980_v35 }
 0x8be   :  { %v15061_v60 = vpop.f32.mrf.mxu1  ;;  %v15022_v33 = vpop.f32.mrf.mxu0 }
 0x8bf   :  { %v15062_v7 = vadd.f32 %v15061_v60, %v15021_v37  ;;  %v15023_v17 = vadd.f32 %v15022_v33, %v14982_v39 }
 0x8c0   :  { %v15063_v43 = vpop.f32.mrf.mxu1  ;;  %v15024_v8 = vpop.f32.mrf.mxu0 }
 0x8c1   :  { %v15064_v34 = vadd.f32 %v15063_v43, %v15023_v17 }
 0x8c2   :  { %v15065_v50 = vpop.f32.mrf.mxu1  ;;  %v15025_v56 = vpop.f32.mrf.mxu0 }
 0x8c4   :  { %v15066_v36 = vpop.f32.mrf.mxu1 }
 0x8fc   :  { %v15102_v27 = vpop.f32.mrf.mxu0 }
 0x8fd   :  { %v15103_v28 = vadd.f32 %v15102_v27, %v15062_v7 }
 0x8fe   :  { %v15143_v32 = vpop.f32.mrf.mxu1  ;;  %v15104_v0 = vpop.f32.mrf.mxu0 }
 0x8ff   :  { %v15105_v53 = vadd.f32 %v15104_v0, %v15064_v34  ;;  %v15144_v38 = vadd.f32 %v15143_v32, %v15103_v28 }
 0x900   :  { %v15145_v15 = vpop.f32.mrf.mxu1  ;;  %v15106_v2 = vpop.f32.mrf.mxu0 }
 0x901   :  { %v15146_v54 = vadd.f32 %v15145_v15, %v15105_v53  ;;  %v15156_v30 = vmax.f32 %v15144_v38, 0.0 }
 0x902   :  { %v15147_v46 = vpop.f32.mrf.mxu1  ;;  %v15107_v18 = vpop.f32.mrf.mxu0 }
 0x903   :  { %v15157_v19 = vmax.f32 %v15146_v54, 0.0 }
 0x904   :  { %v15148_v42 = vpop.f32.mrf.mxu1  ;;  %v15240_v63 = vpop.f32.mrf.mxu0 }
 0x905   :  { %15448 = vmatprep.mubr.f32.mxu1 %v15157_v19 }
 0x906   :  { %v15310_v58 = vpop.f32.mrf.mxu1  ;;  %v15242_v47 = vpop.f32.mrf.mxu0  ;;  %15449 = vmatmul.mubr.f32.vlgmr.msra.gmra.mxu1 %v15156_v30 }
 0x907   :  { %v15311_v55 = vadd.f32 %v15310_v58, %v15240_v63 }
 0x908   :  { %v15312_v45 = vpop.f32.mrf.mxu1 }
 0x90c   :  { %v15380_v22 = vpop.f32.mrf.mxu0 }
 0x90d   :  { %v15381_v59 = vadd.f32 %v15380_v22, %v15311_v55 }
 0x90e   :  { %v15382_v44 = vpop.f32.mrf.mxu0 }
 0x9c6   :  { %v15450_v62 = vpop.f32.mrf.mxu1 }
 0x9c7   :  { %v15451_v57 = vadd.f32 %v15450_v62, %v15381_v59 }
 0x9c8   :  { %v15452_v40 = vpop.f32.mrf.mxu1 }
 0x9c9   :  { %15455 = vst.msk [vmem:[%s18193_s4] sm:$0xff] %vm15454_vm0, %v15451_v57 }
 0x9ca   :  { %15460 = vsyncpa [#allocation3], 1 }
 0x9cb   :  { %15461 = vsyncpa [#allocation5], 1 }
 0x9cc   :  { %15462 = vsyncpa [#allocation8], 1 }

</bundles_post_ra>
